<compile_context>
chip_gen: v7x
topology: tpu7x:2x2x1
jax: 0.10.0
libtpu: 0.0.40
codegen_flags: <defaults>
</compile_context>

<pallas_src>
import functools

import numpy as np
import jax
import jax.numpy as jnp
from jax import lax
from jax.experimental import pallas as pl
from jax.experimental.pallas import tpu as pltpu


# --------------------------------------------------------------------------- #
# Kernels
# --------------------------------------------------------------------------- #
def _upsample_conv_kernel(xp_ref, w_ref, b_ref, o_ref, *, tr, w_in):
    # xp_ref: (H+2, W+2, Cin)   zero-padded ORIGINAL-resolution input (resident)
    # w_ref : (2, 6*Cin, 2*Cout) per-row-parity combined weights,
    #                            K ordered (dr_local, dc, cin), cols (q, cout)
    # b_ref : (1, 2*Cout)        bias tiled over (q, cout), f32
    # o_ref : (tr*W, 4*Cout)     matmul-native output; columns = (p, q, cout)
    cin = xp_ref.shape[-1]
    half = o_ref.shape[-1] // 2                      # = 2*Cout
    row0 = pl.multiple_of(pl.program_id(1) * tr, tr)

    # Per-tap loads directly from the ref (no halo-slab intermediate / spills).
    def tap(dr, dc):
        return xp_ref[pl.ds(row0 + dr, tr), pl.ds(dc, w_in), :].reshape(
            tr * w_in, cin)

    rows = [[tap(dr, dc) for dc in range(3)] for dr in range(3)]
    # Parity-0 output rows read original rows {i-1, i} -> dr in {0, 1}
    # Parity-1 output rows read original rows {i, i+1} -> dr in {1, 2}
    # (dr=1 taps are shared between the two patches.)
    patch0 = jnp.concatenate(rows[0] + rows[1], axis=1)      # (tr*W, 6*Cin)
    patch1 = jnp.concatenate(rows[1] + rows[2], axis=1)      # (tr*W, 6*Cin)

    bias = b_ref[...]                                        # (1, 2*Cout)
    r0 = jnp.dot(patch0, w_ref[0], preferred_element_type=jnp.float32) + bias
    r1 = jnp.dot(patch1, w_ref[1], preferred_element_type=jnp.float32) + bias

    # Store the matmul-native planes into the two lane halves; the (p, q)
    # de-interleave happens in the (already paid) wrapper transpose.
    o_ref[:, :half] = r0.astype(o_ref.dtype)
    o_ref[:, half:] = r1.astype(o_ref.dtype)


def _upsample_only_kernel(x_ref, o_ref):
    # x_ref: (tr, W, C)   o_ref: (tr*W, 4*C)  columns ordered (p, q, c)
    tr, w_in, c = x_ref.shape
    xv = x_ref[...].reshape(tr * w_in, c)
    o_ref[...] = jnp.concatenate([xv, xv, xv, xv], axis=1).astype(o_ref.dtype)


# --------------------------------------------------------------------------- #
# Wrapper helpers
# --------------------------------------------------------------------------- #
def _vmem_limit_bytes():
    # Generation-aware scoped-VMEM limit (~0.7 of physical): ~90 MiB on
    # v5e/v6e (128 MiB), ~45 MiB on v7x (64 MiB).
    try:
        cap = int(pltpu.get_tpu_info().vmem_capacity_bytes)
    except Exception:
        cap = 64 * 1024 * 1024
    return max(32 * 1024 * 1024, min(int(0.7 * cap), 96 * 1024 * 1024))


def _default_compute_dtype():
    # bf16 halves HBM/VMEM traffic at full MXU rate on v6e/v7x (bf16-native VPU
    # and EUP).  Keep f32 on v5e/older per the review guidance.
    try:
        kind = jax.devices()[0].device_kind.lower()
    except Exception:
        return None
    if ("v6" in kind) or ("v7" in kind) or ("7x" in kind):
        return jnp.bfloat16
    return None


def _pick_tile_rows(H, W, requested=None, target_m=512):
    """Largest divisor of H meeting the output-block layout rule
    ((tr*W) % 8 == 0 or tr == H), capped by `requested` (if given) or by an
    MXU/VMEM-friendly M = tr*W target.  Never falls back to the whole image
    unless that is the only legal choice.  (On v7x one may also prefer an even
    total step count so both TensorCores stay busy.)"""
    valid = [d for d in range(1, H + 1)
             if H % d == 0 and ((d * W) % 8 == 0 or d == H)]
    cap = requested if requested is not None else max(1, target_m // max(W, 1))
    capped = [d for d in valid if d <= cap]
    return max(capped) if capped else min(valid)


def _fold_upsample_into_conv(weight, bias):
    """Fold nearest-2x upsampling into the 3x3 conv (phase decomposition).

    Returns (w6, bias2):
      w6   : (2, 6*Cin, 2*Cout)  per-row-parity matmul weights,
             K rows ordered (dr_local, dc, cin), columns ordered (q, cout);
             the all-zero dr block per parity is dropped (K = 6*Cin, not 9*Cin).
      bias2: (1, 2*Cout) f32, tiled over (q, cout).
    Built with plain f32 adds (exact) -- no dot/einsum involved."""
    cout, cin, _, _ = weight.shape
    w = jnp.transpose(weight, (2, 3, 1, 0)).astype(jnp.float32)  # (kh, kw, ci, co)
    zero = jnp.zeros_like(w[:, 0])                               # (kh, ci, co)

    # Column-parity combine: patch column dc gets the kw taps landing on it.
    #   q=0: dc0 <- kw0, dc1 <- kw1+kw2, dc2 <- 0
    #   q=1: dc0 <- 0,   dc1 <- kw0+kw1, dc2 <- kw2
    wq0 = jnp.stack([w[:, 0], w[:, 1] + w[:, 2], zero], axis=1)  # (kh, dc, ci, co)
    wq1 = jnp.stack([zero, w[:, 0] + w[:, 1], w[:, 2]], axis=1)
    wq = jnp.stack([wq0, wq1], axis=0)                           # (q, kh, dc, ci, co)

    # Row-parity combine over kh; the all-zero dr row per parity is dropped.
    #   p=0 (orig rows {i-1, i}): dr0 <- kh0,      dr1 <- kh1+kh2
    #   p=1 (orig rows {i, i+1}): dr0 <- kh0+kh1,  dr1 <- kh2
    wp0 = jnp.stack([wq[:, 0], wq[:, 1] + wq[:, 2]], axis=1)     # (q, dr, dc, ci, co)
    wp1 = jnp.stack([wq[:, 0] + wq[:, 1], wq[:, 2]], axis=1)
    w_comb = jnp.stack([wp0, wp1], axis=0)                       # (p, q, dr, dc, ci, co)

    w6 = jnp.transpose(w_comb, (0, 2, 3, 4, 1, 5)).reshape(2, 6 * cin, 2 * cout)
    bias2 = jnp.tile(bias.astype(jnp.float32), 2).reshape(1, 2 * cout)
    return w6, bias2


def _deinterleave_to_nchw(out_flat, N, H, W, C):
    # out_flat: (N, H*W, 4*C), columns ordered (row-parity p, col-parity q, c).
    # The parity de-interleave is folded into the single NHWC->NCHW transpose.
    out = out_flat.reshape(N, H, W, 2, 2, C)          # (n, i, j, p, q, c)
    out = jnp.transpose(out, (0, 5, 1, 3, 2, 4))      # (n, c, i, p, j, q)
    return out.reshape(N, C, 2 * H, 2 * W)


# --------------------------------------------------------------------------- #
# Public forward
# --------------------------------------------------------------------------- #
def upsample_forward(x_nchw, weight=None, bias=None, *, with_conv=True,
                     tile_rows=None, compute_dtype=None):
    """PyTorch Upsample.forward.  x: (N, Cin, H, W); weight: (Cout, Cin, 3, 3);
    bias: (Cout,).  Returns (N, Cout, 2H, 2W).  compute_dtype=None -> bf16 on
    v6e/v7x, f32 otherwise (accumulation is always f32)."""
    N, cin, H, W = x_nchw.shape

    # TODO(synk): if the surrounding model runs NHWC, accept/return NHWC
    # directly to drop this transpose and the one inside _deinterleave_to_nchw
    # (each is a full-tensor HBM round trip; the output one is 4x the input).
    x_nhwc = jnp.transpose(x_nchw, (0, 2, 3, 1))       # NCHW -> NHWC (channels minor)

    cparams = pltpu.CompilerParams(
        dimension_semantics=("parallel", "parallel"),
        vmem_limit_bytes=_vmem_limit_bytes())

    if not with_conv:
        # Pure nearest-2x: memory-bound copy, so use a larger row tile.
        tr = _pick_tile_rows(H, W, requested=tile_rows, target_m=2048)
        out_flat = pl.pallas_call(
            _upsample_only_kernel,
            out_shape=jax.ShapeDtypeStruct((N, H * W, 4 * cin), x_nchw.dtype),
            grid=(N, H // tr),
            in_specs=[pl.BlockSpec((None, tr, W, cin), lambda n, r: (n, r, 0, 0))],
            out_specs=pl.BlockSpec((None, tr * W, 4 * cin), lambda n, r: (n, r, 0)),
            compiler_params=cparams,
        )(x_nhwc)
        return _deinterleave_to_nchw(out_flat, N, H, W, cin)

    cout = weight.shape[0]
    assert weight.shape == (cout, cin, 3, 3) and bias.shape == (cout,)

    w6, bias2 = _fold_upsample_into_conv(weight, bias)

    if compute_dtype is None:
        compute_dtype = _default_compute_dtype()

    # 1-pixel zero pad at ORIGINAL resolution (the 2x image is never built).
    xp = jnp.pad(x_nhwc, ((0, 0), (1, 1), (1, 1), (0, 0)))
    if compute_dtype is not None:
        xp = xp.astype(compute_dtype)
        w6 = w6.astype(compute_dtype)        # bias stays f32 (added post-matmul)

    # MXU-friendly row tile: aim for M = tr*W of a few hundred rows.
    tr = _pick_tile_rows(H, W, requested=tile_rows, target_m=512)
    kernel = functools.partial(_upsample_conv_kernel, tr=tr, w_in=W)

    def run(weight_pipeline_mode):
        wkw = ({} if weight_pipeline_mode is None
               else dict(pipeline_mode=weight_pipeline_mode))
        return pl.pallas_call(
            kernel,
            out_shape=jax.ShapeDtypeStruct((N, H * W, 4 * cout), x_nchw.dtype),
            grid=(N, H // tr),
            in_specs=[
                pl.BlockSpec((None, H + 2, W + 2, cin), lambda n, r: (n, 0, 0, 0)),
                pl.BlockSpec((2, 6 * cin, 2 * cout), lambda n, r: (0, 0, 0), **wkw),
                pl.BlockSpec((1, 2 * cout), lambda n, r: (0, 0), **wkw),
            ],
            out_specs=pl.BlockSpec((None, tr * W, 4 * cout), lambda n, r: (n, r, 0)),
            compiler_params=cparams,
        )(xp, w6, bias2)

    try:
        # Grid-invariant weights/bias: single-buffer them (halves their VMEM
        # footprint; matters for large Cin/Cout on v7x's 64 MiB VMEM).
        out_flat = run(pl.Buffered(1))
    except Exception:
        # Graceful fallback for jax versions without BlockSpec pipeline_mode /
        # single-buffering support: default double-buffering.
        out_flat = run(None)

    return _deinterleave_to_nchw(out_flat, N, H, W, cout)


# --------------------------------------------------------------------------- #
# Pure-JAX reference (same semantics as the PyTorch module)
# --------------------------------------------------------------------------- #
def reference(x_nchw, weight, bias):
    x_up = jnp.repeat(jnp.repeat(x_nchw, 2, axis=2), 2, axis=3)
    out = lax.conv_general_dilated(
        x_up, weight, window_strides=(1, 1), padding=((1, 1), (1, 1)),
        dimension_numbers=("NCHW", "OIHW", "NCHW"),
        precision=lax.Precision.HIGHEST)
    return out + bias[None, :, None, None]


if __name__ == "__main__":
    key = jax.random.PRNGKey(0)
    k1, k2, k3 = jax.random.split(key, 3)

    # Module spec: Conv2d(in_channels, in_channels, 3, padding=1) -> Cout == Cin.
    N, C, H, W = 2, 4, 16, 16

    x = jax.random.normal(k1, (N, C, H, W), dtype=jnp.float32)
    fan_in = C * 3 * 3
    bound = 1.0 / float(np.sqrt(fan_in))
    weight = jax.random.uniform(k2, (C, C, 3, 3), jnp.float32, -bound, bound)
    bias = jax.random.uniform(k3, (C,), jnp.float32, -bound, bound)

    ref = reference(x, weight, bias)

    # with_conv=True, explicit f32 compute path.  Tolerance tightened (review):
    # 5e-3 bounds even a worst-case reduced-precision MXU pass; real tap/parity
    # bugs produce O(1) errors.
    out_f32 = jax.block_until_ready(
        upsample_forward(x, weight, bias, with_conv=True,
                         compute_dtype=jnp.float32))
    assert out_f32.shape == (N, C, 2 * H, 2 * W)
    np.testing.assert_allclose(np.asarray(out_f32), np.asarray(ref),
                               rtol=5e-3, atol=5e-3)

    # with_conv=True, default compute path (bf16 on v6e/v7x, f32 on v5e).
    out_def = jax.block_until_ready(
        upsample_forward(x, weight, bias, with_conv=True))
    np.testing.assert_allclose(np.asarray(out_def), np.asarray(ref),
                               rtol=1e-2, atol=1e-2)

    # with_conv=False path (pure nearest-neighbor 2x upsample; exact copy).
    out_nc = jax.block_until_ready(upsample_forward(x, with_conv=False))
    ref_nc = jnp.repeat(jnp.repeat(x, 2, axis=2), 2, axis=3)
    np.testing.assert_allclose(np.asarray(out_nc), np.asarray(ref_nc),
                               rtol=1e-6, atol=1e-6)

    print("KERNEL_OK")
</pallas_src>

<mosaic_0001>
module attributes {stable_mosaic.version = 11 : i64} {
  func.func @_upsample_conv_kernel(%arg0: i32, %arg1: i32, %arg2: memref<1x18x18x4xf32, #tpu.memory_space<vmem>>, %arg3: memref<2x24x8xf32, #tpu.memory_space<vmem>>, %arg4: memref<1x8xf32, #tpu.memory_space<vmem>>, %arg5: memref<1x256x16xf32, #tpu.memory_space<vmem>>) attributes {dimension_semantics = [#tpu.dimension_semantics<parallel>, #tpu.dimension_semantics<parallel>], iteration_bounds = array<i64: 2, 1>, scalar_prefetch = 0 : i64, scratch_operands = 0 : i64, tpu.core_type = #tpu.core_type<tc>, window_params = [{transform_indices = @transform_0, window_bounds = array<i64: 1, 18, 18, 4>}, {pipeline_mode = #tpu.pipeline_mode<synchronous>, transform_indices = @transform_1, window_bounds = array<i64: 2, 24, 8>}, {pipeline_mode = #tpu.pipeline_mode<synchronous>, transform_indices = @transform_2, window_bounds = array<i64: 1, 8>}, {transform_indices = @transform_3, window_bounds = array<i64: 1, 256, 16>}]} {
    %c16_i32 = arith.constant 16 : i32
    %0 = arith.muli %arg1, %c16_i32 : i32
    %1 = tpu.assume_multiple %0, 16 : i32
    %c0_i32 = arith.constant 0 : i32
    %2 = arith.addi %1, %c0_i32 : i32
    %c0 = arith.constant 0 : index
    %3 = arith.index_cast %2 : i32 to index
    %c0_0 = arith.constant 0 : index
    %c0_1 = arith.constant 0 : index
    %4 = vector.load %arg2[%c0, %3, %c0_0, %c0_1] : memref<1x18x18x4xf32, #tpu.memory_space<vmem>>, vector<1x16x16x4xf32>
    %5 = vector.shape_cast %4 : vector<1x16x16x4xf32> to vector<16x16x4xf32>
    %6 = vector.shape_cast %5 : vector<16x16x4xf32> to vector<256x4xf32>
    %c0_i32_2 = arith.constant 0 : i32
    %7 = arith.addi %1, %c0_i32_2 : i32
    %c0_3 = arith.constant 0 : index
    %8 = arith.index_cast %7 : i32 to index
    %c1 = arith.constant 1 : index
    %c0_4 = arith.constant 0 : index
    %9 = vector.load %arg2[%c0_3, %8, %c1, %c0_4] : memref<1x18x18x4xf32, #tpu.memory_space<vmem>>, vector<1x16x16x4xf32>
    %10 = vector.shape_cast %9 : vector<1x16x16x4xf32> to vector<16x16x4xf32>
    %11 = vector.shape_cast %10 : vector<16x16x4xf32> to vector<256x4xf32>
    %c0_i32_5 = arith.constant 0 : i32
    %12 = arith.addi %1, %c0_i32_5 : i32
    %c0_6 = arith.constant 0 : index
    %13 = arith.index_cast %12 : i32 to index
    %c2 = arith.constant 2 : index
    %c0_7 = arith.constant 0 : index
    %14 = vector.load %arg2[%c0_6, %13, %c2, %c0_7] : memref<1x18x18x4xf32, #tpu.memory_space<vmem>>, vector<1x16x16x4xf32>
    %15 = vector.shape_cast %14 : vector<1x16x16x4xf32> to vector<16x16x4xf32>
    %16 = vector.shape_cast %15 : vector<16x16x4xf32> to vector<256x4xf32>
    %c1_i32 = arith.constant 1 : i32
    %17 = arith.addi %1, %c1_i32 : i32
    %c0_8 = arith.constant 0 : index
    %18 = arith.index_cast %17 : i32 to index
    %c0_9 = arith.constant 0 : index
    %c0_10 = arith.constant 0 : index
    %19 = vector.load %arg2[%c0_8, %18, %c0_9, %c0_10] : memref<1x18x18x4xf32, #tpu.memory_space<vmem>>, vector<1x16x16x4xf32>
    %20 = vector.shape_cast %19 : vector<1x16x16x4xf32> to vector<16x16x4xf32>
    %21 = vector.shape_cast %20 : vector<16x16x4xf32> to vector<256x4xf32>
    %c1_i32_11 = arith.constant 1 : i32
    %22 = arith.addi %1, %c1_i32_11 : i32
    %c0_12 = arith.constant 0 : index
    %23 = arith.index_cast %22 : i32 to index
    %c1_13 = arith.constant 1 : index
    %c0_14 = arith.constant 0 : index
    %24 = vector.load %arg2[%c0_12, %23, %c1_13, %c0_14] : memref<1x18x18x4xf32, #tpu.memory_space<vmem>>, vector<1x16x16x4xf32>
    %25 = vector.shape_cast %24 : vector<1x16x16x4xf32> to vector<16x16x4xf32>
    %26 = vector.shape_cast %25 : vector<16x16x4xf32> to vector<256x4xf32>
    %c1_i32_15 = arith.constant 1 : i32
    %27 = arith.addi %1, %c1_i32_15 : i32
    %c0_16 = arith.constant 0 : index
    %28 = arith.index_cast %27 : i32 to index
    %c2_17 = arith.constant 2 : index
    %c0_18 = arith.constant 0 : index
    %29 = vector.load %arg2[%c0_16, %28, %c2_17, %c0_18] : memref<1x18x18x4xf32, #tpu.memory_space<vmem>>, vector<1x16x16x4xf32>
    %30 = vector.shape_cast %29 : vector<1x16x16x4xf32> to vector<16x16x4xf32>
    %31 = vector.shape_cast %30 : vector<16x16x4xf32> to vector<256x4xf32>
    %c2_i32 = arith.constant 2 : i32
    %32 = arith.addi %1, %c2_i32 : i32
    %c0_19 = arith.constant 0 : index
    %33 = arith.index_cast %32 : i32 to index
    %c0_20 = arith.constant 0 : index
    %c0_21 = arith.constant 0 : index
    %34 = vector.load %arg2[%c0_19, %33, %c0_20, %c0_21] : memref<1x18x18x4xf32, #tpu.memory_space<vmem>>, vector<1x16x16x4xf32>
    %35 = vector.shape_cast %34 : vector<1x16x16x4xf32> to vector<16x16x4xf32>
    %36 = vector.shape_cast %35 : vector<16x16x4xf32> to vector<256x4xf32>
    %c2_i32_22 = arith.constant 2 : i32
    %37 = arith.addi %1, %c2_i32_22 : i32
    %c0_23 = arith.constant 0 : index
    %38 = arith.index_cast %37 : i32 to index
    %c1_24 = arith.constant 1 : index
    %c0_25 = arith.constant 0 : index
    %39 = vector.load %arg2[%c0_23, %38, %c1_24, %c0_25] : memref<1x18x18x4xf32, #tpu.memory_space<vmem>>, vector<1x16x16x4xf32>
    %40 = vector.shape_cast %39 : vector<1x16x16x4xf32> to vector<16x16x4xf32>
    %41 = vector.shape_cast %40 : vector<16x16x4xf32> to vector<256x4xf32>
    %c2_i32_26 = arith.constant 2 : i32
    %42 = arith.addi %1, %c2_i32_26 : i32
    %c0_27 = arith.constant 0 : index
    %43 = arith.index_cast %42 : i32 to index
    %c2_28 = arith.constant 2 : index
    %c0_29 = arith.constant 0 : index
    %44 = vector.load %arg2[%c0_27, %43, %c2_28, %c0_29] : memref<1x18x18x4xf32, #tpu.memory_space<vmem>>, vector<1x16x16x4xf32>
    %45 = vector.shape_cast %44 : vector<1x16x16x4xf32> to vector<16x16x4xf32>
    %46 = vector.shape_cast %45 : vector<16x16x4xf32> to vector<256x4xf32>
    %47 = tpu.concatenate %6, %11, %16, %21, %26, %31 in 1 : vector<256x4xf32>, vector<256x4xf32>, vector<256x4xf32>, vector<256x4xf32>, vector<256x4xf32>, vector<256x4xf32> -> vector<256x24xf32>
    %48 = tpu.concatenate %21, %26, %31, %36, %41, %46 in 1 : vector<256x4xf32>, vector<256x4xf32>, vector<256x4xf32>, vector<256x4xf32>, vector<256x4xf32>, vector<256x4xf32> -> vector<256x24xf32>
    %c0_30 = arith.constant 0 : index
    %c0_31 = arith.constant 0 : index
    %49 = vector.load %arg4[%c0_30, %c0_31] : memref<1x8xf32, #tpu.memory_space<vmem>>, vector<1x8xf32>
    %c0_32 = arith.constant 0 : index
    %c0_33 = arith.constant 0 : index
    %c0_34 = arith.constant 0 : index
    %50 = vector.load %arg3[%c0_32, %c0_33, %c0_34] : memref<2x24x8xf32, #tpu.memory_space<vmem>>, vector<1x24x8xf32>
    %51 = vector.shape_cast %50 : vector<1x24x8xf32> to vector<24x8xf32>
    %cst = arith.constant dense<0.000000e+00> : vector<256x8xf32>
    %52 = tpu.matmul %47, %51, %cst {dimension_numbers = #tpu.dot_dimension_numbers<[1], [0], [0], [1], [0, 0, 1, 1], [], []>} : vector<256x24xf32>, vector<24x8xf32>, vector<256x8xf32> -> vector<256x8xf32>
    %53 = vector.broadcast %49 : vector<1x8xf32> to vector<256x8xf32>
    %54 = arith.addf %52, %53 : vector<256x8xf32>
    %c1_35 = arith.constant 1 : index
    %c0_36 = arith.constant 0 : index
    %c0_37 = arith.constant 0 : index
    %55 = vector.load %arg3[%c1_35, %c0_36, %c0_37] : memref<2x24x8xf32, #tpu.memory_space<vmem>>, vector<1x24x8xf32>
    %56 = vector.shape_cast %55 : vector<1x24x8xf32> to vector<24x8xf32>
    %cst_38 = arith.constant dense<0.000000e+00> : vector<256x8xf32>
    %57 = tpu.matmul %48, %56, %cst_38 {dimension_numbers = #tpu.dot_dimension_numbers<[1], [0], [0], [1], [0, 0, 1, 1], [], []>} : vector<256x24xf32>, vector<24x8xf32>, vector<256x8xf32> -> vector<256x8xf32>
    %58 = vector.broadcast %49 : vector<1x8xf32> to vector<256x8xf32>
    %59 = arith.addf %57, %58 : vector<256x8xf32>
    %c0_39 = arith.constant 0 : index
    %c0_40 = arith.constant 0 : index
    %c0_41 = arith.constant 0 : index
    %60 = vector.load %arg5[%c0_39, %c0_40, %c0_41] : memref<1x256x16xf32, #tpu.memory_space<vmem>>, vector<1x256x8xf32>
    %61 = vector.shape_cast %60 : vector<1x256x8xf32> to vector<256x8xf32>
    %62 = vector.shape_cast %54 : vector<256x8xf32> to vector<1x256x8xf32>
    tpu.vector_store %arg5[%c0_39, %c0_40, %c0_41], %62 {strides = array<i32>} : memref<1x256x16xf32, #tpu.memory_space<vmem>>, vector<1x256x8xf32>,
    %c0_42 = arith.constant 0 : index
    %c0_43 = arith.constant 0 : index
    %c8 = arith.constant 8 : index
    %63 = vector.load %arg5[%c0_42, %c0_43, %c8] : memref<1x256x16xf32, #tpu.memory_space<vmem>>, vector<1x256x8xf32>
    %64 = vector.shape_cast %63 : vector<1x256x8xf32> to vector<256x8xf32>
    %65 = vector.shape_cast %59 : vector<256x8xf32> to vector<1x256x8xf32>
    tpu.vector_store %arg5[%c0_42, %c0_43, %c8], %65 {strides = array<i32>} : memref<1x256x16xf32, #tpu.memory_space<vmem>>, vector<1x256x8xf32>,
    return
  }
  func.func @transform_0(%arg0: i32, %arg1: i32) -> (i32, i32, i32, i32) {
    %c0_i32 = arith.constant 0 : i32
    %c0_i32_0 = arith.constant 0 : i32
    %c0_i32_1 = arith.constant 0 : i32
    %c0_i32_2 = arith.constant 0 : i32
    return %arg0, %c0_i32, %c0_i32_0, %c0_i32_1 : i32, i32, i32, i32
  }
  func.func @transform_1(%arg0: i32, %arg1: i32) -> (i32, i32, i32) {
    %c0_i32 = arith.constant 0 : i32
    %c0_i32_0 = arith.constant 0 : i32
    %c0_i32_1 = arith.constant 0 : i32
    %c0_i32_2 = arith.constant 0 : i32
    return %c0_i32, %c0_i32_0, %c0_i32_1 : i32, i32, i32
  }
  func.func @transform_2(%arg0: i32, %arg1: i32) -> (i32, i32) {
    %c0_i32 = arith.constant 0 : i32
    %c0_i32_0 = arith.constant 0 : i32
    %c0_i32_1 = arith.constant 0 : i32
    return %c0_i32, %c0_i32_0 : i32, i32
  }
  func.func @transform_3(%arg0: i32, %arg1: i32) -> (i32, i32, i32) {
    %c0_i32 = arith.constant 0 : i32
    %c0_i32_0 = arith.constant 0 : i32
    return %arg0, %arg1, %c0_i32 : i32, i32, i32
  }
}

module attributes {stable_mosaic.version = 11 : i64} {
  func.func @_upsample_conv_kernel(%arg0: i32, %arg1: i32, %arg2: memref<1x18x18x4xf32, #tpu.memory_space<vmem>>, %arg3: memref<2x24x8xf32, #tpu.memory_space<vmem>>, %arg4: memref<1x8xf32, #tpu.memory_space<vmem>>, %arg5: memref<1x256x16xf32, #tpu.memory_space<vmem>>) attributes {dimension_semantics = [#tpu.dimension_semantics<parallel>, #tpu.dimension_semantics<parallel>], iteration_bounds = array<i64: 2, 1>, scalar_prefetch = 0 : i64, scratch_operands = 0 : i64, tpu.core_type = #tpu.core_type<tc>, window_params = [{transform_indices = @transform_0, window_bounds = array<i64: 1, 18, 18, 4>}, {pipeline_mode = #tpu.pipeline_mode<synchronous>, transform_indices = @transform_1, window_bounds = array<i64: 2, 24, 8>}, {pipeline_mode = #tpu.pipeline_mode<synchronous>, transform_indices = @transform_2, window_bounds = array<i64: 1, 8>}, {transform_indices = @transform_3, window_bounds = array<i64: 1, 256, 16>}]} {
    %c16_i32 = arith.constant 16 : i32
    %0 = arith.muli %arg1, %c16_i32 : i32
    %1 = tpu.assume_multiple %0, 16 : i32
    %c0_i32 = arith.constant 0 : i32
    %2 = arith.addi %1, %c0_i32 : i32
    %c0 = arith.constant 0 : index
    %3 = arith.index_cast %2 : i32 to index
    %c0_0 = arith.constant 0 : index
    %c0_1 = arith.constant 0 : index
    %4 = vector.load %arg2[%c0, %3, %c0_0, %c0_1] : memref<1x18x18x4xf32, #tpu.memory_space<vmem>>, vector<1x16x16x4xf32>
    %5 = vector.shape_cast %4 : vector<1x16x16x4xf32> to vector<16x16x4xf32>
    %6 = vector.shape_cast %5 : vector<16x16x4xf32> to vector<256x4xf32>
    %c0_i32_2 = arith.constant 0 : i32
    %7 = arith.addi %1, %c0_i32_2 : i32
    %c0_3 = arith.constant 0 : index
    %8 = arith.index_cast %7 : i32 to index
    %c1 = arith.constant 1 : index
    %c0_4 = arith.constant 0 : index
    %9 = vector.load %arg2[%c0_3, %8, %c1, %c0_4] : memref<1x18x18x4xf32, #tpu.memory_space<vmem>>, vector<1x16x16x4xf32>
    %10 = vector.shape_cast %9 : vector<1x16x16x4xf32> to vector<16x16x4xf32>
    %11 = vector.shape_cast %10 : vector<16x16x4xf32> to vector<256x4xf32>
    %c0_i32_5 = arith.constant 0 : i32
    %12 = arith.addi %1, %c0_i32_5 : i32
    %c0_6 = arith.constant 0 : index
    %13 = arith.index_cast %12 : i32 to index
    %c2 = arith.constant 2 : index
    %c0_7 = arith.constant 0 : index
    %14 = vector.load %arg2[%c0_6, %13, %c2, %c0_7] : memref<1x18x18x4xf32, #tpu.memory_space<vmem>>, vector<1x16x16x4xf32>
    %15 = vector.shape_cast %14 : vector<1x16x16x4xf32> to vector<16x16x4xf32>
    %16 = vector.shape_cast %15 : vector<16x16x4xf32> to vector<256x4xf32>
    %c1_i32 = arith.constant 1 : i32
    %17 = arith.addi %1, %c1_i32 : i32
    %c0_8 = arith.constant 0 : index
    %18 = arith.index_cast %17 : i32 to index
    %c0_9 = arith.constant 0 : index
    %c0_10 = arith.constant 0 : index
    %19 = vector.load %arg2[%c0_8, %18, %c0_9, %c0_10] : memref<1x18x18x4xf32, #tpu.memory_space<vmem>>, vector<1x16x16x4xf32>
    %20 = vector.shape_cast %19 : vector<1x16x16x4xf32> to vector<16x16x4xf32>
    %21 = vector.shape_cast %20 : vector<16x16x4xf32> to vector<256x4xf32>
    %c1_i32_11 = arith.constant 1 : i32
    %22 = arith.addi %1, %c1_i32_11 : i32
    %c0_12 = arith.constant 0 : index
    %23 = arith.index_cast %22 : i32 to index
    %c1_13 = arith.constant 1 : index
    %c0_14 = arith.constant 0 : index
    %24 = vector.load %arg2[%c0_12, %23, %c1_13, %c0_14] : memref<1x18x18x4xf32, #tpu.memory_space<vmem>>, vector<1x16x16x4xf32>
    %25 = vector.shape_cast %24 : vector<1x16x16x4xf32> to vector<16x16x4xf32>
    %26 = vector.shape_cast %25 : vector<16x16x4xf32> to vector<256x4xf32>
    %c1_i32_15 = arith.constant 1 : i32
    %27 = arith.addi %1, %c1_i32_15 : i32
    %c0_16 = arith.constant 0 : index
    %28 = arith.index_cast %27 : i32 to index
    %c2_17 = arith.constant 2 : index
    %c0_18 = arith.constant 0 : index
    %29 = vector.load %arg2[%c0_16, %28, %c2_17, %c0_18] : memref<1x18x18x4xf32, #tpu.memory_space<vmem>>, vector<1x16x16x4xf32>
    %30 = vector.shape_cast %29 : vector<1x16x16x4xf32> to vector<16x16x4xf32>
    %31 = vector.shape_cast %30 : vector<16x16x4xf32> to vector<256x4xf32>
    %c2_i32 = arith.constant 2 : i32
    %32 = arith.addi %1, %c2_i32 : i32
    %c0_19 = arith.constant 0 : index
    %33 = arith.index_cast %32 : i32 to index
    %c0_20 = arith.constant 0 : index
    %c0_21 = arith.constant 0 : index
    %34 = vector.load %arg2[%c0_19, %33, %c0_20, %c0_21] : memref<1x18x18x4xf32, #tpu.memory_space<vmem>>, vector<1x16x16x4xf32>
    %35 = vector.shape_cast %34 : vector<1x16x16x4xf32> to vector<16x16x4xf32>
    %36 = vector.shape_cast %35 : vector<16x16x4xf32> to vector<256x4xf32>
    %c2_i32_22 = arith.constant 2 : i32
    %37 = arith.addi %1, %c2_i32_22 : i32
    %c0_23 = arith.constant 0 : index
    %38 = arith.index_cast %37 : i32 to index
    %c1_24 = arith.constant 1 : index
    %c0_25 = arith.constant 0 : index
    %39 = vector.load %arg2[%c0_23, %38, %c1_24, %c0_25] : memref<1x18x18x4xf32, #tpu.memory_space<vmem>>, vector<1x16x16x4xf32>
    %40 = vector.shape_cast %39 : vector<1x16x16x4xf32> to vector<16x16x4xf32>
    %41 = vector.shape_cast %40 : vector<16x16x4xf32> to vector<256x4xf32>
    %c2_i32_26 = arith.constant 2 : i32
    %42 = arith.addi %1, %c2_i32_26 : i32
    %c0_27 = arith.constant 0 : index
    %43 = arith.index_cast %42 : i32 to index
    %c2_28 = arith.constant 2 : index
    %c0_29 = arith.constant 0 : index
    %44 = vector.load %arg2[%c0_27, %43, %c2_28, %c0_29] : memref<1x18x18x4xf32, #tpu.memory_space<vmem>>, vector<1x16x16x4xf32>
    %45 = vector.shape_cast %44 : vector<1x16x16x4xf32> to vector<16x16x4xf32>
    %46 = vector.shape_cast %45 : vector<16x16x4xf32> to vector<256x4xf32>
    %47 = tpu.concatenate %6, %11, %16, %21, %26, %31 in 1 : vector<256x4xf32>, vector<256x4xf32>, vector<256x4xf32>, vector<256x4xf32>, vector<256x4xf32>, vector<256x4xf32> -> vector<256x24xf32>
    %48 = tpu.concatenate %21, %26, %31, %36, %41, %46 in 1 : vector<256x4xf32>, vector<256x4xf32>, vector<256x4xf32>, vector<256x4xf32>, vector<256x4xf32>, vector<256x4xf32> -> vector<256x24xf32>
    %c0_30 = arith.constant 0 : index
    %c0_31 = arith.constant 0 : index
    %49 = vector.load %arg4[%c0_30, %c0_31] : memref<1x8xf32, #tpu.memory_space<vmem>>, vector<1x8xf32>
    %c0_32 = arith.constant 0 : index
    %c0_33 = arith.constant 0 : index
    %c0_34 = arith.constant 0 : index
    %50 = vector.load %arg3[%c0_32, %c0_33, %c0_34] : memref<2x24x8xf32, #tpu.memory_space<vmem>>, vector<1x24x8xf32>
    %51 = vector.shape_cast %50 : vector<1x24x8xf32> to vector<24x8xf32>
    %cst = arith.constant dense<0.000000e+00> : vector<256x8xf32>
    %52 = tpu.matmul %47, %51, %cst {dimension_numbers = #tpu.dot_dimension_numbers<[1], [0], [0], [1], [0, 0, 1, 1], [], []>} : vector<256x24xf32>, vector<24x8xf32>, vector<256x8xf32> -> vector<256x8xf32>
    %53 = vector.broadcast %49 : vector<1x8xf32> to vector<256x8xf32>
    %54 = arith.addf %52, %53 : vector<256x8xf32>
    %c1_35 = arith.constant 1 : index
    %c0_36 = arith.constant 0 : index
    %c0_37 = arith.constant 0 : index
    %55 = vector.load %arg3[%c1_35, %c0_36, %c0_37] : memref<2x24x8xf32, #tpu.memory_space<vmem>>, vector<1x24x8xf32>
    %56 = vector.shape_cast %55 : vector<1x24x8xf32> to vector<24x8xf32>
    %cst_38 = arith.constant dense<0.000000e+00> : vector<256x8xf32>
    %57 = tpu.matmul %48, %56, %cst_38 {dimension_numbers = #tpu.dot_dimension_numbers<[1], [0], [0], [1], [0, 0, 1, 1], [], []>} : vector<256x24xf32>, vector<24x8xf32>, vector<256x8xf32> -> vector<256x8xf32>
    %58 = vector.broadcast %49 : vector<1x8xf32> to vector<256x8xf32>
    %59 = arith.addf %57, %58 : vector<256x8xf32>
    %c0_39 = arith.constant 0 : index
    %c0_40 = arith.constant 0 : index
    %c0_41 = arith.constant 0 : index
    %60 = vector.load %arg5[%c0_39, %c0_40, %c0_41] : memref<1x256x16xf32, #tpu.memory_space<vmem>>, vector<1x256x8xf32>
    %61 = vector.shape_cast %60 : vector<1x256x8xf32> to vector<256x8xf32>
    %62 = vector.shape_cast %54 : vector<256x8xf32> to vector<1x256x8xf32>
    tpu.vector_store %arg5[%c0_39, %c0_40, %c0_41], %62 {strides = array<i32>} : memref<1x256x16xf32, #tpu.memory_space<vmem>>, vector<1x256x8xf32>,
    %c0_42 = arith.constant 0 : index
    %c0_43 = arith.constant 0 : index
    %c8 = arith.constant 8 : index
    %63 = vector.load %arg5[%c0_42, %c0_43, %c8] : memref<1x256x16xf32, #tpu.memory_space<vmem>>, vector<1x256x8xf32>
    %64 = vector.shape_cast %63 : vector<1x256x8xf32> to vector<256x8xf32>
    %65 = vector.shape_cast %59 : vector<256x8xf32> to vector<1x256x8xf32>
    tpu.vector_store %arg5[%c0_42, %c0_43, %c8], %65 {strides = array<i32>} : memref<1x256x16xf32, #tpu.memory_space<vmem>>, vector<1x256x8xf32>,
    return
  }
  func.func @transform_0(%arg0: i32, %arg1: i32) -> (i32, i32, i32, i32) {
    %c0_i32 = arith.constant 0 : i32
    %c0_i32_0 = arith.constant 0 : i32
    %c0_i32_1 = arith.constant 0 : i32
    %c0_i32_2 = arith.constant 0 : i32
    return %arg0, %c0_i32, %c0_i32_0, %c0_i32_1 : i32, i32, i32, i32
  }
  func.func @transform_1(%arg0: i32, %arg1: i32) -> (i32, i32, i32) {
    %c0_i32 = arith.constant 0 : i32
    %c0_i32_0 = arith.constant 0 : i32
    %c0_i32_1 = arith.constant 0 : i32
    %c0_i32_2 = arith.constant 0 : i32
    return %c0_i32, %c0_i32_0, %c0_i32_1 : i32, i32, i32
  }
  func.func @transform_2(%arg0: i32, %arg1: i32) -> (i32, i32) {
    %c0_i32 = arith.constant 0 : i32
    %c0_i32_0 = arith.constant 0 : i32
    %c0_i32_1 = arith.constant 0 : i32
    return %c0_i32, %c0_i32_0 : i32, i32
  }
  func.func @transform_3(%arg0: i32, %arg1: i32) -> (i32, i32, i32) {
    %c0_i32 = arith.constant 0 : i32
    %c0_i32_0 = arith.constant 0 : i32
    return %arg0, %arg1, %c0_i32 : i32, i32, i32
  }
}

</mosaic_0001>

<bundles_post_ra>
// kernel: tpu_custom_call.1
= control target key start
LH: loop header
LB: loop body
LE: loop exit
PB: predicated region body
PF: predicated region fallthrough
CT: control target
= control target key end

     0   :  { %s3580_s12 = smov 0   ;;  %s3582_s13 = smov 0   ;;  %s5633_s0 = inlined_call_operand.vmem [shape: f32[2,18,18,4], index: 0, kind: input, shape index: {}]   ;;  %s5634_s1 = inlined_call_operand.vmem [shape: f32[2,24,8], index: 1, kind: input, shape index: {}]   ;;  %s5635_s2 = inlined_call_operand.vmem [shape: f32[1,8], index: 2, kind: input, shape index: {}]   ;;  %s5636_s3 = inlined_call_operand.vmem [shape: f32[2,256,16], index: 3, kind: output, shape index: {}]  }
   0x1   :  { %s3584_s14 = smov 0  }
   0x2 LB: > { %s25_s15 = sadd.s32 1, %s3549_s13  ;;  %p2977_p0 = scmp.ge.s32.totalorder %s3553_s14, 1  ;;  %s3553_s14 = sphi %s3584_s14, %s13_s14   ;;  %s3549_s13 = sphi %s3582_s13, %s5900_s13   ;;  %s3545_s12 = sphi %s3580_s12, %s5899_s12  }
   0x3   : > { %p27_p1 = scmp.ge.s32.totalorder %s25_s15, 2  ;;  %p151_p2 = scmp.lt.s32.totalorder %s3553_s14, 3 }
   0x5   : > { %s5902_s15 = smov (%p27_p1, %s25_s15), 0  ;;  %p152_p3 = pnand %p2977_p0, %p151_p2 }
   0x7   : > { %155 = sbr.rel (%p152_p3) target bundleno = 1094 (0x446), region = 32 }
   0xe   : > { %p179_p4 = scmp.lt.s32.totalorder %s3545_s12, 1  ;;  %s3555_s20 = smov 4   ;;  %vm1131_vm0 = vcmask 31744   ;;  %vm1164_vm1 = vcmask 64512   ;;  %vm1197_vm2 = vcmask 97280   ;;  %vm1230_vm3 = vcmask 130048  }
   0xf   : > { %s3556_s21 = smov 8   ;;  %s3557_s22 = smov 12   ;;  %vm1263_vm4 = vcmask 162816   ;;  %vm2042_vm5 = vcmask 195584   ;;  %vm2849_vm6 = vcmask 130112  }
  0x10   : > { %s5904_s12 = smov (!%p179_p4, %s3545_s12), 1  ;;  %s3558_s23 = smov 16  }
  0x11   : > { %s3430_s16 = smul.u32 432, %s5904_s12  ;;  %s3559_s30 = smov 20  }
  0x12   : > { %s3243_s10 = sshll.u32 %s5904_s12, 8 }
  0x13   : > { %s3604_s19 = scalar_lea.vmem %s5633_s0, %s3430_s16  ;;  %s5124_s12 = scalar_lea.vmem %s5636_s3, %s3243_s10 }
  0x14   : > { %v3607_v0 = vld [vmem:[%s3604_s19 + $0x19] sm:$0xff]  ;;  %v229_v1 = vld [vmem:[%s3604_s19 + $0x1] sm:$0xff]  ;;  %v230_v3 = vld [vmem:[%s3604_s19 + $0x9] sm:$0xff] }
  0x15   : > { %527 = vrot.lane.b32.xlu1 %v3607_v0, %s3555_s20  ;;  %523 = vrot.lane.b32.xlu0 %v229_v1, %s3555_s20  ;;  %v3614_v2 = vld [vmem:[%s3604_s19 + $0x21] sm:$0xff]  ;;  %v3621_v4 = vld [vmem:[%s3604_s19 + $0x39] sm:$0xff] }
  0x16   : > { %v3624_v5 = vld [vmem:[%s3604_s19 + $0x31] sm:$0xff]  ;;  %v3634_v7 = vld [vmem:[%s3604_s19 + $0x49] sm:$0xff]  ;;  %v3644_v9 = vld [vmem:[%s3604_s19 + $0x61] sm:$0xff] }
  0x17   : > { %v3631_v6 = vld [vmem:[%s3604_s19 + $0x51] sm:$0xff]  ;;  %v3641_v8 = vld [vmem:[%s3604_s19 + $0x69] sm:$0xff]  ;;  %v3651_v10 = vld [vmem:[%s3604_s19 + $0x81] sm:$0xff] }
  0x18   : > { %v3654_v11 = vld [vmem:[%s3604_s19 + $0x79] sm:$0xff]  ;;  %v3664_v13 = vld [vmem:[%s3604_s19 + $0x91] sm:$0xff]  ;;  %v3674_v15 = vld [vmem:[%s3604_s19 + $0xa9] sm:$0xff] }
  0x19   : > { %529 = vrot.lane.b32.xlu1 %v3614_v2, %s3555_s20  ;;  %525 = vrot.lane.b32.xlu0 %v230_v3, %s3555_s20  ;;  %v3661_v12 = vld [vmem:[%s3604_s19 + $0x99] sm:$0xff]  ;;  %v3671_v14 = vld [vmem:[%s3604_s19 + $0xb1] sm:$0xff] }
  0x1a   : > { %v3681_v16 = vld [vmem:[%s3604_s19 + $0xc9] sm:$0xff]  ;;  %v3684_v17 = vld [vmem:[%s3604_s19 + $0xc1] sm:$0xff]  ;;  %v3694_v19 = vld [vmem:[%s3604_s19 + $0xd9] sm:$0xff] }
  0x1b   : > { %v3691_v18 = vld [vmem:[%s3604_s19 + $0xe1] sm:$0xff]  ;;  %v3701_v20 = vld [vmem:[%s3604_s19 + $0xf9] sm:$0xff]  ;;  %v3704_v21 = vld [vmem:[%s3604_s19 + $0xf1] sm:$0xff] }
  0x1c   : > { %v3711_v22 = vld [vmem:[%s3604_s19 + $0x111] sm:$0xff]  ;;  %v3714_v23 = vld [vmem:[%s3604_s19 + $0x109] sm:$0xff]  ;;  %v3724_v25 = vld [vmem:[%s3604_s19 + $0x121] sm:$0xff] }
  0x1d   : > { %533 = vrot.lane.b32.xlu1 %v3621_v4, %s3555_s20  ;;  %531 = vrot.lane.b32.xlu0 %v3624_v5, %s3555_s20  ;;  %v3721_v24 = vld [vmem:[%s3604_s19 + $0x129] sm:$0xff]  ;;  %v3731_v26 = vld [vmem:[%s3604_s19 + $0x141] sm:$0xff] }
  0x1e   : > { %v3734_v27 = vld [vmem:[%s3604_s19 + $0x139] sm:$0xff]  ;;  %v3744_v29 = vld [vmem:[%s3604_s19 + $0x151] sm:$0xff]  ;;  %v3754_v31 = vld [vmem:[%s3604_s19 + $0x169] sm:$0xff] }
  0x1f   : > { %v3741_v28 = vld [vmem:[%s3604_s19 + $0x159] sm:$0xff]  ;;  %v3751_v30 = vld [vmem:[%s3604_s19 + $0x171] sm:$0xff]  ;;  %v261_v33 = vld [vmem:[%s3604_s19 + $0x2] sm:$0xff] }
  0x20   : > { %v262_v32 = vld [vmem:[%s3604_s19 + $0xa] sm:$0xff]  ;;  %v3765_v34 = vld [vmem:[%s3604_s19 + $0x22] sm:$0xff]  ;;  %v3768_v35 = vld [vmem:[%s3604_s19 + $0x1a] sm:$0xff] }
  0x21   : > { %537 = vrot.lane.b32.xlu1 %v3631_v6, %s3555_s20  ;;  %535 = vrot.lane.b32.xlu0 %v3634_v7, %s3555_s20  ;;  %v3775_v36 = vld [vmem:[%s3604_s19 + $0x3a] sm:$0xff]  ;;  %v3778_v37 = vld [vmem:[%s3604_s19 + $0x32] sm:$0xff] }
  0x22   : > { %v3785_v38 = vld [vmem:[%s3604_s19 + $0x52] sm:$0xff]  ;;  %v3788_v39 = vld [vmem:[%s3604_s19 + $0x4a] sm:$0xff]  ;;  %v3798_v41 = vld [vmem:[%s3604_s19 + $0x62] sm:$0xff] }
  0x23   : > { %v3795_v40 = vld [vmem:[%s3604_s19 + $0x6a] sm:$0xff]  ;;  %v3805_v42 = vld [vmem:[%s3604_s19 + $0x82] sm:$0xff]  ;;  %v3808_v43 = vld [vmem:[%s3604_s19 + $0x7a] sm:$0xff] }
  0x24   : > { %v3815_v44 = vld [vmem:[%s3604_s19 + $0x9a] sm:$0xff]  ;;  %v3818_v45 = vld [vmem:[%s3604_s19 + $0x92] sm:$0xff]  ;;  %v3828_v47 = vld [vmem:[%s3604_s19 + $0xaa] sm:$0xff] }
  0x25   : > { %541 = vrot.lane.b32.xlu1 %v3641_v8, %s3555_s20  ;;  %539 = vrot.lane.b32.xlu0 %v3644_v9, %s3555_s20  ;;  %v3825_v46 = vld [vmem:[%s3604_s19 + $0xb2] sm:$0xff]  ;;  %v3835_v48 = vld [vmem:[%s3604_s19 + $0xca] sm:$0xff] }
  0x26   : > { %v3838_v49 = vld [vmem:[%s3604_s19 + $0xc2] sm:$0xff]  ;;  %v3848_v51 = vld [vmem:[%s3604_s19 + $0xda] sm:$0xff]  ;;  %v3858_v53 = vld [vmem:[%s3604_s19 + $0xf2] sm:$0xff] }
  0x27   : > { %v3845_v50 = vld [vmem:[%s3604_s19 + $0xe2] sm:$0xff]  ;;  %v3855_v52 = vld [vmem:[%s3604_s19 + $0xfa] sm:$0xff]  ;;  %v3865_v54 = vld [vmem:[%s3604_s19 + $0x112] sm:$0xff] }
  0x28   : > { %v3868_v55 = vld [vmem:[%s3604_s19 + $0x10a] sm:$0xff]  ;;  %v3878_v57 = vld [vmem:[%s3604_s19 + $0x122] sm:$0xff]  ;;  %v3888_v59 = vld [vmem:[%s3604_s19 + $0x13a] sm:$0xff] }
  0x29   : > { %545 = vrot.lane.b32.xlu1 %v3651_v10, %s3555_s20  ;;  %543 = vrot.lane.b32.xlu0 %v3654_v11, %s3555_s20  ;;  %v3875_v56 = vld [vmem:[%s3604_s19 + $0x12a] sm:$0xff]  ;;  %v3885_v58 = vld [vmem:[%s3604_s19 + $0x142] sm:$0xff]  ;;  %5672 = vst [vmem:[#allocation3_spill] sm:$0xff] %v3888_v59 }
  0x2a   : > { %5671 = vst [vmem:[#allocation2_spill] sm:$0xff] %v3885_v58  ;;  %v290_v62 = vld [vmem:[%s3604_s19 + $0x15a] sm:$0xff]  ;;  %v289_v63 = vld [vmem:[%s3604_s19 + $0x152] sm:$0xff] }
  0x2d   : > { %549 = vrot.lane.b32.xlu1 %v3661_v12, %s3555_s20  ;;  %547 = vrot.lane.b32.xlu0 %v3664_v13, %s3555_s20 }
  0x31   : > { %553 = vrot.lane.b32.xlu1 %v3671_v14, %s3555_s20  ;;  %551 = vrot.lane.b32.xlu0 %v3674_v15, %s3555_s20 }
  0x35   : > { %557 = vrot.lane.b32.xlu1 %v3681_v16, %s3555_s20  ;;  %555 = vrot.lane.b32.xlu0 %v3684_v17, %s3555_s20 }
  0x39   : > { %561 = vrot.lane.b32.xlu1 %v3691_v18, %s3555_s20  ;;  %559 = vrot.lane.b32.xlu0 %v3694_v19, %s3555_s20 }
  0x3d   : > { %565 = vrot.lane.b32.xlu1 %v3701_v20, %s3555_s20  ;;  %563 = vrot.lane.b32.xlu0 %v3704_v21, %s3555_s20 }
  0x41   : > { %569 = vrot.lane.b32.xlu1 %v3711_v22, %s3555_s20  ;;  %567 = vrot.lane.b32.xlu0 %v3714_v23, %s3555_s20 }
  0x45   : > { %573 = vrot.lane.b32.xlu1 %v3721_v24, %s3555_s20  ;;  %571 = vrot.lane.b32.xlu0 %v3724_v25, %s3555_s20 }
  0x49   : > { %577 = vrot.lane.b32.xlu1 %v3731_v26, %s3555_s20  ;;  %575 = vrot.lane.b32.xlu0 %v3734_v27, %s3555_s20 }
  0x4d   : > { %581 = vrot.lane.b32.xlu1 %v3741_v28, %s3555_s20  ;;  %579 = vrot.lane.b32.xlu0 %v3744_v29, %s3555_s20 }
  0x51   : > { %585 = vrot.lane.b32.xlu1 %v3751_v30, %s3555_s20  ;;  %583 = vrot.lane.b32.xlu0 %v3754_v31, %s3555_s20 }
  0x55   : > { %653 = vrot.lane.b32.xlu1 %v262_v32, %s3556_s21  ;;  %651 = vrot.lane.b32.xlu0 %v261_v33, %s3556_s21  ;;  %v292_v32 = vld [vmem:[%s3604_s19 + $0x172] sm:$0xff]  ;;  %v291_v33 = vld [vmem:[%s3604_s19 + $0x16a] sm:$0xff] }
  0x59   : > { %657 = vrot.lane.b32.xlu1 %v3765_v34, %s3556_s21  ;;  %655 = vrot.lane.b32.xlu0 %v3768_v35, %s3556_s21 }
  0x5d   : > { %661 = vrot.lane.b32.xlu1 %v3775_v36, %s3556_s21  ;;  %659 = vrot.lane.b32.xlu0 %v3778_v37, %s3556_s21 }
  0x61   : > { %665 = vrot.lane.b32.xlu1 %v3785_v38, %s3556_s21  ;;  %663 = vrot.lane.b32.xlu0 %v3788_v39, %s3556_s21 }
  0x65   : > { %669 = vrot.lane.b32.xlu1 %v3795_v40, %s3556_s21  ;;  %667 = vrot.lane.b32.xlu0 %v3798_v41, %s3556_s21 }
  0x69   : > { %673 = vrot.lane.b32.xlu1 %v3805_v42, %s3556_s21  ;;  %671 = vrot.lane.b32.xlu0 %v3808_v43, %s3556_s21 }
  0x6d   : > { %677 = vrot.lane.b32.xlu1 %v3815_v44, %s3556_s21  ;;  %675 = vrot.lane.b32.xlu0 %v3818_v45, %s3556_s21 }
  0x71   : > { %681 = vrot.lane.b32.xlu1 %v3825_v46, %s3556_s21  ;;  %679 = vrot.lane.b32.xlu0 %v3828_v47, %s3556_s21 }
  0x75   : > { %685 = vrot.lane.b32.xlu1 %v3835_v48, %s3556_s21  ;;  %683 = vrot.lane.b32.xlu0 %v3838_v49, %s3556_s21 }
  0x79   : > { %689 = vrot.lane.b32.xlu1 %v3845_v50, %s3556_s21  ;;  %687 = vrot.lane.b32.xlu0 %v3848_v51, %s3556_s21 }
  0x7d   : > { %693 = vrot.lane.b32.xlu1 %v3855_v52, %s3556_s21  ;;  %691 = vrot.lane.b32.xlu0 %v3858_v53, %s3556_s21 }
  0x81   : > { %697 = vrot.lane.b32.xlu1 %v3865_v54, %s3556_s21  ;;  %695 = vrot.lane.b32.xlu0 %v3868_v55, %s3556_s21 }
  0x85   : > { %701 = vrot.lane.b32.xlu1 %v3875_v56, %s3556_s21  ;;  %699 = vrot.lane.b32.xlu0 %v3878_v57, %s3556_s21 }
  0x87   : > { %v3890_v60 = vpop.permute.xlu1 %527  ;;  %v3892_v61 = vpop.permute.xlu0 %523 }
  0x88   : > { %5673 = vst [vmem:[#allocation4_spill] sm:$0xff] %v3890_v60  ;;  %5674 = vst [vmem:[#allocation5_spill] sm:$0xff] %v3892_v61 }
  0x89   : > { %705 = vrot.lane.b32.xlu1 %v3885_v58, %s3556_s21  ;;  %703 = vrot.lane.b32.xlu0 %v3888_v59, %s3556_s21  ;;  %v225_v59 = vld [vmem:[%s3604_s19 + $0x150] sm:$0xff]  ;;  %v227_v58 = vld [vmem:[%s3604_s19 + $0x168] sm:$0xff] }
  0x8b   : > { %v3900_v1 = vpop.permute.xlu1 %529  ;;  %v3902_v3 = vpop.permute.xlu0 %525 }
  0x8c   : > { %5675 = vst [vmem:[#allocation6_spill] sm:$0xff] %v3900_v1  ;;  %5676 = vst [vmem:[#allocation7_spill] sm:$0xff] %v3902_v3 }
  0x8d   : > { %709 = vrot.lane.b32.xlu1 %v290_v62, %s3556_s21  ;;  %707 = vrot.lane.b32.xlu0 %v289_v63, %s3556_s21  ;;  %v3919_v62 = vld [vmem:[%s3604_s19 + $0x18] sm:$0xff]  ;;  %v3922_v63 = vld [vmem:[%s3604_s19 + $0x20] sm:$0xff] }
  0x8e   : > { %5681 = vst [vmem:[#allocation12_spill] sm:$0xff] %v3919_v62  ;;  %5682 = vst [vmem:[#allocation13_spill] sm:$0xff] %v3922_v63 }
  0x8f   : > { %v3908_v60 = vpop.permute.xlu1 %533  ;;  %v3910_v61 = vpop.permute.xlu0 %531 }
  0x90   : > { %5677 = vst [vmem:[#allocation8_spill] sm:$0xff] %v3908_v60  ;;  %5678 = vst [vmem:[#allocation9_spill] sm:$0xff] %v3910_v61 }
  0x91   : > { %713 = vrot.lane.b32.xlu1 %v292_v32, %s3556_s21  ;;  %711 = vrot.lane.b32.xlu0 %v291_v33, %s3556_s21 }
  0x93   : > { %v3914_v1 = vpop.permute.xlu1 %537  ;;  %v3916_v3 = vpop.permute.xlu0 %535 }
  0x94   : > { %5679 = vst [vmem:[#allocation10_spill] sm:$0xff] %v3914_v1  ;;  %5680 = vst [vmem:[#allocation11_spill] sm:$0xff] %v3916_v3  ;;  %v3933_v1 = vld [vmem:[%s3604_s19 + $0x38] sm:$0xff]  ;;  %v3936_v3 = vld [vmem:[%s3604_s19 + $0x30] sm:$0xff] }
  0x95   : > { %781 = vrot.lane.b32.xlu1 %v3922_v63, %s3557_s22  ;;  %779 = vrot.lane.b32.xlu0 %v3919_v62, %s3557_s22  ;;  %5685 = vst [vmem:[#allocation16_spill] sm:$0xff] %v3933_v1  ;;  %5686 = vst [vmem:[#allocation17_spill] sm:$0xff] %v3936_v3  ;;  %v3947_v63 = vld [vmem:[%s3604_s19 + $0x50] sm:$0xff] }
  0x96   : > { %5689 = vst [vmem:[#allocation20_spill] sm:$0xff] %v3947_v63 }
  0x97   : > { %v3928_v32 = vpop.permute.xlu1 %541  ;;  %v3930_v33 = vpop.permute.xlu0 %539 }
  0x98   : > { %5683 = vst [vmem:[#allocation14_spill] sm:$0xff] %v3928_v32  ;;  %5684 = vst [vmem:[#allocation15_spill] sm:$0xff] %v3930_v33  ;;  %v3950_v32 = vld [vmem:[%s3604_s19 + $0x48] sm:$0xff] }
  0x99   : > { %785 = vrot.lane.b32.xlu1 %v3933_v1, %s3557_s22  ;;  %783 = vrot.lane.b32.xlu0 %v3936_v3, %s3557_s22  ;;  %5690 = vst [vmem:[#allocation21_spill] sm:$0xff] %v3950_v32  ;;  %v3961_v3 = vld [vmem:[%s3604_s19 + $0x68] sm:$0xff]  ;;  %v226_v1 = vld [vmem:[%s3604_s19 + $0x158] sm:$0xff] }
  0x9a   : > { %5693 = vst [vmem:[#allocation24_spill] sm:$0xff] %v3961_v3 }
  0x9b   : > { %v3942_v61 = vpop.permute.xlu1 %545  ;;  %v3944_v60 = vpop.permute.xlu0 %543 }
  0x9c   : > { %5687 = vst [vmem:[#allocation18_spill] sm:$0xff] %v3942_v61  ;;  %5688 = vst [vmem:[#allocation19_spill] sm:$0xff] %v3944_v60  ;;  %v3964_v61 = vld [vmem:[%s3604_s19 + $0x60] sm:$0xff] }
  0x9d   : > { %789 = vrot.lane.b32.xlu1 %v3947_v63, %s3557_s22  ;;  %787 = vrot.lane.b32.xlu0 %v3950_v32, %s3557_s22  ;;  %5694 = vst [vmem:[#allocation25_spill] sm:$0xff] %v3964_v61  ;;  %v3975_v63 = vld [vmem:[%s3604_s19 + $0x80] sm:$0xff] }
  0x9e   : > { %5697 = vst [vmem:[#allocation28_spill] sm:$0xff] %v3975_v63 }
  0x9f   : > { %v3956_v33 = vpop.permute.xlu1 %549  ;;  %v3958_v62 = vpop.permute.xlu0 %547 }
  0xa0   : > { %5691 = vst [vmem:[#allocation22_spill] sm:$0xff] %v3956_v33  ;;  %5692 = vst [vmem:[#allocation23_spill] sm:$0xff] %v3958_v62  ;;  %v3978_v33 = vld [vmem:[%s3604_s19 + $0x78] sm:$0xff] }
  0xa1   : > { %793 = vrot.lane.b32.xlu1 %v3961_v3, %s3557_s22  ;;  %791 = vrot.lane.b32.xlu0 %v3964_v61, %s3557_s22  ;;  %5698 = vst [vmem:[#allocation29_spill] sm:$0xff] %v3978_v33  ;;  %v3989_v3 = vld [vmem:[%s3604_s19 + $0x98] sm:$0xff] }
  0xa2   : > { %5701 = vst [vmem:[#allocation32_spill] sm:$0xff] %v3989_v3 }
  0xa3   : > { %v3970_v60 = vpop.permute.xlu1 %553  ;;  %v3972_v32 = vpop.permute.xlu0 %551 }
  0xa4   : > { %5695 = vst [vmem:[#allocation26_spill] sm:$0xff] %v3970_v60  ;;  %5696 = vst [vmem:[#allocation27_spill] sm:$0xff] %v3972_v32  ;;  %v3992_v60 = vld [vmem:[%s3604_s19 + $0x90] sm:$0xff] }
  0xa5   : > { %797 = vrot.lane.b32.xlu1 %v3975_v63, %s3557_s22  ;;  %795 = vrot.lane.b32.xlu0 %v3978_v33, %s3557_s22  ;;  %5702 = vst [vmem:[#allocation33_spill] sm:$0xff] %v3992_v60  ;;  %v4003_v63 = vld [vmem:[%s3604_s19 + $0xb0] sm:$0xff] }
  0xa6   : > { %5705 = vst [vmem:[#allocation36_spill] sm:$0xff] %v4003_v63 }
  0xa7   : > { %v3984_v62 = vpop.permute.xlu1 %557  ;;  %v3986_v61 = vpop.permute.xlu0 %555 }
  0xa8   : > { %5699 = vst [vmem:[#allocation30_spill] sm:$0xff] %v3984_v62  ;;  %5700 = vst [vmem:[#allocation31_spill] sm:$0xff] %v3986_v61  ;;  %v4006_v62 = vld [vmem:[%s3604_s19 + $0xa8] sm:$0xff] }
  0xa9   : > { %801 = vrot.lane.b32.xlu1 %v3989_v3, %s3557_s22  ;;  %799 = vrot.lane.b32.xlu0 %v3992_v60, %s3557_s22  ;;  %5706 = vst [vmem:[#allocation37_spill] sm:$0xff] %v4006_v62  ;;  %v4017_v3 = vld [vmem:[%s3604_s19 + $0xc8] sm:$0xff] }
  0xaa   : > { %5709 = vst [vmem:[#allocation40_spill] sm:$0xff] %v4017_v3 }
  0xab   : > { %v3998_v32 = vpop.permute.xlu1 %561  ;;  %v4000_v33 = vpop.permute.xlu0 %559 }
  0xac   : > { %5703 = vst [vmem:[#allocation34_spill] sm:$0xff] %v3998_v32  ;;  %5704 = vst [vmem:[#allocation35_spill] sm:$0xff] %v4000_v33  ;;  %v4020_v32 = vld [vmem:[%s3604_s19 + $0xc0] sm:$0xff] }
  0xad   : > { %805 = vrot.lane.b32.xlu1 %v4003_v63, %s3557_s22  ;;  %803 = vrot.lane.b32.xlu0 %v4006_v62, %s3557_s22  ;;  %5710 = vst [vmem:[#allocation41_spill] sm:$0xff] %v4020_v32  ;;  %v4031_v63 = vld [vmem:[%s3604_s19 + $0xe0] sm:$0xff] }
  0xae   : > { %5713 = vst [vmem:[#allocation44_spill] sm:$0xff] %v4031_v63 }
  0xaf   : > { %v4012_v61 = vpop.permute.xlu1 %565  ;;  %v4014_v60 = vpop.permute.xlu0 %563 }
  0xb0   : > { %5707 = vst [vmem:[#allocation38_spill] sm:$0xff] %v4012_v61  ;;  %5708 = vst [vmem:[#allocation39_spill] sm:$0xff] %v4014_v60  ;;  %v4034_v61 = vld [vmem:[%s3604_s19 + $0xd8] sm:$0xff] }
  0xb1   : > { %809 = vrot.lane.b32.xlu1 %v4017_v3, %s3557_s22  ;;  %807 = vrot.lane.b32.xlu0 %v4020_v32, %s3557_s22  ;;  %5714 = vst [vmem:[#allocation45_spill] sm:$0xff] %v4034_v61  ;;  %v4045_v3 = vld [vmem:[%s3604_s19 + $0xf8] sm:$0xff] }
  0xb2   : > { %5717 = vst [vmem:[#allocation48_spill] sm:$0xff] %v4045_v3 }
  0xb3   : > { %v4026_v33 = vpop.permute.xlu1 %569  ;;  %v4028_v62 = vpop.permute.xlu0 %567 }
  0xb4   : > { %5711 = vst [vmem:[#allocation42_spill] sm:$0xff] %v4026_v33  ;;  %5712 = vst [vmem:[#allocation43_spill] sm:$0xff] %v4028_v62  ;;  %v4048_v33 = vld [vmem:[%s3604_s19 + $0xf0] sm:$0xff] }
  0xb5   : > { %813 = vrot.lane.b32.xlu1 %v4031_v63, %s3557_s22  ;;  %811 = vrot.lane.b32.xlu0 %v4034_v61, %s3557_s22  ;;  %5718 = vst [vmem:[#allocation49_spill] sm:$0xff] %v4048_v33  ;;  %v4059_v63 = vld [vmem:[%s3604_s19 + $0x110] sm:$0xff] }
  0xb6   : > { %5721 = vst [vmem:[#allocation52_spill] sm:$0xff] %v4059_v63 }
  0xb7   : > { %v4040_v60 = vpop.permute.xlu1 %573  ;;  %v4042_v32 = vpop.permute.xlu0 %571 }
  0xb8   : > { %5715 = vst [vmem:[#allocation46_spill] sm:$0xff] %v4040_v60  ;;  %5716 = vst [vmem:[#allocation47_spill] sm:$0xff] %v4042_v32  ;;  %v4062_v60 = vld [vmem:[%s3604_s19 + $0x108] sm:$0xff] }
  0xb9   : > { %817 = vrot.lane.b32.xlu1 %v4045_v3, %s3557_s22  ;;  %815 = vrot.lane.b32.xlu0 %v4048_v33, %s3557_s22  ;;  %5722 = vst [vmem:[#allocation53_spill] sm:$0xff] %v4062_v60  ;;  %v4073_v3 = vld [vmem:[%s3604_s19 + $0x128] sm:$0xff] }
  0xba   : > { %5725 = vst [vmem:[#allocation56_spill] sm:$0xff] %v4073_v3 }
  0xbb   : > { %v4054_v62 = vpop.permute.xlu1 %577  ;;  %v4056_v61 = vpop.permute.xlu0 %575 }
  0xbc   : > { %5719 = vst [vmem:[#allocation50_spill] sm:$0xff] %v4054_v62  ;;  %5720 = vst [vmem:[#allocation51_spill] sm:$0xff] %v4056_v61  ;;  %v4076_v62 = vld [vmem:[%s3604_s19 + $0x120] sm:$0xff] }
  0xbd   : > { %821 = vrot.lane.b32.xlu1 %v4059_v63, %s3557_s22  ;;  %819 = vrot.lane.b32.xlu0 %v4062_v60, %s3557_s22  ;;  %5726 = vst [vmem:[#allocation57_spill] sm:$0xff] %v4076_v62  ;;  %v224_v63 = vld [vmem:[%s3604_s19 + $0x140] sm:$0xff] }
  0xbf   : > { %v4068_v32 = vpop.permute.xlu1 %581  ;;  %v4070_v33 = vpop.permute.xlu0 %579 }
  0xc0   : > { %5723 = vst [vmem:[#allocation54_spill] sm:$0xff] %v4068_v32  ;;  %5724 = vst [vmem:[#allocation55_spill] sm:$0xff] %v4070_v33  ;;  %v223_v32 = vld [vmem:[%s3604_s19 + $0x138] sm:$0xff] }
  0xc1   : > { %825 = vrot.lane.b32.xlu1 %v4073_v3, %s3557_s22  ;;  %823 = vrot.lane.b32.xlu0 %v4076_v62, %s3557_s22  ;;  %v228_v62 = vld [vmem:[%s3604_s19 + $0x170] sm:$0xff] }
  0xc3   : > { %v4082_v61 = vpop.permute.xlu1 %585  ;;  %v4084_v60 = vpop.permute.xlu0 %583 }
  0xc4   : > { %5727 = vst [vmem:[#allocation58_spill] sm:$0xff] %v4082_v61  ;;  %5728 = vst [vmem:[#allocation59_spill] sm:$0xff] %v4084_v60 }
  0xc5   : > { %829 = vrot.lane.b32.xlu1 %v224_v63, %s3557_s22  ;;  %827 = vrot.lane.b32.xlu0 %v223_v32, %s3557_s22  ;;  %v3012_v63 = vld [vmem:[%s3604_s19 + $0x188] sm:$0xff]  ;;  %v3011_v32 = vld [vmem:[%s3604_s19 + $0x180] sm:$0xff] }
  0xc7   : > { %v4090_v33 = vpop.permute.xlu1 %653  ;;  %v4092_v3 = vpop.permute.xlu0 %651 }
  0xc8   : > { %5729 = vst [vmem:[#allocation60_spill] sm:$0xff] %v4090_v33  ;;  %5730 = vst [vmem:[#allocation61_spill] sm:$0xff] %v4092_v3 }
  0xc9   : > { %833 = vrot.lane.b32.xlu1 %v226_v1, %s3557_s22  ;;  %831 = vrot.lane.b32.xlu0 %v225_v59, %s3557_s22 }
  0xcb   : > { %v4098_v61 = vpop.permute.xlu1 %657  ;;  %v4100_v60 = vpop.permute.xlu0 %655 }
  0xcd   : > { %837 = vrot.lane.b32.xlu1 %v228_v62, %s3557_s22  ;;  %835 = vrot.lane.b32.xlu0 %v227_v58, %s3557_s22 }
  0xcf   : > { %v4108_v33 = vpop.permute.xlu1 %661  ;;  %v4110_v3 = vpop.permute.xlu0 %659 }
  0xd1   : > { %841 = vrot.lane.b32.xlu1 %v3012_v63, %s3557_s22  ;;  %839 = vrot.lane.b32.xlu0 %v3011_v32, %s3557_s22 }
  0xd3   : > { %v4114_v59 = vpop.permute.xlu1 %665  ;;  %v4116_v1 = vpop.permute.xlu0 %663 }
  0xd4   : > { %5731 = vst [vmem:[#allocation62_spill] sm:$0xff] %v4116_v1 }
  0xd5   : > { %909 = vrot.lane.b32.xlu1 %v3614_v2, %s3558_s23  ;;  %907 = vrot.lane.b32.xlu0 %v3607_v0, %s3558_s23 }
  0xd7   : > { %v4122_v58 = vpop.permute.xlu1 %669  ;;  %v4124_v62 = vpop.permute.xlu0 %667 }
  0xd8   : > { %5732 = vst [vmem:[#allocation63_spill] sm:$0xff] %v4122_v58  ;;  %5733 = vst [vmem:[#allocation64_spill] sm:$0xff] %v4124_v62 }
  0xd9   : > { %913 = vrot.lane.b32.xlu1 %v3621_v4, %s3558_s23  ;;  %911 = vrot.lane.b32.xlu0 %v3624_v5, %s3558_s23 }
  0xdb   : > { %v4130_v63 = vpop.permute.xlu1 %673  ;;  %v4132_v32 = vpop.permute.xlu0 %671 }
  0xdc   : > { %5734 = vst [vmem:[#allocation65_spill] sm:$0xff] %v4130_v63  ;;  %5735 = vst [vmem:[#allocation66_spill] sm:$0xff] %v4132_v32 }
  0xdd   : > { %917 = vrot.lane.b32.xlu1 %v3631_v6, %s3558_s23  ;;  %915 = vrot.lane.b32.xlu0 %v3634_v7, %s3558_s23 }
  0xdf   : > { %v4138_v1 = vpop.permute.xlu1 %677  ;;  %v4140_v58 = vpop.permute.xlu0 %675 }
  0xe0   : > { %5736 = vst [vmem:[#allocation67_spill] sm:$0xff] %v4138_v1  ;;  %5737 = vst [vmem:[#allocation68_spill] sm:$0xff] %v4140_v58 }
  0xe1   : > { %921 = vrot.lane.b32.xlu1 %v3641_v8, %s3558_s23  ;;  %919 = vrot.lane.b32.xlu0 %v3644_v9, %s3558_s23 }
  0xe3   : > { %v4146_v62 = vpop.permute.xlu1 %681  ;;  %v4148_v63 = vpop.permute.xlu0 %679 }
  0xe4   : > { %5738 = vst [vmem:[#allocation69_spill] sm:$0xff] %v4146_v62 }
  0xe5   : > { %925 = vrot.lane.b32.xlu1 %v3651_v10, %s3558_s23  ;;  %923 = vrot.lane.b32.xlu0 %v3654_v11, %s3558_s23 }
  0xe7   : > { %v4154_v32 = vpop.permute.xlu1 %685  ;;  %v4156_v1 = vpop.permute.xlu0 %683 }
  0xe8   : > { %5739 = vst [vmem:[#allocation70_spill] sm:$0xff] %v4154_v32 }
  0xe9   : > { %929 = vrot.lane.b32.xlu1 %v3661_v12, %s3558_s23  ;;  %927 = vrot.lane.b32.xlu0 %v3664_v13, %s3558_s23 }
  0xeb   : > { %v4162_v58 = vpop.permute.xlu1 %689  ;;  %v4164_v62 = vpop.permute.xlu0 %687 }
  0xec   : > { %5740 = vst [vmem:[#allocation71_spill] sm:$0xff] %v4162_v58  ;;  %5741 = vst [vmem:[#allocation72_spill] sm:$0xff] %v4164_v62 }
  0xed   : > { %933 = vrot.lane.b32.xlu1 %v3671_v14, %s3558_s23  ;;  %931 = vrot.lane.b32.xlu0 %v3674_v15, %s3558_s23 }
  0xef   : > { %v4170_v10 = vpop.permute.xlu1 %693  ;;  %v4172_v32 = vpop.permute.xlu0 %691 }
  0xf0   : > { %5742 = vst [vmem:[#allocation73_spill] sm:$0xff] %v4170_v10  ;;  %5743 = vst [vmem:[#allocation74_spill] sm:$0xff] %v4172_v32 }
  0xf1   : > { %937 = vrot.lane.b32.xlu1 %v3681_v16, %s3558_s23  ;;  %935 = vrot.lane.b32.xlu0 %v3684_v17, %s3558_s23 }
  0xf3   : > { %v4178_v12 = vpop.permute.xlu1 %697  ;;  %v4180_v13 = vpop.permute.xlu0 %695 }
  0xf4   : > { %5744 = vst [vmem:[#allocation75_spill] sm:$0xff] %v4178_v12  ;;  %5745 = vst [vmem:[#allocation76_spill] sm:$0xff] %v4180_v13 }
  0xf5   : > { %941 = vrot.lane.b32.xlu1 %v3691_v18, %s3558_s23  ;;  %939 = vrot.lane.b32.xlu0 %v3694_v19, %s3558_s23 }
  0xf7   : > { %v4186_v14 = vpop.permute.xlu1 %701  ;;  %v4188_v15 = vpop.permute.xlu0 %699 }
  0xf8   : > { %5746 = vst [vmem:[#allocation77_spill] sm:$0xff] %v4186_v14  ;;  %5747 = vst [vmem:[#allocation78_spill] sm:$0xff] %v4188_v15 }
  0xf9   : > { %945 = vrot.lane.b32.xlu1 %v3701_v20, %s3558_s23  ;;  %943 = vrot.lane.b32.xlu0 %v3704_v21, %s3558_s23  ;;  %v2033_v20 = vld [vmem:[%s5634_s1] sm:$0xff]  ;;  %v2034_v21 = vld [vmem:[%s5634_s1 + $0x8] sm:$0xff] }
  0xfb   : > { %v4194_v16 = vpop.permute.xlu1 %705  ;;  %v4196_v17 = vpop.permute.xlu0 %703 }
  0xfc   : > { %5748 = vst [vmem:[#allocation79_spill] sm:$0xff] %v4194_v16  ;;  %5749 = vst [vmem:[#allocation80_spill] sm:$0xff] %v4196_v17 }
  0xfd   : > { %949 = vrot.lane.b32.xlu1 %v3711_v22, %s3558_s23  ;;  %947 = vrot.lane.b32.xlu0 %v3714_v23, %s3558_s23  ;;  %v3422_v22 = vpack.c.bf16 %v2034_v21, %v2033_v20  ;;  %v2035_v20 = vld [vmem:[%s5634_s1 + $0x10] sm:$0xff] }
  0xfe   : > { %v3044_v21 = vld [vmem:[%s3604_s19 + $0x189] sm:$0xff] }
  0xff   : > { %v4202_v18 = vpop.permute.xlu1 %709  ;;  %v4204_v19 = vpop.permute.xlu0 %707  ;;  %3423 = vmatprep.subr.bf16.mxu0 %v3422_v22 }
 0x100   : > { %5750 = vst [vmem:[#allocation81_spill] sm:$0xff] %v4202_v18  ;;  %5751 = vst [vmem:[#allocation82_spill] sm:$0xff] %v4204_v19  ;;  %3425 = vmatpush3.bf16.msra.mxu0 %v3422_v22  ;;  %v3043_v22 = vld [vmem:[%s3604_s19 + $0x181] sm:$0xff] }
 0x101   : > { %953 = vrot.lane.b32.xlu1 %v3721_v24, %s3558_s23  ;;  %951 = vrot.lane.b32.xlu0 %v3724_v25, %s3558_s23 }
 0x102   : > { %3318 = vmatprep.subr.mxu0 %v2035_v20 }
 0x103   : > { %v4216_v23 = vpop.permute.xlu1 %713  ;;  %v4218_v18 = vpop.permute.xlu0 %711 }
 0x104   : > { %5752 = vst [vmem:[#allocation83_spill] sm:$0xff] %v4216_v23  ;;  %5753 = vst [vmem:[#allocation84_spill] sm:$0xff] %v4218_v18  ;;  %3319 = vmatpush3.msra.mxu0 %v2035_v20 }
 0x105   : > { %957 = vrot.lane.b32.xlu1 %v3731_v26, %s3558_s23  ;;  %955 = vrot.lane.b32.xlu0 %v3734_v27, %s3558_s23 }
 0x107   : > { %v4224_v24 = vpop.permute.xlu1 %781  ;;  %v4226_v25 = vpop.permute.xlu0 %779 }
 0x109   : > { %961 = vrot.lane.b32.xlu1 %v3741_v28, %s3558_s23  ;;  %959 = vrot.lane.b32.xlu0 %v3744_v29, %s3558_s23 }
 0x10b   : > { %v4235_v26 = vpop.permute.xlu1 %785  ;;  %v4237_v27 = vpop.permute.xlu0 %783 }
 0x10d   : > { %965 = vrot.lane.b32.xlu1 %v3751_v30, %s3558_s23  ;;  %963 = vrot.lane.b32.xlu0 %v3754_v31, %s3558_s23 }
 0x10f   : > { %v4245_v18 = vpop.permute.xlu1 %789  ;;  %v4247_v23 = vpop.permute.xlu0 %787 }
 0x111   : > { %969 = vrot.lane.b32.xlu1 %v3044_v21, %s3558_s23  ;;  %967 = vrot.lane.b32.xlu0 %v3043_v22, %s3558_s23 }
 0x113   : > { %v4251_v28 = vpop.permute.xlu1 %793  ;;  %v4253_v29 = vpop.permute.xlu0 %791 }
 0x115   : > { %1037 = vrot.lane.b32.xlu1 %v3765_v34, %s3559_s30  ;;  %1035 = vrot.lane.b32.xlu0 %v3768_v35, %s3559_s30 }
 0x117   : > { %v4259_v30 = vpop.permute.xlu1 %797  ;;  %v4261_v31 = vpop.permute.xlu0 %795 }
 0x119   : > { %1041 = vrot.lane.b32.xlu1 %v3775_v36, %s3559_s30  ;;  %1039 = vrot.lane.b32.xlu0 %v3778_v37, %s3559_s30 }
 0x11b   : > { %v4267_v20 = vpop.permute.xlu1 %801  ;;  %v4269_v21 = vpop.permute.xlu0 %799 }
 0x11d   : > { %1045 = vrot.lane.b32.xlu1 %v3785_v38, %s3559_s30  ;;  %1043 = vrot.lane.b32.xlu0 %v3788_v39, %s3559_s30 }
 0x11f   : > { %v4275_v22 = vpop.permute.xlu1 %805  ;;  %v4277_v19 = vpop.permute.xlu0 %803 }
 0x121   : > { %1049 = vrot.lane.b32.xlu1 %v3795_v40, %s3559_s30  ;;  %1047 = vrot.lane.b32.xlu0 %v3798_v41, %s3559_s30 }
 0x123   : > { %v4283_v17 = vpop.permute.xlu1 %809  ;;  %v4285_v16 = vpop.permute.xlu0 %807 }
 0x125   : > { %1053 = vrot.lane.b32.xlu1 %v3805_v42, %s3559_s30  ;;  %1051 = vrot.lane.b32.xlu0 %v3808_v43, %s3559_s30 }
 0x127   : > { %v4291_v15 = vpop.permute.xlu1 %813  ;;  %v4293_v14 = vpop.permute.xlu0 %811 }
 0x128   : > { %5754 = vst [vmem:[#allocation85_spill] sm:$0xff] %v4291_v15  ;;  %5755 = vst [vmem:[#allocation86_spill] sm:$0xff] %v4293_v14 }
 0x129   : > { %1057 = vrot.lane.b32.xlu1 %v3815_v44, %s3559_s30  ;;  %1055 = vrot.lane.b32.xlu0 %v3818_v45, %s3559_s30 }
 0x12b   : > { %v4299_v13 = vpop.permute.xlu1 %817  ;;  %v4301_v12 = vpop.permute.xlu0 %815 }
 0x12c   : > { %5756 = vst [vmem:[#allocation87_spill] sm:$0xff] %v4299_v13  ;;  %5757 = vst [vmem:[#allocation88_spill] sm:$0xff] %v4301_v12 }
 0x12d   : > { %1061 = vrot.lane.b32.xlu1 %v3825_v46, %s3559_s30  ;;  %1059 = vrot.lane.b32.xlu0 %v3828_v47, %s3559_s30 }
 0x12f   : > { %v4307_v32 = vpop.permute.xlu1 %821  ;;  %v4309_v10 = vpop.permute.xlu0 %819 }
 0x130   : > { %5758 = vst [vmem:[#allocation89_spill] sm:$0xff] %v4307_v32  ;;  %5759 = vst [vmem:[#allocation90_spill] sm:$0xff] %v4309_v10  ;;  %v3111_v10 = vld [vmem:[%s3604_s19 + $0x49] sm:$0xff] }
 0x131   : > { %1065 = vrot.lane.b32.xlu1 %v3835_v48, %s3559_s30  ;;  %1063 = vrot.lane.b32.xlu0 %v3838_v49, %s3559_s30 }
 0x133   : > { %v4315_v44 = vpop.permute.xlu1 %825  ;;  %v4317_v45 = vpop.permute.xlu0 %823 }
 0x134   : > { %5760 = vst [vmem:[#allocation91_spill] sm:$0xff] %v4315_v44  ;;  %5761 = vst [vmem:[#allocation92_spill] sm:$0xff] %v4317_v45 }
 0x135   : > { %1069 = vrot.lane.b32.xlu1 %v3845_v50, %s3559_s30  ;;  %1067 = vrot.lane.b32.xlu0 %v3848_v51, %s3559_s30 }
 0x137   : > { %v4323_v46 = vpop.permute.xlu1 %829  ;;  %v4325_v47 = vpop.permute.xlu0 %827 }
 0x138   : > { %5762 = vst [vmem:[#allocation93_spill] sm:$0xff] %v4323_v46  ;;  %5763 = vst [vmem:[#allocation94_spill] sm:$0xff] %v4325_v47 }
 0x139   : > { %1073 = vrot.lane.b32.xlu1 %v3855_v52, %s3559_s30  ;;  %1071 = vrot.lane.b32.xlu0 %v3858_v53, %s3559_s30 }
 0x13b   : > { %v4331_v48 = vpop.permute.xlu1 %833  ;;  %v4333_v49 = vpop.permute.xlu0 %831 }
 0x13c   : > { %5764 = vst [vmem:[#allocation95_spill] sm:$0xff] %v4331_v48  ;;  %5765 = vst [vmem:[#allocation96_spill] sm:$0xff] %v4333_v49  ;;  %v5770_v49 = vld [vmem:[#allocation2_spill] sm:$0xff] }
 0x13d   : > { %1077 = vrot.lane.b32.xlu1 %v3865_v54, %s3559_s30  ;;  %1075 = vrot.lane.b32.xlu0 %v3868_v55, %s3559_s30  ;;  %v5771_v54 = vld [vmem:[#allocation3_spill] sm:$0xff] }
 0x13f   : > { %v4339_v50 = vpop.permute.xlu1 %837  ;;  %v4341_v51 = vpop.permute.xlu0 %835 }
 0x140   : > { %5766 = vst [vmem:[#allocation97_spill] sm:$0xff] %v4339_v50  ;;  %5767 = vst [vmem:[#allocation98_spill] sm:$0xff] %v4341_v51  ;;  %v3109_v50 = vld [vmem:[%s3604_s19 + $0x31] sm:$0xff] }
 0x141   : > { %1081 = vrot.lane.b32.xlu1 %v3875_v56, %s3559_s30  ;;  %1079 = vrot.lane.b32.xlu0 %v3878_v57, %s3559_s30 }
 0x143   : > { %v4347_v52 = vpop.permute.xlu1 %841  ;;  %v4349_v53 = vpop.permute.xlu0 %839 }
 0x144   : > { %5768 = vst [vmem:[#allocation99_spill] sm:$0xff] %v4347_v52  ;;  %5769 = vst [vmem:[#allocation100_spill] sm:$0xff] %v4349_v53  ;;  %v5772_v52 = vld [vmem:[#allocation16_spill] sm:$0xff] }
 0x145   : > { %1085 = vrot.lane.b32.xlu1 %v5770_v49, %s3559_s30  ;;  %1083 = vrot.lane.b32.xlu0 %v5771_v54, %s3559_s30  ;;  %v3206_v49 = vld [vmem:[%s5634_s1 + $0x18] sm:$0xff] }
 0x147   : > { %v4355_v55 = vpop.permute.xlu1 %909  ;;  %v4357_v51 = vpop.permute.xlu0 %907 }
 0x149   : > { %1298 = vrot.lane.b32.xlu1 %v3614_v2, %s3555_s20  ;;  %1296 = vrot.lane.b32.xlu0 %v3607_v0, %s3555_s20  ;;  %v3207_v2 = vld [vmem:[%s5634_s1 + $0x20] sm:$0xff] }
 0x14a   : > { %v3426_v53 = vpack.c.bf16 %v3207_v2, %v3206_v49  ;;  %v3110_v49 = vld [vmem:[%s3604_s19 + $0x39] sm:$0xff] }
 0x14b   : > { %v4363_v56 = vpop.permute.xlu1 %913  ;;  %v4365_v57 = vpop.permute.xlu0 %911 }
 0x14c   : > { %3427 = vmatprep.subr.bf16.mxu1 %v3426_v53 }
 0x14d   : > { %1394 = vrot.lane.b32.xlu1 %v3765_v34, %s3556_s21  ;;  %1392 = vrot.lane.b32.xlu0 %v3768_v35, %s3556_s21  ;;  %v5773_v34 = vld [vmem:[#allocation17_spill] sm:$0xff]  ;;  %v3208_v35 = vld [vmem:[%s5634_s1 + $0x28] sm:$0xff] }
 0x14e   : > { %3429 = vmatpush3.bf16.msra.mxu1 %v3426_v53 }
 0x14f   : > { %v4377_v0 = vpop.permute.xlu1 %917  ;;  %v4379_v54 = vpop.permute.xlu0 %915  ;;  %3372 = vmatprep.subr.mxu1 %v3208_v35 }
 0x151   : > { %1522 = vrot.lane.b32.xlu1 %v5772_v52, %s3557_s22  ;;  %1520 = vrot.lane.b32.xlu0 %v5773_v34, %s3557_s22 }
 0x152   : > { %3373 = vmatpush3.msra.mxu1 %v3208_v35 }
 0x153   : > { %v4389_v48 = vpop.permute.xlu1 %921  ;;  %v4391_v47 = vpop.permute.xlu0 %919 }
 0x155   : > { %1300 = vrot.lane.b32.xlu1 %v3624_v5, %s3555_s20  ;;  %1648 = vrot.lane.b32.xlu0 %v3109_v50, %s3558_s23  ;;  %v3142_v5 = vld [vmem:[%s3604_s19 + $0x3a] sm:$0xff] }
 0x157   : > { %v4397_v2 = vpop.permute.xlu1 %925  ;;  %v4399_v46 = vpop.permute.xlu0 %923 }
 0x159   : > { %1776 = vrot.lane.b32.xlu1 %v3778_v37, %s3559_s30  ;;  %1650 = vrot.lane.b32.xlu0 %v3110_v49, %s3558_s23 }
 0x15b   : > { %v4404_v45 = vpop.permute.xlu1 %929  ;;  %v4406_v53 = vpop.permute.xlu0 %927 }
 0x15d   : > { %1396 = vrot.lane.b32.xlu1 %v3778_v37, %s3556_s21  ;;  %1302 = vrot.lane.b32.xlu0 %v3621_v4, %s3555_s20  ;;  %v5774_v37 = vld [vmem:[#allocation20_spill] sm:$0xff]  ;;  %v5775_v4 = vld [vmem:[#allocation21_spill] sm:$0xff] }
 0x15f   : > { %v4413_v50 = vpop.permute.xlu1 %933  ;;  %v4415_v35 = vpop.permute.xlu0 %931 }
 0x161   : > { %1398 = vrot.lane.b32.xlu1 %v3775_v36, %s3556_s21  ;;  %1778 = vrot.lane.b32.xlu0 %v3142_v5, %s3559_s30  ;;  %v3143_v36 = vld [vmem:[%s3604_s19 + $0x4a] sm:$0xff] }
 0x162   : > { %v3112_v5 = vld [vmem:[%s3604_s19 + $0x51] sm:$0xff] }
 0x163   : > { %v4420_v49 = vpop.permute.xlu1 %937  ;;  %v4422_v44 = vpop.permute.xlu0 %935 }
 0x165   : > { %1526 = vrot.lane.b32.xlu1 %v5774_v37, %s3557_s22  ;;  %1524 = vrot.lane.b32.xlu0 %v5775_v4, %s3557_s22 }
 0x167   : > { %v4429_v32 = vpop.permute.xlu1 %941  ;;  %v4431_v12 = vpop.permute.xlu0 %939 }
 0x168   : > { %5776 = vst [vmem:[#allocation2_spill] sm:$0xff] %v4429_v32  ;;  %5777 = vst [vmem:[#allocation3_spill] sm:$0xff] %v4431_v12  ;;  %v5795_v12 = vld [vmem:[#allocation60_spill] sm:$0xff] }
 0x169   : > { %1304 = vrot.lane.b32.xlu1 %v3634_v7, %s3555_s20  ;;  %1652 = vrot.lane.b32.xlu0 %v3111_v10, %s3558_s23  ;;  %v3144_v7 = vld [vmem:[%s3604_s19 + $0x52] sm:$0xff] }
 0x16b   : > { %v4438_v13 = vpop.permute.xlu1 %945  ;;  %v4440_v62 = vpop.permute.xlu0 %943 }
 0x16c   : > { %5778 = vst [vmem:[#allocation16_spill] sm:$0xff] %v4438_v13  ;;  %5779 = vst [vmem:[#allocation17_spill] sm:$0xff] %v4440_v62  ;;  %v198_v13 = vld [vmem:[%s3604_s19 + $0x8] sm:$0xff] }
 0x16d   : > { %1780 = vrot.lane.b32.xlu1 %v3143_v36, %s3559_s30  ;;  %1654 = vrot.lane.b32.xlu0 %v3112_v5, %s3558_s23  ;;  %v5786_v5 = vld [vmem:[#allocation24_spill] sm:$0xff] }
 0x16f   : > { %v4444_v58 = vpop.permute.xlu1 %949  ;;  %v4446_v32 = vpop.permute.xlu0 %947 }
 0x170   : > { %5780 = vst [vmem:[#allocation20_spill] sm:$0xff] %v4444_v58  ;;  %5781 = vst [vmem:[#allocation21_spill] sm:$0xff] %v4446_v32  ;;  %v197_v58 = vld [vmem:[%s3604_s19] sm:$0xff] }
 0x171   : > { %1400 = vrot.lane.b32.xlu1 %v3788_v39, %s3556_s21  ;;  %1306 = vrot.lane.b32.xlu0 %v3631_v6, %s3555_s20  ;;  %v5787_v6 = vld [vmem:[#allocation25_spill] sm:$0xff] }
 0x173   : > { %v4453_v10 = vpop.permute.xlu1 %953  ;;  %v4455_v62 = vpop.permute.xlu0 %951 }
 0x174   : > { %5782 = vst [vmem:[#allocation101_spill] sm:$0xff] %v4453_v10  ;;  %5783 = vst [vmem:[#allocation102_spill] sm:$0xff] %v4455_v62  ;;  %v3113_v10 = vld [vmem:[%s3604_s19 + $0x61] sm:$0xff] }
 0x175   : > { %1402 = vrot.lane.b32.xlu1 %v3785_v38, %s3556_s21  ;;  %1782 = vrot.lane.b32.xlu0 %v3144_v7, %s3559_s30  ;;  %v3145_v38 = vld [vmem:[%s3604_s19 + $0x62] sm:$0xff] }
 0x176   : > { %v3114_v7 = vld [vmem:[%s3604_s19 + $0x69] sm:$0xff] }
 0x177   : > { %v4460_v36 = vpop.permute.xlu1 %957  ;;  %v4462_v39 = vpop.permute.xlu0 %955 }
 0x178   : > { %5784 = vst [vmem:[#allocation103_spill] sm:$0xff] %v4460_v36  ;;  %5785 = vst [vmem:[#allocation104_spill] sm:$0xff] %v4462_v39 }
 0x179   : > { %1530 = vrot.lane.b32.xlu1 %v5786_v5, %s3557_s22  ;;  %1528 = vrot.lane.b32.xlu0 %v5787_v6, %s3557_s22 }
 0x17b   : > { %v4469_v32 = vpop.permute.xlu1 %961  ;;  %v4471_v62 = vpop.permute.xlu0 %959 }
 0x17c   : > { %5788 = vst [vmem:[#allocation24_spill] sm:$0xff] %v4469_v32  ;;  %5789 = vst [vmem:[#allocation25_spill] sm:$0xff] %v4471_v62 }
 0x17d   : > { %1308 = vrot.lane.b32.xlu1 %v3644_v9, %s3555_s20  ;;  %1656 = vrot.lane.b32.xlu0 %v3113_v10, %s3558_s23  ;;  %v5793_v10 = vld [vmem:[#allocation5_spill] sm:$0xff] }
 0x17e   : > { %v1132_v32 = vsel %vm1131_vm0, %v197_v58, %v5793_v10  ;;  %v5798_v10 = vld [vmem:[#allocation12_spill] sm:$0xff] }
 0x17f   : > { %v4478_v36 = vpop.permute.xlu1 %965  ;;  %v4480_v39 = vpop.permute.xlu0 %963 }
 0x180   : > { %5790 = vst [vmem:[#allocation105_spill] sm:$0xff] %v4478_v36  ;;  %5791 = vst [vmem:[#allocation106_spill] sm:$0xff] %v4480_v39  ;;  %v5794_v36 = vld [vmem:[#allocation7_spill] sm:$0xff] }
 0x181   : > { %1784 = vrot.lane.b32.xlu1 %v3145_v38, %s3559_s30  ;;  %1658 = vrot.lane.b32.xlu0 %v3114_v7, %s3558_s23  ;;  %v1133_v39 = vsel %vm1131_vm0, %v198_v13, %v5794_v36  ;;  %v5796_v38 = vld [vmem:[#allocation61_spill] sm:$0xff]  ;;  %v3146_v36 = vld [vmem:[%s3604_s19 + $0x6a] sm:$0xff] }
 0x182   : > { %v1166_v14 = vsel %vm1164_vm1, %v1133_v39, %v5795_v12  ;;  %v1165_v15 = vsel %vm1164_vm1, %v1132_v32, %v5796_v38  ;;  %v5799_v38 = vld [vmem:[#allocation6_spill] sm:$0xff] }
 0x183   : > { %v4486_v62 = vpop.permute.xlu1 %969  ;;  %v4488_v9 = vpop.permute.xlu0 %967  ;;  %v1199_v58 = vsel %vm1197_vm2, %v1166_v14, %v4224_v24  ;;  %v1198_v13 = vsel %vm1197_vm2, %v1165_v15, %v4226_v25 }
 0x184   : > { %5792 = vst [vmem:[#allocation107_spill] sm:$0xff] %v4488_v9  ;;  %v1232_v12 = vsel %vm1230_vm3, %v1199_v58, %v4355_v55  ;;  %v1231_v32 = vsel %vm1230_vm3, %v1198_v13, %v4357_v51  ;;  %v5800_v9 = vld [vmem:[#allocation13_spill] sm:$0xff]  ;;  %v5801_v13 = vld [vmem:[#allocation8_spill] sm:$0xff] }
 0x185   : > { %1404 = vrot.lane.b32.xlu1 %v3798_v41, %s3556_s21  ;;  %1310 = vrot.lane.b32.xlu0 %v3641_v8, %s3555_s20  ;;  %v5797_v41 = vld [vmem:[#allocation4_spill] sm:$0xff]  ;;  %v1135_v14 = vsel %vm1131_vm0, %v5800_v9, %v5799_v38  ;;  %v5805_v38 = vld [vmem:[#allocation10_spill] sm:$0xff] }
 0x186   : > { %v1134_v8 = vsel %vm1131_vm0, %v5798_v10, %v5797_v41  ;;  %v1168_v25 = vsel %vm1164_vm1, %v1135_v14, %v4098_v61  ;;  %v3115_v41 = vld [vmem:[%s3604_s19 + $0x79] sm:$0xff] }
 0x187   : > { %v1038_v39 = vpop.permute.xlu1 %1037  ;;  %v1036_v7 = vpop.permute.xlu0 %1035  ;;  %v1167_v51 = vsel %vm1164_vm1, %v1134_v8, %v4100_v60  ;;  %v1201_v55 = vsel %vm1197_vm2, %v1168_v25, %v4235_v26  ;;  %v1137_v26 = vsel %vm1131_vm0, %v5772_v52, %v5801_v13 }
 0x188   : > { %v1265_v15 = vsel %vm1263_vm4, %v1232_v12, %v1038_v39  ;;  %v1264_v24 = vsel %vm1263_vm4, %v1231_v32, %v1036_v7  ;;  %v1200_v9 = vsel %vm1197_vm2, %v1167_v51, %v4237_v27  ;;  %v1234_v58 = vsel %vm1230_vm3, %v1201_v55, %v4363_v56  ;;  %v5803_v39 = vld [vmem:[#allocation28_spill] sm:$0xff]  ;;  %v5804_v7 = vld [vmem:[#allocation29_spill] sm:$0xff]  ;;  %v3116_v55 = vld [vmem:[%s3604_s19 + $0x81] sm:$0xff] }
 0x189   : > { %1406 = vrot.lane.b32.xlu1 %v3795_v40, %s3556_s21  ;;  %1786 = vrot.lane.b32.xlu0 %v3146_v36, %s3559_s30  ;;  %v1233_v60 = vsel %vm1230_vm3, %v1200_v9, %v4365_v57  ;;  %v5802_v36 = vld [vmem:[#allocation9_spill] sm:$0xff]  ;;  %v1170_v32 = vsel %vm1164_vm1, %v1137_v26, %v4108_v33 }
 0x18a   : > { %3320 = vmatprep.mubr.msk.f32.mxu0 %vm2042_vm5, %v1264_v24  ;;  %v1136_v27 = vsel %vm1131_vm0, %v5773_v34, %v5802_v36  ;;  %v1203_v52 = vsel %vm1197_vm2, %v1170_v32, %v4245_v18  ;;  %v1139_v18 = vsel %vm1131_vm0, %v5774_v37, %v5805_v38  ;;  %v5807_v24 = vld [vmem:[#allocation62_spill] sm:$0xff] }
 0x18b   : > { %3321 = vmatmul.mubr.msk.f32.vlgmr.msra.gmra.mrb[0].mxu0 %vm2042_vm5, %v1265_v15  ;;  %v1042_v40 = vpop.permute.xlu1 %1041  ;;  %v1040_v61 = vpop.permute.xlu0 %1039  ;;  %v1169_v57 = vsel %vm1164_vm1, %v1136_v27, %v4110_v3  ;;  %v1236_v33 = vsel %vm1230_vm3, %v1203_v52, %v4377_v0  ;;  %v3147_v51 = vld [vmem:[%s3604_s19 + $0x7a] sm:$0xff]  ;;  %v5813_v52 = vld [vmem:[#allocation19_spill] sm:$0xff] }
 0x18c   : > { %v1267_v12 = vsel %vm1263_vm4, %v1234_v58, %v1042_v40  ;;  %v1266_v56 = vsel %vm1263_vm4, %v1233_v60, %v1040_v61  ;;  %v1202_v34 = vsel %vm1197_vm2, %v1169_v57, %v4247_v23  ;;  %v5806_v23 = vld [vmem:[#allocation11_spill] sm:$0xff]  ;;  %v5808_v60 = vld [vmem:[#allocation14_spill] sm:$0xff] }
 0x18d   : > { %1534 = vrot.lane.b32.xlu1 %v5803_v39, %s3557_s22  ;;  %1532 = vrot.lane.b32.xlu0 %v5804_v7, %s3557_s22  ;;  %v1235_v3 = vsel %vm1230_vm3, %v1202_v34, %v4379_v54  ;;  %v1138_v14 = vsel %vm1131_vm0, %v5775_v4, %v5806_v23  ;;  %v1172_v54 = vsel %vm1164_vm1, %v1139_v18, %v4114_v59  ;;  %v5809_v40 = vld [vmem:[#allocation15_spill] sm:$0xff]  ;;  %v5812_v57 = vld [vmem:[#allocation18_spill] sm:$0xff] }
 0x18e   : > { %3323 = vmatprep.mubr.msk.f32.mxu0 %vm2042_vm5, %v1266_v56  ;;  %v1171_v25 = vsel %vm1164_vm1, %v1138_v14, %v5807_v24  ;;  %v1205_v37 = vsel %vm1197_vm2, %v1172_v54, %v4251_v28  ;;  %v1141_v28 = vsel %vm1131_vm0, %v5786_v5, %v5808_v60  ;;  %v5816_v14 = vld [vmem:[#allocation22_spill] sm:$0xff] }
 0x18f   : > { %3324 = vmatmul.mubr.msk.f32.gmra.mrb[2].mxu0 %vm2042_vm5, %v1267_v12  ;;  %v1046_v10 = vpop.permute.xlu1 %1045  ;;  %v1044_v8 = vpop.permute.xlu0 %1043  ;;  %v1204_v4 = vsel %vm1197_vm2, %v1171_v25, %v4253_v29  ;;  %v1238_v59 = vsel %vm1230_vm3, %v1205_v37, %v4389_v48  ;;  %v1140_v29 = vsel %vm1131_vm0, %v5787_v6, %v5809_v40  ;;  %v5810_v48 = vld [vmem:[#allocation63_spill] sm:$0xff]  ;;  %v5821_v37 = vld [vmem:[#allocation68_spill] sm:$0xff] }
 0x190   : > { %v1269_v15 = vsel %vm1263_vm4, %v1236_v33, %v1046_v10  ;;  %v1268_v0 = vsel %vm1263_vm4, %v1235_v3, %v1044_v8  ;;  %v1237_v9 = vsel %vm1230_vm3, %v1204_v4, %v4391_v47  ;;  %v1174_v26 = vsel %vm1164_vm1, %v1141_v28, %v5810_v48  ;;  %v5811_v47 = vld [vmem:[#allocation64_spill] sm:$0xff]  ;;  %v5815_v33 = vld [vmem:[#allocation66_spill] sm:$0xff]  ;;  %v5820_v25 = vld [vmem:[#allocation67_spill] sm:$0xff] }
 0x191   : > { %1312 = vrot.lane.b32.xlu1 %v3654_v11, %s3555_s20  ;;  %1660 = vrot.lane.b32.xlu0 %v3115_v41, %s3558_s23  ;;  %v1173_v36 = vsel %vm1164_vm1, %v1140_v29, %v5811_v47  ;;  %v1207_v5 = vsel %vm1197_vm2, %v1174_v26, %v4259_v30  ;;  %v1143_v30 = vsel %vm1131_vm0, %v5803_v39, %v5812_v57  ;;  %v5814_v41 = vld [vmem:[#allocation65_spill] sm:$0xff]  ;;  %v3460_v10 = vld [vmem:[%s3604_s19 + $0x81] sm:$0xff] }
 0x192   : > { %3326 = vmatprep.mubr.msk.f32.mxu0 %vm2042_vm5, %v1268_v0  ;;  %v1206_v6 = vsel %vm1197_vm2, %v1173_v36, %v4261_v31  ;;  %v1240_v27 = vsel %vm1230_vm3, %v1207_v5, %v4397_v2  ;;  %v1142_v31 = vsel %vm1131_vm0, %v5804_v7, %v5813_v52  ;;  %v3148_v8 = vld [vmem:[%s3604_s19 + $0x82] sm:$0xff]  ;;  %v5819_v0 = vld [vmem:[#allocation33_spill] sm:$0xff] }
 0x193   : > { %3327 = vmatmul.mubr.msk.f32.gmra.mrb[4].mxu0 %vm2042_vm5, %v1269_v15  ;;  %v1050_v11 = vpop.permute.xlu1 %1049  ;;  %v1048_v58 = vpop.permute.xlu0 %1047  ;;  %v1239_v12 = vsel %vm1230_vm3, %v1206_v6, %v4399_v46  ;;  %v1176_v46 = vsel %vm1164_vm1, %v1143_v30, %v5814_v41  ;;  %v1175_v3 = vsel %vm1164_vm1, %v1142_v31, %v5815_v33  ;;  %v5822_v28 = vld [vmem:[#allocation26_spill] sm:$0xff]  ;;  %v5825_v29 = vld [vmem:[#allocation37_spill] sm:$0xff] }
 0x194   : > { %v1271_v61 = vsel %vm1263_vm4, %v1238_v59, %v1050_v11  ;;  %v1270_v13 = vsel %vm1263_vm4, %v1237_v9, %v1048_v58  ;;  %v1209_v39 = vsel %vm1197_vm2, %v1176_v46, %v4267_v20  ;;  %v1208_v7 = vsel %vm1197_vm2, %v1175_v3, %v4269_v21  ;;  %v5817_v20 = vld [vmem:[#allocation32_spill] sm:$0xff]  ;;  %v5818_v21 = vld [vmem:[#allocation23_spill] sm:$0xff]  ;;  %v3086_v59 = vld [vmem:[%s3604_s19 + $0x98] sm:$0xff] }
 0x195   : > { %1788 = vrot.lane.b32.xlu1 %v3147_v51, %s3559_s30  ;;  %1662 = vrot.lane.b32.xlu0 %v3116_v55, %s3558_s23  ;;  %v1242_v38 = vsel %vm1230_vm3, %v1209_v39, %v4404_v45  ;;  %v1241_v18 = vsel %vm1230_vm3, %v1208_v7, %v4406_v53  ;;  %v1145_v15 = vsel %vm1131_vm0, %v5817_v20, %v5816_v14  ;;  %v3085_v9 = vld [vmem:[%s3604_s19 + $0x90] sm:$0xff]  ;;  %v5826_v48 = vld [vmem:[#allocation69_spill] sm:$0xff]  ;;  %v5831_v31 = vld [vmem:[#allocation70_spill] sm:$0xff] }
 0x196   : > { %3329 = vmatprep.mubr.msk.f32.mxu0 %vm2042_vm5, %v1270_v13  ;;  %v1144_v54 = vsel %vm1131_vm0, %v5819_v0, %v5818_v21  ;;  %v1178_v53 = vsel %vm1164_vm1, %v1145_v15, %v5820_v25  ;;  %v3117_v5 = vld [vmem:[%s3604_s19 + $0x91] sm:$0xff]  ;;  %v5833_v33 = vld [vmem:[#allocation86_spill] sm:$0xff]  ;;  %v5838_v15 = vld [vmem:[#allocation35_spill] sm:$0xff] }
 0x197   : > { %3330 = vmatmul.mubr.msk.f32.gmra.mrb[6].mxu0 %vm2042_vm5, %v1271_v61  ;;  %v1054_v56 = vpop.permute.xlu1 %1053  ;;  %v1052_v32 = vpop.permute.xlu0 %1051  ;;  %v1177_v4 = vsel %vm1164_vm1, %v1144_v54, %v5821_v37  ;;  %v1211_v51 = vsel %vm1197_vm2, %v1178_v53, %v4275_v22  ;;  %v5823_v22 = vld [vmem:[#allocation36_spill] sm:$0xff]  ;;  %v5830_v57 = vld [vmem:[#allocation41_spill] sm:$0xff]  ;;  %v5834_v7 = vld [vmem:[#allocation2_spill] sm:$0xff] }
 0x198   : > { %v1273_v34 = vsel %vm1263_vm4, %v1240_v27, %v1054_v56  ;;  %v1272_v2 = vsel %vm1263_vm4, %v1239_v12, %v1052_v32  ;;  %v1210_v55 = vsel %vm1197_vm2, %v1177_v4, %v4277_v19  ;;  %v1244_v11 = vsel %vm1230_vm3, %v1211_v51, %v4413_v50  ;;  %v5824_v19 = vld [vmem:[#allocation27_spill] sm:$0xff]  ;;  %v5827_v56 = vld [vmem:[#allocation30_spill] sm:$0xff]  ;;  %v5832_v41 = vld [vmem:[#allocation85_spill] sm:$0xff] }
 0x199   : > { %1408 = vrot.lane.b32.xlu1 %v3808_v43, %s3556_s21  ;;  %1314 = vrot.lane.b32.xlu0 %v3460_v10, %s3555_s20  ;;  %v1243_v58 = vsel %vm1230_vm3, %v1210_v55, %v4415_v35  ;;  %v1147_v40 = vsel %vm1131_vm0, %v5823_v22, %v5822_v28  ;;  %v1146_v61 = vsel %vm1131_vm0, %v5825_v29, %v5824_v19  ;;  %v3149_v10 = vld [vmem:[%s3604_s19 + $0x92] sm:$0xff]  ;;  %v5842_v4 = vld [vmem:[#allocation87_spill] sm:$0xff]  ;;  %v5846_v22 = vld [vmem:[#allocation38_spill] sm:$0xff] }
 0x19a   : > { %3332 = vmatprep.mubr.msk.f32.mxu0 %vm2042_vm5, %v1272_v2  ;;  %v1180_v26 = vsel %vm1164_vm1, %v1147_v40, %v5826_v48  ;;  %v1179_v35 = vsel %vm1164_vm1, %v1146_v61, %v4148_v63  ;;  %v3461_v2 = vld [vmem:[%s3604_s19 + $0x91] sm:$0xff]  ;;  %v3118_v39 = vld [vmem:[%s3604_s19 + $0x99] sm:$0xff]  ;;  %v5848_v29 = vld [vmem:[#allocation39_spill] sm:$0xff] }
 0x19b   : > { %3333 = vmatmul.mubr.msk.f32.gmra.mrb[8].mxu0 %vm2042_vm5, %v1273_v34  ;;  %v1058_v43 = vpop.permute.xlu1 %1057  ;;  %v1056_v23 = vpop.permute.xlu0 %1055  ;;  %v1213_v47 = vsel %vm1197_vm2, %v1180_v26, %v4283_v17  ;;  %v1212_v36 = vsel %vm1197_vm2, %v1179_v35, %v4285_v16  ;;  %v5828_v17 = vld [vmem:[#allocation40_spill] sm:$0xff]  ;;  %v5829_v16 = vld [vmem:[#allocation31_spill] sm:$0xff]  ;;  %v5839_v21 = vld [vmem:[#allocation45_spill] sm:$0xff] }
 0x19c   : > { %v1275_v24 = vsel %vm1263_vm4, %v1242_v38, %v1058_v43  ;;  %v1274_v45 = vsel %vm1263_vm4, %v1241_v18, %v1056_v23  ;;  %v1246_v6 = vsel %vm1230_vm3, %v1213_v47, %v4420_v49  ;;  %v1245_v63 = vsel %vm1230_vm3, %v1212_v36, %v4422_v44  ;;  %v5835_v38 = vld [vmem:[#allocation3_spill] sm:$0xff]  ;;  %v5836_v23 = vld [vmem:[#allocation34_spill] sm:$0xff]  ;;  %v5837_v14 = vld [vmem:[#allocation44_spill] sm:$0xff] }
 0x19d   : > { %1410 = vrot.lane.b32.xlu1 %v3805_v42, %s3556_s21  ;;  %1790 = vrot.lane.b32.xlu0 %v3148_v8, %s3559_s30  ;;  %v1149_v32 = vsel %vm1131_vm0, %v5828_v17, %v5827_v56  ;;  %v1148_v30 = vsel %vm1131_vm0, %v5830_v57, %v5829_v16  ;;  %v1151_v20 = vsel %vm1131_vm0, %v5837_v14, %v5836_v23  ;;  %v5841_v53 = vld [vmem:[#allocation72_spill] sm:$0xff]  ;;  %v5849_v61 = vld [vmem:[#allocation49_spill] sm:$0xff]  ;;  %v5851_v47 = vld [vmem:[#allocation74_spill] sm:$0xff] }
 0x19e   : > { %3335 = vmatprep.mubr.msk.f32.mxu0 %vm2042_vm5, %v1274_v45  ;;  %v1182_v44 = vsel %vm1164_vm1, %v1149_v32, %v5831_v31  ;;  %v1181_v34 = vsel %vm1164_vm1, %v1148_v30, %v4156_v1  ;;  %v1150_v0 = vsel %vm1131_vm0, %v5839_v21, %v5838_v15  ;;  %v5840_v45 = vld [vmem:[#allocation71_spill] sm:$0xff]  ;;  %v5843_v55 = vld [vmem:[#allocation88_spill] sm:$0xff]  ;;  %v5850_v26 = vld [vmem:[#allocation73_spill] sm:$0xff] }
 0x19f   : > { %3336 = vmatmul.mubr.msk.f32.gmra.mrb[10].mxu0 %vm2042_vm5, %v1275_v24  ;;  %v1062_v42 = vpop.permute.xlu1 %1061  ;;  %v1060_v60 = vpop.permute.xlu0 %1059  ;;  %v1215_v46 = vsel %vm1197_vm2, %v1182_v44, %v5832_v41  ;;  %v1214_v3 = vsel %vm1197_vm2, %v1181_v34, %v5833_v33  ;;  %v1184_v25 = vsel %vm1164_vm1, %v1151_v20, %v5840_v45  ;;  %v1183_v37 = vsel %vm1164_vm1, %v1150_v0, %v5841_v53  ;;  %v5847_v40 = vld [vmem:[#allocation48_spill] sm:$0xff]  ;;  %v3150_v17 = vld [vmem:[%s3604_s19 + $0x9a] sm:$0xff]  ;;  %v3087_v20 = vld [vmem:[%s3604_s19 + $0xa8] sm:$0xff] }
 0x1a0   : > { %v1277_v13 = vsel %vm1263_vm4, %v1244_v11, %v1062_v42  ;;  %v1276_v50 = vsel %vm1263_vm4, %v1243_v58, %v1060_v60  ;;  %v1248_v8 = vsel %vm1230_vm3, %v1215_v46, %v5834_v7  ;;  %v1247_v1 = vsel %vm1230_vm3, %v1214_v3, %v5835_v38  ;;  %v5845_v58 = vld [vmem:[#allocation17_spill] sm:$0xff]  ;;  %v5854_v32 = vld [vmem:[#allocation20_spill] sm:$0xff]  ;;  %v5856_v31 = vld [vmem:[#allocation42_spill] sm:$0xff] }
 0x1a1   : > { %1538 = vrot.lane.b32.xlu1 %v3086_v59, %s3557_s22  ;;  %1536 = vrot.lane.b32.xlu0 %v3085_v9, %s3557_s22  ;;  %v1217_v51 = vsel %vm1197_vm2, %v1184_v25, %v5842_v4  ;;  %v1216_v59 = vsel %vm1197_vm2, %v1183_v37, %v5843_v55  ;;  %v5844_v9 = vld [vmem:[#allocation16_spill] sm:$0xff]  ;;  %v1153_v19 = vsel %vm1131_vm0, %v5847_v40, %v5846_v22  ;;  %v5855_v57 = vld [vmem:[#allocation21_spill] sm:$0xff]  ;;  %v5865_v0 = vld [vmem:[#allocation102_spill] sm:$0xff] }
 0x1a2   : > { %3338 = vmatprep.mubr.msk.f32.mxu0 %vm2042_vm5, %v1276_v50  ;;  %v1250_v11 = vsel %vm1230_vm3, %v1217_v51, %v5844_v9  ;;  %v1249_v42 = vsel %vm1230_vm3, %v1216_v59, %v5845_v58  ;;  %v1186_v35 = vsel %vm1164_vm1, %v1153_v19, %v5850_v26  ;;  %v5857_v44 = vld [vmem:[#allocation52_spill] sm:$0xff]  ;;  %v5859_v41 = vld [vmem:[#allocation53_spill] sm:$0xff]  ;;  %v5866_v25 = vld [vmem:[#allocation46_spill] sm:$0xff] }
 0x1a3   : > { %3339 = vmatmul.mubr.msk.f32.gmra.mrb[12].mxu0 %vm2042_vm5, %v1277_v13  ;;  %v1066_v27 = vpop.permute.xlu1 %1065  ;;  %v1064_v12 = vpop.permute.xlu0 %1063  ;;  %v1152_v13 = vsel %vm1131_vm0, %v5849_v61, %v5848_v29  ;;  %v1155_v34 = vsel %vm1131_vm0, %v5857_v44, %v5856_v31  ;;  %v5861_v7 = vld [vmem:[#allocation76_spill] sm:$0xff]  ;;  %v3464_v38 = vld [vmem:[%s3604_s19 + $0x9a] sm:$0xff]  ;;  %v5868_v4 = vld [vmem:[#allocation47_spill] sm:$0xff] }
 0x1a4   : > { %v1279_v52 = vsel %vm1263_vm4, %v1246_v6, %v1066_v27  ;;  %v1278_v49 = vsel %vm1263_vm4, %v1245_v63, %v1064_v12  ;;  %v1185_v36 = vsel %vm1164_vm1, %v1152_v13, %v5851_v47  ;;  %v3463_v6 = vld [vmem:[%s3604_s19 + $0x99] sm:$0xff]  ;;  %v3088_v14 = vld [vmem:[%s3604_s19 + $0xb0] sm:$0xff]  ;;  %v5874_v61 = vld [vmem:[#allocation103_spill] sm:$0xff] }
 0x1a5   : > { %1316 = vrot.lane.b32.xlu1 %v3461_v2, %s3555_s20  ;;  %1664 = vrot.lane.b32.xlu0 %v3117_v5, %s3558_s23  ;;  %v3462_v5 = vld [vmem:[%s3604_s19 + $0x92] sm:$0xff]  ;;  %v5853_v12 = vld [vmem:[#allocation90_spill] sm:$0xff]  ;;  %v5858_v2 = vld [vmem:[#allocation43_spill] sm:$0xff] }
 0x1a6   : > { %3341 = vmatprep.mubr.msk.f32.mxu0 %vm2042_vm5, %v1278_v49  ;;  %v5852_v63 = vld [vmem:[#allocation89_spill] sm:$0xff]  ;;  %v1218_v56 = vsel %vm1197_vm2, %v1185_v36, %v5853_v12  ;;  %v1154_v46 = vsel %vm1131_vm0, %v5859_v41, %v5858_v2  ;;  %v5867_v53 = vld [vmem:[#allocation56_spill] sm:$0xff]  ;;  %v5873_v40 = vld [vmem:[#allocation94_spill] sm:$0xff] }
 0x1a7   : > { %3342 = vmatmul.mubr.msk.f32.gmra.mrb[14].mxu0 %vm2042_vm5, %v1279_v52  ;;  %v1070_v18 = vpop.permute.xlu1 %1069  ;;  %v1068_v43 = vpop.permute.xlu0 %1067  ;;  %v1219_v27 = vsel %vm1197_vm2, %v1186_v35, %v5852_v63  ;;  %v1251_v30 = vsel %vm1230_vm3, %v1218_v56, %v5855_v57  ;;  %v5864_v15 = vld [vmem:[#allocation101_spill] sm:$0xff]  ;;  %v1157_v37 = vsel %vm1131_vm0, %v5867_v53, %v5866_v25  ;;  %v3119_v29 = vld [vmem:[%s3604_s19 + $0xa9] sm:$0xff]  ;;  %v3089_v44 = vld [vmem:[%s3604_s19 + $0xc0] sm:$0xff] }
 0x1a8   : > { %v1281_v54 = vsel %vm1263_vm4, %v1248_v8, %v1070_v18  ;;  %v1280_v24 = vsel %vm1263_vm4, %v1247_v1, %v1068_v43  ;;  %v1252_v16 = vsel %vm1230_vm3, %v1219_v27, %v5854_v32  ;;  %v1187_v8 = vsel %vm1164_vm1, %v1154_v46, %v5861_v7  ;;  %v5862_v1 = vld [vmem:[#allocation91_spill] sm:$0xff]  ;;  %v5863_v43 = vld [vmem:[#allocation92_spill] sm:$0xff]  ;;  %v5869_v51 = vld [vmem:[#allocation57_spill] sm:$0xff] }
 0x1a9   : > { %1792 = vrot.lane.b32.xlu1 %v3149_v10, %s3559_s30  ;;  %1666 = vrot.lane.b32.xlu0 %v3118_v39, %s3558_s23  ;;  %v5860_v10 = vld [vmem:[#allocation75_spill] sm:$0xff]  ;;  %v1220_v23 = vsel %vm1197_vm2, %v1187_v8, %v5863_v43  ;;  %v1156_v55 = vsel %vm1131_vm0, %v5869_v51, %v5868_v4  ;;  %v3120_v63 = vld [vmem:[%s3604_s19 + $0xb1] sm:$0xff] }
 0x1aa   : > { %3344 = vmatprep.mubr.msk.f32.mxu0 %vm2042_vm5, %v1280_v24  ;;  %v1188_v39 = vsel %vm1164_vm1, %v1155_v34, %v5860_v10  ;;  %v3466_v32 = vld [vmem:[%s3604_s19 + $0xaa] sm:$0xff]  ;;  %v3152_v57 = vld [vmem:[%s3604_s19 + $0xb2] sm:$0xff]  ;;  %v3121_v10 = vld [vmem:[%s3604_s19 + $0xc1] sm:$0xff] }
 0x1ab   : > { %3345 = vmatmul.mubr.msk.f32.gmra.mrb[16].mxu0 %vm2042_vm5, %v1281_v54  ;;  %v1074_v60 = vpop.permute.xlu1 %1073  ;;  %v1072_v28 = vpop.permute.xlu0 %1071  ;;  %v1221_v18 = vsel %vm1197_vm2, %v1188_v39, %v5862_v1  ;;  %v1253_v54 = vsel %vm1230_vm3, %v1220_v23, %v5865_v0  ;;  %v3090_v31 = vld [vmem:[%s3604_s19 + $0xc8] sm:$0xff]  ;;  %v3469_v41 = vld [vmem:[%s3604_s19 + $0x18] sm:$0xff] }
 0x1ac   : > { %v1283_v50 = vsel %vm1263_vm4, %v1250_v11, %v1074_v60  ;;  %v1282_v48 = vsel %vm1263_vm4, %v1249_v42, %v1072_v28  ;;  %v1254_v21 = vsel %vm1230_vm3, %v1221_v18, %v5864_v15  ;;  %v5870_v11 = vld [vmem:[#allocation77_spill] sm:$0xff]  ;;  %v5871_v42 = vld [vmem:[#allocation78_spill] sm:$0xff]  ;;  %v3122_v43 = vld [vmem:[%s3604_s19 + $0xc9] sm:$0xff] }
 0x1ad   : > { %1412 = vrot.lane.b32.xlu1 %v3462_v5, %s3556_s21  ;;  %1318 = vrot.lane.b32.xlu0 %v3463_v6, %s3555_s20  ;;  %v1190_v58 = vsel %vm1164_vm1, %v1157_v37, %v5870_v11  ;;  %v1189_v60 = vsel %vm1164_vm1, %v1156_v55, %v5871_v42  ;;  %v5872_v28 = vld [vmem:[#allocation93_spill] sm:$0xff]  ;;  %v3465_v5 = vld [vmem:[%s3604_s19 + $0xa9] sm:$0xff]  ;;  %v3470_v1 = vld [vmem:[%s3604_s19 + $0xc1] sm:$0xff] }
 0x1ae   : > { %3347 = vmatprep.mubr.msk.f32.mxu0 %vm2042_vm5, %v1282_v48  ;;  %v1223_v22 = vsel %vm1197_vm2, %v1190_v58, %v5872_v28  ;;  %v1222_v19 = vsel %vm1197_vm2, %v1189_v60, %v5873_v40  ;;  %v3151_v6 = vld [vmem:[%s3604_s19 + $0xaa] sm:$0xff]  ;;  %v3153_v18 = vld [vmem:[%s3604_s19 + $0xc2] sm:$0xff]  ;;  %v3091_v11 = vld [vmem:[%s3604_s19 + $0xd8] sm:$0xff] }
 0x1af   : > { %3348 = vmatmul.mubr.msk.f32.gmra.mrb[18].mxu0 %vm2042_vm5, %v1283_v50  ;;  %v1078_v52 = vpop.permute.xlu1 %1077  ;;  %v1076_v49 = vpop.permute.xlu0 %1075  ;;  %v1256_v13 = vsel %vm1230_vm3, %v1223_v22, %v5874_v61  ;;  %v5875_v50 = vld [vmem:[#allocation104_spill] sm:$0xff]  ;;  %v3472_v53 = vld [vmem:[%s3604_s19 + $0xc2] sm:$0xff] }
 0x1b0   : > { %v1285_v33 = vsel %vm1263_vm4, %v1252_v16, %v1078_v52  ;;  %v1284_v3 = vsel %vm1263_vm4, %v1251_v30, %v1076_v49  ;;  %v1255_v48 = vsel %vm1230_vm3, %v1222_v19, %v5875_v50  ;;  %v3467_v16 = vld [vmem:[%s3604_s19 + $0xb1] sm:$0xff]  ;;  %v3473_v37 = vld [vmem:[%s3604_s19 + $0xc9] sm:$0xff]  ;;  %v3123_v19 = vld [vmem:[%s3604_s19 + $0xd9] sm:$0xff] }
 0x1b1   : > { %1414 = vrot.lane.b32.xlu1 %v3464_v38, %s3556_s21  ;;  %1794 = vrot.lane.b32.xlu0 %v3150_v17, %s3559_s30  ;;  %v3468_v49 = vld [vmem:[%s3604_s19 + $0xb2] sm:$0xff]  ;;  %v3154_v4 = vld [vmem:[%s3604_s19 + $0xca] sm:$0xff] }
 0x1b2   : > { %3350 = vmatprep.mubr.msk.f32.mxu0 %vm2042_vm5, %v1284_v3  ;;  %v3475_v60 = vld [vmem:[%s3604_s19 + $0x30] sm:$0xff] }
 0x1b3   : > { %3351 = vmatmul.mubr.msk.f32.gmra.mrb[20].mxu0 %vm2042_vm5, %v1285_v33  ;;  %v1082_v24 = vpop.permute.xlu1 %1081  ;;  %v1080_v45 = vpop.permute.xlu0 %1079 }
 0x1b4   : > { %v1287_v59 = vsel %vm1263_vm4, %v1254_v21, %v1082_v24  ;;  %v1286_v9 = vsel %vm1263_vm4, %v1253_v54, %v1080_v45 }
 0x1b5   : > { %1542 = vrot.lane.b32.xlu1 %v3088_v14, %s3557_s22  ;;  %1540 = vrot.lane.b32.xlu0 %v3087_v20, %s3557_s22  ;;  %v3471_v20 = vld [vmem:[%s3604_s19 + $0x20] sm:$0xff] }
 0x1b6   : > { %3353 = vmatprep.mubr.msk.f32.mxu0 %vm2042_vm5, %v1286_v9  ;;  %v3092_v9 = vld [vmem:[%s3604_s19 + $0xe0] sm:$0xff] }
 0x1b7   : > { %3354 = vmatmul.mubr.msk.f32.gmra.mrb[22].mxu0 %vm2042_vm5, %v1287_v59  ;;  %v1086_v26 = vpop.permute.xlu1 %1085  ;;  %v1084_v35 = vpop.permute.xlu0 %1083  ;;  %v3474_v59 = vld [vmem:[%s3604_s19 + $0xca] sm:$0xff] }
 0x1b8   : > { %v1289_v47 = vsel %vm1263_vm4, %v1256_v13, %v1086_v26  ;;  %v1288_v36 = vsel %vm1263_vm4, %v1255_v48, %v1084_v35  ;;  %v3476_v48 = vld [vmem:[%s3604_s19 + $0xd9] sm:$0xff]  ;;  %v3124_v35 = vld [vmem:[%s3604_s19 + $0xe1] sm:$0xff] }
 0x1b9   : > { %1320 = vrot.lane.b32.xlu1 %v3465_v5, %s3555_s20  ;;  %1668 = vrot.lane.b32.xlu0 %v3119_v29, %s3558_s23  ;;  %v3155_v26 = vld [vmem:[%s3604_s19 + $0xda] sm:$0xff] }
 0x1ba   : > { %3356 = vmatprep.mubr.msk.f32.mxu0 %vm2042_vm5, %v1288_v36  ;;  %v3477_v5 = vld [vmem:[%s3604_s19 + $0x38] sm:$0xff] }
 0x1bb   : > { %3357 = vmatmul.mubr.msk.f32.gmra.mrb[24].mxu0 %vm2042_vm5, %v1289_v47  ;;  %v1299_v27 = vpop.permute.xlu1 %1298  ;;  %v1297_v12 = vpop.permute.xlu0 %1296 }
 0x1bc   : > { %v1872_v46 = vsel %vm1131_vm0, %v3469_v41, %v1297_v12  ;;  %v1873_v15 = vsel %vm1131_vm0, %v3471_v20, %v1299_v27 }
 0x1bd   : > { %1796 = vrot.lane.b32.xlu1 %v3151_v6, %s3559_s30  ;;  %1670 = vrot.lane.b32.xlu0 %v3120_v63, %s3558_s23 }
 0x1bf   : > { %v1395_v56 = vpop.permute.xlu1 %1394  ;;  %v1393_v17 = vpop.permute.xlu0 %1392 }
 0x1c0   : > { %v1904_v33 = vsel %vm1164_vm1, %v1872_v46, %v1393_v17  ;;  %v1905_v21 = vsel %vm1164_vm1, %v1873_v15, %v1395_v56  ;;  %v3481_v46 = vld [vmem:[%s3604_s19 + $0x48] sm:$0xff]  ;;  %v3483_v15 = vld [vmem:[%s3604_s19 + $0x50] sm:$0xff] }
 0x1c1   : > { %1416 = vrot.lane.b32.xlu1 %v3466_v32, %s3556_s21  ;;  %1322 = vrot.lane.b32.xlu0 %v3467_v16, %s3555_s20  ;;  %v3478_v16 = vld [vmem:[%s3604_s19 + $0xda] sm:$0xff] }
 0x1c3   : > { %v1523_v30 = vpop.permute.xlu1 %1522  ;;  %v1521_v52 = vpop.permute.xlu0 %1520 }
 0x1c4   : > { %v1936_v3 = vsel %vm1197_vm2, %v1904_v33, %v1521_v52  ;;  %v1937_v0 = vsel %vm1197_vm2, %v1905_v21, %v1523_v30  ;;  %v3156_v30 = vld [vmem:[%s3604_s19 + $0xe2] sm:$0xff] }
 0x1c5   : > { %1418 = vrot.lane.b32.xlu1 %v3468_v49, %s3556_s21  ;;  %1798 = vrot.lane.b32.xlu0 %v3152_v57, %s3559_s30  ;;  %v3479_v57 = vld [vmem:[%s3604_s19 + $0xe1] sm:$0xff] }
 0x1c7   : > { %v1301_v34 = vpop.permute.xlu1 %1300  ;;  %v1649_v2 = vpop.permute.xlu0 %1648 }
 0x1c8   : > { %v1968_v39 = vsel %vm1230_vm3, %v1936_v3, %v1649_v2  ;;  %v1874_v28 = vsel %vm1131_vm0, %v3475_v60, %v1301_v34  ;;  %v3093_v34 = vld [vmem:[%s3604_s19 + $0xf0] sm:$0xff] }
 0x1c9   : > { %1546 = vrot.lane.b32.xlu1 %v3090_v31, %s3557_s22  ;;  %1544 = vrot.lane.b32.xlu0 %v3089_v44, %s3557_s22  ;;  %v3480_v31 = vld [vmem:[%s3604_s19 + $0xe2] sm:$0xff]  ;;  %v3094_v44 = vld [vmem:[%s3604_s19 + $0xf8] sm:$0xff] }
 0x1cb   : > { %v1777_v7 = vpop.permute.xlu1 %1776  ;;  %v1651_v8 = vpop.permute.xlu0 %1650 }
 0x1cc   : > { %v2000_v38 = vsel %vm1263_vm4, %v1968_v39, %v1777_v7  ;;  %v1969_v54 = vsel %vm1230_vm3, %v1937_v0, %v1651_v8  ;;  %v3125_v39 = vld [vmem:[%s3604_s19 + $0xf1] sm:$0xff] }
 0x1cd   : > { %1324 = vrot.lane.b32.xlu1 %v3470_v1, %s3555_s20  ;;  %1672 = vrot.lane.b32.xlu0 %v3121_v10, %s3558_s23 }
 0x1ce   : > { %3374 = vmatprep.mubr.msk.f32.mxu1 %vm2042_vm5, %v2000_v38 }
 0x1cf   : > { %v1397_v23 = vpop.permute.xlu1 %1396  ;;  %v1303_v14 = vpop.permute.xlu0 %1302 }
 0x1d0   : > { %v1906_v22 = vsel %vm1164_vm1, %v1874_v28, %v1397_v23  ;;  %v1875_v6 = vsel %vm1131_vm0, %v3477_v5, %v1303_v14  ;;  %v3126_v23 = vld [vmem:[%s3604_s19 + $0xf9] sm:$0xff] }
 0x1d1   : > { %1800 = vrot.lane.b32.xlu1 %v3153_v18, %s3559_s30  ;;  %1674 = vrot.lane.b32.xlu0 %v3122_v43, %s3558_s23  ;;  %v3482_v18 = vld [vmem:[%s3604_s19 + $0xf1] sm:$0xff]  ;;  %v3487_v28 = vld [vmem:[%s3604_s19 + $0x60] sm:$0xff] }
 0x1d2   : > { %v3157_v43 = vld [vmem:[%s3604_s19 + $0xf2] sm:$0xff] }
 0x1d3   : > { %v1399_v24 = vpop.permute.xlu1 %1398  ;;  %v1779_v45 = vpop.permute.xlu0 %1778 }
 0x1d4   : > { %v2001_v25 = vsel %vm1263_vm4, %v1969_v54, %v1779_v45  ;;  %v1907_v63 = vsel %vm1164_vm1, %v1875_v6, %v1399_v24  ;;  %v3489_v6 = vld [vmem:[%s3604_s19 + $0x68] sm:$0xff] }
 0x1d5   : > { %1420 = vrot.lane.b32.xlu1 %v3472_v53, %s3556_s21  ;;  %1326 = vrot.lane.b32.xlu0 %v3473_v37, %s3555_s20  ;;  %v3484_v37 = vld [vmem:[%s3604_s19 + $0xf2] sm:$0xff] }
 0x1d6   : > { %3375 = vmatmul.mubr.msk.f32.vlgmr.msra.gmra.mrb[0].mxu1 %vm2042_vm5, %v2001_v25 }
 0x1d7   : > { %v1527_v51 = vpop.permute.xlu1 %1526  ;;  %v1525_v55 = vpop.permute.xlu0 %1524 }
 0x1d8   : > { %v1938_v40 = vsel %vm1197_vm2, %v1906_v22, %v1525_v55  ;;  %v1939_v27 = vsel %vm1197_vm2, %v1907_v63, %v1527_v51  ;;  %v3158_v51 = vld [vmem:[%s3604_s19 + $0xfa] sm:$0xff] }
 0x1d9   : > { %1422 = vrot.lane.b32.xlu1 %v3474_v59, %s3556_s21  ;;  %1802 = vrot.lane.b32.xlu0 %v3154_v4, %s3559_s30  ;;  %v3485_v4 = vld [vmem:[%s3604_s19 + $0xf9] sm:$0xff] }
 0x1db   : > { %v1305_v58 = vpop.permute.xlu1 %1304  ;;  %v1653_v42 = vpop.permute.xlu0 %1652 }
 0x1dc   : > { %v1970_v29 = vsel %vm1230_vm3, %v1938_v40, %v1653_v42  ;;  %v1876_v33 = vsel %vm1131_vm0, %v3481_v46, %v1305_v58  ;;  %v3095_v58 = vld [vmem:[%s3604_s19 + $0x108] sm:$0xff] }
 0x1dd   : > { %1550 = vrot.lane.b32.xlu1 %v3092_v9, %s3557_s22  ;;  %1548 = vrot.lane.b32.xlu0 %v3091_v11, %s3557_s22  ;;  %v3486_v9 = vld [vmem:[%s3604_s19 + $0xfa] sm:$0xff]  ;;  %v3096_v11 = vld [vmem:[%s3604_s19 + $0x110] sm:$0xff] }
 0x1df   : > { %v1781_v61 = vpop.permute.xlu1 %1780  ;;  %v1655_v13 = vpop.permute.xlu0 %1654 }
 0x1e0   : > { %v2002_v50 = vsel %vm1263_vm4, %v1970_v29, %v1781_v61  ;;  %v1971_v12 = vsel %vm1230_vm3, %v1939_v27, %v1655_v13  ;;  %v3127_v29 = vld [vmem:[%s3604_s19 + $0x109] sm:$0xff] }
 0x1e1   : > { %1328 = vrot.lane.b32.xlu1 %v3476_v48, %s3555_s20  ;;  %1676 = vrot.lane.b32.xlu0 %v3123_v19, %s3558_s23 }
 0x1e2   : > { %3377 = vmatprep.mubr.msk.f32.mxu1 %vm2042_vm5, %v2002_v50 }
 0x1e3   : > { %v1401_v47 = vpop.permute.xlu1 %1400  ;;  %v1307_v36 = vpop.permute.xlu0 %1306 }
 0x1e4   : > { %v1908_v3 = vsel %vm1164_vm1, %v1876_v33, %v1401_v47  ;;  %v1877_v21 = vsel %vm1131_vm0, %v3483_v15, %v1307_v36  ;;  %v3128_v47 = vld [vmem:[%s3604_s19 + $0x111] sm:$0xff] }
 0x1e5   : > { %1804 = vrot.lane.b32.xlu1 %v3155_v26, %s3559_s30  ;;  %1678 = vrot.lane.b32.xlu0 %v3124_v35, %s3558_s23  ;;  %v3488_v26 = vld [vmem:[%s3604_s19 + $0x109] sm:$0xff]  ;;  %v3493_v33 = vld [vmem:[%s3604_s19 + $0x78] sm:$0xff] }
 0x1e6   : > { %v3159_v35 = vld [vmem:[%s3604_s19 + $0x10a] sm:$0xff] }
 0x1e7   : > { %v1403_v56 = vpop.permute.xlu1 %1402  ;;  %v1783_v17 = vpop.permute.xlu0 %1782 }
 0x1e8   : > { %v2003_v32 = vsel %vm1263_vm4, %v1971_v12, %v1783_v17  ;;  %v1909_v0 = vsel %vm1164_vm1, %v1877_v21, %v1403_v56  ;;  %v3495_v21 = vld [vmem:[%s3604_s19 + $0x80] sm:$0xff] }
 0x1e9   : > { %1424 = vrot.lane.b32.xlu1 %v3478_v16, %s3556_s21  ;;  %1330 = vrot.lane.b32.xlu0 %v3479_v57, %s3555_s20  ;;  %v3490_v57 = vld [vmem:[%s3604_s19 + $0x10a] sm:$0xff] }
 0x1ea   : > { %3378 = vmatmul.mubr.msk.f32.gmra.mrb[2].mxu1 %vm2042_vm5, %v2003_v32 }
 0x1eb   : > { %v1531_v52 = vpop.permute.xlu1 %1530  ;;  %v1529_v49 = vpop.permute.xlu0 %1528 }
 0x1ec   : > { %v1940_v10 = vsel %vm1197_vm2, %v1908_v3, %v1529_v49  ;;  %v1941_v54 = vsel %vm1197_vm2, %v1909_v0, %v1531_v52  ;;  %v3160_v52 = vld [vmem:[%s3604_s19 + $0x112] sm:$0xff] }
 0x1ed   : > { %1426 = vrot.lane.b32.xlu1 %v3480_v31, %s3556_s21  ;;  %1806 = vrot.lane.b32.xlu0 %v3156_v30, %s3559_s30  ;;  %v3491_v30 = vld [vmem:[%s3604_s19 + $0x111] sm:$0xff] }
 0x1ef   : > { %v1309_v2 = vpop.permute.xlu1 %1308  ;;  %v1657_v41 = vpop.permute.xlu0 %1656 }
 0x1f0   : > { %v1972_v7 = vsel %vm1230_vm3, %v1940_v10, %v1657_v41  ;;  %v1878_v22 = vsel %vm1131_vm0, %v3487_v28, %v1309_v2  ;;  %v3097_v2 = vld [vmem:[%s3604_s19 + $0x120] sm:$0xff] }
 0x1f1   : > { %1554 = vrot.lane.b32.xlu1 %v3094_v44, %s3557_s22  ;;  %1552 = vrot.lane.b32.xlu0 %v3093_v34, %s3557_s22  ;;  %v3492_v44 = vld [vmem:[%s3604_s19 + $0x112] sm:$0xff]  ;;  %v3098_v34 = vld [vmem:[%s3604_s19 + $0x128] sm:$0xff] }
 0x1f3   : > { %v1785_v8 = vpop.permute.xlu1 %1784  ;;  %v1659_v38 = vpop.permute.xlu0 %1658 }
 0x1f4   : > { %v2004_v1 = vsel %vm1263_vm4, %v1972_v7, %v1785_v8  ;;  %v1973_v24 = vsel %vm1230_vm3, %v1941_v54, %v1659_v38  ;;  %v3129_v7 = vld [vmem:[%s3604_s19 + $0x121] sm:$0xff] }
 0x1f5   : > { %1332 = vrot.lane.b32.xlu1 %v3482_v18, %s3555_s20  ;;  %1680 = vrot.lane.b32.xlu0 %v3125_v39, %s3558_s23 }
 0x1f6   : > { %3380 = vmatprep.mubr.msk.f32.mxu1 %vm2042_vm5, %v2004_v1 }
 0x1f7   : > { %v1405_v14 = vpop.permute.xlu1 %1404  ;;  %v1311_v20 = vpop.permute.xlu0 %1310 }
 0x1f8   : > { %v1910_v40 = vsel %vm1164_vm1, %v1878_v22, %v1405_v14  ;;  %v1879_v63 = vsel %vm1131_vm0, %v3489_v6, %v1311_v20  ;;  %v3130_v14 = vld [vmem:[%s3604_s19 + $0x129] sm:$0xff] }
 0x1f9   : > { %1808 = vrot.lane.b32.xlu1 %v3157_v43, %s3559_s30  ;;  %1682 = vrot.lane.b32.xlu0 %v3126_v23, %s3558_s23  ;;  %v3494_v43 = vld [vmem:[%s3604_s19 + $0x121] sm:$0xff]  ;;  %v3499_v22 = vld [vmem:[%s3604_s19 + $0x90] sm:$0xff] }
 0x1fa   : > { %v3161_v23 = vld [vmem:[%s3604_s19 + $0x122] sm:$0xff] }
 0x1fb   : > { %v1407_v45 = vpop.permute.xlu1 %1406  ;;  %v1787_v25 = vpop.permute.xlu0 %1786 }
 0x1fc   : > { %v2005_v53 = vsel %vm1263_vm4, %v1973_v24, %v1787_v25  ;;  %v1911_v27 = vsel %vm1164_vm1, %v1879_v63, %v1407_v45  ;;  %v3501_v63 = vld [vmem:[%s3604_s19 + $0x98] sm:$0xff] }
 0x1fd   : > { %1428 = vrot.lane.b32.xlu1 %v3484_v37, %s3556_s21  ;;  %1334 = vrot.lane.b32.xlu0 %v3485_v4, %s3555_s20  ;;  %v3496_v4 = vld [vmem:[%s3604_s19 + $0x122] sm:$0xff] }
 0x1fe   : > { %3381 = vmatmul.mubr.msk.f32.gmra.mrb[4].mxu1 %vm2042_vm5, %v2005_v53 }
 0x1ff   : > { %v1535_v55 = vpop.permute.xlu1 %1534  ;;  %v1533_v59 = vpop.permute.xlu0 %1532 }
 0x200   : > { %v1942_v19 = vsel %vm1197_vm2, %v1910_v40, %v1533_v59  ;;  %v1943_v12 = vsel %vm1197_vm2, %v1911_v27, %v1535_v55  ;;  %v3162_v55 = vld [vmem:[%s3604_s19 + $0x12a] sm:$0xff] }
 0x201   : > { %1430 = vrot.lane.b32.xlu1 %v3486_v9, %s3556_s21  ;;  %1810 = vrot.lane.b32.xlu0 %v3158_v51, %s3559_s30  ;;  %v3497_v51 = vld [vmem:[%s3604_s19 + $0x129] sm:$0xff] }
 0x203   : > { %v1313_v42 = vpop.permute.xlu1 %1312  ;;  %v1661_v60 = vpop.permute.xlu0 %1660 }
 0x204   : > { %v1974_v61 = vsel %vm1230_vm3, %v1942_v19, %v1661_v60  ;;  %v1880_v3 = vsel %vm1131_vm0, %v3493_v33, %v1313_v42  ;;  %v3099_v42 = vld [vmem:[%s3604_s19 + $0x138] sm:$0xff] }
 0x205   : > { %1558 = vrot.lane.b32.xlu1 %v3096_v11, %s3557_s22  ;;  %1556 = vrot.lane.b32.xlu0 %v3095_v58, %s3557_s22  ;;  %v3498_v11 = vld [vmem:[%s3604_s19 + $0x12a] sm:$0xff]  ;;  %v3100_v58 = vld [vmem:[%s3604_s19 + $0x140] sm:$0xff] }
 0x207   : > { %v1789_v13 = vpop.permute.xlu1 %1788  ;;  %v1663_v50 = vpop.permute.xlu0 %1662 }
 0x208   : > { %v2006_v48 = vsel %vm1263_vm4, %v1974_v61, %v1789_v13  ;;  %v1975_v56 = vsel %vm1230_vm3, %v1943_v12, %v1663_v50  ;;  %v3131_v61 = vld [vmem:[%s3604_s19 + $0x139] sm:$0xff] }
 0x209   : > { %1336 = vrot.lane.b32.xlu1 %v3488_v26, %s3555_s20  ;;  %1684 = vrot.lane.b32.xlu0 %v3127_v29, %s3558_s23 }
 0x20a   : > { %3383 = vmatprep.mubr.msk.f32.mxu1 %vm2042_vm5, %v2006_v48 }
 0x20b   : > { %v1409_v36 = vpop.permute.xlu1 %1408  ;;  %v1315_v5 = vpop.permute.xlu0 %1314 }
 0x20c   : > { %v1912_v10 = vsel %vm1164_vm1, %v1880_v3, %v1409_v36  ;;  %v1881_v0 = vsel %vm1131_vm0, %v3495_v21, %v1315_v5  ;;  %v3132_v36 = vld [vmem:[%s3604_s19 + $0x141] sm:$0xff] }
 0x20d   : > { %1812 = vrot.lane.b32.xlu1 %v3159_v35, %s3559_s30  ;;  %1686 = vrot.lane.b32.xlu0 %v3128_v47, %s3558_s23  ;;  %v3500_v35 = vld [vmem:[%s3604_s19 + $0x139] sm:$0xff]  ;;  %v3505_v3 = vld [vmem:[%s3604_s19 + $0xa8] sm:$0xff] }
 0x20e   : > { %v3163_v47 = vld [vmem:[%s3604_s19 + $0x13a] sm:$0xff] }
 0x20f   : > { %v1411_v17 = vpop.permute.xlu1 %1410  ;;  %v1791_v32 = vpop.permute.xlu0 %1790 }
 0x210   : > { %v2007_v16 = vsel %vm1263_vm4, %v1975_v56, %v1791_v32  ;;  %v1913_v54 = vsel %vm1164_vm1, %v1881_v0, %v1411_v17  ;;  %v3507_v0 = vld [vmem:[%s3604_s19 + $0xb0] sm:$0xff] }
 0x211   : > { %1432 = vrot.lane.b32.xlu1 %v3490_v57, %s3556_s21  ;;  %1338 = vrot.lane.b32.xlu0 %v3491_v30, %s3555_s20  ;;  %v3502_v30 = vld [vmem:[%s3604_s19 + $0x13a] sm:$0xff] }
 0x212   : > { %3384 = vmatmul.mubr.msk.f32.gmra.mrb[6].mxu1 %vm2042_vm5, %v2007_v16 }
 0x213   : > { %v1539_v49 = vpop.permute.xlu1 %1538  ;;  %v1537_v31 = vpop.permute.xlu0 %1536 }
 0x214   : > { %v1944_v39 = vsel %vm1197_vm2, %v1912_v10, %v1537_v31  ;;  %v1945_v24 = vsel %vm1197_vm2, %v1913_v54, %v1539_v49  ;;  %v3164_v49 = vld [vmem:[%s3604_s19 + $0x142] sm:$0xff] }
 0x215   : > { %1434 = vrot.lane.b32.xlu1 %v3492_v44, %s3556_s21  ;;  %1814 = vrot.lane.b32.xlu0 %v3160_v52, %s3559_s30  ;;  %v3503_v52 = vld [vmem:[%s3604_s19 + $0x141] sm:$0xff] }
 0x217   : > { %v1317_v41 = vpop.permute.xlu1 %1316  ;;  %v1665_v46 = vpop.permute.xlu0 %1664 }
 0x218   : > { %v1976_v8 = vsel %vm1230_vm3, %v1944_v39, %v1665_v46  ;;  %v1882_v40 = vsel %vm1131_vm0, %v3499_v22, %v1317_v41  ;;  %v3101_v41 = vld [vmem:[%s3604_s19 + $0x150] sm:$0xff] }
 0x219   : > { %1562 = vrot.lane.b32.xlu1 %v3098_v34, %s3557_s22  ;;  %1560 = vrot.lane.b32.xlu0 %v3097_v2, %s3557_s22  ;;  %v3504_v34 = vld [vmem:[%s3604_s19 + $0x142] sm:$0xff]  ;;  %v3102_v2 = vld [vmem:[%s3604_s19 + $0x158] sm:$0xff] }
 0x21b   : > { %v1793_v38 = vpop.permute.xlu1 %1792  ;;  %v1667_v1 = vpop.permute.xlu0 %1666 }
 0x21c   : > { %v2008_v18 = vsel %vm1263_vm4, %v1976_v8, %v1793_v38  ;;  %v1977_v45 = vsel %vm1230_vm3, %v1945_v24, %v1667_v1  ;;  %v3133_v8 = vld [vmem:[%s3604_s19 + $0x151] sm:$0xff] }
 0x21d   : > { %1340 = vrot.lane.b32.xlu1 %v3494_v43, %s3555_s20  ;;  %1688 = vrot.lane.b32.xlu0 %v3129_v7, %s3558_s23 }
 0x21e   : > { %3386 = vmatprep.mubr.msk.f32.mxu1 %vm2042_vm5, %v2008_v18 }
 0x21f   : > { %v1413_v20 = vpop.permute.xlu1 %1412  ;;  %v1319_v15 = vpop.permute.xlu0 %1318 }
 0x220   : > { %v1914_v19 = vsel %vm1164_vm1, %v1882_v40, %v1413_v20  ;;  %v1883_v27 = vsel %vm1131_vm0, %v3501_v63, %v1319_v15  ;;  %v3134_v20 = vld [vmem:[%s3604_s19 + $0x159] sm:$0xff]  ;;  %v3511_v63 = vld [vmem:[%s3604_s19 + $0xc8] sm:$0xff] }
 0x221   : > { %1816 = vrot.lane.b32.xlu1 %v3161_v23, %s3559_s30  ;;  %1690 = vrot.lane.b32.xlu0 %v3130_v14, %s3558_s23  ;;  %v3506_v23 = vld [vmem:[%s3604_s19 + $0x151] sm:$0xff] }
 0x222   : > { %v5062_v14 = vld [vmem:[%s3604_s19 + $0x152] sm:$0xff] }
 0x223   : > { %v1415_v25 = vpop.permute.xlu1 %1414  ;;  %v1795_v53 = vpop.permute.xlu0 %1794 }
 0x224   : > { %v2009_v37 = vsel %vm1263_vm4, %v1977_v45, %v1795_v53  ;;  %v1915_v12 = vsel %vm1164_vm1, %v1883_v27, %v1415_v25 }
 0x225   : > { %1436 = vrot.lane.b32.xlu1 %v3496_v4, %s3556_s21  ;;  %1342 = vrot.lane.b32.xlu0 %v3497_v51, %s3555_s20  ;;  %v3508_v51 = vld [vmem:[%s3604_s19 + $0x159] sm:$0xff] }
 0x226   : > { %3387 = vmatmul.mubr.msk.f32.gmra.mrb[8].mxu1 %vm2042_vm5, %v2009_v37 }
 0x227   : > { %v1543_v59 = vpop.permute.xlu1 %1542  ;;  %v1541_v9 = vpop.permute.xlu0 %1540 }
 0x228   : > { %v1946_v29 = vsel %vm1197_vm2, %v1914_v19, %v1541_v9  ;;  %v1947_v56 = vsel %vm1197_vm2, %v1915_v12, %v1543_v59 }
 0x229   : > { %1438 = vrot.lane.b32.xlu1 %v3498_v11, %s3556_s21  ;;  %1818 = vrot.lane.b32.xlu0 %v3162_v55, %s3559_s30  ;;  %v5080_v55 = vld [vmem:[%s3604_s19 + $0x15a] sm:$0xff]  ;;  %v3104_v11 = vld [vmem:[%s3604_s19 + $0x170] sm:$0xff] }
 0x22b   : > { %v1321_v60 = vpop.permute.xlu1 %1320  ;;  %v1669_v28 = vpop.permute.xlu0 %1668 }
 0x22c   : > { %v1978_v13 = vsel %vm1230_vm3, %v1946_v29, %v1669_v28  ;;  %v1884_v10 = vsel %vm1131_vm0, %v3505_v3, %v1321_v60  ;;  %v3509_v28 = vld [vmem:[%s3604_s19 + $0xc0] sm:$0xff]  ;;  %v3135_v29 = vld [vmem:[%s3604_s19 + $0x169] sm:$0xff] }
 0x22d   : > { %1566 = vrot.lane.b32.xlu1 %v3100_v58, %s3557_s22  ;;  %1564 = vrot.lane.b32.xlu0 %v3099_v42, %s3557_s22  ;;  %v3103_v58 = vld [vmem:[%s3604_s19 + $0x168] sm:$0xff] }
 0x22f   : > { %v1797_v50 = vpop.permute.xlu1 %1796  ;;  %v1671_v48 = vpop.permute.xlu0 %1670 }
 0x230   : > { %v2010_v26 = vsel %vm1263_vm4, %v1978_v13, %v1797_v50  ;;  %v1979_v17 = vsel %vm1230_vm3, %v1947_v56, %v1671_v48 }
 0x231   : > { %1344 = vrot.lane.b32.xlu1 %v3500_v35, %s3555_s20  ;;  %1692 = vrot.lane.b32.xlu0 %v3131_v61, %s3558_s23  ;;  %v5104_v35 = vld [vmem:[%s3604_s19 + $0x16a] sm:$0xff] }
 0x232   : > { %3389 = vmatprep.mubr.msk.f32.mxu1 %vm2042_vm5, %v2010_v26  ;;  %v3510_v26 = vld [vmem:[%s3604_s19 + $0x169] sm:$0xff] }
 0x233   : > { %v1417_v5 = vpop.permute.xlu1 %1416  ;;  %v1323_v6 = vpop.permute.xlu0 %1322 }
 0x234   : > { %v1916_v39 = vsel %vm1164_vm1, %v1884_v10, %v1417_v5  ;;  %v1885_v54 = vsel %vm1131_vm0, %v3507_v0, %v1323_v6  ;;  %v5113_v6 = vld [vmem:[%s5635_s2] ss:$0 sm:$0xff] }
 0x235   : > { %1820 = vrot.lane.b32.xlu1 %v3163_v47, %s3559_s30  ;;  %1694 = vrot.lane.b32.xlu0 %v3132_v36, %s3558_s23  ;;  %v3136_v47 = vld [vmem:[%s3604_s19 + $0x171] sm:$0xff] }
 0x237   : > { %v1419_v32 = vpop.permute.xlu1 %1418  ;;  %v1799_v16 = vpop.permute.xlu0 %1798 }
 0x238   : > { %v2011_v57 = vsel %vm1263_vm4, %v1979_v17, %v1799_v16  ;;  %v1917_v24 = vsel %vm1164_vm1, %v1885_v54, %v1419_v32 }
 0x239   : > { %1440 = vrot.lane.b32.xlu1 %v3502_v30, %s3556_s21  ;;  %1346 = vrot.lane.b32.xlu0 %v3503_v52, %s3555_s20 }
 0x23a   : > { %3390 = vmatmul.mubr.msk.f32.gmra.mrb[10].mxu1 %vm2042_vm5, %v2011_v57 }
 0x23b   : > { %v1547_v31 = vpop.permute.xlu1 %1546  ;;  %v1545_v44 = vpop.permute.xlu0 %1544 }
 0x23c   : > { %v1948_v7 = vsel %vm1197_vm2, %v1916_v39, %v1545_v44  ;;  %v1949_v45 = vsel %vm1197_vm2, %v1917_v24, %v1547_v31  ;;  %v3512_v44 = vld [vmem:[%s3604_s19 + $0x171] sm:$0xff]  ;;  %v3137_v24 = vld [vmem:[%s3604_s19 + $0x181] sm:$0xff] }
 0x23d   : > { %1442 = vrot.lane.b32.xlu1 %v3504_v34, %s3556_s21  ;;  %1822 = vrot.lane.b32.xlu0 %v3164_v49, %s3559_s30 }
 0x23f   : > { %v1325_v46 = vpop.permute.xlu1 %1324  ;;  %v1673_v33 = vpop.permute.xlu0 %1672 }
 0x240   : > { %v1980_v38 = vsel %vm1230_vm3, %v1948_v7, %v1673_v33  ;;  %v1886_v22 = vsel %vm1131_vm0, %v3509_v28, %v1325_v46  ;;  %v3106_v7 = vld [vmem:[%s3604_s19 + $0x188] sm:$0xff] }
 0x241   : > { %1570 = vrot.lane.b32.xlu1 %v3102_v2, %s3557_s22  ;;  %1568 = vrot.lane.b32.xlu0 %v3101_v41, %s3557_s22  ;;  %v5143_v2 = vld [vmem:[%s3604_s19 + $0x172] sm:$0xff] }
 0x243   : > { %v1801_v1 = vpop.permute.xlu1 %1800  ;;  %v1675_v18 = vpop.permute.xlu0 %1674 }
 0x244   : > { %v2012_v43 = vsel %vm1263_vm4, %v1980_v38, %v1801_v1  ;;  %v1981_v25 = vsel %vm1230_vm3, %v1949_v45, %v1675_v18 }
 0x245   : > { %1348 = vrot.lane.b32.xlu1 %v3506_v23, %s3555_s20  ;;  %1696 = vrot.lane.b32.xlu0 %v3133_v8, %s3558_s23  ;;  %v3105_v8 = vld [vmem:[%s3604_s19 + $0x180] sm:$0xff] }
 0x246   : > { %3392 = vmatprep.mubr.msk.f32.mxu1 %vm2042_vm5, %v2012_v43  ;;  %v3513_v43 = vld [vmem:[%s3604_s19 + $0xd8] sm:$0xff] }
 0x247   : > { %v1421_v15 = vpop.permute.xlu1 %1420  ;;  %v1327_v21 = vpop.permute.xlu0 %1326 }
 0x248   : > { %v1918_v40 = vsel %vm1164_vm1, %v1886_v22, %v1421_v15  ;;  %v1887_v27 = vsel %vm1131_vm0, %v3511_v63, %v1327_v21 }
 0x249   : > { %1824 = vrot.lane.b32.xlu1 %v5062_v14, %s3559_s30  ;;  %1698 = vrot.lane.b32.xlu0 %v3134_v20, %s3558_s23 }
 0x24b   : > { %v1423_v53 = vpop.permute.xlu1 %1422  ;;  %v1803_v37 = vpop.permute.xlu0 %1802 }
 0x24c   : > { %v2013_v4 = vsel %vm1263_vm4, %v1981_v25, %v1803_v37  ;;  %v1919_v12 = vsel %vm1164_vm1, %v1887_v27, %v1423_v53 }
 0x24d   : > { %1444 = vrot.lane.b32.xlu1 %v5062_v14, %s3556_s21  ;;  %1350 = vrot.lane.b32.xlu0 %v3508_v51, %s3555_s20 }
 0x24e   : > { %3393 = vmatmul.mubr.msk.f32.gmra.mrb[12].mxu1 %vm2042_vm5, %v2013_v4 }
 0x24f   : > { %v1551_v59 = vpop.permute.xlu1 %1550  ;;  %v1549_v9 = vpop.permute.xlu0 %1548 }
 0x250   : > { %v1950_v19 = vsel %vm1197_vm2, %v1918_v40, %v1549_v9  ;;  %v1951_v17 = vsel %vm1197_vm2, %v1919_v12, %v1551_v59  ;;  %v3514_v9 = vld [vmem:[%s3604_s19 + $0x181] sm:$0xff] }
 0x251   : > { %1446 = vrot.lane.b32.xlu1 %v5080_v55, %s3556_s21  ;;  %1826 = vrot.lane.b32.xlu0 %v5080_v55, %s3559_s30 }
 0x253   : > { %v5088_v42 = vpop.permute.xlu1 %1328  ;;  %v1677_v60 = vpop.permute.xlu0 %1676 }
 0x254   : > { %v1982_v61 = vsel %vm1230_vm3, %v1950_v19, %v1677_v60  ;;  %v1888_v23 = vsel %vm1131_vm0, %v3513_v43, %v5088_v42  ;;  %v3138_v42 = vld [vmem:[%s3604_s19 + $0x189] sm:$0xff]  ;;  %v3139_v43 = vld [vmem:[%s3604_s19 + $0x199] sm:$0xff] }
 0x255   : > { %1574 = vrot.lane.b32.xlu1 %v3104_v11, %s3557_s22  ;;  %1572 = vrot.lane.b32.xlu0 %v3103_v58, %s3557_s22  ;;  %v5186_v58 = vld [vmem:[%s3604_s19 + $0x182] sm:$0xff] }
 0x257   : > { %v1805_v13 = vpop.permute.xlu1 %1804  ;;  %v1679_v50 = vpop.permute.xlu0 %1678 }
 0x258   : > { %v2014_v48 = vsel %vm1263_vm4, %v1982_v61, %v1805_v13  ;;  %v1983_v30 = vsel %vm1230_vm3, %v1951_v17, %v1679_v50 }
 0x259   : > { %1352 = vrot.lane.b32.xlu1 %v3510_v26, %s3555_s20  ;;  %1700 = vrot.lane.b32.xlu0 %v3135_v29, %s3558_s23  ;;  %v3515_v29 = vld [vmem:[%s3604_s19 + $0xe0] sm:$0xff] }
 0x25a   : > { %3395 = vmatprep.mubr.msk.f32.mxu1 %vm2042_vm5, %v2014_v48 }
 0x25b   : > { %v1425_v36 = vpop.permute.xlu1 %1424  ;;  %v5107_v5 = vpop.permute.xlu0 %1330 }
 0x25c   : > { %v1920_v21 = vsel %vm1164_vm1, %v1888_v23, %v1425_v36  ;;  %v1889_v61 = vsel %vm1131_vm0, %v3515_v29, %v5107_v5 }
 0x25d   : > { %1828 = vrot.lane.b32.xlu1 %v5104_v35, %s3559_s30  ;;  %1702 = vrot.lane.b32.xlu0 %v3136_v47, %s3558_s23 }
 0x25e   : > { %v3322_v56 = vpop.f32.mrb[0].mxu0 }
 0x25f   : > { %v2211_v32 = vadd.f32 %v3322_v56, %v5113_v6  ;;  %v2205_v16 = vpop.f32.mrb[1].mxu0  ;;  %v5128_v57 = vpop.permute.xlu1 %1426  ;;  %v3516_v56 = vld [vmem:[%s3604_s19 + $0x189] sm:$0xff] }
 0x260   : > { %v2206_v52 = vadd.f32 %v5113_v6, %v2205_v16  ;;  %v1807_v49 = vpop.permute.xlu0 %1806  ;;  %v1921_v13 = vsel %vm1164_vm1, %v1889_v61, %v5128_v57 }
 0x261   : > { %2690 = vst.msk [vmem:[%s5124_s12 + $0x8] sm:$0xff] %vm1164_vm1, %v2211_v32  ;;  %v2015_v31 = vsel %vm1263_vm4, %v1983_v30, %v1807_v49  ;;  %1448 = vrot.lane.b32.xlu1 %v5104_v35, %s3556_s21  ;;  %1354 = vrot.lane.b32.xlu0 %v3512_v44, %s3555_s20  ;;  %v5222_v32 = vld [vmem:[%s3604_s19 + $0x18a] sm:$0xff] }
 0x262   : > { %2689 = vst.msk [vmem:[%s5124_s12] sm:$0xff] %vm1164_vm1, %v2206_v52  ;;  %v3325_v34 = vpop.f32.mrb[2].mxu0  ;;  %3396 = vmatmul.mubr.msk.f32.gmra.mrb[14].mxu1 %vm2042_vm5, %v2015_v31  ;;  %v3108_v44 = vld [vmem:[%s3604_s19 + $0x1a0] sm:$0xff] }
 0x263   : > { %v2221_v41 = vadd.f32 %v3325_v34, %v5113_v6  ;;  %v2215_v46 = vpop.f32.mrb[3].mxu0  ;;  %v1555_v33 = vpop.permute.xlu1 %1554  ;;  %v3107_v34 = vld [vmem:[%s3604_s19 + $0x198] sm:$0xff] }
 0x264   : > { %v2216_v3 = vadd.f32 %v5113_v6, %v2215_v46  ;;  %v1553_v10 = vpop.permute.xlu0 %1552  ;;  %v1953_v48 = vsel %vm1197_vm2, %v1921_v13, %v1555_v33 }
 0x265   : > { %2692 = vst.msk [vmem:[%s5124_s12 + $0x18] sm:$0xff] %vm1164_vm1, %v2221_v41  ;;  %1450 = vrot.lane.b32.xlu1 %v5143_v2, %s3556_s21  ;;  %1830 = vrot.lane.b32.xlu0 %v5143_v2, %s3559_s30  ;;  %v1952_v0 = vsel %vm1197_vm2, %v1920_v21, %v1553_v10 }
 0x266   : > { %2691 = vst.msk [vmem:[%s5124_s12 + $0x10] sm:$0xff] %vm1164_vm1, %v2216_v3  ;;  %v3328_v39 = vpop.f32.mrb[4].mxu0  ;;  %v3517_v3 = vld [vmem:[%s3604_s19 + $0xf0] sm:$0xff] }
 0x267   : > { %v2231_v38 = vadd.f32 %v3328_v39, %v5113_v6  ;;  %v2225_v1 = vpop.f32.mrb[5].mxu0  ;;  %v5158_v18 = vpop.permute.xlu1 %1332 }
 0x268   : > { %v2226_v20 = vadd.f32 %v5113_v6, %v2225_v1  ;;  %v1681_v15 = vpop.permute.xlu0 %1680  ;;  %v1890_v10 = vsel %vm1131_vm0, %v3517_v3, %v5158_v18  ;;  %v3140_v18 = vld [vmem:[%s3604_s19 + $0x1a1] sm:$0xff] }
 0x269   : > { %2694 = vst.msk [vmem:[%s5124_s12 + $0x28] sm:$0xff] %vm1164_vm1, %v2231_v38  ;;  %1578 = vrot.lane.b32.xlu1 %v3106_v7, %s3557_s22  ;;  %1576 = vrot.lane.b32.xlu0 %v3105_v8, %s3557_s22  ;;  %v1984_v45 = vsel %vm1230_vm3, %v1952_v0, %v1681_v15 }
 0x26a   : > { %2693 = vst.msk [vmem:[%s5124_s12 + $0x20] sm:$0xff] %vm1164_vm1, %v2226_v20  ;;  %v3331_v54 = vpop.f32.mrb[6].mxu0 }
 0x26b   : > { %v2241_v25 = vadd.f32 %v3331_v54, %v5113_v6  ;;  %v2235_v53 = vpop.f32.mrb[7].mxu0  ;;  %v1809_v37 = vpop.permute.xlu1 %1808 }
 0x26c   : > { %v2236_v4 = vadd.f32 %v5113_v6, %v2235_v53  ;;  %v2016_v51 = vsel %vm1263_vm4, %v1984_v45, %v1809_v37  ;;  %v1683_v59 = vpop.permute.xlu0 %1682  ;;  %v3171_v53 = vld [vmem:[%s3604_s19 + $0x19a] sm:$0xff] }
 0x26d   : > { %2696 = vst.msk [vmem:[%s5124_s12 + $0x38] sm:$0xff] %vm1164_vm1, %v2241_v25  ;;  %1356 = vrot.lane.b32.xlu1 %v3514_v9, %s3555_s20  ;;  %1704 = vrot.lane.b32.xlu0 %v3137_v24, %s3558_s23  ;;  %v1985_v5 = vsel %vm1230_vm3, %v1953_v48, %v1683_v59  ;;  %v3172_v25 = vld [vmem:[%s3604_s19 + $0x1a2] sm:$0xff] }
 0x26e   : > { %2695 = vst.msk [vmem:[%s5124_s12 + $0x30] sm:$0xff] %vm1164_vm1, %v2236_v4  ;;  %v3334_v11 = vpop.f32.mrb[8].mxu0  ;;  %3398 = vmatprep.mubr.msk.f32.mxu1 %vm2042_vm5, %v2016_v51 }
 0x26f   : > { %v2251_v60 = vadd.f32 %v3334_v11, %v5113_v6  ;;  %v2245_v28 = vpop.f32.mrb[9].mxu0  ;;  %v1429_v22 = vpop.permute.xlu1 %1428  ;;  %v3518_v11 = vld [vmem:[%s3604_s19 + $0xf8] sm:$0xff] }
 0x270   : > { %v2246_v40 = vadd.f32 %v5113_v6, %v2245_v28  ;;  %v5191_v19 = vpop.permute.xlu0 %1334  ;;  %v1922_v8 = vsel %vm1164_vm1, %v1890_v10, %v1429_v22 }
 0x271   : > { %2698 = vst.msk [vmem:[%s5124_s12 + $0x48] sm:$0xff] %vm1164_vm1, %v2251_v60  ;;  %1832 = vrot.lane.b32.xlu1 %v5186_v58, %s3559_s30  ;;  %1706 = vrot.lane.b32.xlu0 %v3138_v42, %s3558_s23  ;;  %v1891_v42 = vsel %vm1131_vm0, %v3518_v11, %v5191_v19 }
 0x272   : > { %2697 = vst.msk [vmem:[%s5124_s12 + $0x40] sm:$0xff] %vm1164_vm1, %v2246_v40  ;;  %v3337_v50 = vpop.f32.mrb[10].mxu0 }
 0x273   : > { %v2261_v26 = vadd.f32 %v3337_v50, %v5113_v6  ;;  %v2255_v47 = vpop.f32.mrb[11].mxu0  ;;  %v5207_v36 = vpop.permute.xlu1 %1430 }
 0x274   : > { %v2256_v63 = vadd.f32 %v5113_v6, %v2255_v47  ;;  %v1811_v27 = vpop.permute.xlu0 %1810  ;;  %v1923_v60 = vsel %vm1164_vm1, %v1891_v42, %v5207_v36 }
 0x275   : > { %2700 = vst.msk [vmem:[%s5124_s12 + $0x58] sm:$0xff] %vm1164_vm1, %v2261_v26  ;;  %v2017_v12 = vsel %vm1263_vm4, %v1985_v5, %v1811_v27  ;;  %1452 = vrot.lane.b32.xlu1 %v5186_v58, %s3556_s21  ;;  %1358 = vrot.lane.b32.xlu0 %v3516_v56, %s3555_s20 }
 0x276   : > { %2699 = vst.msk [vmem:[%s5124_s12 + $0x50] sm:$0xff] %vm1164_vm1, %v2256_v63  ;;  %v3340_v17 = vpop.f32.mrb[12].mxu0  ;;  %3399 = vmatmul.mubr.msk.f32.gmra.mrb[16].mxu1 %vm2042_vm5, %v2017_v12 }
 0x277   : > { %v2271_v16 = vadd.f32 %v3340_v17, %v5113_v6  ;;  %v2265_v57 = vpop.f32.mrb[13].mxu0  ;;  %v1559_v30 = vpop.permute.xlu1 %1558  ;;  %v3519_v17 = vld [vmem:[%s3604_s19 + $0x108] sm:$0xff] }
 0x278   : > { %v2266_v52 = vadd.f32 %v5113_v6, %v2265_v57  ;;  %v1557_v49 = vpop.permute.xlu0 %1556  ;;  %v1955_v22 = vsel %vm1197_vm2, %v1923_v60, %v1559_v30 }
 0x279   : > { %2702 = vst.msk [vmem:[%s5124_s12 + $0x68] sm:$0xff] %vm1164_vm1, %v2271_v16  ;;  %1454 = vrot.lane.b32.xlu1 %v5222_v32, %s3556_s21  ;;  %1834 = vrot.lane.b32.xlu0 %v5222_v32, %s3559_s30  ;;  %v1954_v38 = vsel %vm1197_vm2, %v1922_v8, %v1557_v49 }
 0x27a   : > { %2701 = vst.msk [vmem:[%s5124_s12 + $0x60] sm:$0xff] %vm1164_vm1, %v2266_v52  ;;  %v3343_v31 = vpop.f32.mrb[14].mxu0 }
 0x27b   : > { %v2281_v41 = vadd.f32 %v3343_v31, %v5113_v6  ;;  %v2275_v46 = vpop.f32.mrb[15].mxu0  ;;  %v5237_v33 = vpop.permute.xlu1 %1336 }
 0x27c   : > { %v2276_v39 = vadd.f32 %v5113_v6, %v2275_v46  ;;  %v1685_v7 = vpop.permute.xlu0 %1684  ;;  %v1892_v16 = vsel %vm1131_vm0, %v3519_v17, %v5237_v33  ;;  %v3520_v46 = vld [vmem:[%s3604_s19 + $0x110] sm:$0xff] }
 0x27d   : > { %2704 = vst.msk [vmem:[%s5124_s12 + $0x78] sm:$0xff] %vm1164_vm1, %v2281_v41  ;;  %1582 = vrot.lane.b32.xlu1 %v3108_v44, %s3557_s22  ;;  %1580 = vrot.lane.b32.xlu0 %v3107_v34, %s3557_s22  ;;  %v1986_v23 = vsel %vm1230_vm3, %v1954_v38, %v1685_v7 }
 0x27e   : > { %2703 = vst.msk [vmem:[%s5124_s12 + $0x70] sm:$0xff] %vm1164_vm1, %v2276_v39  ;;  %v3346_v1 = vpop.f32.mrb[16].mxu0 }
 0x27f   : > { %v2291_v20 = vadd.f32 %v3346_v1, %v5113_v6  ;;  %v2285_v15 = vpop.f32.mrb[17].mxu0  ;;  %v1813_v21 = vpop.permute.xlu1 %1812 }
 0x280   : > { %v2286_v0 = vadd.f32 %v5113_v6, %v2285_v15  ;;  %v2018_v54 = vsel %vm1263_vm4, %v1986_v23, %v1813_v21  ;;  %v1687_v24 = vpop.permute.xlu0 %1686 }
 0x281   : > { %2706 = vst.msk [vmem:[%s5124_s12 + $0x88] sm:$0xff] %vm1164_vm1, %v2291_v20  ;;  %1710 = vrot.lane.b32.xlu1 %v3140_v18, %s3558_s23  ;;  %1708 = vrot.lane.b32.xlu0 %v3139_v43, %s3558_s23  ;;  %v1987_v19 = vsel %vm1230_vm3, %v1955_v22, %v1687_v24  ;;  %v3521_v18 = vld [vmem:[%s3604_s19 + $0x120] sm:$0xff] }
 0x282   : > { %2705 = vst.msk [vmem:[%s5124_s12 + $0x80] sm:$0xff] %vm1164_vm1, %v2286_v0  ;;  %v3349_v45 = vpop.f32.mrb[18].mxu0  ;;  %3401 = vmatprep.mubr.msk.f32.mxu1 %vm2042_vm5, %v2018_v54 }
 0x283   : > { %v2301_v37 = vadd.f32 %v3349_v45, %v5113_v6  ;;  %v2295_v4 = vpop.f32.mrb[19].mxu0  ;;  %v1433_v51 = vpop.permute.xlu1 %1432 }
 0x284   : > { %v2296_v59 = vadd.f32 %v5113_v6, %v2295_v4  ;;  %v1339_v9 = vpop.permute.xlu0 %1338 }
 0x285   : > { %2708 = vst.msk [vmem:[%s5124_s12 + $0x98] sm:$0xff] %vm1164_vm1, %v2301_v37  ;;  %1838 = vrot.lane.b32.xlu1 %v3172_v25, %s3559_s30  ;;  %1836 = vrot.lane.b32.xlu0 %v3171_v53, %s3559_s30 }
 0x286   : > { %2707 = vst.msk [vmem:[%s5124_s12 + $0x90] sm:$0xff] %vm1164_vm1, %v2296_v59  ;;  %v3352_v28 = vpop.f32.mrb[20].mxu0  ;;  %v3522_v59 = vld [vmem:[%s3604_s19 + $0x128] sm:$0xff] }
 0x287   : > { %v2311_v40 = vadd.f32 %v3352_v28, %v5113_v6  ;;  %v2305_v29 = vpop.f32.mrb[21].mxu0  ;;  %v1435_v61 = vpop.permute.xlu1 %1434 }
 0x288   : > { %v2306_v13 = vadd.f32 %v5113_v6, %v2305_v29  ;;  %v1815_v50 = vpop.permute.xlu0 %1814 }
 0x289   : > { %2710 = vst.msk [vmem:[%s5124_s12 + $0xa8] sm:$0xff] %vm1164_vm1, %v2311_v40  ;;  %v2019_v48 = vsel %vm1263_vm4, %v1987_v19, %v1815_v50  ;;  %1089 = vrot.lane.b32.xlu1 %v5080_v55, %s3559_s30  ;;  %1087 = vrot.lane.b32.xlu0 %v5062_v14, %s3559_s30 }
 0x28a   : > { %2709 = vst.msk [vmem:[%s5124_s12 + $0xa0] sm:$0xff] %vm1164_vm1, %v2306_v13  ;;  %v3355_v26 = vpop.f32.mrb[22].mxu0  ;;  %3402 = vmatmul.mubr.msk.f32.gmra.mrb[18].mxu1 %vm2042_vm5, %v2019_v48  ;;  %v5347_v13 = vld [vmem:[%s3604_s19 + $0x138] sm:$0xff] }
 0x28b   : > { %v2321_v47 = vadd.f32 %v3355_v26, %v5113_v6  ;;  %v2315_v36 = vpop.f32.mrb[23].mxu0  ;;  %v1563_v5 = vpop.permute.xlu1 %1562 }
 0x28c   : > { %v2316_v63 = vadd.f32 %v5113_v6, %v2315_v36  ;;  %v1561_v27 = vpop.permute.xlu0 %1560 }
 0x28d   : > { %2712 = vst.msk [vmem:[%s5124_s12 + $0xb8] sm:$0xff] %vm1164_vm1, %v2321_v47  ;;  %1093 = vrot.lane.b32.xlu1 %v5143_v2, %s3559_s30  ;;  %1091 = vrot.lane.b32.xlu0 %v5104_v35, %s3559_s30  ;;  %v1924_v2 = vsel %vm1164_vm1, %v1892_v16, %v1433_v51 }
 0x28e   : > { %2711 = vst.msk [vmem:[%s5124_s12 + $0xb0] sm:$0xff] %vm1164_vm1, %v2316_v63  ;;  %v3358_v14 = vpop.f32.mrb[24].mxu0  ;;  %v1956_v35 = vsel %vm1197_vm2, %v1924_v2, %v1561_v27 }
 0x28f   : > { %v2331_v55 = vadd.f32 %v3358_v14, %v5113_v6  ;;  %v2325_v12 = vpop.f32.mrb[25].mxu0  ;;  %v1341_v56 = vpop.permute.xlu1 %1340 }
 0x290   : > { %v2326_v57 = vadd.f32 %v5113_v6, %v2325_v12  ;;  %v1689_v30 = vpop.permute.xlu0 %1688  ;;  %v1894_v43 = vsel %vm1131_vm0, %v3521_v18, %v1341_v56 }
 0x291   : > { %2714 = vst.msk [vmem:[%s5124_s12 + $0xc8] sm:$0xff] %vm1164_vm1, %v2331_v55  ;;  %1097 = vrot.lane.b32.xlu1 %v5222_v32, %s3559_s30  ;;  %1095 = vrot.lane.b32.xlu0 %v5186_v58, %s3559_s30  ;;  %v1988_v52 = vsel %vm1230_vm3, %v1956_v35, %v1689_v30  ;;  %v1893_v32 = vsel %vm1131_vm0, %v3520_v46, %v1339_v9 }
 0x292   : > { %2713 = vst.msk [vmem:[%s5124_s12 + $0xc0] sm:$0xff] %vm1164_vm1, %v2326_v57  ;;  %v1925_v58 = vsel %vm1164_vm1, %v1893_v32, %v1435_v61  ;;  %v5360_v57 = vld [vmem:[%s3604_s19 + $0x140] sm:$0xff]  ;;  %v5371_v32 = vld [vmem:[%s3604_s19 + $0x150] sm:$0xff] }
 0x293   : > { %v1817_v49 = vpop.permute.xlu1 %1816  ;;  %v1957_v33 = vsel %vm1197_vm2, %v1925_v58, %v1563_v5 }
 0x294   : > { %v2020_v31 = vsel %vm1263_vm4, %v1988_v52, %v1817_v49  ;;  %v1691_v44 = vpop.permute.xlu0 %1690 }
 0x295   : > { %3404 = vmatprep.mubr.msk.f32.mxu1 %vm2042_vm5, %v2020_v31  ;;  %v1989_v10 = vsel %vm1230_vm3, %v1957_v33, %v1691_v44 }
 0x297   : > { %v1437_v34 = vpop.permute.xlu1 %1436 }
 0x298   : > { %v1343_v41 = vpop.permute.xlu0 %1342  ;;  %v1926_v20 = vsel %vm1164_vm1, %v1894_v43, %v1437_v34 }
 0x299   : > { %v1895_v9 = vsel %vm1131_vm0, %v3522_v59, %v1343_v41 }
 0x29b   : > { %v1439_v3 = vpop.permute.xlu1 %1438 }
 0x29c   : > { %v1819_v39 = vpop.permute.xlu0 %1818  ;;  %v1927_v11 = vsel %vm1164_vm1, %v1895_v9, %v1439_v3  ;;  %v5395_v9 = vld [vmem:[%s3604_s19 + $0x168] sm:$0xff] }
 0x29d   : > { %v2021_v7 = vsel %vm1263_vm4, %v1989_v10, %v1819_v39 }
 0x29e   : > { %3405 = vmatmul.mubr.msk.f32.gmra.mrb[20].mxu1 %vm2042_vm5, %v2021_v7 }
 0x29f   : > { %v1567_v8 = vpop.permute.xlu1 %1566 }
 0x2a0   : > { %v1565_v38 = vpop.permute.xlu0 %1564  ;;  %v1959_v42 = vsel %vm1197_vm2, %v1927_v11, %v1567_v8 }
 0x2a1   : > { %v1958_v15 = vsel %vm1197_vm2, %v1926_v20, %v1565_v38 }
 0x2a3   : > { %v1345_v1 = vpop.permute.xlu1 %1344 }
 0x2a4   : > { %v1693_v23 = vpop.permute.xlu0 %1692  ;;  %v1896_v50 = vsel %vm1131_vm0, %v5347_v13, %v1345_v1 }
 0x2a5   : > { %v1990_v21 = vsel %vm1230_vm3, %v1958_v15, %v1693_v23 }
 0x2a7   : > { %v1821_v0 = vpop.permute.xlu1 %1820 }
 0x2a8   : > { %v2022_v54 = vsel %vm1263_vm4, %v1990_v21, %v1821_v0  ;;  %v1695_v24 = vpop.permute.xlu0 %1694  ;;  %v5384_v21 = vld [vmem:[%s3604_s19 + $0x158] sm:$0xff] }
 0x2a9   : > { %v3376_v45 = vpop.f32.mrb[0].mxu1  ;;  %3407 = vmatprep.mubr.msk.f32.mxu1 %vm2042_vm5, %v2022_v54  ;;  %v1991_v28 = vsel %vm1230_vm3, %v1959_v42, %v1695_v24 }
 0x2aa   : > { %v2536_v25 = vadd.f32 %v3376_v45, %v5113_v6  ;;  %v2530_v53 = vpop.f32.mrb[1].mxu1 }
 0x2ab   : > { %v2531_v37 = vadd.f32 %v5113_v6, %v2530_v53  ;;  %v1441_v4 = vpop.permute.xlu1 %1440 }
 0x2ac   : > { %2755 = vrot.lane.b32.xlu1 %v2536_v25, %s3556_s21  ;;  %v1347_v51 = vpop.permute.xlu0 %1346  ;;  %v1928_v26 = vsel %vm1164_vm1, %v1896_v50, %v1441_v4 }
 0x2ad   : > { %2753 = vrot.lane.b32.xlu0 %v2531_v37, %s3556_s21  ;;  %v1897_v30 = vsel %vm1131_vm0, %v5360_v57, %v1347_v51 }
 0x2af   : > { %v1443_v60 = vpop.permute.xlu1 %1442 }
 0x2b0   : > { %v1823_v22 = vpop.permute.xlu0 %1822  ;;  %v1929_v2 = vsel %vm1164_vm1, %v1897_v30, %v1443_v60 }
 0x2b1   : > { %v2023_v40 = vsel %vm1263_vm4, %v1991_v28, %v1823_v22 }
 0x2b2   : > { %3408 = vmatmul.mubr.msk.f32.gmra.mrb[22].mxu1 %vm2042_vm5, %v2023_v40 }
 0x2b3   : > { %v1571_v29 = vpop.permute.xlu1 %1570 }
 0x2b4   : > { %v1569_v61 = vpop.permute.xlu0 %1568  ;;  %v1961_v35 = vsel %vm1197_vm2, %v1929_v2, %v1571_v29 }
 0x2b5   : > { %v1960_v47 = vsel %vm1197_vm2, %v1928_v26, %v1569_v61 }
 0x2b7   : > { %v1349_v19 = vpop.permute.xlu1 %1348 }
 0x2b8   : > { %v1697_v48 = vpop.permute.xlu0 %1696  ;;  %v1898_v58 = vsel %vm1131_vm0, %v5371_v32, %v1349_v19 }
 0x2b9   : > { %v1992_v36 = vsel %vm1230_vm3, %v1960_v47, %v1697_v48 }
 0x2bb   : > { %v1825_v5 = vpop.permute.xlu1 %1824 }
 0x2bc   : > { %v2024_v63 = vsel %vm1263_vm4, %v1992_v36, %v1825_v5  ;;  %v1699_v27 = vpop.permute.xlu0 %1698  ;;  %v3528_v5 = vld [vmem:[%s3604_s19 + $0x170] sm:$0xff] }
 0x2bd   : > { %v3379_v14 = vpop.f32.mrb[2].mxu1  ;;  %3410 = vmatprep.mubr.msk.f32.mxu1 %vm2042_vm5, %v2024_v63  ;;  %v1993_v49 = vsel %vm1230_vm3, %v1961_v35, %v1699_v27  ;;  %v3529_v35 = vld [vmem:[%s3604_s19 + $0x188] sm:$0xff] }
 0x2be   : > { %v2546_v55 = vadd.f32 %v3379_v14, %v5113_v6  ;;  %v2540_v12 = vpop.f32.mrb[3].mxu1 }
 0x2bf   : > { %v2541_v56 = vadd.f32 %v5113_v6, %v2540_v12  ;;  %v1445_v17 = vpop.permute.xlu1 %1444 }
 0x2c0   : > { %2759 = vrot.lane.b32.xlu1 %v2546_v55, %s3556_s21  ;;  %v1351_v16 = vpop.permute.xlu0 %1350  ;;  %v1930_v3 = vsel %vm1164_vm1, %v1898_v58, %v1445_v17 }
 0x2c1   : > { %2757 = vrot.lane.b32.xlu0 %v2541_v56, %s3556_s21  ;;  %v1899_v0 = vsel %vm1131_vm0, %v5384_v21, %v1351_v16 }
 0x2c3   : > { %v1447_v52 = vpop.permute.xlu1 %1446 }
 0x2c4   : > { %v1827_v31 = vpop.permute.xlu0 %1826  ;;  %v1931_v54 = vsel %vm1164_vm1, %v1899_v0, %v1447_v52  ;;  %v5879_v0 = vld [vmem:[#allocation80_spill] sm:$0xff] }
 0x2c5   : > { %v2025_v44 = vsel %vm1263_vm4, %v1993_v49, %v1827_v31  ;;  %v3530_v31 = vld [vmem:[%s3604_s19 + $0x180] sm:$0xff] }
 0x2c6   : > { %3411 = vmatmul.mubr.msk.f32.gmra.mrb[24].mxu1 %vm2042_vm5, %v2025_v44 }
 0x2c7   : > { %v1575_v34 = vpop.permute.xlu1 %1574 }
 0x2c8   : > { %v1573_v41 = vpop.permute.xlu0 %1572  ;;  %v1963_v24 = vsel %vm1197_vm2, %v1931_v54, %v1575_v34 }
 0x2c9   : > { %v1962_v10 = vsel %vm1197_vm2, %v1930_v3, %v1573_v41 }
 0x2cb   : > { %v1353_v46 = vpop.permute.xlu1 %1352 }
 0x2cc   : > { %v1701_v33 = vpop.permute.xlu0 %1700  ;;  %v1900_v11 = vsel %vm1131_vm0, %v5395_v9, %v1353_v46 }
 0x2cd   : > { %v1994_v39 = vsel %vm1230_vm3, %v1962_v10, %v1701_v33  ;;  %v5876_v10 = vld [vmem:[#allocation50_spill] sm:$0xff] }
 0x2cf   : > { %v1829_v7 = vpop.permute.xlu1 %1828 }
 0x2d0   : > { %v2026_v8 = vsel %vm1263_vm4, %v1994_v39, %v1829_v7  ;;  %v1703_v38 = vpop.permute.xlu0 %1702  ;;  %v1159_v39 = vsel %vm1131_vm0, %v5360_v57, %v5876_v10  ;;  %v5898_v10 = vld [vmem:[#allocation107_spill] sm:$0xff] }
 0x2d1   : > { %v3382_v1 = vpop.f32.mrb[4].mxu1  ;;  %3413 = vmatprep.mubr.msk.f32.mxu1 %vm2042_vm5, %v2026_v8  ;;  %v1995_v25 = vsel %vm1230_vm3, %v1963_v24, %v1703_v38  ;;  %v5880_v24 = vld [vmem:[#allocation95_spill] sm:$0xff] }
 0x2d2   : > { %v2556_v18 = vadd.f32 %v3382_v1, %v5113_v6  ;;  %v2550_v43 = vpop.f32.mrb[5].mxu1  ;;  %v5877_v1 = vld [vmem:[#allocation51_spill] sm:$0xff] }
 0x2d3   : > { %v2551_v23 = vadd.f32 %v5113_v6, %v2550_v43  ;;  %v1449_v20 = vpop.permute.xlu1 %1448  ;;  %v5878_v43 = vld [vmem:[#allocation79_spill] sm:$0xff] }
 0x2d4   : > { %2763 = vrot.lane.b32.xlu1 %v2556_v18, %s3556_s21  ;;  %v1355_v15 = vpop.permute.xlu0 %1354  ;;  %v1932_v60 = vsel %vm1164_vm1, %v1900_v11, %v1449_v20  ;;  %v1158_v18 = vsel %vm1131_vm0, %v5347_v13, %v5877_v1  ;;  %v5883_v11 = vld [vmem:[#allocation54_spill] sm:$0xff] }
 0x2d5   : > { %2761 = vrot.lane.b32.xlu0 %v2551_v23, %s3556_s21  ;;  %v1901_v63 = vsel %vm1131_vm0, %v3528_v5, %v1355_v15  ;;  %v1192_v23 = vsel %vm1164_vm1, %v1159_v39, %v5878_v43  ;;  %v1191_v54 = vsel %vm1164_vm1, %v1158_v18, %v5879_v0 }
 0x2d6   : > { %v1225_v57 = vsel %vm1197_vm2, %v1192_v23, %v5880_v24 }
 0x2d7   : > { %v1451_v45 = vpop.permute.xlu1 %1450 }
 0x2d8   : > { %v1831_v53 = vpop.permute.xlu0 %1830  ;;  %v1933_v27 = vsel %vm1164_vm1, %v1901_v63, %v1451_v45  ;;  %v5889_v63 = vld [vmem:[#allocation98_spill] sm:$0xff] }
 0x2d9   : > { %v2027_v37 = vsel %vm1263_vm4, %v1995_v25, %v1831_v53  ;;  %v5881_v53 = vld [vmem:[#allocation96_spill] sm:$0xff] }
 0x2da   : > { %3414 = vmatmul.mubr.msk.f32.gmra.mrb[26].mxu1 %vm2042_vm5, %v2027_v37  ;;  %v1224_v13 = vsel %vm1197_vm2, %v1191_v54, %v5881_v53  ;;  %v5882_v37 = vld [vmem:[#allocation24_spill] sm:$0xff] }
 0x2db   : > { %v1579_v4 = vpop.permute.xlu1 %1578 }
 0x2dc   : > { %v1577_v51 = vpop.permute.xlu0 %1576  ;;  %v1965_v14 = vsel %vm1197_vm2, %v1933_v27, %v1579_v4  ;;  %v1258_v4 = vsel %vm1230_vm3, %v1225_v57, %v5882_v37 }
 0x2dd   : > { %v1964_v28 = vsel %vm1197_vm2, %v1932_v60, %v1577_v51  ;;  %v5884_v60 = vld [vmem:[#allocation25_spill] sm:$0xff] }
 0x2df   : > { %v1357_v59 = vpop.permute.xlu1 %1356 }
 0x2e0   : > { %v1705_v42 = vpop.permute.xlu0 %1704  ;;  %v1902_v44 = vsel %vm1131_vm0, %v3530_v31, %v1357_v59 }
 0x2e1   : > { %v1996_v22 = vsel %vm1230_vm3, %v1964_v28, %v1705_v42  ;;  %v1161_v42 = vsel %vm1131_vm0, %v5384_v21, %v5883_v11  ;;  %v1257_v28 = vsel %vm1230_vm3, %v1224_v13, %v5884_v60  ;;  %v5887_v21 = vld [vmem:[#allocation82_spill] sm:$0xff] }
 0x2e3   : > { %v1833_v40 = vpop.permute.xlu1 %1832 }
 0x2e4   : > { %v2028_v29 = vsel %vm1263_vm4, %v1996_v22, %v1833_v40  ;;  %v1707_v61 = vpop.permute.xlu0 %1706 }
 0x2e5   : > { %v3385_v19 = vpop.f32.mrb[6].mxu1  ;;  %3416 = vmatprep.mubr.msk.f32.mxu1 %vm2042_vm5, %v2028_v29  ;;  %v1997_v12 = vsel %vm1230_vm3, %v1965_v14, %v1707_v61  ;;  %v5885_v29 = vld [vmem:[#allocation55_spill] sm:$0xff]  ;;  %v5890_v14 = vld [vmem:[#allocation105_spill] sm:$0xff] }
 0x2e6   : > { %v2566_v50 = vadd.f32 %v3385_v19, %v5113_v6  ;;  %v2560_v48 = vpop.f32.mrb[7].mxu1  ;;  %v1160_v61 = vsel %vm1131_vm0, %v5371_v32, %v5885_v29  ;;  %v5886_v19 = vld [vmem:[#allocation81_spill] sm:$0xff] }
 0x2e7   : > { %v2561_v26 = vadd.f32 %v5113_v6, %v2560_v48  ;;  %v1453_v47 = vpop.permute.xlu1 %1452 }
 0x2e8   : > { %2767 = vrot.lane.b32.xlu1 %v2566_v50, %s3556_s21  ;;  %v1359_v36 = vpop.permute.xlu0 %1358  ;;  %v1934_v41 = vsel %vm1164_vm1, %v1902_v44, %v1453_v47  ;;  %v1194_v50 = vsel %vm1164_vm1, %v1161_v42, %v5886_v19  ;;  %v5888_v47 = vld [vmem:[#allocation97_spill] sm:$0xff] }
 0x2e9   : > { %2765 = vrot.lane.b32.xlu0 %v2561_v26, %s3556_s21  ;;  %v1903_v52 = vsel %vm1131_vm0, %v3529_v35, %v1359_v36  ;;  %v1193_v26 = vsel %vm1164_vm1, %v1160_v61, %v5887_v21  ;;  %v1227_v36 = vsel %vm1197_vm2, %v1194_v50, %v5888_v47  ;;  %v5893_v35 = vld [vmem:[#allocation59_spill] sm:$0xff] }
 0x2ea   : > { %v1226_v27 = vsel %vm1197_vm2, %v1193_v26, %v5889_v63  ;;  %v1260_v32 = vsel %vm1230_vm3, %v1227_v36, %v5890_v14 }
 0x2eb   : > { %v1455_v55 = vpop.permute.xlu1 %1454 }
 0x2ec   : > { %v1835_v56 = vpop.permute.xlu0 %1834  ;;  %v1935_v34 = vsel %vm1164_vm1, %v1903_v52, %v1455_v55  ;;  %v1162_v52 = vsel %vm1131_vm0, %v5395_v9, %v5893_v35 }
 0x2ed   : > { %v2029_v17 = vsel %vm1263_vm4, %v1997_v12, %v1835_v56  ;;  %v5891_v12 = vld [vmem:[#allocation58_spill] sm:$0xff] }
 0x2ee   : > { %3417 = vmatmul.mubr.msk.f32.gmra.mrb[28].mxu1 %vm2042_vm5, %v2029_v17  ;;  %v1163_v56 = vsel %vm1131_vm0, %v3528_v5, %v5891_v12  ;;  %v5892_v17 = vld [vmem:[#allocation106_spill] sm:$0xff] }
 0x2ef   : > { %v1583_v16 = vpop.permute.xlu1 %1582 }
 0x2f0   : > { %v1581_v30 = vpop.permute.xlu0 %1580  ;;  %v1967_v46 = vsel %vm1197_vm2, %v1935_v34, %v1583_v16  ;;  %v1259_v16 = vsel %vm1230_vm3, %v1226_v27, %v5892_v17  ;;  %v5895_v34 = vld [vmem:[#allocation84_spill] sm:$0xff] }
 0x2f1   : > { %v1966_v58 = vsel %vm1197_vm2, %v1934_v41, %v1581_v30  ;;  %v1195_v41 = vsel %vm1164_vm1, %v1162_v52, %v5895_v34 }
 0x2f3   : > { %v1711_v2 = vpop.permute.xlu1 %1710 }
 0x2f4   : > { %v1709_v49 = vpop.permute.xlu0 %1708  ;;  %v1999_v33 = vsel %vm1230_vm3, %v1967_v46, %v1711_v2  ;;  %v5896_v46 = vld [vmem:[#allocation99_spill] sm:$0xff] }
 0x2f5   : > { %v1998_v7 = vsel %vm1230_vm3, %v1966_v58, %v1709_v49  ;;  %v5894_v49 = vld [vmem:[#allocation83_spill] sm:$0xff]  ;;  %v5897_v58 = vld [vmem:[#allocation100_spill] sm:$0xff] }
 0x2f6   : > { %v1196_v31 = vsel %vm1164_vm1, %v1163_v56, %v5894_v49 }
 0x2f7   : > { %v1839_v3 = vpop.permute.xlu1 %1838  ;;  %v1229_v5 = vsel %vm1197_vm2, %v1196_v31, %v5896_v46 }
 0x2f8   : > { %v2031_v8 = vsel %vm1263_vm4, %v1999_v33, %v1839_v3  ;;  %v1837_v38 = vpop.permute.xlu0 %1836  ;;  %v1228_v33 = vsel %vm1197_vm2, %v1195_v41, %v5897_v58  ;;  %v1262_v3 = vsel %vm1230_vm3, %v1229_v5, %v4486_v62 }
 0x2f9   : > { %v2030_v20 = vsel %vm1263_vm4, %v1998_v7, %v1837_v38  ;;  %v3388_v15 = vpop.f32.mrb[8].mxu1  ;;  %v1261_v39 = vsel %vm1230_vm3, %v1228_v33, %v5898_v10 }
 0x2fa   : > { %v2576_v45 = vadd.f32 %v3388_v15, %v5113_v6  ;;  %v2570_v25 = vpop.f32.mrb[9].mxu1  ;;  %3419 = vmatprep.mubr.msk.f32.mxu1 %vm2042_vm5, %v2030_v20 }
 0x2fb   : > { %v2571_v51 = vadd.f32 %v5113_v6, %v2570_v25  ;;  %3420 = vmatmul.mubr.msk.f32.gmra.mrb[30].mxu1 %vm2042_vm5, %v2031_v8  ;;  %v1090_v59 = vpop.permute.xlu1 %1089 }
 0x2fc   : > { %v1291_v22 = vsel %vm1263_vm4, %v1258_v4, %v1090_v59  ;;  %2771 = vrot.lane.b32.xlu1 %v2576_v45, %s3556_s21  ;;  %v1088_v40 = vpop.permute.xlu0 %1087 }
 0x2fd   : > { %v1290_v48 = vsel %vm1263_vm4, %v1257_v28, %v1088_v40  ;;  %2769 = vrot.lane.b32.xlu0 %v2571_v51, %s3556_s21 }
 0x2fe   : > { %3359 = vmatprep.mubr.msk.f32.mxu0 %vm2042_vm5, %v1290_v48 }
 0x2ff   : > { %3360 = vmatmul.mubr.msk.f32.gmra.mrb[26].mxu0 %vm2042_vm5, %v1291_v22  ;;  %v1094_v55 = vpop.permute.xlu1 %1093 }
 0x300   : > { %v1293_v30 = vsel %vm1263_vm4, %v1260_v32, %v1094_v55  ;;  %v1092_v2 = vpop.permute.xlu0 %1091 }
 0x301   : > { %v1292_v44 = vsel %vm1263_vm4, %v1259_v16, %v1092_v2 }
 0x302   : > { %3362 = vmatprep.mubr.msk.f32.mxu0 %vm2042_vm5, %v1292_v44 }
 0x303   : > { %3363 = vmatmul.mubr.msk.f32.gmra.mrb[28].mxu0 %vm2042_vm5, %v1293_v30  ;;  %v1098_v9 = vpop.permute.xlu1 %1097 }
 0x304   : > { %v1295_v7 = vsel %vm1263_vm4, %v1262_v3, %v1098_v9  ;;  %v1096_v8 = vpop.permute.xlu0 %1095 }
 0x305   : > { %v1294_v38 = vsel %vm1263_vm4, %v1261_v39, %v1096_v8 }
 0x306   : > { %3365 = vmatprep.mubr.msk.f32.mxu0 %vm2042_vm5, %v1294_v38 }
 0x307   : > { %3366 = vmatmul.mubr.msk.f32.gmra.mrb[30].mxu0 %vm2042_vm5, %v1295_v7 }
 0x30d   : > { %v3391_v1 = vpop.f32.mrb[10].mxu1 }
 0x30e   : > { %v2586_v62 = vadd.f32 %v3391_v1, %v5113_v6  ;;  %v2580_v18 = vpop.f32.mrb[11].mxu1 }
 0x30f   : > { %v2581_v43 = vadd.f32 %v5113_v6, %v2580_v18 }
 0x310   : > { %2775 = vrot.lane.b32.xlu1 %v2586_v62, %s3556_s21 }
 0x311   : > { %2773 = vrot.lane.b32.xlu0 %v2581_v43, %s3556_s21 }
 0x31e   : > { %v2756_v23 = vpop.permute.xlu1 %2755 }
 0x31f   : > { %2851 = vst.msk [vmem:[%s5124_s12 + $0x8] sm:$0xff] %vm2849_vm6, %v2756_v23  ;;  %v2754_v20 = vpop.permute.xlu0 %2753 }
 0x320   : > { %2850 = vst.msk [vmem:[%s5124_s12] sm:$0xff] %vm2849_vm6, %v2754_v20 }
 0x321   : > { %v3394_v15 = vpop.f32.mrb[12].mxu1 }
 0x322   : > { %v2596_v0 = vadd.f32 %v3394_v15, %v5113_v6  ;;  %v2590_v54 = vpop.f32.mrb[13].mxu1 }
 0x323   : > { %v2591_v24 = vadd.f32 %v5113_v6, %v2590_v54 }
 0x324   : > { %2779 = vrot.lane.b32.xlu1 %v2596_v0, %s3556_s21 }
 0x325   : > { %2777 = vrot.lane.b32.xlu0 %v2591_v24, %s3556_s21 }
 0x332   : > { %v2760_v57 = vpop.permute.xlu1 %2759 }
 0x333   : > { %2853 = vst.msk [vmem:[%s5124_s12 + $0x18] sm:$0xff] %vm2849_vm6, %v2760_v57  ;;  %v2758_v45 = vpop.permute.xlu0 %2757 }
 0x334   : > { %2852 = vst.msk [vmem:[%s5124_s12 + $0x10] sm:$0xff] %vm2849_vm6, %v2758_v45 }
 0x335   : > { %v3397_v25 = vpop.f32.mrb[14].mxu1 }
 0x336   : > { %v2606_v53 = vadd.f32 %v3397_v25, %v5113_v6  ;;  %v2600_v13 = vpop.f32.mrb[15].mxu1 }
 0x337   : > { %v2601_v37 = vadd.f32 %v5113_v6, %v2600_v13 }
 0x338   : > { %2783 = vrot.lane.b32.xlu1 %v2606_v53, %s3556_s21 }
 0x339   : > { %2781 = vrot.lane.b32.xlu0 %v2601_v37, %s3556_s21 }
 0x346   : > { %v2764_v4 = vpop.permute.xlu1 %2763 }
 0x347   : > { %2855 = vst.msk [vmem:[%s5124_s12 + $0x28] sm:$0xff] %vm2849_vm6, %v2764_v4  ;;  %v2762_v51 = vpop.permute.xlu0 %2761 }
 0x348   : > { %2854 = vst.msk [vmem:[%s5124_s12 + $0x20] sm:$0xff] %vm2849_vm6, %v2762_v51 }
 0x349   : > { %v3400_v59 = vpop.f32.mrb[16].mxu1 }
 0x34a   : > { %v2616_v11 = vadd.f32 %v3400_v59, %v5113_v6  ;;  %v2610_v42 = vpop.f32.mrb[17].mxu1 }
 0x34b   : > { %v2611_v60 = vadd.f32 %v5113_v6, %v2610_v42 }
 0x34c   : > { %2787 = vrot.lane.b32.xlu1 %v2616_v11, %s3556_s21 }
 0x34d   : > { %2785 = vrot.lane.b32.xlu0 %v2611_v60, %s3556_s21 }
 0x35a   : > { %v2768_v28 = vpop.permute.xlu1 %2767 }
 0x35b   : > { %2857 = vst.msk [vmem:[%s5124_s12 + $0x38] sm:$0xff] %vm2849_vm6, %v2768_v28  ;;  %v2766_v22 = vpop.permute.xlu0 %2765 }
 0x35c   : > { %2856 = vst.msk [vmem:[%s5124_s12 + $0x30] sm:$0xff] %vm2849_vm6, %v2766_v22 }
 0x35d   : > { %v3403_v40 = vpop.f32.mrb[18].mxu1 }
 0x35e   : > { %v2626_v29 = vadd.f32 %v3403_v40, %v5113_v6  ;;  %v2620_v61 = vpop.f32.mrb[19].mxu1 }
 0x35f   : > { %v2621_v19 = vadd.f32 %v5113_v6, %v2620_v61 }
 0x360   : > { %2791 = vrot.lane.b32.xlu1 %v2626_v29, %s3556_s21 }
 0x361   : > { %2789 = vrot.lane.b32.xlu0 %v2621_v19, %s3556_s21 }
 0x36e   : > { %v2772_v50 = vpop.permute.xlu1 %2771 }
 0x36f   : > { %2859 = vst.msk [vmem:[%s5124_s12 + $0x48] sm:$0xff] %vm2849_vm6, %v2772_v50  ;;  %v2770_v48 = vpop.permute.xlu0 %2769 }
 0x370   : > { %2858 = vst.msk [vmem:[%s5124_s12 + $0x40] sm:$0xff] %vm2849_vm6, %v2770_v48 }
 0x371   : > { %v3406_v21 = vpop.f32.mrb[20].mxu1 }
 0x372   : > { %v2636_v26 = vadd.f32 %v3406_v21, %v5113_v6  ;;  %v2630_v47 = vpop.f32.mrb[21].mxu1 }
 0x373   : > { %v2631_v36 = vadd.f32 %v5113_v6, %v2630_v47 }
 0x374   : > { %2795 = vrot.lane.b32.xlu1 %v2636_v26, %s3556_s21 }
 0x375   : > { %2793 = vrot.lane.b32.xlu0 %v2631_v36, %s3556_s21 }
 0x382   : > { %v2776_v63 = vpop.permute.xlu1 %2775 }
 0x383   : > { %2861 = vst.msk [vmem:[%s5124_s12 + $0x58] sm:$0xff] %vm2849_vm6, %v2776_v63  ;;  %v2774_v27 = vpop.permute.xlu0 %2773 }
 0x384   : > { %2860 = vst.msk [vmem:[%s5124_s12 + $0x50] sm:$0xff] %vm2849_vm6, %v2774_v27 }
 0x385   : > { %v3409_v14 = vpop.f32.mrb[22].mxu1 }
 0x386   : > { %v2646_v32 = vadd.f32 %v3409_v14, %v5113_v6  ;;  %v2640_v55 = vpop.f32.mrb[23].mxu1 }
 0x387   : > { %v2641_v12 = vadd.f32 %v5113_v6, %v2640_v55 }
 0x388   : > { %2799 = vrot.lane.b32.xlu1 %v2646_v32, %s3556_s21 }
 0x389   : > { %2797 = vrot.lane.b32.xlu0 %v2641_v12, %s3556_s21 }
 0x396   : > { %v2780_v56 = vpop.permute.xlu1 %2779 }
 0x397   : > { %2863 = vst.msk [vmem:[%s5124_s12 + $0x68] sm:$0xff] %vm2849_vm6, %v2780_v56  ;;  %v2778_v17 = vpop.permute.xlu0 %2777 }
 0x398   : > { %2862 = vst.msk [vmem:[%s5124_s12 + $0x60] sm:$0xff] %vm2849_vm6, %v2778_v17 }
 0x399   : > { %v3412_v16 = vpop.f32.mrb[24].mxu1 }
 0x39a   : > { %v2656_v30 = vadd.f32 %v3412_v16, %v5113_v6  ;;  %v2650_v2 = vpop.f32.mrb[25].mxu1 }
 0x39b   : > { %v2651_v35 = vadd.f32 %v5113_v6, %v2650_v2 }
 0x39c   : > { %2803 = vrot.lane.b32.xlu1 %v2656_v30, %s3556_s21 }
 0x39d   : > { %2801 = vrot.lane.b32.xlu0 %v2651_v35, %s3556_s21 }
 0x3aa   : > { %v2784_v52 = vpop.permute.xlu1 %2783 }
 0x3ab   : > { %2865 = vst.msk [vmem:[%s5124_s12 + $0x78] sm:$0xff] %vm2849_vm6, %v2784_v52  ;;  %v2782_v49 = vpop.permute.xlu0 %2781 }
 0x3ac   : > { %2864 = vst.msk [vmem:[%s5124_s12 + $0x70] sm:$0xff] %vm2849_vm6, %v2782_v49 }
 0x3ad   : > { %v3415_v31 = vpop.f32.mrb[26].mxu1 }
 0x3ae   : > { %v2666_v44 = vadd.f32 %v3415_v31, %v5113_v6  ;;  %v2660_v34 = vpop.f32.mrb[27].mxu1 }
 0x3af   : > { %v2661_v41 = vadd.f32 %v5113_v6, %v2660_v34 }
 0x3b0   : > { %2807 = vrot.lane.b32.xlu1 %v2666_v44, %s3556_s21 }
 0x3b1   : > { %2805 = vrot.lane.b32.xlu0 %v2661_v41, %s3556_s21 }
 0x3be   : > { %v2788_v46 = vpop.permute.xlu1 %2787 }
 0x3bf   : > { %2867 = vst.msk [vmem:[%s5124_s12 + $0x88] sm:$0xff] %vm2849_vm6, %v2788_v46  ;;  %v2786_v5 = vpop.permute.xlu0 %2785 }
 0x3c0   : > { %2866 = vst.msk [vmem:[%s5124_s12 + $0x80] sm:$0xff] %vm2849_vm6, %v2786_v5 }
 0x3c1   : > { %v3418_v58 = vpop.f32.mrb[28].mxu1 }
 0x3c2   : > { %v2676_v33 = vadd.f32 %v3418_v58, %v5113_v6  ;;  %v2670_v3 = vpop.f32.mrb[29].mxu1 }
 0x3c3   : > { %v2671_v9 = vadd.f32 %v5113_v6, %v2670_v3 }
 0x3c4   : > { %2811 = vrot.lane.b32.xlu1 %v2676_v33, %s3556_s21 }
 0x3c5   : > { %2809 = vrot.lane.b32.xlu0 %v2671_v9, %s3556_s21 }
 0x3ce   : > { %v3421_v10 = vpop.f32.mrb[30].mxu1 }
 0x3cf   : > { %v2686_v39 = vadd.f32 %v3421_v10, %v5113_v6  ;;  %v2680_v7 = vpop.f32.mrb[31].mxu1 }
 0x3d0   : > { %v2681_v8 = vadd.f32 %v5113_v6, %v2680_v7 }
 0x3d1   : > { %2815 = vrot.lane.b32.xlu1 %v2686_v39, %s3556_s21 }
 0x3d2   : > { %v2792_v38 = vpop.permute.xlu1 %2791  ;;  %2813 = vrot.lane.b32.xlu0 %v2681_v8, %s3556_s21  ;;  %v3361_v1 = vpop.f32.mrb[26].mxu0 }
 0x3d3   : > { %2869 = vst.msk [vmem:[%s5124_s12 + $0x98] sm:$0xff] %vm2849_vm6, %v2792_v38  ;;  %v2341_v62 = vadd.f32 %v3361_v1, %v5113_v6  ;;  %v2790_v18 = vpop.permute.xlu0 %2789  ;;  %v2335_v43 = vpop.f32.mrb[27].mxu0 }
 0x3d4   : > { %2868 = vst.msk [vmem:[%s5124_s12 + $0x90] sm:$0xff] %vm2849_vm6, %v2790_v18  ;;  %v2336_v23 = vadd.f32 %v5113_v6, %v2335_v43 }
 0x3d5   : > { %2716 = vst.msk [vmem:[%s5124_s12 + $0xd8] sm:$0xff] %vm1164_vm1, %v2341_v62 }
 0x3d6   : > { %2715 = vst.msk [vmem:[%s5124_s12 + $0xd0] sm:$0xff] %vm1164_vm1, %v2336_v23  ;;  %v3364_v20 = vpop.f32.mrb[28].mxu0 }
 0x3d7   : > { %v2351_v15 = vadd.f32 %v3364_v20, %v5113_v6  ;;  %v2345_v0 = vpop.f32.mrb[29].mxu0 }
 0x3d8   : > { %v2346_v54 = vadd.f32 %v5113_v6, %v2345_v0 }
 0x3d9   : > { %2718 = vst.msk [vmem:[%s5124_s12 + $0xe8] sm:$0xff] %vm1164_vm1, %v2351_v15 }
 0x3da   : > { %2717 = vst.msk [vmem:[%s5124_s12 + $0xe0] sm:$0xff] %vm1164_vm1, %v2346_v54  ;;  %v3367_v24 = vpop.f32.mrb[30].mxu0 }
 0x3db   : > { %v2361_v57 = vadd.f32 %v3367_v24, %v5113_v6  ;;  %v2355_v45 = vpop.f32.mrb[31].mxu0 }
 0x3dc   : > { %v2356_v25 = vadd.f32 %v5113_v6, %v2355_v45 }
 0x3dd   : > { %2720 = vst.msk [vmem:[%s5124_s12 + $0xf8] sm:$0xff] %vm1164_vm1, %v2361_v57 }
 0x3de   : > { %2719 = vst.msk [vmem:[%s5124_s12 + $0xf0] sm:$0xff] %vm1164_vm1, %v2356_v25 }
 0x3e6   : > { %v2796_v53 = vpop.permute.xlu1 %2795 }
 0x3e7   : > { %2871 = vst.msk [vmem:[%s5124_s12 + $0xa8] sm:$0xff] %vm2849_vm6, %v2796_v53  ;;  %v2794_v13 = vpop.permute.xlu0 %2793 }
 0x3e8   : > { %2870 = vst.msk [vmem:[%s5124_s12 + $0xa0] sm:$0xff] %vm2849_vm6, %v2794_v13 }
 0x3fa   : > { %v2800_v37 = vpop.permute.xlu1 %2799 }
 0x3fb   : > { %2873 = vst.msk [vmem:[%s5124_s12 + $0xb8] sm:$0xff] %vm2849_vm6, %v2800_v37  ;;  %v2798_v4 = vpop.permute.xlu0 %2797 }
 0x3fc   : > { %2872 = vst.msk [vmem:[%s5124_s12 + $0xb0] sm:$0xff] %vm2849_vm6, %v2798_v4 }
 0x40e   : > { %v2804_v6 = vpop.permute.xlu1 %2803 }
 0x40f   : > { %2875 = vst.msk [vmem:[%s5124_s12 + $0xc8] sm:$0xff] %vm2849_vm6, %v2804_v6  ;;  %v2802_v51 = vpop.permute.xlu0 %2801 }
 0x410   : > { %2874 = vst.msk [vmem:[%s5124_s12 + $0xc0] sm:$0xff] %vm2849_vm6, %v2802_v51 }
 0x422   : > { %v2808_v59 = vpop.permute.xlu1 %2807 }
 0x423   : > { %2877 = vst.msk [vmem:[%s5124_s12 + $0xd8] sm:$0xff] %vm2849_vm6, %v2808_v59  ;;  %v2806_v11 = vpop.permute.xlu0 %2805 }
 0x424   : > { %2876 = vst.msk [vmem:[%s5124_s12 + $0xd0] sm:$0xff] %vm2849_vm6, %v2806_v11 }
 0x436   : > { %v2812_v42 = vpop.permute.xlu1 %2811 }
 0x437   : > { %2879 = vst.msk [vmem:[%s5124_s12 + $0xe8] sm:$0xff] %vm2849_vm6, %v2812_v42  ;;  %v2810_v60 = vpop.permute.xlu0 %2809 }
 0x438   : > { %2878 = vst.msk [vmem:[%s5124_s12 + $0xe0] sm:$0xff] %vm2849_vm6, %v2810_v60 }
 0x443   : > { %v2816_v28 = vpop.permute.xlu1 %2815 }
 0x444   : > { %2881 = vst.msk [vmem:[%s5124_s12 + $0xf8] sm:$0xff] %vm2849_vm6, %v2816_v28  ;;  %v2814_v22 = vpop.permute.xlu0 %2813 }
 0x445   : > { %2880 = vst.msk [vmem:[%s5124_s12 + $0xf0] sm:$0xff] %vm2849_vm6, %v2814_v22 }
 0x446 PF: > { %s13_s14 = sadd.s32 1, %s3553_s14   ;;  %s5899_s12 = smov %s3549_s13 }
 0x447   : > { %p10_p5 = scmp.ge.s32.totalorder %s13_s14, 4   ;;  %s5900_s13 = smov %s5902_s15 }
 0x449   :  { %12 = sbr.rel (!%p10_p5) target bundleno = 2 (0x2), region = 66 }

// kernel: tpu_custom_call.1
= control target key start
LH: loop header
LB: loop body
LE: loop exit
PB: predicated region body
PF: predicated region fallthrough
CT: control target
= control target key end

     0   :  { %s3580_s12 = smov 0   ;;  %s3582_s13 = smov 0   ;;  %s5633_s0 = inlined_call_operand.vmem [shape: f32[2,18,18,4], index: 0, kind: input, shape index: {}]   ;;  %s5634_s1 = inlined_call_operand.vmem [shape: f32[2,24,8], index: 1, kind: input, shape index: {}]   ;;  %s5635_s2 = inlined_call_operand.vmem [shape: f32[1,8], index: 2, kind: input, shape index: {}]   ;;  %s5636_s3 = inlined_call_operand.vmem [shape: f32[2,256,16], index: 3, kind: output, shape index: {}]  }
   0x1   :  { %s3584_s14 = smov 0  }
   0x2 LB: > { %s25_s15 = sadd.s32 1, %s3549_s13  ;;  %p2977_p0 = scmp.ge.s32.totalorder %s3553_s14, 1  ;;  %s3553_s14 = sphi %s3584_s14, %s13_s14   ;;  %s3549_s13 = sphi %s3582_s13, %s5900_s13   ;;  %s3545_s12 = sphi %s3580_s12, %s5899_s12  }
   0x3   : > { %p27_p1 = scmp.ge.s32.totalorder %s25_s15, 2  ;;  %p151_p2 = scmp.lt.s32.totalorder %s3553_s14, 3 }
   0x5   : > { %s5902_s15 = smov (%p27_p1, %s25_s15), 0  ;;  %p152_p3 = pnand %p2977_p0, %p151_p2 }
   0x7   : > { %155 = sbr.rel (%p152_p3) target bundleno = 1094 (0x446), region = 32 }
   0xe   : > { %p179_p4 = scmp.lt.s32.totalorder %s3545_s12, 1  ;;  %s3555_s20 = smov 4   ;;  %vm1131_vm0 = vcmask 31744   ;;  %vm1164_vm1 = vcmask 64512   ;;  %vm1197_vm2 = vcmask 97280   ;;  %vm1230_vm3 = vcmask 130048  }
   0xf   : > { %s3556_s21 = smov 8   ;;  %s3557_s22 = smov 12   ;;  %vm1263_vm4 = vcmask 162816   ;;  %vm2042_vm5 = vcmask 195584   ;;  %vm2849_vm6 = vcmask 130112  }
  0x10   : > { %s5904_s12 = smov (!%p179_p4, %s3545_s12), 1  ;;  %s3558_s23 = smov 16  }
  0x11   : > { %s3430_s16 = smul.u32 432, %s5904_s12  ;;  %s3559_s30 = smov 20  }
  0x12   : > { %s3243_s10 = sshll.u32 %s5904_s12, 8 }
  0x13   : > { %s3604_s19 = scalar_lea.vmem %s5633_s0, %s3430_s16  ;;  %s5124_s12 = scalar_lea.vmem %s5636_s3, %s3243_s10 }
  0x14   : > { %v3607_v0 = vld [vmem:[%s3604_s19 + $0x19] sm:$0xff]  ;;  %v229_v1 = vld [vmem:[%s3604_s19 + $0x1] sm:$0xff]  ;;  %v230_v3 = vld [vmem:[%s3604_s19 + $0x9] sm:$0xff] }
  0x15   : > { %527 = vrot.lane.b32.xlu1 %v3607_v0, %s3555_s20  ;;  %523 = vrot.lane.b32.xlu0 %v229_v1, %s3555_s20  ;;  %v3614_v2 = vld [vmem:[%s3604_s19 + $0x21] sm:$0xff]  ;;  %v3621_v4 = vld [vmem:[%s3604_s19 + $0x39] sm:$0xff] }
  0x16   : > { %v3624_v5 = vld [vmem:[%s3604_s19 + $0x31] sm:$0xff]  ;;  %v3634_v7 = vld [vmem:[%s3604_s19 + $0x49] sm:$0xff]  ;;  %v3644_v9 = vld [vmem:[%s3604_s19 + $0x61] sm:$0xff] }
  0x17   : > { %v3631_v6 = vld [vmem:[%s3604_s19 + $0x51] sm:$0xff]  ;;  %v3641_v8 = vld [vmem:[%s3604_s19 + $0x69] sm:$0xff]  ;;  %v3651_v10 = vld [vmem:[%s3604_s19 + $0x81] sm:$0xff] }
  0x18   : > { %v3654_v11 = vld [vmem:[%s3604_s19 + $0x79] sm:$0xff]  ;;  %v3664_v13 = vld [vmem:[%s3604_s19 + $0x91] sm:$0xff]  ;;  %v3674_v15 = vld [vmem:[%s3604_s19 + $0xa9] sm:$0xff] }
  0x19   : > { %529 = vrot.lane.b32.xlu1 %v3614_v2, %s3555_s20  ;;  %525 = vrot.lane.b32.xlu0 %v230_v3, %s3555_s20  ;;  %v3661_v12 = vld [vmem:[%s3604_s19 + $0x99] sm:$0xff]  ;;  %v3671_v14 = vld [vmem:[%s3604_s19 + $0xb1] sm:$0xff] }
  0x1a   : > { %v3681_v16 = vld [vmem:[%s3604_s19 + $0xc9] sm:$0xff]  ;;  %v3684_v17 = vld [vmem:[%s3604_s19 + $0xc1] sm:$0xff]  ;;  %v3694_v19 = vld [vmem:[%s3604_s19 + $0xd9] sm:$0xff] }
  0x1b   : > { %v3691_v18 = vld [vmem:[%s3604_s19 + $0xe1] sm:$0xff]  ;;  %v3701_v20 = vld [vmem:[%s3604_s19 + $0xf9] sm:$0xff]  ;;  %v3704_v21 = vld [vmem:[%s3604_s19 + $0xf1] sm:$0xff] }
  0x1c   : > { %v3711_v22 = vld [vmem:[%s3604_s19 + $0x111] sm:$0xff]  ;;  %v3714_v23 = vld [vmem:[%s3604_s19 + $0x109] sm:$0xff]  ;;  %v3724_v25 = vld [vmem:[%s3604_s19 + $0x121] sm:$0xff] }
  0x1d   : > { %533 = vrot.lane.b32.xlu1 %v3621_v4, %s3555_s20  ;;  %531 = vrot.lane.b32.xlu0 %v3624_v5, %s3555_s20  ;;  %v3721_v24 = vld [vmem:[%s3604_s19 + $0x129] sm:$0xff]  ;;  %v3731_v26 = vld [vmem:[%s3604_s19 + $0x141] sm:$0xff] }
  0x1e   : > { %v3734_v27 = vld [vmem:[%s3604_s19 + $0x139] sm:$0xff]  ;;  %v3744_v29 = vld [vmem:[%s3604_s19 + $0x151] sm:$0xff]  ;;  %v3754_v31 = vld [vmem:[%s3604_s19 + $0x169] sm:$0xff] }
  0x1f   : > { %v3741_v28 = vld [vmem:[%s3604_s19 + $0x159] sm:$0xff]  ;;  %v3751_v30 = vld [vmem:[%s3604_s19 + $0x171] sm:$0xff]  ;;  %v261_v33 = vld [vmem:[%s3604_s19 + $0x2] sm:$0xff] }
  0x20   : > { %v262_v32 = vld [vmem:[%s3604_s19 + $0xa] sm:$0xff]  ;;  %v3765_v34 = vld [vmem:[%s3604_s19 + $0x22] sm:$0xff]  ;;  %v3768_v35 = vld [vmem:[%s3604_s19 + $0x1a] sm:$0xff] }
  0x21   : > { %537 = vrot.lane.b32.xlu1 %v3631_v6, %s3555_s20  ;;  %535 = vrot.lane.b32.xlu0 %v3634_v7, %s3555_s20  ;;  %v3775_v36 = vld [vmem:[%s3604_s19 + $0x3a] sm:$0xff]  ;;  %v3778_v37 = vld [vmem:[%s3604_s19 + $0x32] sm:$0xff] }
  0x22   : > { %v3785_v38 = vld [vmem:[%s3604_s19 + $0x52] sm:$0xff]  ;;  %v3788_v39 = vld [vmem:[%s3604_s19 + $0x4a] sm:$0xff]  ;;  %v3798_v41 = vld [vmem:[%s3604_s19 + $0x62] sm:$0xff] }
  0x23   : > { %v3795_v40 = vld [vmem:[%s3604_s19 + $0x6a] sm:$0xff]  ;;  %v3805_v42 = vld [vmem:[%s3604_s19 + $0x82] sm:$0xff]  ;;  %v3808_v43 = vld [vmem:[%s3604_s19 + $0x7a] sm:$0xff] }
  0x24   : > { %v3815_v44 = vld [vmem:[%s3604_s19 + $0x9a] sm:$0xff]  ;;  %v3818_v45 = vld [vmem:[%s3604_s19 + $0x92] sm:$0xff]  ;;  %v3828_v47 = vld [vmem:[%s3604_s19 + $0xaa] sm:$0xff] }
  0x25   : > { %541 = vrot.lane.b32.xlu1 %v3641_v8, %s3555_s20  ;;  %539 = vrot.lane.b32.xlu0 %v3644_v9, %s3555_s20  ;;  %v3825_v46 = vld [vmem:[%s3604_s19 + $0xb2] sm:$0xff]  ;;  %v3835_v48 = vld [vmem:[%s3604_s19 + $0xca] sm:$0xff] }
  0x26   : > { %v3838_v49 = vld [vmem:[%s3604_s19 + $0xc2] sm:$0xff]  ;;  %v3848_v51 = vld [vmem:[%s3604_s19 + $0xda] sm:$0xff]  ;;  %v3858_v53 = vld [vmem:[%s3604_s19 + $0xf2] sm:$0xff] }
  0x27   : > { %v3845_v50 = vld [vmem:[%s3604_s19 + $0xe2] sm:$0xff]  ;;  %v3855_v52 = vld [vmem:[%s3604_s19 + $0xfa] sm:$0xff]  ;;  %v3865_v54 = vld [vmem:[%s3604_s19 + $0x112] sm:$0xff] }
  0x28   : > { %v3868_v55 = vld [vmem:[%s3604_s19 + $0x10a] sm:$0xff]  ;;  %v3878_v57 = vld [vmem:[%s3604_s19 + $0x122] sm:$0xff]  ;;  %v3888_v59 = vld [vmem:[%s3604_s19 + $0x13a] sm:$0xff] }
  0x29   : > { %545 = vrot.lane.b32.xlu1 %v3651_v10, %s3555_s20  ;;  %543 = vrot.lane.b32.xlu0 %v3654_v11, %s3555_s20  ;;  %v3875_v56 = vld [vmem:[%s3604_s19 + $0x12a] sm:$0xff]  ;;  %v3885_v58 = vld [vmem:[%s3604_s19 + $0x142] sm:$0xff]  ;;  %5672 = vst [vmem:[#allocation3_spill] sm:$0xff] %v3888_v59 }
  0x2a   : > { %5671 = vst [vmem:[#allocation2_spill] sm:$0xff] %v3885_v58  ;;  %v290_v62 = vld [vmem:[%s3604_s19 + $0x15a] sm:$0xff]  ;;  %v289_v63 = vld [vmem:[%s3604_s19 + $0x152] sm:$0xff] }
  0x2d   : > { %549 = vrot.lane.b32.xlu1 %v3661_v12, %s3555_s20  ;;  %547 = vrot.lane.b32.xlu0 %v3664_v13, %s3555_s20 }
  0x31   : > { %553 = vrot.lane.b32.xlu1 %v3671_v14, %s3555_s20  ;;  %551 = vrot.lane.b32.xlu0 %v3674_v15, %s3555_s20 }
  0x35   : > { %557 = vrot.lane.b32.xlu1 %v3681_v16, %s3555_s20  ;;  %555 = vrot.lane.b32.xlu0 %v3684_v17, %s3555_s20 }
  0x39   : > { %561 = vrot.lane.b32.xlu1 %v3691_v18, %s3555_s20  ;;  %559 = vrot.lane.b32.xlu0 %v3694_v19, %s3555_s20 }
  0x3d   : > { %565 = vrot.lane.b32.xlu1 %v3701_v20, %s3555_s20  ;;  %563 = vrot.lane.b32.xlu0 %v3704_v21, %s3555_s20 }
  0x41   : > { %569 = vrot.lane.b32.xlu1 %v3711_v22, %s3555_s20  ;;  %567 = vrot.lane.b32.xlu0 %v3714_v23, %s3555_s20 }
  0x45   : > { %573 = vrot.lane.b32.xlu1 %v3721_v24, %s3555_s20  ;;  %571 = vrot.lane.b32.xlu0 %v3724_v25, %s3555_s20 }
  0x49   : > { %577 = vrot.lane.b32.xlu1 %v3731_v26, %s3555_s20  ;;  %575 = vrot.lane.b32.xlu0 %v3734_v27, %s3555_s20 }
  0x4d   : > { %581 = vrot.lane.b32.xlu1 %v3741_v28, %s3555_s20  ;;  %579 = vrot.lane.b32.xlu0 %v3744_v29, %s3555_s20 }
  0x51   : > { %585 = vrot.lane.b32.xlu1 %v3751_v30, %s3555_s20  ;;  %583 = vrot.lane.b32.xlu0 %v3754_v31, %s3555_s20 }
  0x55   : > { %653 = vrot.lane.b32.xlu1 %v262_v32, %s3556_s21  ;;  %651 = vrot.lane.b32.xlu0 %v261_v33, %s3556_s21  ;;  %v292_v32 = vld [vmem:[%s3604_s19 + $0x172] sm:$0xff]  ;;  %v291_v33 = vld [vmem:[%s3604_s19 + $0x16a] sm:$0xff] }
  0x59   : > { %657 = vrot.lane.b32.xlu1 %v3765_v34, %s3556_s21  ;;  %655 = vrot.lane.b32.xlu0 %v3768_v35, %s3556_s21 }
  0x5d   : > { %661 = vrot.lane.b32.xlu1 %v3775_v36, %s3556_s21  ;;  %659 = vrot.lane.b32.xlu0 %v3778_v37, %s3556_s21 }
  0x61   : > { %665 = vrot.lane.b32.xlu1 %v3785_v38, %s3556_s21  ;;  %663 = vrot.lane.b32.xlu0 %v3788_v39, %s3556_s21 }
  0x65   : > { %669 = vrot.lane.b32.xlu1 %v3795_v40, %s3556_s21  ;;  %667 = vrot.lane.b32.xlu0 %v3798_v41, %s3556_s21 }
  0x69   : > { %673 = vrot.lane.b32.xlu1 %v3805_v42, %s3556_s21  ;;  %671 = vrot.lane.b32.xlu0 %v3808_v43, %s3556_s21 }
  0x6d   : > { %677 = vrot.lane.b32.xlu1 %v3815_v44, %s3556_s21  ;;  %675 = vrot.lane.b32.xlu0 %v3818_v45, %s3556_s21 }
  0x71   : > { %681 = vrot.lane.b32.xlu1 %v3825_v46, %s3556_s21  ;;  %679 = vrot.lane.b32.xlu0 %v3828_v47, %s3556_s21 }
  0x75   : > { %685 = vrot.lane.b32.xlu1 %v3835_v48, %s3556_s21  ;;  %683 = vrot.lane.b32.xlu0 %v3838_v49, %s3556_s21 }
  0x79   : > { %689 = vrot.lane.b32.xlu1 %v3845_v50, %s3556_s21  ;;  %687 = vrot.lane.b32.xlu0 %v3848_v51, %s3556_s21 }
  0x7d   : > { %693 = vrot.lane.b32.xlu1 %v3855_v52, %s3556_s21  ;;  %691 = vrot.lane.b32.xlu0 %v3858_v53, %s3556_s21 }
  0x81   : > { %697 = vrot.lane.b32.xlu1 %v3865_v54, %s3556_s21  ;;  %695 = vrot.lane.b32.xlu0 %v3868_v55, %s3556_s21 }
  0x85   : > { %701 = vrot.lane.b32.xlu1 %v3875_v56, %s3556_s21  ;;  %699 = vrot.lane.b32.xlu0 %v3878_v57, %s3556_s21 }
  0x87   : > { %v3890_v60 = vpop.permute.xlu1 %527  ;;  %v3892_v61 = vpop.permute.xlu0 %523 }
  0x88   : > { %5673 = vst [vmem:[#allocation4_spill] sm:$0xff] %v3890_v60  ;;  %5674 = vst [vmem:[#allocation5_spill] sm:$0xff] %v3892_v61 }
  0x89   : > { %705 = vrot.lane.b32.xlu1 %v3885_v58, %s3556_s21  ;;  %703 = vrot.lane.b32.xlu0 %v3888_v59, %s3556_s21  ;;  %v225_v59 = vld [vmem:[%s3604_s19 + $0x150] sm:$0xff]  ;;  %v227_v58 = vld [vmem:[%s3604_s19 + $0x168] sm:$0xff] }
  0x8b   : > { %v3900_v1 = vpop.permute.xlu1 %529  ;;  %v3902_v3 = vpop.permute.xlu0 %525 }
  0x8c   : > { %5675 = vst [vmem:[#allocation6_spill] sm:$0xff] %v3900_v1  ;;  %5676 = vst [vmem:[#allocation7_spill] sm:$0xff] %v3902_v3 }
  0x8d   : > { %709 = vrot.lane.b32.xlu1 %v290_v62, %s3556_s21  ;;  %707 = vrot.lane.b32.xlu0 %v289_v63, %s3556_s21  ;;  %v3919_v62 = vld [vmem:[%s3604_s19 + $0x18] sm:$0xff]  ;;  %v3922_v63 = vld [vmem:[%s3604_s19 + $0x20] sm:$0xff] }
  0x8e   : > { %5681 = vst [vmem:[#allocation12_spill] sm:$0xff] %v3919_v62  ;;  %5682 = vst [vmem:[#allocation13_spill] sm:$0xff] %v3922_v63 }
  0x8f   : > { %v3908_v60 = vpop.permute.xlu1 %533  ;;  %v3910_v61 = vpop.permute.xlu0 %531 }
  0x90   : > { %5677 = vst [vmem:[#allocation8_spill] sm:$0xff] %v3908_v60  ;;  %5678 = vst [vmem:[#allocation9_spill] sm:$0xff] %v3910_v61 }
  0x91   : > { %713 = vrot.lane.b32.xlu1 %v292_v32, %s3556_s21  ;;  %711 = vrot.lane.b32.xlu0 %v291_v33, %s3556_s21 }
  0x93   : > { %v3914_v1 = vpop.permute.xlu1 %537  ;;  %v3916_v3 = vpop.permute.xlu0 %535 }
  0x94   : > { %5679 = vst [vmem:[#allocation10_spill] sm:$0xff] %v3914_v1  ;;  %5680 = vst [vmem:[#allocation11_spill] sm:$0xff] %v3916_v3  ;;  %v3933_v1 = vld [vmem:[%s3604_s19 + $0x38] sm:$0xff]  ;;  %v3936_v3 = vld [vmem:[%s3604_s19 + $0x30] sm:$0xff] }
  0x95   : > { %781 = vrot.lane.b32.xlu1 %v3922_v63, %s3557_s22  ;;  %779 = vrot.lane.b32.xlu0 %v3919_v62, %s3557_s22  ;;  %5685 = vst [vmem:[#allocation16_spill] sm:$0xff] %v3933_v1  ;;  %5686 = vst [vmem:[#allocation17_spill] sm:$0xff] %v3936_v3  ;;  %v3947_v63 = vld [vmem:[%s3604_s19 + $0x50] sm:$0xff] }
  0x96   : > { %5689 = vst [vmem:[#allocation20_spill] sm:$0xff] %v3947_v63 }
  0x97   : > { %v3928_v32 = vpop.permute.xlu1 %541  ;;  %v3930_v33 = vpop.permute.xlu0 %539 }
  0x98   : > { %5683 = vst [vmem:[#allocation14_spill] sm:$0xff] %v3928_v32  ;;  %5684 = vst [vmem:[#allocation15_spill] sm:$0xff] %v3930_v33  ;;  %v3950_v32 = vld [vmem:[%s3604_s19 + $0x48] sm:$0xff] }
  0x99   : > { %785 = vrot.lane.b32.xlu1 %v3933_v1, %s3557_s22  ;;  %783 = vrot.lane.b32.xlu0 %v3936_v3, %s3557_s22  ;;  %5690 = vst [vmem:[#allocation21_spill] sm:$0xff] %v3950_v32  ;;  %v3961_v3 = vld [vmem:[%s3604_s19 + $0x68] sm:$0xff]  ;;  %v226_v1 = vld [vmem:[%s3604_s19 + $0x158] sm:$0xff] }
  0x9a   : > { %5693 = vst [vmem:[#allocation24_spill] sm:$0xff] %v3961_v3 }
  0x9b   : > { %v3942_v61 = vpop.permute.xlu1 %545  ;;  %v3944_v60 = vpop.permute.xlu0 %543 }
  0x9c   : > { %5687 = vst [vmem:[#allocation18_spill] sm:$0xff] %v3942_v61  ;;  %5688 = vst [vmem:[#allocation19_spill] sm:$0xff] %v3944_v60  ;;  %v3964_v61 = vld [vmem:[%s3604_s19 + $0x60] sm:$0xff] }
  0x9d   : > { %789 = vrot.lane.b32.xlu1 %v3947_v63, %s3557_s22  ;;  %787 = vrot.lane.b32.xlu0 %v3950_v32, %s3557_s22  ;;  %5694 = vst [vmem:[#allocation25_spill] sm:$0xff] %v3964_v61  ;;  %v3975_v63 = vld [vmem:[%s3604_s19 + $0x80] sm:$0xff] }
  0x9e   : > { %5697 = vst [vmem:[#allocation28_spill] sm:$0xff] %v3975_v63 }
  0x9f   : > { %v3956_v33 = vpop.permute.xlu1 %549  ;;  %v3958_v62 = vpop.permute.xlu0 %547 }
  0xa0   : > { %5691 = vst [vmem:[#allocation22_spill] sm:$0xff] %v3956_v33  ;;  %5692 = vst [vmem:[#allocation23_spill] sm:$0xff] %v3958_v62  ;;  %v3978_v33 = vld [vmem:[%s3604_s19 + $0x78] sm:$0xff] }
  0xa1   : > { %793 = vrot.lane.b32.xlu1 %v3961_v3, %s3557_s22  ;;  %791 = vrot.lane.b32.xlu0 %v3964_v61, %s3557_s22  ;;  %5698 = vst [vmem:[#allocation29_spill] sm:$0xff] %v3978_v33  ;;  %v3989_v3 = vld [vmem:[%s3604_s19 + $0x98] sm:$0xff] }
  0xa2   : > { %5701 = vst [vmem:[#allocation32_spill] sm:$0xff] %v3989_v3 }
  0xa3   : > { %v3970_v60 = vpop.permute.xlu1 %553  ;;  %v3972_v32 = vpop.permute.xlu0 %551 }
  0xa4   : > { %5695 = vst [vmem:[#allocation26_spill] sm:$0xff] %v3970_v60  ;;  %5696 = vst [vmem:[#allocation27_spill] sm:$0xff] %v3972_v32  ;;  %v3992_v60 = vld [vmem:[%s3604_s19 + $0x90] sm:$0xff] }
  0xa5   : > { %797 = vrot.lane.b32.xlu1 %v3975_v63, %s3557_s22  ;;  %795 = vrot.lane.b32.xlu0 %v3978_v33, %s3557_s22  ;;  %5702 = vst [vmem:[#allocation33_spill] sm:$0xff] %v3992_v60  ;;  %v4003_v63 = vld [vmem:[%s3604_s19 + $0xb0] sm:$0xff] }
  0xa6   : > { %5705 = vst [vmem:[#allocation36_spill] sm:$0xff] %v4003_v63 }
  0xa7   : > { %v3984_v62 = vpop.permute.xlu1 %557  ;;  %v3986_v61 = vpop.permute.xlu0 %555 }
  0xa8   : > { %5699 = vst [vmem:[#allocation30_spill] sm:$0xff] %v3984_v62  ;;  %5700 = vst [vmem:[#allocation31_spill] sm:$0xff] %v3986_v61  ;;  %v4006_v62 = vld [vmem:[%s3604_s19 + $0xa8] sm:$0xff] }
  0xa9   : > { %801 = vrot.lane.b32.xlu1 %v3989_v3, %s3557_s22  ;;  %799 = vrot.lane.b32.xlu0 %v3992_v60, %s3557_s22  ;;  %5706 = vst [vmem:[#allocation37_spill] sm:$0xff] %v4006_v62  ;;  %v4017_v3 = vld [vmem:[%s3604_s19 + $0xc8] sm:$0xff] }
  0xaa   : > { %5709 = vst [vmem:[#allocation40_spill] sm:$0xff] %v4017_v3 }
  0xab   : > { %v3998_v32 = vpop.permute.xlu1 %561  ;;  %v4000_v33 = vpop.permute.xlu0 %559 }
  0xac   : > { %5703 = vst [vmem:[#allocation34_spill] sm:$0xff] %v3998_v32  ;;  %5704 = vst [vmem:[#allocation35_spill] sm:$0xff] %v4000_v33  ;;  %v4020_v32 = vld [vmem:[%s3604_s19 + $0xc0] sm:$0xff] }
  0xad   : > { %805 = vrot.lane.b32.xlu1 %v4003_v63, %s3557_s22  ;;  %803 = vrot.lane.b32.xlu0 %v4006_v62, %s3557_s22  ;;  %5710 = vst [vmem:[#allocation41_spill] sm:$0xff] %v4020_v32  ;;  %v4031_v63 = vld [vmem:[%s3604_s19 + $0xe0] sm:$0xff] }
  0xae   : > { %5713 = vst [vmem:[#allocation44_spill] sm:$0xff] %v4031_v63 }
  0xaf   : > { %v4012_v61 = vpop.permute.xlu1 %565  ;;  %v4014_v60 = vpop.permute.xlu0 %563 }
  0xb0   : > { %5707 = vst [vmem:[#allocation38_spill] sm:$0xff] %v4012_v61  ;;  %5708 = vst [vmem:[#allocation39_spill] sm:$0xff] %v4014_v60  ;;  %v4034_v61 = vld [vmem:[%s3604_s19 + $0xd8] sm:$0xff] }
  0xb1   : > { %809 = vrot.lane.b32.xlu1 %v4017_v3, %s3557_s22  ;;  %807 = vrot.lane.b32.xlu0 %v4020_v32, %s3557_s22  ;;  %5714 = vst [vmem:[#allocation45_spill] sm:$0xff] %v4034_v61  ;;  %v4045_v3 = vld [vmem:[%s3604_s19 + $0xf8] sm:$0xff] }
  0xb2   : > { %5717 = vst [vmem:[#allocation48_spill] sm:$0xff] %v4045_v3 }
  0xb3   : > { %v4026_v33 = vpop.permute.xlu1 %569  ;;  %v4028_v62 = vpop.permute.xlu0 %567 }
  0xb4   : > { %5711 = vst [vmem:[#allocation42_spill] sm:$0xff] %v4026_v33  ;;  %5712 = vst [vmem:[#allocation43_spill] sm:$0xff] %v4028_v62  ;;  %v4048_v33 = vld [vmem:[%s3604_s19 + $0xf0] sm:$0xff] }
  0xb5   : > { %813 = vrot.lane.b32.xlu1 %v4031_v63, %s3557_s22  ;;  %811 = vrot.lane.b32.xlu0 %v4034_v61, %s3557_s22  ;;  %5718 = vst [vmem:[#allocation49_spill] sm:$0xff] %v4048_v33  ;;  %v4059_v63 = vld [vmem:[%s3604_s19 + $0x110] sm:$0xff] }
  0xb6   : > { %5721 = vst [vmem:[#allocation52_spill] sm:$0xff] %v4059_v63 }
  0xb7   : > { %v4040_v60 = vpop.permute.xlu1 %573  ;;  %v4042_v32 = vpop.permute.xlu0 %571 }
  0xb8   : > { %5715 = vst [vmem:[#allocation46_spill] sm:$0xff] %v4040_v60  ;;  %5716 = vst [vmem:[#allocation47_spill] sm:$0xff] %v4042_v32  ;;  %v4062_v60 = vld [vmem:[%s3604_s19 + $0x108] sm:$0xff] }
  0xb9   : > { %817 = vrot.lane.b32.xlu1 %v4045_v3, %s3557_s22  ;;  %815 = vrot.lane.b32.xlu0 %v4048_v33, %s3557_s22  ;;  %5722 = vst [vmem:[#allocation53_spill] sm:$0xff] %v4062_v60  ;;  %v4073_v3 = vld [vmem:[%s3604_s19 + $0x128] sm:$0xff] }
  0xba   : > { %5725 = vst [vmem:[#allocation56_spill] sm:$0xff] %v4073_v3 }
  0xbb   : > { %v4054_v62 = vpop.permute.xlu1 %577  ;;  %v4056_v61 = vpop.permute.xlu0 %575 }
  0xbc   : > { %5719 = vst [vmem:[#allocation50_spill] sm:$0xff] %v4054_v62  ;;  %5720 = vst [vmem:[#allocation51_spill] sm:$0xff] %v4056_v61  ;;  %v4076_v62 = vld [vmem:[%s3604_s19 + $0x120] sm:$0xff] }
  0xbd   : > { %821 = vrot.lane.b32.xlu1 %v4059_v63, %s3557_s22  ;;  %819 = vrot.lane.b32.xlu0 %v4062_v60, %s3557_s22  ;;  %5726 = vst [vmem:[#allocation57_spill] sm:$0xff] %v4076_v62  ;;  %v224_v63 = vld [vmem:[%s3604_s19 + $0x140] sm:$0xff] }
  0xbf   : > { %v4068_v32 = vpop.permute.xlu1 %581  ;;  %v4070_v33 = vpop.permute.xlu0 %579 }
  0xc0   : > { %5723 = vst [vmem:[#allocation54_spill] sm:$0xff] %v4068_v32  ;;  %5724 = vst [vmem:[#allocation55_spill] sm:$0xff] %v4070_v33  ;;  %v223_v32 = vld [vmem:[%s3604_s19 + $0x138] sm:$0xff] }
  0xc1   : > { %825 = vrot.lane.b32.xlu1 %v4073_v3, %s3557_s22  ;;  %823 = vrot.lane.b32.xlu0 %v4076_v62, %s3557_s22  ;;  %v228_v62 = vld [vmem:[%s3604_s19 + $0x170] sm:$0xff] }
  0xc3   : > { %v4082_v61 = vpop.permute.xlu1 %585  ;;  %v4084_v60 = vpop.permute.xlu0 %583 }
  0xc4   : > { %5727 = vst [vmem:[#allocation58_spill] sm:$0xff] %v4082_v61  ;;  %5728 = vst [vmem:[#allocation59_spill] sm:$0xff] %v4084_v60 }
  0xc5   : > { %829 = vrot.lane.b32.xlu1 %v224_v63, %s3557_s22  ;;  %827 = vrot.lane.b32.xlu0 %v223_v32, %s3557_s22  ;;  %v3012_v63 = vld [vmem:[%s3604_s19 + $0x188] sm:$0xff]  ;;  %v3011_v32 = vld [vmem:[%s3604_s19 + $0x180] sm:$0xff] }
  0xc7   : > { %v4090_v33 = vpop.permute.xlu1 %653  ;;  %v4092_v3 = vpop.permute.xlu0 %651 }
  0xc8   : > { %5729 = vst [vmem:[#allocation60_spill] sm:$0xff] %v4090_v33  ;;  %5730 = vst [vmem:[#allocation61_spill] sm:$0xff] %v4092_v3 }
  0xc9   : > { %833 = vrot.lane.b32.xlu1 %v226_v1, %s3557_s22  ;;  %831 = vrot.lane.b32.xlu0 %v225_v59, %s3557_s22 }
  0xcb   : > { %v4098_v61 = vpop.permute.xlu1 %657  ;;  %v4100_v60 = vpop.permute.xlu0 %655 }
  0xcd   : > { %837 = vrot.lane.b32.xlu1 %v228_v62, %s3557_s22  ;;  %835 = vrot.lane.b32.xlu0 %v227_v58, %s3557_s22 }
  0xcf   : > { %v4108_v33 = vpop.permute.xlu1 %661  ;;  %v4110_v3 = vpop.permute.xlu0 %659 }
  0xd1   : > { %841 = vrot.lane.b32.xlu1 %v3012_v63, %s3557_s22  ;;  %839 = vrot.lane.b32.xlu0 %v3011_v32, %s3557_s22 }
  0xd3   : > { %v4114_v59 = vpop.permute.xlu1 %665  ;;  %v4116_v1 = vpop.permute.xlu0 %663 }
  0xd4   : > { %5731 = vst [vmem:[#allocation62_spill] sm:$0xff] %v4116_v1 }
  0xd5   : > { %909 = vrot.lane.b32.xlu1 %v3614_v2, %s3558_s23  ;;  %907 = vrot.lane.b32.xlu0 %v3607_v0, %s3558_s23 }
  0xd7   : > { %v4122_v58 = vpop.permute.xlu1 %669  ;;  %v4124_v62 = vpop.permute.xlu0 %667 }
  0xd8   : > { %5732 = vst [vmem:[#allocation63_spill] sm:$0xff] %v4122_v58  ;;  %5733 = vst [vmem:[#allocation64_spill] sm:$0xff] %v4124_v62 }
  0xd9   : > { %913 = vrot.lane.b32.xlu1 %v3621_v4, %s3558_s23  ;;  %911 = vrot.lane.b32.xlu0 %v3624_v5, %s3558_s23 }
  0xdb   : > { %v4130_v63 = vpop.permute.xlu1 %673  ;;  %v4132_v32 = vpop.permute.xlu0 %671 }
  0xdc   : > { %5734 = vst [vmem:[#allocation65_spill] sm:$0xff] %v4130_v63  ;;  %5735 = vst [vmem:[#allocation66_spill] sm:$0xff] %v4132_v32 }
  0xdd   : > { %917 = vrot.lane.b32.xlu1 %v3631_v6, %s3558_s23  ;;  %915 = vrot.lane.b32.xlu0 %v3634_v7, %s3558_s23 }
  0xdf   : > { %v4138_v1 = vpop.permute.xlu1 %677  ;;  %v4140_v58 = vpop.permute.xlu0 %675 }
  0xe0   : > { %5736 = vst [vmem:[#allocation67_spill] sm:$0xff] %v4138_v1  ;;  %5737 = vst [vmem:[#allocation68_spill] sm:$0xff] %v4140_v58 }
  0xe1   : > { %921 = vrot.lane.b32.xlu1 %v3641_v8, %s3558_s23  ;;  %919 = vrot.lane.b32.xlu0 %v3644_v9, %s3558_s23 }
  0xe3   : > { %v4146_v62 = vpop.permute.xlu1 %681  ;;  %v4148_v63 = vpop.permute.xlu0 %679 }
  0xe4   : > { %5738 = vst [vmem:[#allocation69_spill] sm:$0xff] %v4146_v62 }
  0xe5   : > { %925 = vrot.lane.b32.xlu1 %v3651_v10, %s3558_s23  ;;  %923 = vrot.lane.b32.xlu0 %v3654_v11, %s3558_s23 }
  0xe7   : > { %v4154_v32 = vpop.permute.xlu1 %685  ;;  %v4156_v1 = vpop.permute.xlu0 %683 }
  0xe8   : > { %5739 = vst [vmem:[#allocation70_spill] sm:$0xff] %v4154_v32 }
  0xe9   : > { %929 = vrot.lane.b32.xlu1 %v3661_v12, %s3558_s23  ;;  %927 = vrot.lane.b32.xlu0 %v3664_v13, %s3558_s23 }
  0xeb   : > { %v4162_v58 = vpop.permute.xlu1 %689  ;;  %v4164_v62 = vpop.permute.xlu0 %687 }
  0xec   : > { %5740 = vst [vmem:[#allocation71_spill] sm:$0xff] %v4162_v58  ;;  %5741 = vst [vmem:[#allocation72_spill] sm:$0xff] %v4164_v62 }
  0xed   : > { %933 = vrot.lane.b32.xlu1 %v3671_v14, %s3558_s23  ;;  %931 = vrot.lane.b32.xlu0 %v3674_v15, %s3558_s23 }
  0xef   : > { %v4170_v10 = vpop.permute.xlu1 %693  ;;  %v4172_v32 = vpop.permute.xlu0 %691 }
  0xf0   : > { %5742 = vst [vmem:[#allocation73_spill] sm:$0xff] %v4170_v10  ;;  %5743 = vst [vmem:[#allocation74_spill] sm:$0xff] %v4172_v32 }
  0xf1   : > { %937 = vrot.lane.b32.xlu1 %v3681_v16, %s3558_s23  ;;  %935 = vrot.lane.b32.xlu0 %v3684_v17, %s3558_s23 }
  0xf3   : > { %v4178_v12 = vpop.permute.xlu1 %697  ;;  %v4180_v13 = vpop.permute.xlu0 %695 }
  0xf4   : > { %5744 = vst [vmem:[#allocation75_spill] sm:$0xff] %v4178_v12  ;;  %5745 = vst [vmem:[#allocation76_spill] sm:$0xff] %v4180_v13 }
  0xf5   : > { %941 = vrot.lane.b32.xlu1 %v3691_v18, %s3558_s23  ;;  %939 = vrot.lane.b32.xlu0 %v3694_v19, %s3558_s23 }
  0xf7   : > { %v4186_v14 = vpop.permute.xlu1 %701  ;;  %v4188_v15 = vpop.permute.xlu0 %699 }
  0xf8   : > { %5746 = vst [vmem:[#allocation77_spill] sm:$0xff] %v4186_v14  ;;  %5747 = vst [vmem:[#allocation78_spill] sm:$0xff] %v4188_v15 }
  0xf9   : > { %945 = vrot.lane.b32.xlu1 %v3701_v20, %s3558_s23  ;;  %943 = vrot.lane.b32.xlu0 %v3704_v21, %s3558_s23  ;;  %v2033_v20 = vld [vmem:[%s5634_s1] sm:$0xff]  ;;  %v2034_v21 = vld [vmem:[%s5634_s1 + $0x8] sm:$0xff] }
  0xfb   : > { %v4194_v16 = vpop.permute.xlu1 %705  ;;  %v4196_v17 = vpop.permute.xlu0 %703 }
  0xfc   : > { %5748 = vst [vmem:[#allocation79_spill] sm:$0xff] %v4194_v16  ;;  %5749 = vst [vmem:[#allocation80_spill] sm:$0xff] %v4196_v17 }
  0xfd   : > { %949 = vrot.lane.b32.xlu1 %v3711_v22, %s3558_s23  ;;  %947 = vrot.lane.b32.xlu0 %v3714_v23, %s3558_s23  ;;  %v3422_v22 = vpack.c.bf16 %v2034_v21, %v2033_v20  ;;  %v2035_v20 = vld [vmem:[%s5634_s1 + $0x10] sm:$0xff] }
  0xfe   : > { %v3044_v21 = vld [vmem:[%s3604_s19 + $0x189] sm:$0xff] }
  0xff   : > { %v4202_v18 = vpop.permute.xlu1 %709  ;;  %v4204_v19 = vpop.permute.xlu0 %707  ;;  %3423 = vmatprep.subr.bf16.mxu0 %v3422_v22 }
 0x100   : > { %5750 = vst [vmem:[#allocation81_spill] sm:$0xff] %v4202_v18  ;;  %5751 = vst [vmem:[#allocation82_spill] sm:$0xff] %v4204_v19  ;;  %3425 = vmatpush3.bf16.msra.mxu0 %v3422_v22  ;;  %v3043_v22 = vld [vmem:[%s3604_s19 + $0x181] sm:$0xff] }
 0x101   : > { %953 = vrot.lane.b32.xlu1 %v3721_v24, %s3558_s23  ;;  %951 = vrot.lane.b32.xlu0 %v3724_v25, %s3558_s23 }
 0x102   : > { %3318 = vmatprep.subr.mxu0 %v2035_v20 }
 0x103   : > { %v4216_v23 = vpop.permute.xlu1 %713  ;;  %v4218_v18 = vpop.permute.xlu0 %711 }
 0x104   : > { %5752 = vst [vmem:[#allocation83_spill] sm:$0xff] %v4216_v23  ;;  %5753 = vst [vmem:[#allocation84_spill] sm:$0xff] %v4218_v18  ;;  %3319 = vmatpush3.msra.mxu0 %v2035_v20 }
 0x105   : > { %957 = vrot.lane.b32.xlu1 %v3731_v26, %s3558_s23  ;;  %955 = vrot.lane.b32.xlu0 %v3734_v27, %s3558_s23 }
 0x107   : > { %v4224_v24 = vpop.permute.xlu1 %781  ;;  %v4226_v25 = vpop.permute.xlu0 %779 }
 0x109   : > { %961 = vrot.lane.b32.xlu1 %v3741_v28, %s3558_s23  ;;  %959 = vrot.lane.b32.xlu0 %v3744_v29, %s3558_s23 }
 0x10b   : > { %v4235_v26 = vpop.permute.xlu1 %785  ;;  %v4237_v27 = vpop.permute.xlu0 %783 }
 0x10d   : > { %965 = vrot.lane.b32.xlu1 %v3751_v30, %s3558_s23  ;;  %963 = vrot.lane.b32.xlu0 %v3754_v31, %s3558_s23 }
 0x10f   : > { %v4245_v18 = vpop.permute.xlu1 %789  ;;  %v4247_v23 = vpop.permute.xlu0 %787 }
 0x111   : > { %969 = vrot.lane.b32.xlu1 %v3044_v21, %s3558_s23  ;;  %967 = vrot.lane.b32.xlu0 %v3043_v22, %s3558_s23 }
 0x113   : > { %v4251_v28 = vpop.permute.xlu1 %793  ;;  %v4253_v29 = vpop.permute.xlu0 %791 }
 0x115   : > { %1037 = vrot.lane.b32.xlu1 %v3765_v34, %s3559_s30  ;;  %1035 = vrot.lane.b32.xlu0 %v3768_v35, %s3559_s30 }
 0x117   : > { %v4259_v30 = vpop.permute.xlu1 %797  ;;  %v4261_v31 = vpop.permute.xlu0 %795 }
 0x119   : > { %1041 = vrot.lane.b32.xlu1 %v3775_v36, %s3559_s30  ;;  %1039 = vrot.lane.b32.xlu0 %v3778_v37, %s3559_s30 }
 0x11b   : > { %v4267_v20 = vpop.permute.xlu1 %801  ;;  %v4269_v21 = vpop.permute.xlu0 %799 }
 0x11d   : > { %1045 = vrot.lane.b32.xlu1 %v3785_v38, %s3559_s30  ;;  %1043 = vrot.lane.b32.xlu0 %v3788_v39, %s3559_s30 }
 0x11f   : > { %v4275_v22 = vpop.permute.xlu1 %805  ;;  %v4277_v19 = vpop.permute.xlu0 %803 }
 0x121   : > { %1049 = vrot.lane.b32.xlu1 %v3795_v40, %s3559_s30  ;;  %1047 = vrot.lane.b32.xlu0 %v3798_v41, %s3559_s30 }
 0x123   : > { %v4283_v17 = vpop.permute.xlu1 %809  ;;  %v4285_v16 = vpop.permute.xlu0 %807 }
 0x125   : > { %1053 = vrot.lane.b32.xlu1 %v3805_v42, %s3559_s30  ;;  %1051 = vrot.lane.b32.xlu0 %v3808_v43, %s3559_s30 }
 0x127   : > { %v4291_v15 = vpop.permute.xlu1 %813  ;;  %v4293_v14 = vpop.permute.xlu0 %811 }
 0x128   : > { %5754 = vst [vmem:[#allocation85_spill] sm:$0xff] %v4291_v15  ;;  %5755 = vst [vmem:[#allocation86_spill] sm:$0xff] %v4293_v14 }
 0x129   : > { %1057 = vrot.lane.b32.xlu1 %v3815_v44, %s3559_s30  ;;  %1055 = vrot.lane.b32.xlu0 %v3818_v45, %s3559_s30 }
 0x12b   : > { %v4299_v13 = vpop.permute.xlu1 %817  ;;  %v4301_v12 = vpop.permute.xlu0 %815 }
 0x12c   : > { %5756 = vst [vmem:[#allocation87_spill] sm:$0xff] %v4299_v13  ;;  %5757 = vst [vmem:[#allocation88_spill] sm:$0xff] %v4301_v12 }
 0x12d   : > { %1061 = vrot.lane.b32.xlu1 %v3825_v46, %s3559_s30  ;;  %1059 = vrot.lane.b32.xlu0 %v3828_v47, %s3559_s30 }
 0x12f   : > { %v4307_v32 = vpop.permute.xlu1 %821  ;;  %v4309_v10 = vpop.permute.xlu0 %819 }
 0x130   : > { %5758 = vst [vmem:[#allocation89_spill] sm:$0xff] %v4307_v32  ;;  %5759 = vst [vmem:[#allocation90_spill] sm:$0xff] %v4309_v10  ;;  %v3111_v10 = vld [vmem:[%s3604_s19 + $0x49] sm:$0xff] }
 0x131   : > { %1065 = vrot.lane.b32.xlu1 %v3835_v48, %s3559_s30  ;;  %1063 = vrot.lane.b32.xlu0 %v3838_v49, %s3559_s30 }
 0x133   : > { %v4315_v44 = vpop.permute.xlu1 %825  ;;  %v4317_v45 = vpop.permute.xlu0 %823 }
 0x134   : > { %5760 = vst [vmem:[#allocation91_spill] sm:$0xff] %v4315_v44  ;;  %5761 = vst [vmem:[#allocation92_spill] sm:$0xff] %v4317_v45 }
 0x135   : > { %1069 = vrot.lane.b32.xlu1 %v3845_v50, %s3559_s30  ;;  %1067 = vrot.lane.b32.xlu0 %v3848_v51, %s3559_s30 }
 0x137   : > { %v4323_v46 = vpop.permute.xlu1 %829  ;;  %v4325_v47 = vpop.permute.xlu0 %827 }
 0x138   : > { %5762 = vst [vmem:[#allocation93_spill] sm:$0xff] %v4323_v46  ;;  %5763 = vst [vmem:[#allocation94_spill] sm:$0xff] %v4325_v47 }
 0x139   : > { %1073 = vrot.lane.b32.xlu1 %v3855_v52, %s3559_s30  ;;  %1071 = vrot.lane.b32.xlu0 %v3858_v53, %s3559_s30 }
 0x13b   : > { %v4331_v48 = vpop.permute.xlu1 %833  ;;  %v4333_v49 = vpop.permute.xlu0 %831 }
 0x13c   : > { %5764 = vst [vmem:[#allocation95_spill] sm:$0xff] %v4331_v48  ;;  %5765 = vst [vmem:[#allocation96_spill] sm:$0xff] %v4333_v49  ;;  %v5770_v49 = vld [vmem:[#allocation2_spill] sm:$0xff] }
 0x13d   : > { %1077 = vrot.lane.b32.xlu1 %v3865_v54, %s3559_s30  ;;  %1075 = vrot.lane.b32.xlu0 %v3868_v55, %s3559_s30  ;;  %v5771_v54 = vld [vmem:[#allocation3_spill] sm:$0xff] }
 0x13f   : > { %v4339_v50 = vpop.permute.xlu1 %837  ;;  %v4341_v51 = vpop.permute.xlu0 %835 }
 0x140   : > { %5766 = vst [vmem:[#allocation97_spill] sm:$0xff] %v4339_v50  ;;  %5767 = vst [vmem:[#allocation98_spill] sm:$0xff] %v4341_v51  ;;  %v3109_v50 = vld [vmem:[%s3604_s19 + $0x31] sm:$0xff] }
 0x141   : > { %1081 = vrot.lane.b32.xlu1 %v3875_v56, %s3559_s30  ;;  %1079 = vrot.lane.b32.xlu0 %v3878_v57, %s3559_s30 }
 0x143   : > { %v4347_v52 = vpop.permute.xlu1 %841  ;;  %v4349_v53 = vpop.permute.xlu0 %839 }
 0x144   : > { %5768 = vst [vmem:[#allocation99_spill] sm:$0xff] %v4347_v52  ;;  %5769 = vst [vmem:[#allocation100_spill] sm:$0xff] %v4349_v53  ;;  %v5772_v52 = vld [vmem:[#allocation16_spill] sm:$0xff] }
 0x145   : > { %1085 = vrot.lane.b32.xlu1 %v5770_v49, %s3559_s30  ;;  %1083 = vrot.lane.b32.xlu0 %v5771_v54, %s3559_s30  ;;  %v3206_v49 = vld [vmem:[%s5634_s1 + $0x18] sm:$0xff] }
 0x147   : > { %v4355_v55 = vpop.permute.xlu1 %909  ;;  %v4357_v51 = vpop.permute.xlu0 %907 }
 0x149   : > { %1298 = vrot.lane.b32.xlu1 %v3614_v2, %s3555_s20  ;;  %1296 = vrot.lane.b32.xlu0 %v3607_v0, %s3555_s20  ;;  %v3207_v2 = vld [vmem:[%s5634_s1 + $0x20] sm:$0xff] }
 0x14a   : > { %v3426_v53 = vpack.c.bf16 %v3207_v2, %v3206_v49  ;;  %v3110_v49 = vld [vmem:[%s3604_s19 + $0x39] sm:$0xff] }
 0x14b   : > { %v4363_v56 = vpop.permute.xlu1 %913  ;;  %v4365_v57 = vpop.permute.xlu0 %911 }
 0x14c   : > { %3427 = vmatprep.subr.bf16.mxu1 %v3426_v53 }
 0x14d   : > { %1394 = vrot.lane.b32.xlu1 %v3765_v34, %s3556_s21  ;;  %1392 = vrot.lane.b32.xlu0 %v3768_v35, %s3556_s21  ;;  %v5773_v34 = vld [vmem:[#allocation17_spill] sm:$0xff]  ;;  %v3208_v35 = vld [vmem:[%s5634_s1 + $0x28] sm:$0xff] }
 0x14e   : > { %3429 = vmatpush3.bf16.msra.mxu1 %v3426_v53 }
 0x14f   : > { %v4377_v0 = vpop.permute.xlu1 %917  ;;  %v4379_v54 = vpop.permute.xlu0 %915  ;;  %3372 = vmatprep.subr.mxu1 %v3208_v35 }
 0x151   : > { %1522 = vrot.lane.b32.xlu1 %v5772_v52, %s3557_s22  ;;  %1520 = vrot.lane.b32.xlu0 %v5773_v34, %s3557_s22 }
 0x152   : > { %3373 = vmatpush3.msra.mxu1 %v3208_v35 }
 0x153   : > { %v4389_v48 = vpop.permute.xlu1 %921  ;;  %v4391_v47 = vpop.permute.xlu0 %919 }
 0x155   : > { %1300 = vrot.lane.b32.xlu1 %v3624_v5, %s3555_s20  ;;  %1648 = vrot.lane.b32.xlu0 %v3109_v50, %s3558_s23  ;;  %v3142_v5 = vld [vmem:[%s3604_s19 + $0x3a] sm:$0xff] }
 0x157   : > { %v4397_v2 = vpop.permute.xlu1 %925  ;;  %v4399_v46 = vpop.permute.xlu0 %923 }
 0x159   : > { %1776 = vrot.lane.b32.xlu1 %v3778_v37, %s3559_s30  ;;  %1650 = vrot.lane.b32.xlu0 %v3110_v49, %s3558_s23 }
 0x15b   : > { %v4404_v45 = vpop.permute.xlu1 %929  ;;  %v4406_v53 = vpop.permute.xlu0 %927 }
 0x15d   : > { %1396 = vrot.lane.b32.xlu1 %v3778_v37, %s3556_s21  ;;  %1302 = vrot.lane.b32.xlu0 %v3621_v4, %s3555_s20  ;;  %v5774_v37 = vld [vmem:[#allocation20_spill] sm:$0xff]  ;;  %v5775_v4 = vld [vmem:[#allocation21_spill] sm:$0xff] }
 0x15f   : > { %v4413_v50 = vpop.permute.xlu1 %933  ;;  %v4415_v35 = vpop.permute.xlu0 %931 }
 0x161   : > { %1398 = vrot.lane.b32.xlu1 %v3775_v36, %s3556_s21  ;;  %1778 = vrot.lane.b32.xlu0 %v3142_v5, %s3559_s30  ;;  %v3143_v36 = vld [vmem:[%s3604_s19 + $0x4a] sm:$0xff] }
 0x162   : > { %v3112_v5 = vld [vmem:[%s3604_s19 + $0x51] sm:$0xff] }
 0x163   : > { %v4420_v49 = vpop.permute.xlu1 %937  ;;  %v4422_v44 = vpop.permute.xlu0 %935 }
 0x165   : > { %1526 = vrot.lane.b32.xlu1 %v5774_v37, %s3557_s22  ;;  %1524 = vrot.lane.b32.xlu0 %v5775_v4, %s3557_s22 }
 0x167   : > { %v4429_v32 = vpop.permute.xlu1 %941  ;;  %v4431_v12 = vpop.permute.xlu0 %939 }
 0x168   : > { %5776 = vst [vmem:[#allocation2_spill] sm:$0xff] %v4429_v32  ;;  %5777 = vst [vmem:[#allocation3_spill] sm:$0xff] %v4431_v12  ;;  %v5795_v12 = vld [vmem:[#allocation60_spill] sm:$0xff] }
 0x169   : > { %1304 = vrot.lane.b32.xlu1 %v3634_v7, %s3555_s20  ;;  %1652 = vrot.lane.b32.xlu0 %v3111_v10, %s3558_s23  ;;  %v3144_v7 = vld [vmem:[%s3604_s19 + $0x52] sm:$0xff] }
 0x16b   : > { %v4438_v13 = vpop.permute.xlu1 %945  ;;  %v4440_v62 = vpop.permute.xlu0 %943 }
 0x16c   : > { %5778 = vst [vmem:[#allocation16_spill] sm:$0xff] %v4438_v13  ;;  %5779 = vst [vmem:[#allocation17_spill] sm:$0xff] %v4440_v62  ;;  %v198_v13 = vld [vmem:[%s3604_s19 + $0x8] sm:$0xff] }
 0x16d   : > { %1780 = vrot.lane.b32.xlu1 %v3143_v36, %s3559_s30  ;;  %1654 = vrot.lane.b32.xlu0 %v3112_v5, %s3558_s23  ;;  %v5786_v5 = vld [vmem:[#allocation24_spill] sm:$0xff] }
 0x16f   : > { %v4444_v58 = vpop.permute.xlu1 %949  ;;  %v4446_v32 = vpop.permute.xlu0 %947 }
 0x170   : > { %5780 = vst [vmem:[#allocation20_spill] sm:$0xff] %v4444_v58  ;;  %5781 = vst [vmem:[#allocation21_spill] sm:$0xff] %v4446_v32  ;;  %v197_v58 = vld [vmem:[%s3604_s19] sm:$0xff] }
 0x171   : > { %1400 = vrot.lane.b32.xlu1 %v3788_v39, %s3556_s21  ;;  %1306 = vrot.lane.b32.xlu0 %v3631_v6, %s3555_s20  ;;  %v5787_v6 = vld [vmem:[#allocation25_spill] sm:$0xff] }
 0x173   : > { %v4453_v10 = vpop.permute.xlu1 %953  ;;  %v4455_v62 = vpop.permute.xlu0 %951 }
 0x174   : > { %5782 = vst [vmem:[#allocation101_spill] sm:$0xff] %v4453_v10  ;;  %5783 = vst [vmem:[#allocation102_spill] sm:$0xff] %v4455_v62  ;;  %v3113_v10 = vld [vmem:[%s3604_s19 + $0x61] sm:$0xff] }
 0x175   : > { %1402 = vrot.lane.b32.xlu1 %v3785_v38, %s3556_s21  ;;  %1782 = vrot.lane.b32.xlu0 %v3144_v7, %s3559_s30  ;;  %v3145_v38 = vld [vmem:[%s3604_s19 + $0x62] sm:$0xff] }
 0x176   : > { %v3114_v7 = vld [vmem:[%s3604_s19 + $0x69] sm:$0xff] }
 0x177   : > { %v4460_v36 = vpop.permute.xlu1 %957  ;;  %v4462_v39 = vpop.permute.xlu0 %955 }
 0x178   : > { %5784 = vst [vmem:[#allocation103_spill] sm:$0xff] %v4460_v36  ;;  %5785 = vst [vmem:[#allocation104_spill] sm:$0xff] %v4462_v39 }
 0x179   : > { %1530 = vrot.lane.b32.xlu1 %v5786_v5, %s3557_s22  ;;  %1528 = vrot.lane.b32.xlu0 %v5787_v6, %s3557_s22 }
 0x17b   : > { %v4469_v32 = vpop.permute.xlu1 %961  ;;  %v4471_v62 = vpop.permute.xlu0 %959 }
 0x17c   : > { %5788 = vst [vmem:[#allocation24_spill] sm:$0xff] %v4469_v32  ;;  %5789 = vst [vmem:[#allocation25_spill] sm:$0xff] %v4471_v62 }
 0x17d   : > { %1308 = vrot.lane.b32.xlu1 %v3644_v9, %s3555_s20  ;;  %1656 = vrot.lane.b32.xlu0 %v3113_v10, %s3558_s23  ;;  %v5793_v10 = vld [vmem:[#allocation5_spill] sm:$0xff] }
 0x17e   : > { %v1132_v32 = vsel %vm1131_vm0, %v197_v58, %v5793_v10  ;;  %v5798_v10 = vld [vmem:[#allocation12_spill] sm:$0xff] }
 0x17f   : > { %v4478_v36 = vpop.permute.xlu1 %965  ;;  %v4480_v39 = vpop.permute.xlu0 %963 }
 0x180   : > { %5790 = vst [vmem:[#allocation105_spill] sm:$0xff] %v4478_v36  ;;  %5791 = vst [vmem:[#allocation106_spill] sm:$0xff] %v4480_v39  ;;  %v5794_v36 = vld [vmem:[#allocation7_spill] sm:$0xff] }
 0x181   : > { %1784 = vrot.lane.b32.xlu1 %v3145_v38, %s3559_s30  ;;  %1658 = vrot.lane.b32.xlu0 %v3114_v7, %s3558_s23  ;;  %v1133_v39 = vsel %vm1131_vm0, %v198_v13, %v5794_v36  ;;  %v5796_v38 = vld [vmem:[#allocation61_spill] sm:$0xff]  ;;  %v3146_v36 = vld [vmem:[%s3604_s19 + $0x6a] sm:$0xff] }
 0x182   : > { %v1166_v14 = vsel %vm1164_vm1, %v1133_v39, %v5795_v12  ;;  %v1165_v15 = vsel %vm1164_vm1, %v1132_v32, %v5796_v38  ;;  %v5799_v38 = vld [vmem:[#allocation6_spill] sm:$0xff] }
 0x183   : > { %v4486_v62 = vpop.permute.xlu1 %969  ;;  %v4488_v9 = vpop.permute.xlu0 %967  ;;  %v1199_v58 = vsel %vm1197_vm2, %v1166_v14, %v4224_v24  ;;  %v1198_v13 = vsel %vm1197_vm2, %v1165_v15, %v4226_v25 }
 0x184   : > { %5792 = vst [vmem:[#allocation107_spill] sm:$0xff] %v4488_v9  ;;  %v1232_v12 = vsel %vm1230_vm3, %v1199_v58, %v4355_v55  ;;  %v1231_v32 = vsel %vm1230_vm3, %v1198_v13, %v4357_v51  ;;  %v5800_v9 = vld [vmem:[#allocation13_spill] sm:$0xff]  ;;  %v5801_v13 = vld [vmem:[#allocation8_spill] sm:$0xff] }
 0x185   : > { %1404 = vrot.lane.b32.xlu1 %v3798_v41, %s3556_s21  ;;  %1310 = vrot.lane.b32.xlu0 %v3641_v8, %s3555_s20  ;;  %v5797_v41 = vld [vmem:[#allocation4_spill] sm:$0xff]  ;;  %v1135_v14 = vsel %vm1131_vm0, %v5800_v9, %v5799_v38  ;;  %v5805_v38 = vld [vmem:[#allocation10_spill] sm:$0xff] }
 0x186   : > { %v1134_v8 = vsel %vm1131_vm0, %v5798_v10, %v5797_v41  ;;  %v1168_v25 = vsel %vm1164_vm1, %v1135_v14, %v4098_v61  ;;  %v3115_v41 = vld [vmem:[%s3604_s19 + $0x79] sm:$0xff] }
 0x187   : > { %v1038_v39 = vpop.permute.xlu1 %1037  ;;  %v1036_v7 = vpop.permute.xlu0 %1035  ;;  %v1167_v51 = vsel %vm1164_vm1, %v1134_v8, %v4100_v60  ;;  %v1201_v55 = vsel %vm1197_vm2, %v1168_v25, %v4235_v26  ;;  %v1137_v26 = vsel %vm1131_vm0, %v5772_v52, %v5801_v13 }
 0x188   : > { %v1265_v15 = vsel %vm1263_vm4, %v1232_v12, %v1038_v39  ;;  %v1264_v24 = vsel %vm1263_vm4, %v1231_v32, %v1036_v7  ;;  %v1200_v9 = vsel %vm1197_vm2, %v1167_v51, %v4237_v27  ;;  %v1234_v58 = vsel %vm1230_vm3, %v1201_v55, %v4363_v56  ;;  %v5803_v39 = vld [vmem:[#allocation28_spill] sm:$0xff]  ;;  %v5804_v7 = vld [vmem:[#allocation29_spill] sm:$0xff]  ;;  %v3116_v55 = vld [vmem:[%s3604_s19 + $0x81] sm:$0xff] }
 0x189   : > { %1406 = vrot.lane.b32.xlu1 %v3795_v40, %s3556_s21  ;;  %1786 = vrot.lane.b32.xlu0 %v3146_v36, %s3559_s30  ;;  %v1233_v60 = vsel %vm1230_vm3, %v1200_v9, %v4365_v57  ;;  %v5802_v36 = vld [vmem:[#allocation9_spill] sm:$0xff]  ;;  %v1170_v32 = vsel %vm1164_vm1, %v1137_v26, %v4108_v33 }
 0x18a   : > { %3320 = vmatprep.mubr.msk.f32.mxu0 %vm2042_vm5, %v1264_v24  ;;  %v1136_v27 = vsel %vm1131_vm0, %v5773_v34, %v5802_v36  ;;  %v1203_v52 = vsel %vm1197_vm2, %v1170_v32, %v4245_v18  ;;  %v1139_v18 = vsel %vm1131_vm0, %v5774_v37, %v5805_v38  ;;  %v5807_v24 = vld [vmem:[#allocation62_spill] sm:$0xff] }
 0x18b   : > { %3321 = vmatmul.mubr.msk.f32.vlgmr.msra.gmra.mrb[0].mxu0 %vm2042_vm5, %v1265_v15  ;;  %v1042_v40 = vpop.permute.xlu1 %1041  ;;  %v1040_v61 = vpop.permute.xlu0 %1039  ;;  %v1169_v57 = vsel %vm1164_vm1, %v1136_v27, %v4110_v3  ;;  %v1236_v33 = vsel %vm1230_vm3, %v1203_v52, %v4377_v0  ;;  %v3147_v51 = vld [vmem:[%s3604_s19 + $0x7a] sm:$0xff]  ;;  %v5813_v52 = vld [vmem:[#allocation19_spill] sm:$0xff] }
 0x18c   : > { %v1267_v12 = vsel %vm1263_vm4, %v1234_v58, %v1042_v40  ;;  %v1266_v56 = vsel %vm1263_vm4, %v1233_v60, %v1040_v61  ;;  %v1202_v34 = vsel %vm1197_vm2, %v1169_v57, %v4247_v23  ;;  %v5806_v23 = vld [vmem:[#allocation11_spill] sm:$0xff]  ;;  %v5808_v60 = vld [vmem:[#allocation14_spill] sm:$0xff] }
 0x18d   : > { %1534 = vrot.lane.b32.xlu1 %v5803_v39, %s3557_s22  ;;  %1532 = vrot.lane.b32.xlu0 %v5804_v7, %s3557_s22  ;;  %v1235_v3 = vsel %vm1230_vm3, %v1202_v34, %v4379_v54  ;;  %v1138_v14 = vsel %vm1131_vm0, %v5775_v4, %v5806_v23  ;;  %v1172_v54 = vsel %vm1164_vm1, %v1139_v18, %v4114_v59  ;;  %v5809_v40 = vld [vmem:[#allocation15_spill] sm:$0xff]  ;;  %v5812_v57 = vld [vmem:[#allocation18_spill] sm:$0xff] }
 0x18e   : > { %3323 = vmatprep.mubr.msk.f32.mxu0 %vm2042_vm5, %v1266_v56  ;;  %v1171_v25 = vsel %vm1164_vm1, %v1138_v14, %v5807_v24  ;;  %v1205_v37 = vsel %vm1197_vm2, %v1172_v54, %v4251_v28  ;;  %v1141_v28 = vsel %vm1131_vm0, %v5786_v5, %v5808_v60  ;;  %v5816_v14 = vld [vmem:[#allocation22_spill] sm:$0xff] }
 0x18f   : > { %3324 = vmatmul.mubr.msk.f32.gmra.mrb[2].mxu0 %vm2042_vm5, %v1267_v12  ;;  %v1046_v10 = vpop.permute.xlu1 %1045  ;;  %v1044_v8 = vpop.permute.xlu0 %1043  ;;  %v1204_v4 = vsel %vm1197_vm2, %v1171_v25, %v4253_v29  ;;  %v1238_v59 = vsel %vm1230_vm3, %v1205_v37, %v4389_v48  ;;  %v1140_v29 = vsel %vm1131_vm0, %v5787_v6, %v5809_v40  ;;  %v5810_v48 = vld [vmem:[#allocation63_spill] sm:$0xff]  ;;  %v5821_v37 = vld [vmem:[#allocation68_spill] sm:$0xff] }
 0x190   : > { %v1269_v15 = vsel %vm1263_vm4, %v1236_v33, %v1046_v10  ;;  %v1268_v0 = vsel %vm1263_vm4, %v1235_v3, %v1044_v8  ;;  %v1237_v9 = vsel %vm1230_vm3, %v1204_v4, %v4391_v47  ;;  %v1174_v26 = vsel %vm1164_vm1, %v1141_v28, %v5810_v48  ;;  %v5811_v47 = vld [vmem:[#allocation64_spill] sm:$0xff]  ;;  %v5815_v33 = vld [vmem:[#allocation66_spill] sm:$0xff]  ;;  %v5820_v25 = vld [vmem:[#allocation67_spill] sm:$0xff] }
 0x191   : > { %1312 = vrot.lane.b32.xlu1 %v3654_v11, %s3555_s20  ;;  %1660 = vrot.lane.b32.xlu0 %v3115_v41, %s3558_s23  ;;  %v1173_v36 = vsel %vm1164_vm1, %v1140_v29, %v5811_v47  ;;  %v1207_v5 = vsel %vm1197_vm2, %v1174_v26, %v4259_v30  ;;  %v1143_v30 = vsel %vm1131_vm0, %v5803_v39, %v5812_v57  ;;  %v5814_v41 = vld [vmem:[#allocation65_spill] sm:$0xff]  ;;  %v3460_v10 = vld [vmem:[%s3604_s19 + $0x81] sm:$0xff] }
 0x192   : > { %3326 = vmatprep.mubr.msk.f32.mxu0 %vm2042_vm5, %v1268_v0  ;;  %v1206_v6 = vsel %vm1197_vm2, %v1173_v36, %v4261_v31  ;;  %v1240_v27 = vsel %vm1230_vm3, %v1207_v5, %v4397_v2  ;;  %v1142_v31 = vsel %vm1131_vm0, %v5804_v7, %v5813_v52  ;;  %v3148_v8 = vld [vmem:[%s3604_s19 + $0x82] sm:$0xff]  ;;  %v5819_v0 = vld [vmem:[#allocation33_spill] sm:$0xff] }
 0x193   : > { %3327 = vmatmul.mubr.msk.f32.gmra.mrb[4].mxu0 %vm2042_vm5, %v1269_v15  ;;  %v1050_v11 = vpop.permute.xlu1 %1049  ;;  %v1048_v58 = vpop.permute.xlu0 %1047  ;;  %v1239_v12 = vsel %vm1230_vm3, %v1206_v6, %v4399_v46  ;;  %v1176_v46 = vsel %vm1164_vm1, %v1143_v30, %v5814_v41  ;;  %v1175_v3 = vsel %vm1164_vm1, %v1142_v31, %v5815_v33  ;;  %v5822_v28 = vld [vmem:[#allocation26_spill] sm:$0xff]  ;;  %v5825_v29 = vld [vmem:[#allocation37_spill] sm:$0xff] }
 0x194   : > { %v1271_v61 = vsel %vm1263_vm4, %v1238_v59, %v1050_v11  ;;  %v1270_v13 = vsel %vm1263_vm4, %v1237_v9, %v1048_v58  ;;  %v1209_v39 = vsel %vm1197_vm2, %v1176_v46, %v4267_v20  ;;  %v1208_v7 = vsel %vm1197_vm2, %v1175_v3, %v4269_v21  ;;  %v5817_v20 = vld [vmem:[#allocation32_spill] sm:$0xff]  ;;  %v5818_v21 = vld [vmem:[#allocation23_spill] sm:$0xff]  ;;  %v3086_v59 = vld [vmem:[%s3604_s19 + $0x98] sm:$0xff] }
 0x195   : > { %1788 = vrot.lane.b32.xlu1 %v3147_v51, %s3559_s30  ;;  %1662 = vrot.lane.b32.xlu0 %v3116_v55, %s3558_s23  ;;  %v1242_v38 = vsel %vm1230_vm3, %v1209_v39, %v4404_v45  ;;  %v1241_v18 = vsel %vm1230_vm3, %v1208_v7, %v4406_v53  ;;  %v1145_v15 = vsel %vm1131_vm0, %v5817_v20, %v5816_v14  ;;  %v3085_v9 = vld [vmem:[%s3604_s19 + $0x90] sm:$0xff]  ;;  %v5826_v48 = vld [vmem:[#allocation69_spill] sm:$0xff]  ;;  %v5831_v31 = vld [vmem:[#allocation70_spill] sm:$0xff] }
 0x196   : > { %3329 = vmatprep.mubr.msk.f32.mxu0 %vm2042_vm5, %v1270_v13  ;;  %v1144_v54 = vsel %vm1131_vm0, %v5819_v0, %v5818_v21  ;;  %v1178_v53 = vsel %vm1164_vm1, %v1145_v15, %v5820_v25  ;;  %v3117_v5 = vld [vmem:[%s3604_s19 + $0x91] sm:$0xff]  ;;  %v5833_v33 = vld [vmem:[#allocation86_spill] sm:$0xff]  ;;  %v5838_v15 = vld [vmem:[#allocation35_spill] sm:$0xff] }
 0x197   : > { %3330 = vmatmul.mubr.msk.f32.gmra.mrb[6].mxu0 %vm2042_vm5, %v1271_v61  ;;  %v1054_v56 = vpop.permute.xlu1 %1053  ;;  %v1052_v32 = vpop.permute.xlu0 %1051  ;;  %v1177_v4 = vsel %vm1164_vm1, %v1144_v54, %v5821_v37  ;;  %v1211_v51 = vsel %vm1197_vm2, %v1178_v53, %v4275_v22  ;;  %v5823_v22 = vld [vmem:[#allocation36_spill] sm:$0xff]  ;;  %v5830_v57 = vld [vmem:[#allocation41_spill] sm:$0xff]  ;;  %v5834_v7 = vld [vmem:[#allocation2_spill] sm:$0xff] }
 0x198   : > { %v1273_v34 = vsel %vm1263_vm4, %v1240_v27, %v1054_v56  ;;  %v1272_v2 = vsel %vm1263_vm4, %v1239_v12, %v1052_v32  ;;  %v1210_v55 = vsel %vm1197_vm2, %v1177_v4, %v4277_v19  ;;  %v1244_v11 = vsel %vm1230_vm3, %v1211_v51, %v4413_v50  ;;  %v5824_v19 = vld [vmem:[#allocation27_spill] sm:$0xff]  ;;  %v5827_v56 = vld [vmem:[#allocation30_spill] sm:$0xff]  ;;  %v5832_v41 = vld [vmem:[#allocation85_spill] sm:$0xff] }
 0x199   : > { %1408 = vrot.lane.b32.xlu1 %v3808_v43, %s3556_s21  ;;  %1314 = vrot.lane.b32.xlu0 %v3460_v10, %s3555_s20  ;;  %v1243_v58 = vsel %vm1230_vm3, %v1210_v55, %v4415_v35  ;;  %v1147_v40 = vsel %vm1131_vm0, %v5823_v22, %v5822_v28  ;;  %v1146_v61 = vsel %vm1131_vm0, %v5825_v29, %v5824_v19  ;;  %v3149_v10 = vld [vmem:[%s3604_s19 + $0x92] sm:$0xff]  ;;  %v5842_v4 = vld [vmem:[#allocation87_spill] sm:$0xff]  ;;  %v5846_v22 = vld [vmem:[#allocation38_spill] sm:$0xff] }
 0x19a   : > { %3332 = vmatprep.mubr.msk.f32.mxu0 %vm2042_vm5, %v1272_v2  ;;  %v1180_v26 = vsel %vm1164_vm1, %v1147_v40, %v5826_v48  ;;  %v1179_v35 = vsel %vm1164_vm1, %v1146_v61, %v4148_v63  ;;  %v3461_v2 = vld [vmem:[%s3604_s19 + $0x91] sm:$0xff]  ;;  %v3118_v39 = vld [vmem:[%s3604_s19 + $0x99] sm:$0xff]  ;;  %v5848_v29 = vld [vmem:[#allocation39_spill] sm:$0xff] }
 0x19b   : > { %3333 = vmatmul.mubr.msk.f32.gmra.mrb[8].mxu0 %vm2042_vm5, %v1273_v34  ;;  %v1058_v43 = vpop.permute.xlu1 %1057  ;;  %v1056_v23 = vpop.permute.xlu0 %1055  ;;  %v1213_v47 = vsel %vm1197_vm2, %v1180_v26, %v4283_v17  ;;  %v1212_v36 = vsel %vm1197_vm2, %v1179_v35, %v4285_v16  ;;  %v5828_v17 = vld [vmem:[#allocation40_spill] sm:$0xff]  ;;  %v5829_v16 = vld [vmem:[#allocation31_spill] sm:$0xff]  ;;  %v5839_v21 = vld [vmem:[#allocation45_spill] sm:$0xff] }
 0x19c   : > { %v1275_v24 = vsel %vm1263_vm4, %v1242_v38, %v1058_v43  ;;  %v1274_v45 = vsel %vm1263_vm4, %v1241_v18, %v1056_v23  ;;  %v1246_v6 = vsel %vm1230_vm3, %v1213_v47, %v4420_v49  ;;  %v1245_v63 = vsel %vm1230_vm3, %v1212_v36, %v4422_v44  ;;  %v5835_v38 = vld [vmem:[#allocation3_spill] sm:$0xff]  ;;  %v5836_v23 = vld [vmem:[#allocation34_spill] sm:$0xff]  ;;  %v5837_v14 = vld [vmem:[#allocation44_spill] sm:$0xff] }
 0x19d   : > { %1410 = vrot.lane.b32.xlu1 %v3805_v42, %s3556_s21  ;;  %1790 = vrot.lane.b32.xlu0 %v3148_v8, %s3559_s30  ;;  %v1149_v32 = vsel %vm1131_vm0, %v5828_v17, %v5827_v56  ;;  %v1148_v30 = vsel %vm1131_vm0, %v5830_v57, %v5829_v16  ;;  %v1151_v20 = vsel %vm1131_vm0, %v5837_v14, %v5836_v23  ;;  %v5841_v53 = vld [vmem:[#allocation72_spill] sm:$0xff]  ;;  %v5849_v61 = vld [vmem:[#allocation49_spill] sm:$0xff]  ;;  %v5851_v47 = vld [vmem:[#allocation74_spill] sm:$0xff] }
 0x19e   : > { %3335 = vmatprep.mubr.msk.f32.mxu0 %vm2042_vm5, %v1274_v45  ;;  %v1182_v44 = vsel %vm1164_vm1, %v1149_v32, %v5831_v31  ;;  %v1181_v34 = vsel %vm1164_vm1, %v1148_v30, %v4156_v1  ;;  %v1150_v0 = vsel %vm1131_vm0, %v5839_v21, %v5838_v15  ;;  %v5840_v45 = vld [vmem:[#allocation71_spill] sm:$0xff]  ;;  %v5843_v55 = vld [vmem:[#allocation88_spill] sm:$0xff]  ;;  %v5850_v26 = vld [vmem:[#allocation73_spill] sm:$0xff] }
 0x19f   : > { %3336 = vmatmul.mubr.msk.f32.gmra.mrb[10].mxu0 %vm2042_vm5, %v1275_v24  ;;  %v1062_v42 = vpop.permute.xlu1 %1061  ;;  %v1060_v60 = vpop.permute.xlu0 %1059  ;;  %v1215_v46 = vsel %vm1197_vm2, %v1182_v44, %v5832_v41  ;;  %v1214_v3 = vsel %vm1197_vm2, %v1181_v34, %v5833_v33  ;;  %v1184_v25 = vsel %vm1164_vm1, %v1151_v20, %v5840_v45  ;;  %v1183_v37 = vsel %vm1164_vm1, %v1150_v0, %v5841_v53  ;;  %v5847_v40 = vld [vmem:[#allocation48_spill] sm:$0xff]  ;;  %v3150_v17 = vld [vmem:[%s3604_s19 + $0x9a] sm:$0xff]  ;;  %v3087_v20 = vld [vmem:[%s3604_s19 + $0xa8] sm:$0xff] }
 0x1a0   : > { %v1277_v13 = vsel %vm1263_vm4, %v1244_v11, %v1062_v42  ;;  %v1276_v50 = vsel %vm1263_vm4, %v1243_v58, %v1060_v60  ;;  %v1248_v8 = vsel %vm1230_vm3, %v1215_v46, %v5834_v7  ;;  %v1247_v1 = vsel %vm1230_vm3, %v1214_v3, %v5835_v38  ;;  %v5845_v58 = vld [vmem:[#allocation17_spill] sm:$0xff]  ;;  %v5854_v32 = vld [vmem:[#allocation20_spill] sm:$0xff]  ;;  %v5856_v31 = vld [vmem:[#allocation42_spill] sm:$0xff] }
 0x1a1   : > { %1538 = vrot.lane.b32.xlu1 %v3086_v59, %s3557_s22  ;;  %1536 = vrot.lane.b32.xlu0 %v3085_v9, %s3557_s22  ;;  %v1217_v51 = vsel %vm1197_vm2, %v1184_v25, %v5842_v4  ;;  %v1216_v59 = vsel %vm1197_vm2, %v1183_v37, %v5843_v55  ;;  %v5844_v9 = vld [vmem:[#allocation16_spill] sm:$0xff]  ;;  %v1153_v19 = vsel %vm1131_vm0, %v5847_v40, %v5846_v22  ;;  %v5855_v57 = vld [vmem:[#allocation21_spill] sm:$0xff]  ;;  %v5865_v0 = vld [vmem:[#allocation102_spill] sm:$0xff] }
 0x1a2   : > { %3338 = vmatprep.mubr.msk.f32.mxu0 %vm2042_vm5, %v1276_v50  ;;  %v1250_v11 = vsel %vm1230_vm3, %v1217_v51, %v5844_v9  ;;  %v1249_v42 = vsel %vm1230_vm3, %v1216_v59, %v5845_v58  ;;  %v1186_v35 = vsel %vm1164_vm1, %v1153_v19, %v5850_v26  ;;  %v5857_v44 = vld [vmem:[#allocation52_spill] sm:$0xff]  ;;  %v5859_v41 = vld [vmem:[#allocation53_spill] sm:$0xff]  ;;  %v5866_v25 = vld [vmem:[#allocation46_spill] sm:$0xff] }
 0x1a3   : > { %3339 = vmatmul.mubr.msk.f32.gmra.mrb[12].mxu0 %vm2042_vm5, %v1277_v13  ;;  %v1066_v27 = vpop.permute.xlu1 %1065  ;;  %v1064_v12 = vpop.permute.xlu0 %1063  ;;  %v1152_v13 = vsel %vm1131_vm0, %v5849_v61, %v5848_v29  ;;  %v1155_v34 = vsel %vm1131_vm0, %v5857_v44, %v5856_v31  ;;  %v5861_v7 = vld [vmem:[#allocation76_spill] sm:$0xff]  ;;  %v3464_v38 = vld [vmem:[%s3604_s19 + $0x9a] sm:$0xff]  ;;  %v5868_v4 = vld [vmem:[#allocation47_spill] sm:$0xff] }
 0x1a4   : > { %v1279_v52 = vsel %vm1263_vm4, %v1246_v6, %v1066_v27  ;;  %v1278_v49 = vsel %vm1263_vm4, %v1245_v63, %v1064_v12  ;;  %v1185_v36 = vsel %vm1164_vm1, %v1152_v13, %v5851_v47  ;;  %v3463_v6 = vld [vmem:[%s3604_s19 + $0x99] sm:$0xff]  ;;  %v3088_v14 = vld [vmem:[%s3604_s19 + $0xb0] sm:$0xff]  ;;  %v5874_v61 = vld [vmem:[#allocation103_spill] sm:$0xff] }
 0x1a5   : > { %1316 = vrot.lane.b32.xlu1 %v3461_v2, %s3555_s20  ;;  %1664 = vrot.lane.b32.xlu0 %v3117_v5, %s3558_s23  ;;  %v3462_v5 = vld [vmem:[%s3604_s19 + $0x92] sm:$0xff]  ;;  %v5853_v12 = vld [vmem:[#allocation90_spill] sm:$0xff]  ;;  %v5858_v2 = vld [vmem:[#allocation43_spill] sm:$0xff] }
 0x1a6   : > { %3341 = vmatprep.mubr.msk.f32.mxu0 %vm2042_vm5, %v1278_v49  ;;  %v5852_v63 = vld [vmem:[#allocation89_spill] sm:$0xff]  ;;  %v1218_v56 = vsel %vm1197_vm2, %v1185_v36, %v5853_v12  ;;  %v1154_v46 = vsel %vm1131_vm0, %v5859_v41, %v5858_v2  ;;  %v5867_v53 = vld [vmem:[#allocation56_spill] sm:$0xff]  ;;  %v5873_v40 = vld [vmem:[#allocation94_spill] sm:$0xff] }
 0x1a7   : > { %3342 = vmatmul.mubr.msk.f32.gmra.mrb[14].mxu0 %vm2042_vm5, %v1279_v52  ;;  %v1070_v18 = vpop.permute.xlu1 %1069  ;;  %v1068_v43 = vpop.permute.xlu0 %1067  ;;  %v1219_v27 = vsel %vm1197_vm2, %v1186_v35, %v5852_v63  ;;  %v1251_v30 = vsel %vm1230_vm3, %v1218_v56, %v5855_v57  ;;  %v5864_v15 = vld [vmem:[#allocation101_spill] sm:$0xff]  ;;  %v1157_v37 = vsel %vm1131_vm0, %v5867_v53, %v5866_v25  ;;  %v3119_v29 = vld [vmem:[%s3604_s19 + $0xa9] sm:$0xff]  ;;  %v3089_v44 = vld [vmem:[%s3604_s19 + $0xc0] sm:$0xff] }
 0x1a8   : > { %v1281_v54 = vsel %vm1263_vm4, %v1248_v8, %v1070_v18  ;;  %v1280_v24 = vsel %vm1263_vm4, %v1247_v1, %v1068_v43  ;;  %v1252_v16 = vsel %vm1230_vm3, %v1219_v27, %v5854_v32  ;;  %v1187_v8 = vsel %vm1164_vm1, %v1154_v46, %v5861_v7  ;;  %v5862_v1 = vld [vmem:[#allocation91_spill] sm:$0xff]  ;;  %v5863_v43 = vld [vmem:[#allocation92_spill] sm:$0xff]  ;;  %v5869_v51 = vld [vmem:[#allocation57_spill] sm:$0xff] }
 0x1a9   : > { %1792 = vrot.lane.b32.xlu1 %v3149_v10, %s3559_s30  ;;  %1666 = vrot.lane.b32.xlu0 %v3118_v39, %s3558_s23  ;;  %v5860_v10 = vld [vmem:[#allocation75_spill] sm:$0xff]  ;;  %v1220_v23 = vsel %vm1197_vm2, %v1187_v8, %v5863_v43  ;;  %v1156_v55 = vsel %vm1131_vm0, %v5869_v51, %v5868_v4  ;;  %v3120_v63 = vld [vmem:[%s3604_s19 + $0xb1] sm:$0xff] }
 0x1aa   : > { %3344 = vmatprep.mubr.msk.f32.mxu0 %vm2042_vm5, %v1280_v24  ;;  %v1188_v39 = vsel %vm1164_vm1, %v1155_v34, %v5860_v10  ;;  %v3466_v32 = vld [vmem:[%s3604_s19 + $0xaa] sm:$0xff]  ;;  %v3152_v57 = vld [vmem:[%s3604_s19 + $0xb2] sm:$0xff]  ;;  %v3121_v10 = vld [vmem:[%s3604_s19 + $0xc1] sm:$0xff] }
 0x1ab   : > { %3345 = vmatmul.mubr.msk.f32.gmra.mrb[16].mxu0 %vm2042_vm5, %v1281_v54  ;;  %v1074_v60 = vpop.permute.xlu1 %1073  ;;  %v1072_v28 = vpop.permute.xlu0 %1071  ;;  %v1221_v18 = vsel %vm1197_vm2, %v1188_v39, %v5862_v1  ;;  %v1253_v54 = vsel %vm1230_vm3, %v1220_v23, %v5865_v0  ;;  %v3090_v31 = vld [vmem:[%s3604_s19 + $0xc8] sm:$0xff]  ;;  %v3469_v41 = vld [vmem:[%s3604_s19 + $0x18] sm:$0xff] }
 0x1ac   : > { %v1283_v50 = vsel %vm1263_vm4, %v1250_v11, %v1074_v60  ;;  %v1282_v48 = vsel %vm1263_vm4, %v1249_v42, %v1072_v28  ;;  %v1254_v21 = vsel %vm1230_vm3, %v1221_v18, %v5864_v15  ;;  %v5870_v11 = vld [vmem:[#allocation77_spill] sm:$0xff]  ;;  %v5871_v42 = vld [vmem:[#allocation78_spill] sm:$0xff]  ;;  %v3122_v43 = vld [vmem:[%s3604_s19 + $0xc9] sm:$0xff] }
 0x1ad   : > { %1412 = vrot.lane.b32.xlu1 %v3462_v5, %s3556_s21  ;;  %1318 = vrot.lane.b32.xlu0 %v3463_v6, %s3555_s20  ;;  %v1190_v58 = vsel %vm1164_vm1, %v1157_v37, %v5870_v11  ;;  %v1189_v60 = vsel %vm1164_vm1, %v1156_v55, %v5871_v42  ;;  %v5872_v28 = vld [vmem:[#allocation93_spill] sm:$0xff]  ;;  %v3465_v5 = vld [vmem:[%s3604_s19 + $0xa9] sm:$0xff]  ;;  %v3470_v1 = vld [vmem:[%s3604_s19 + $0xc1] sm:$0xff] }
 0x1ae   : > { %3347 = vmatprep.mubr.msk.f32.mxu0 %vm2042_vm5, %v1282_v48  ;;  %v1223_v22 = vsel %vm1197_vm2, %v1190_v58, %v5872_v28  ;;  %v1222_v19 = vsel %vm1197_vm2, %v1189_v60, %v5873_v40  ;;  %v3151_v6 = vld [vmem:[%s3604_s19 + $0xaa] sm:$0xff]  ;;  %v3153_v18 = vld [vmem:[%s3604_s19 + $0xc2] sm:$0xff]  ;;  %v3091_v11 = vld [vmem:[%s3604_s19 + $0xd8] sm:$0xff] }
 0x1af   : > { %3348 = vmatmul.mubr.msk.f32.gmra.mrb[18].mxu0 %vm2042_vm5, %v1283_v50  ;;  %v1078_v52 = vpop.permute.xlu1 %1077  ;;  %v1076_v49 = vpop.permute.xlu0 %1075  ;;  %v1256_v13 = vsel %vm1230_vm3, %v1223_v22, %v5874_v61  ;;  %v5875_v50 = vld [vmem:[#allocation104_spill] sm:$0xff]  ;;  %v3472_v53 = vld [vmem:[%s3604_s19 + $0xc2] sm:$0xff] }
 0x1b0   : > { %v1285_v33 = vsel %vm1263_vm4, %v1252_v16, %v1078_v52  ;;  %v1284_v3 = vsel %vm1263_vm4, %v1251_v30, %v1076_v49  ;;  %v1255_v48 = vsel %vm1230_vm3, %v1222_v19, %v5875_v50  ;;  %v3467_v16 = vld [vmem:[%s3604_s19 + $0xb1] sm:$0xff]  ;;  %v3473_v37 = vld [vmem:[%s3604_s19 + $0xc9] sm:$0xff]  ;;  %v3123_v19 = vld [vmem:[%s3604_s19 + $0xd9] sm:$0xff] }
 0x1b1   : > { %1414 = vrot.lane.b32.xlu1 %v3464_v38, %s3556_s21  ;;  %1794 = vrot.lane.b32.xlu0 %v3150_v17, %s3559_s30  ;;  %v3468_v49 = vld [vmem:[%s3604_s19 + $0xb2] sm:$0xff]  ;;  %v3154_v4 = vld [vmem:[%s3604_s19 + $0xca] sm:$0xff] }
 0x1b2   : > { %3350 = vmatprep.mubr.msk.f32.mxu0 %vm2042_vm5, %v1284_v3  ;;  %v3475_v60 = vld [vmem:[%s3604_s19 + $0x30] sm:$0xff] }
 0x1b3   : > { %3351 = vmatmul.mubr.msk.f32.gmra.mrb[20].mxu0 %vm2042_vm5, %v1285_v33  ;;  %v1082_v24 = vpop.permute.xlu1 %1081  ;;  %v1080_v45 = vpop.permute.xlu0 %1079 }
 0x1b4   : > { %v1287_v59 = vsel %vm1263_vm4, %v1254_v21, %v1082_v24  ;;  %v1286_v9 = vsel %vm1263_vm4, %v1253_v54, %v1080_v45 }
 0x1b5   : > { %1542 = vrot.lane.b32.xlu1 %v3088_v14, %s3557_s22  ;;  %1540 = vrot.lane.b32.xlu0 %v3087_v20, %s3557_s22  ;;  %v3471_v20 = vld [vmem:[%s3604_s19 + $0x20] sm:$0xff] }
 0x1b6   : > { %3353 = vmatprep.mubr.msk.f32.mxu0 %vm2042_vm5, %v1286_v9  ;;  %v3092_v9 = vld [vmem:[%s3604_s19 + $0xe0] sm:$0xff] }
 0x1b7   : > { %3354 = vmatmul.mubr.msk.f32.gmra.mrb[22].mxu0 %vm2042_vm5, %v1287_v59  ;;  %v1086_v26 = vpop.permute.xlu1 %1085  ;;  %v1084_v35 = vpop.permute.xlu0 %1083  ;;  %v3474_v59 = vld [vmem:[%s3604_s19 + $0xca] sm:$0xff] }
 0x1b8   : > { %v1289_v47 = vsel %vm1263_vm4, %v1256_v13, %v1086_v26  ;;  %v1288_v36 = vsel %vm1263_vm4, %v1255_v48, %v1084_v35  ;;  %v3476_v48 = vld [vmem:[%s3604_s19 + $0xd9] sm:$0xff]  ;;  %v3124_v35 = vld [vmem:[%s3604_s19 + $0xe1] sm:$0xff] }
 0x1b9   : > { %1320 = vrot.lane.b32.xlu1 %v3465_v5, %s3555_s20  ;;  %1668 = vrot.lane.b32.xlu0 %v3119_v29, %s3558_s23  ;;  %v3155_v26 = vld [vmem:[%s3604_s19 + $0xda] sm:$0xff] }
 0x1ba   : > { %3356 = vmatprep.mubr.msk.f32.mxu0 %vm2042_vm5, %v1288_v36  ;;  %v3477_v5 = vld [vmem:[%s3604_s19 + $0x38] sm:$0xff] }
 0x1bb   : > { %3357 = vmatmul.mubr.msk.f32.gmra.mrb[24].mxu0 %vm2042_vm5, %v1289_v47  ;;  %v1299_v27 = vpop.permute.xlu1 %1298  ;;  %v1297_v12 = vpop.permute.xlu0 %1296 }
 0x1bc   : > { %v1872_v46 = vsel %vm1131_vm0, %v3469_v41, %v1297_v12  ;;  %v1873_v15 = vsel %vm1131_vm0, %v3471_v20, %v1299_v27 }
 0x1bd   : > { %1796 = vrot.lane.b32.xlu1 %v3151_v6, %s3559_s30  ;;  %1670 = vrot.lane.b32.xlu0 %v3120_v63, %s3558_s23 }
 0x1bf   : > { %v1395_v56 = vpop.permute.xlu1 %1394  ;;  %v1393_v17 = vpop.permute.xlu0 %1392 }
 0x1c0   : > { %v1904_v33 = vsel %vm1164_vm1, %v1872_v46, %v1393_v17  ;;  %v1905_v21 = vsel %vm1164_vm1, %v1873_v15, %v1395_v56  ;;  %v3481_v46 = vld [vmem:[%s3604_s19 + $0x48] sm:$0xff]  ;;  %v3483_v15 = vld [vmem:[%s3604_s19 + $0x50] sm:$0xff] }
 0x1c1   : > { %1416 = vrot.lane.b32.xlu1 %v3466_v32, %s3556_s21  ;;  %1322 = vrot.lane.b32.xlu0 %v3467_v16, %s3555_s20  ;;  %v3478_v16 = vld [vmem:[%s3604_s19 + $0xda] sm:$0xff] }
 0x1c3   : > { %v1523_v30 = vpop.permute.xlu1 %1522  ;;  %v1521_v52 = vpop.permute.xlu0 %1520 }
 0x1c4   : > { %v1936_v3 = vsel %vm1197_vm2, %v1904_v33, %v1521_v52  ;;  %v1937_v0 = vsel %vm1197_vm2, %v1905_v21, %v1523_v30  ;;  %v3156_v30 = vld [vmem:[%s3604_s19 + $0xe2] sm:$0xff] }
 0x1c5   : > { %1418 = vrot.lane.b32.xlu1 %v3468_v49, %s3556_s21  ;;  %1798 = vrot.lane.b32.xlu0 %v3152_v57, %s3559_s30  ;;  %v3479_v57 = vld [vmem:[%s3604_s19 + $0xe1] sm:$0xff] }
 0x1c7   : > { %v1301_v34 = vpop.permute.xlu1 %1300  ;;  %v1649_v2 = vpop.permute.xlu0 %1648 }
 0x1c8   : > { %v1968_v39 = vsel %vm1230_vm3, %v1936_v3, %v1649_v2  ;;  %v1874_v28 = vsel %vm1131_vm0, %v3475_v60, %v1301_v34  ;;  %v3093_v34 = vld [vmem:[%s3604_s19 + $0xf0] sm:$0xff] }
 0x1c9   : > { %1546 = vrot.lane.b32.xlu1 %v3090_v31, %s3557_s22  ;;  %1544 = vrot.lane.b32.xlu0 %v3089_v44, %s3557_s22  ;;  %v3480_v31 = vld [vmem:[%s3604_s19 + $0xe2] sm:$0xff]  ;;  %v3094_v44 = vld [vmem:[%s3604_s19 + $0xf8] sm:$0xff] }
 0x1cb   : > { %v1777_v7 = vpop.permute.xlu1 %1776  ;;  %v1651_v8 = vpop.permute.xlu0 %1650 }
 0x1cc   : > { %v2000_v38 = vsel %vm1263_vm4, %v1968_v39, %v1777_v7  ;;  %v1969_v54 = vsel %vm1230_vm3, %v1937_v0, %v1651_v8  ;;  %v3125_v39 = vld [vmem:[%s3604_s19 + $0xf1] sm:$0xff] }
 0x1cd   : > { %1324 = vrot.lane.b32.xlu1 %v3470_v1, %s3555_s20  ;;  %1672 = vrot.lane.b32.xlu0 %v3121_v10, %s3558_s23 }
 0x1ce   : > { %3374 = vmatprep.mubr.msk.f32.mxu1 %vm2042_vm5, %v2000_v38 }
 0x1cf   : > { %v1397_v23 = vpop.permute.xlu1 %1396  ;;  %v1303_v14 = vpop.permute.xlu0 %1302 }
 0x1d0   : > { %v1906_v22 = vsel %vm1164_vm1, %v1874_v28, %v1397_v23  ;;  %v1875_v6 = vsel %vm1131_vm0, %v3477_v5, %v1303_v14  ;;  %v3126_v23 = vld [vmem:[%s3604_s19 + $0xf9] sm:$0xff] }
 0x1d1   : > { %1800 = vrot.lane.b32.xlu1 %v3153_v18, %s3559_s30  ;;  %1674 = vrot.lane.b32.xlu0 %v3122_v43, %s3558_s23  ;;  %v3482_v18 = vld [vmem:[%s3604_s19 + $0xf1] sm:$0xff]  ;;  %v3487_v28 = vld [vmem:[%s3604_s19 + $0x60] sm:$0xff] }
 0x1d2   : > { %v3157_v43 = vld [vmem:[%s3604_s19 + $0xf2] sm:$0xff] }
 0x1d3   : > { %v1399_v24 = vpop.permute.xlu1 %1398  ;;  %v1779_v45 = vpop.permute.xlu0 %1778 }
 0x1d4   : > { %v2001_v25 = vsel %vm1263_vm4, %v1969_v54, %v1779_v45  ;;  %v1907_v63 = vsel %vm1164_vm1, %v1875_v6, %v1399_v24  ;;  %v3489_v6 = vld [vmem:[%s3604_s19 + $0x68] sm:$0xff] }
 0x1d5   : > { %1420 = vrot.lane.b32.xlu1 %v3472_v53, %s3556_s21  ;;  %1326 = vrot.lane.b32.xlu0 %v3473_v37, %s3555_s20  ;;  %v3484_v37 = vld [vmem:[%s3604_s19 + $0xf2] sm:$0xff] }
 0x1d6   : > { %3375 = vmatmul.mubr.msk.f32.vlgmr.msra.gmra.mrb[0].mxu1 %vm2042_vm5, %v2001_v25 }
 0x1d7   : > { %v1527_v51 = vpop.permute.xlu1 %1526  ;;  %v1525_v55 = vpop.permute.xlu0 %1524 }
 0x1d8   : > { %v1938_v40 = vsel %vm1197_vm2, %v1906_v22, %v1525_v55  ;;  %v1939_v27 = vsel %vm1197_vm2, %v1907_v63, %v1527_v51  ;;  %v3158_v51 = vld [vmem:[%s3604_s19 + $0xfa] sm:$0xff] }
 0x1d9   : > { %1422 = vrot.lane.b32.xlu1 %v3474_v59, %s3556_s21  ;;  %1802 = vrot.lane.b32.xlu0 %v3154_v4, %s3559_s30  ;;  %v3485_v4 = vld [vmem:[%s3604_s19 + $0xf9] sm:$0xff] }
 0x1db   : > { %v1305_v58 = vpop.permute.xlu1 %1304  ;;  %v1653_v42 = vpop.permute.xlu0 %1652 }
 0x1dc   : > { %v1970_v29 = vsel %vm1230_vm3, %v1938_v40, %v1653_v42  ;;  %v1876_v33 = vsel %vm1131_vm0, %v3481_v46, %v1305_v58  ;;  %v3095_v58 = vld [vmem:[%s3604_s19 + $0x108] sm:$0xff] }
 0x1dd   : > { %1550 = vrot.lane.b32.xlu1 %v3092_v9, %s3557_s22  ;;  %1548 = vrot.lane.b32.xlu0 %v3091_v11, %s3557_s22  ;;  %v3486_v9 = vld [vmem:[%s3604_s19 + $0xfa] sm:$0xff]  ;;  %v3096_v11 = vld [vmem:[%s3604_s19 + $0x110] sm:$0xff] }
 0x1df   : > { %v1781_v61 = vpop.permute.xlu1 %1780  ;;  %v1655_v13 = vpop.permute.xlu0 %1654 }
 0x1e0   : > { %v2002_v50 = vsel %vm1263_vm4, %v1970_v29, %v1781_v61  ;;  %v1971_v12 = vsel %vm1230_vm3, %v1939_v27, %v1655_v13  ;;  %v3127_v29 = vld [vmem:[%s3604_s19 + $0x109] sm:$0xff] }
 0x1e1   : > { %1328 = vrot.lane.b32.xlu1 %v3476_v48, %s3555_s20  ;;  %1676 = vrot.lane.b32.xlu0 %v3123_v19, %s3558_s23 }
 0x1e2   : > { %3377 = vmatprep.mubr.msk.f32.mxu1 %vm2042_vm5, %v2002_v50 }
 0x1e3   : > { %v1401_v47 = vpop.permute.xlu1 %1400  ;;  %v1307_v36 = vpop.permute.xlu0 %1306 }
 0x1e4   : > { %v1908_v3 = vsel %vm1164_vm1, %v1876_v33, %v1401_v47  ;;  %v1877_v21 = vsel %vm1131_vm0, %v3483_v15, %v1307_v36  ;;  %v3128_v47 = vld [vmem:[%s3604_s19 + $0x111] sm:$0xff] }
 0x1e5   : > { %1804 = vrot.lane.b32.xlu1 %v3155_v26, %s3559_s30  ;;  %1678 = vrot.lane.b32.xlu0 %v3124_v35, %s3558_s23  ;;  %v3488_v26 = vld [vmem:[%s3604_s19 + $0x109] sm:$0xff]  ;;  %v3493_v33 = vld [vmem:[%s3604_s19 + $0x78] sm:$0xff] }
 0x1e6   : > { %v3159_v35 = vld [vmem:[%s3604_s19 + $0x10a] sm:$0xff] }
 0x1e7   : > { %v1403_v56 = vpop.permute.xlu1 %1402  ;;  %v1783_v17 = vpop.permute.xlu0 %1782 }
 0x1e8   : > { %v2003_v32 = vsel %vm1263_vm4, %v1971_v12, %v1783_v17  ;;  %v1909_v0 = vsel %vm1164_vm1, %v1877_v21, %v1403_v56  ;;  %v3495_v21 = vld [vmem:[%s3604_s19 + $0x80] sm:$0xff] }
 0x1e9   : > { %1424 = vrot.lane.b32.xlu1 %v3478_v16, %s3556_s21  ;;  %1330 = vrot.lane.b32.xlu0 %v3479_v57, %s3555_s20  ;;  %v3490_v57 = vld [vmem:[%s3604_s19 + $0x10a] sm:$0xff] }
 0x1ea   : > { %3378 = vmatmul.mubr.msk.f32.gmra.mrb[2].mxu1 %vm2042_vm5, %v2003_v32 }
 0x1eb   : > { %v1531_v52 = vpop.permute.xlu1 %1530  ;;  %v1529_v49 = vpop.permute.xlu0 %1528 }
 0x1ec   : > { %v1940_v10 = vsel %vm1197_vm2, %v1908_v3, %v1529_v49  ;;  %v1941_v54 = vsel %vm1197_vm2, %v1909_v0, %v1531_v52  ;;  %v3160_v52 = vld [vmem:[%s3604_s19 + $0x112] sm:$0xff] }
 0x1ed   : > { %1426 = vrot.lane.b32.xlu1 %v3480_v31, %s3556_s21  ;;  %1806 = vrot.lane.b32.xlu0 %v3156_v30, %s3559_s30  ;;  %v3491_v30 = vld [vmem:[%s3604_s19 + $0x111] sm:$0xff] }
 0x1ef   : > { %v1309_v2 = vpop.permute.xlu1 %1308  ;;  %v1657_v41 = vpop.permute.xlu0 %1656 }
 0x1f0   : > { %v1972_v7 = vsel %vm1230_vm3, %v1940_v10, %v1657_v41  ;;  %v1878_v22 = vsel %vm1131_vm0, %v3487_v28, %v1309_v2  ;;  %v3097_v2 = vld [vmem:[%s3604_s19 + $0x120] sm:$0xff] }
 0x1f1   : > { %1554 = vrot.lane.b32.xlu1 %v3094_v44, %s3557_s22  ;;  %1552 = vrot.lane.b32.xlu0 %v3093_v34, %s3557_s22  ;;  %v3492_v44 = vld [vmem:[%s3604_s19 + $0x112] sm:$0xff]  ;;  %v3098_v34 = vld [vmem:[%s3604_s19 + $0x128] sm:$0xff] }
 0x1f3   : > { %v1785_v8 = vpop.permute.xlu1 %1784  ;;  %v1659_v38 = vpop.permute.xlu0 %1658 }
 0x1f4   : > { %v2004_v1 = vsel %vm1263_vm4, %v1972_v7, %v1785_v8  ;;  %v1973_v24 = vsel %vm1230_vm3, %v1941_v54, %v1659_v38  ;;  %v3129_v7 = vld [vmem:[%s3604_s19 + $0x121] sm:$0xff] }
 0x1f5   : > { %1332 = vrot.lane.b32.xlu1 %v3482_v18, %s3555_s20  ;;  %1680 = vrot.lane.b32.xlu0 %v3125_v39, %s3558_s23 }
 0x1f6   : > { %3380 = vmatprep.mubr.msk.f32.mxu1 %vm2042_vm5, %v2004_v1 }
 0x1f7   : > { %v1405_v14 = vpop.permute.xlu1 %1404  ;;  %v1311_v20 = vpop.permute.xlu0 %1310 }
 0x1f8   : > { %v1910_v40 = vsel %vm1164_vm1, %v1878_v22, %v1405_v14  ;;  %v1879_v63 = vsel %vm1131_vm0, %v3489_v6, %v1311_v20  ;;  %v3130_v14 = vld [vmem:[%s3604_s19 + $0x129] sm:$0xff] }
 0x1f9   : > { %1808 = vrot.lane.b32.xlu1 %v3157_v43, %s3559_s30  ;;  %1682 = vrot.lane.b32.xlu0 %v3126_v23, %s3558_s23  ;;  %v3494_v43 = vld [vmem:[%s3604_s19 + $0x121] sm:$0xff]  ;;  %v3499_v22 = vld [vmem:[%s3604_s19 + $0x90] sm:$0xff] }
 0x1fa   : > { %v3161_v23 = vld [vmem:[%s3604_s19 + $0x122] sm:$0xff] }
 0x1fb   : > { %v1407_v45 = vpop.permute.xlu1 %1406  ;;  %v1787_v25 = vpop.permute.xlu0 %1786 }
 0x1fc   : > { %v2005_v53 = vsel %vm1263_vm4, %v1973_v24, %v1787_v25  ;;  %v1911_v27 = vsel %vm1164_vm1, %v1879_v63, %v1407_v45  ;;  %v3501_v63 = vld [vmem:[%s3604_s19 + $0x98] sm:$0xff] }
 0x1fd   : > { %1428 = vrot.lane.b32.xlu1 %v3484_v37, %s3556_s21  ;;  %1334 = vrot.lane.b32.xlu0 %v3485_v4, %s3555_s20  ;;  %v3496_v4 = vld [vmem:[%s3604_s19 + $0x122] sm:$0xff] }
 0x1fe   : > { %3381 = vmatmul.mubr.msk.f32.gmra.mrb[4].mxu1 %vm2042_vm5, %v2005_v53 }
 0x1ff   : > { %v1535_v55 = vpop.permute.xlu1 %1534  ;;  %v1533_v59 = vpop.permute.xlu0 %1532 }
 0x200   : > { %v1942_v19 = vsel %vm1197_vm2, %v1910_v40, %v1533_v59  ;;  %v1943_v12 = vsel %vm1197_vm2, %v1911_v27, %v1535_v55  ;;  %v3162_v55 = vld [vmem:[%s3604_s19 + $0x12a] sm:$0xff] }
 0x201   : > { %1430 = vrot.lane.b32.xlu1 %v3486_v9, %s3556_s21  ;;  %1810 = vrot.lane.b32.xlu0 %v3158_v51, %s3559_s30  ;;  %v3497_v51 = vld [vmem:[%s3604_s19 + $0x129] sm:$0xff] }
 0x203   : > { %v1313_v42 = vpop.permute.xlu1 %1312  ;;  %v1661_v60 = vpop.permute.xlu0 %1660 }
 0x204   : > { %v1974_v61 = vsel %vm1230_vm3, %v1942_v19, %v1661_v60  ;;  %v1880_v3 = vsel %vm1131_vm0, %v3493_v33, %v1313_v42  ;;  %v3099_v42 = vld [vmem:[%s3604_s19 + $0x138] sm:$0xff] }
 0x205   : > { %1558 = vrot.lane.b32.xlu1 %v3096_v11, %s3557_s22  ;;  %1556 = vrot.lane.b32.xlu0 %v3095_v58, %s3557_s22  ;;  %v3498_v11 = vld [vmem:[%s3604_s19 + $0x12a] sm:$0xff]  ;;  %v3100_v58 = vld [vmem:[%s3604_s19 + $0x140] sm:$0xff] }
 0x207   : > { %v1789_v13 = vpop.permute.xlu1 %1788  ;;  %v1663_v50 = vpop.permute.xlu0 %1662 }
 0x208   : > { %v2006_v48 = vsel %vm1263_vm4, %v1974_v61, %v1789_v13  ;;  %v1975_v56 = vsel %vm1230_vm3, %v1943_v12, %v1663_v50  ;;  %v3131_v61 = vld [vmem:[%s3604_s19 + $0x139] sm:$0xff] }
 0x209   : > { %1336 = vrot.lane.b32.xlu1 %v3488_v26, %s3555_s20  ;;  %1684 = vrot.lane.b32.xlu0 %v3127_v29, %s3558_s23 }
 0x20a   : > { %3383 = vmatprep.mubr.msk.f32.mxu1 %vm2042_vm5, %v2006_v48 }
 0x20b   : > { %v1409_v36 = vpop.permute.xlu1 %1408  ;;  %v1315_v5 = vpop.permute.xlu0 %1314 }
 0x20c   : > { %v1912_v10 = vsel %vm1164_vm1, %v1880_v3, %v1409_v36  ;;  %v1881_v0 = vsel %vm1131_vm0, %v3495_v21, %v1315_v5  ;;  %v3132_v36 = vld [vmem:[%s3604_s19 + $0x141] sm:$0xff] }
 0x20d   : > { %1812 = vrot.lane.b32.xlu1 %v3159_v35, %s3559_s30  ;;  %1686 = vrot.lane.b32.xlu0 %v3128_v47, %s3558_s23  ;;  %v3500_v35 = vld [vmem:[%s3604_s19 + $0x139] sm:$0xff]  ;;  %v3505_v3 = vld [vmem:[%s3604_s19 + $0xa8] sm:$0xff] }
 0x20e   : > { %v3163_v47 = vld [vmem:[%s3604_s19 + $0x13a] sm:$0xff] }
 0x20f   : > { %v1411_v17 = vpop.permute.xlu1 %1410  ;;  %v1791_v32 = vpop.permute.xlu0 %1790 }
 0x210   : > { %v2007_v16 = vsel %vm1263_vm4, %v1975_v56, %v1791_v32  ;;  %v1913_v54 = vsel %vm1164_vm1, %v1881_v0, %v1411_v17  ;;  %v3507_v0 = vld [vmem:[%s3604_s19 + $0xb0] sm:$0xff] }
 0x211   : > { %1432 = vrot.lane.b32.xlu1 %v3490_v57, %s3556_s21  ;;  %1338 = vrot.lane.b32.xlu0 %v3491_v30, %s3555_s20  ;;  %v3502_v30 = vld [vmem:[%s3604_s19 + $0x13a] sm:$0xff] }
 0x212   : > { %3384 = vmatmul.mubr.msk.f32.gmra.mrb[6].mxu1 %vm2042_vm5, %v2007_v16 }
 0x213   : > { %v1539_v49 = vpop.permute.xlu1 %1538  ;;  %v1537_v31 = vpop.permute.xlu0 %1536 }
 0x214   : > { %v1944_v39 = vsel %vm1197_vm2, %v1912_v10, %v1537_v31  ;;  %v1945_v24 = vsel %vm1197_vm2, %v1913_v54, %v1539_v49  ;;  %v3164_v49 = vld [vmem:[%s3604_s19 + $0x142] sm:$0xff] }
 0x215   : > { %1434 = vrot.lane.b32.xlu1 %v3492_v44, %s3556_s21  ;;  %1814 = vrot.lane.b32.xlu0 %v3160_v52, %s3559_s30  ;;  %v3503_v52 = vld [vmem:[%s3604_s19 + $0x141] sm:$0xff] }
 0x217   : > { %v1317_v41 = vpop.permute.xlu1 %1316  ;;  %v1665_v46 = vpop.permute.xlu0 %1664 }
 0x218   : > { %v1976_v8 = vsel %vm1230_vm3, %v1944_v39, %v1665_v46  ;;  %v1882_v40 = vsel %vm1131_vm0, %v3499_v22, %v1317_v41  ;;  %v3101_v41 = vld [vmem:[%s3604_s19 + $0x150] sm:$0xff] }
 0x219   : > { %1562 = vrot.lane.b32.xlu1 %v3098_v34, %s3557_s22  ;;  %1560 = vrot.lane.b32.xlu0 %v3097_v2, %s3557_s22  ;;  %v3504_v34 = vld [vmem:[%s3604_s19 + $0x142] sm:$0xff]  ;;  %v3102_v2 = vld [vmem:[%s3604_s19 + $0x158] sm:$0xff] }
 0x21b   : > { %v1793_v38 = vpop.permute.xlu1 %1792  ;;  %v1667_v1 = vpop.permute.xlu0 %1666 }
 0x21c   : > { %v2008_v18 = vsel %vm1263_vm4, %v1976_v8, %v1793_v38  ;;  %v1977_v45 = vsel %vm1230_vm3, %v1945_v24, %v1667_v1  ;;  %v3133_v8 = vld [vmem:[%s3604_s19 + $0x151] sm:$0xff] }
 0x21d   : > { %1340 = vrot.lane.b32.xlu1 %v3494_v43, %s3555_s20  ;;  %1688 = vrot.lane.b32.xlu0 %v3129_v7, %s3558_s23 }
 0x21e   : > { %3386 = vmatprep.mubr.msk.f32.mxu1 %vm2042_vm5, %v2008_v18 }
 0x21f   : > { %v1413_v20 = vpop.permute.xlu1 %1412  ;;  %v1319_v15 = vpop.permute.xlu0 %1318 }
 0x220   : > { %v1914_v19 = vsel %vm1164_vm1, %v1882_v40, %v1413_v20  ;;  %v1883_v27 = vsel %vm1131_vm0, %v3501_v63, %v1319_v15  ;;  %v3134_v20 = vld [vmem:[%s3604_s19 + $0x159] sm:$0xff]  ;;  %v3511_v63 = vld [vmem:[%s3604_s19 + $0xc8] sm:$0xff] }
 0x221   : > { %1816 = vrot.lane.b32.xlu1 %v3161_v23, %s3559_s30  ;;  %1690 = vrot.lane.b32.xlu0 %v3130_v14, %s3558_s23  ;;  %v3506_v23 = vld [vmem:[%s3604_s19 + $0x151] sm:$0xff] }
 0x222   : > { %v5062_v14 = vld [vmem:[%s3604_s19 + $0x152] sm:$0xff] }
 0x223   : > { %v1415_v25 = vpop.permute.xlu1 %1414  ;;  %v1795_v53 = vpop.permute.xlu0 %1794 }
 0x224   : > { %v2009_v37 = vsel %vm1263_vm4, %v1977_v45, %v1795_v53  ;;  %v1915_v12 = vsel %vm1164_vm1, %v1883_v27, %v1415_v25 }
 0x225   : > { %1436 = vrot.lane.b32.xlu1 %v3496_v4, %s3556_s21  ;;  %1342 = vrot.lane.b32.xlu0 %v3497_v51, %s3555_s20  ;;  %v3508_v51 = vld [vmem:[%s3604_s19 + $0x159] sm:$0xff] }
 0x226   : > { %3387 = vmatmul.mubr.msk.f32.gmra.mrb[8].mxu1 %vm2042_vm5, %v2009_v37 }
 0x227   : > { %v1543_v59 = vpop.permute.xlu1 %1542  ;;  %v1541_v9 = vpop.permute.xlu0 %1540 }
 0x228   : > { %v1946_v29 = vsel %vm1197_vm2, %v1914_v19, %v1541_v9  ;;  %v1947_v56 = vsel %vm1197_vm2, %v1915_v12, %v1543_v59 }
 0x229   : > { %1438 = vrot.lane.b32.xlu1 %v3498_v11, %s3556_s21  ;;  %1818 = vrot.lane.b32.xlu0 %v3162_v55, %s3559_s30  ;;  %v5080_v55 = vld [vmem:[%s3604_s19 + $0x15a] sm:$0xff]  ;;  %v3104_v11 = vld [vmem:[%s3604_s19 + $0x170] sm:$0xff] }
 0x22b   : > { %v1321_v60 = vpop.permute.xlu1 %1320  ;;  %v1669_v28 = vpop.permute.xlu0 %1668 }
 0x22c   : > { %v1978_v13 = vsel %vm1230_vm3, %v1946_v29, %v1669_v28  ;;  %v1884_v10 = vsel %vm1131_vm0, %v3505_v3, %v1321_v60  ;;  %v3509_v28 = vld [vmem:[%s3604_s19 + $0xc0] sm:$0xff]  ;;  %v3135_v29 = vld [vmem:[%s3604_s19 + $0x169] sm:$0xff] }
 0x22d   : > { %1566 = vrot.lane.b32.xlu1 %v3100_v58, %s3557_s22  ;;  %1564 = vrot.lane.b32.xlu0 %v3099_v42, %s3557_s22  ;;  %v3103_v58 = vld [vmem:[%s3604_s19 + $0x168] sm:$0xff] }
 0x22f   : > { %v1797_v50 = vpop.permute.xlu1 %1796  ;;  %v1671_v48 = vpop.permute.xlu0 %1670 }
 0x230   : > { %v2010_v26 = vsel %vm1263_vm4, %v1978_v13, %v1797_v50  ;;  %v1979_v17 = vsel %vm1230_vm3, %v1947_v56, %v1671_v48 }
 0x231   : > { %1344 = vrot.lane.b32.xlu1 %v3500_v35, %s3555_s20  ;;  %1692 = vrot.lane.b32.xlu0 %v3131_v61, %s3558_s23  ;;  %v5104_v35 = vld [vmem:[%s3604_s19 + $0x16a] sm:$0xff] }
 0x232   : > { %3389 = vmatprep.mubr.msk.f32.mxu1 %vm2042_vm5, %v2010_v26  ;;  %v3510_v26 = vld [vmem:[%s3604_s19 + $0x169] sm:$0xff] }
 0x233   : > { %v1417_v5 = vpop.permute.xlu1 %1416  ;;  %v1323_v6 = vpop.permute.xlu0 %1322 }
 0x234   : > { %v1916_v39 = vsel %vm1164_vm1, %v1884_v10, %v1417_v5  ;;  %v1885_v54 = vsel %vm1131_vm0, %v3507_v0, %v1323_v6  ;;  %v5113_v6 = vld [vmem:[%s5635_s2] ss:$0 sm:$0xff] }
 0x235   : > { %1820 = vrot.lane.b32.xlu1 %v3163_v47, %s3559_s30  ;;  %1694 = vrot.lane.b32.xlu0 %v3132_v36, %s3558_s23  ;;  %v3136_v47 = vld [vmem:[%s3604_s19 + $0x171] sm:$0xff] }
 0x237   : > { %v1419_v32 = vpop.permute.xlu1 %1418  ;;  %v1799_v16 = vpop.permute.xlu0 %1798 }
 0x238   : > { %v2011_v57 = vsel %vm1263_vm4, %v1979_v17, %v1799_v16  ;;  %v1917_v24 = vsel %vm1164_vm1, %v1885_v54, %v1419_v32 }
 0x239   : > { %1440 = vrot.lane.b32.xlu1 %v3502_v30, %s3556_s21  ;;  %1346 = vrot.lane.b32.xlu0 %v3503_v52, %s3555_s20 }
 0x23a   : > { %3390 = vmatmul.mubr.msk.f32.gmra.mrb[10].mxu1 %vm2042_vm5, %v2011_v57 }
 0x23b   : > { %v1547_v31 = vpop.permute.xlu1 %1546  ;;  %v1545_v44 = vpop.permute.xlu0 %1544 }
 0x23c   : > { %v1948_v7 = vsel %vm1197_vm2, %v1916_v39, %v1545_v44  ;;  %v1949_v45 = vsel %vm1197_vm2, %v1917_v24, %v1547_v31  ;;  %v3512_v44 = vld [vmem:[%s3604_s19 + $0x171] sm:$0xff]  ;;  %v3137_v24 = vld [vmem:[%s3604_s19 + $0x181] sm:$0xff] }
 0x23d   : > { %1442 = vrot.lane.b32.xlu1 %v3504_v34, %s3556_s21  ;;  %1822 = vrot.lane.b32.xlu0 %v3164_v49, %s3559_s30 }
 0x23f   : > { %v1325_v46 = vpop.permute.xlu1 %1324  ;;  %v1673_v33 = vpop.permute.xlu0 %1672 }
 0x240   : > { %v1980_v38 = vsel %vm1230_vm3, %v1948_v7, %v1673_v33  ;;  %v1886_v22 = vsel %vm1131_vm0, %v3509_v28, %v1325_v46  ;;  %v3106_v7 = vld [vmem:[%s3604_s19 + $0x188] sm:$0xff] }
 0x241   : > { %1570 = vrot.lane.b32.xlu1 %v3102_v2, %s3557_s22  ;;  %1568 = vrot.lane.b32.xlu0 %v3101_v41, %s3557_s22  ;;  %v5143_v2 = vld [vmem:[%s3604_s19 + $0x172] sm:$0xff] }
 0x243   : > { %v1801_v1 = vpop.permute.xlu1 %1800  ;;  %v1675_v18 = vpop.permute.xlu0 %1674 }
 0x244   : > { %v2012_v43 = vsel %vm1263_vm4, %v1980_v38, %v1801_v1  ;;  %v1981_v25 = vsel %vm1230_vm3, %v1949_v45, %v1675_v18 }
 0x245   : > { %1348 = vrot.lane.b32.xlu1 %v3506_v23, %s3555_s20  ;;  %1696 = vrot.lane.b32.xlu0 %v3133_v8, %s3558_s23  ;;  %v3105_v8 = vld [vmem:[%s3604_s19 + $0x180] sm:$0xff] }
 0x246   : > { %3392 = vmatprep.mubr.msk.f32.mxu1 %vm2042_vm5, %v2012_v43  ;;  %v3513_v43 = vld [vmem:[%s3604_s19 + $0xd8] sm:$0xff] }
 0x247   : > { %v1421_v15 = vpop.permute.xlu1 %1420  ;;  %v1327_v21 = vpop.permute.xlu0 %1326 }
 0x248   : > { %v1918_v40 = vsel %vm1164_vm1, %v1886_v22, %v1421_v15  ;;  %v1887_v27 = vsel %vm1131_vm0, %v3511_v63, %v1327_v21 }
 0x249   : > { %1824 = vrot.lane.b32.xlu1 %v5062_v14, %s3559_s30  ;;  %1698 = vrot.lane.b32.xlu0 %v3134_v20, %s3558_s23 }
 0x24b   : > { %v1423_v53 = vpop.permute.xlu1 %1422  ;;  %v1803_v37 = vpop.permute.xlu0 %1802 }
 0x24c   : > { %v2013_v4 = vsel %vm1263_vm4, %v1981_v25, %v1803_v37  ;;  %v1919_v12 = vsel %vm1164_vm1, %v1887_v27, %v1423_v53 }
 0x24d   : > { %1444 = vrot.lane.b32.xlu1 %v5062_v14, %s3556_s21  ;;  %1350 = vrot.lane.b32.xlu0 %v3508_v51, %s3555_s20 }
 0x24e   : > { %3393 = vmatmul.mubr.msk.f32.gmra.mrb[12].mxu1 %vm2042_vm5, %v2013_v4 }
 0x24f   : > { %v1551_v59 = vpop.permute.xlu1 %1550  ;;  %v1549_v9 = vpop.permute.xlu0 %1548 }
 0x250   : > { %v1950_v19 = vsel %vm1197_vm2, %v1918_v40, %v1549_v9  ;;  %v1951_v17 = vsel %vm1197_vm2, %v1919_v12, %v1551_v59  ;;  %v3514_v9 = vld [vmem:[%s3604_s19 + $0x181] sm:$0xff] }
 0x251   : > { %1446 = vrot.lane.b32.xlu1 %v5080_v55, %s3556_s21  ;;  %1826 = vrot.lane.b32.xlu0 %v5080_v55, %s3559_s30 }
 0x253   : > { %v5088_v42 = vpop.permute.xlu1 %1328  ;;  %v1677_v60 = vpop.permute.xlu0 %1676 }
 0x254   : > { %v1982_v61 = vsel %vm1230_vm3, %v1950_v19, %v1677_v60  ;;  %v1888_v23 = vsel %vm1131_vm0, %v3513_v43, %v5088_v42  ;;  %v3138_v42 = vld [vmem:[%s3604_s19 + $0x189] sm:$0xff]  ;;  %v3139_v43 = vld [vmem:[%s3604_s19 + $0x199] sm:$0xff] }
 0x255   : > { %1574 = vrot.lane.b32.xlu1 %v3104_v11, %s3557_s22  ;;  %1572 = vrot.lane.b32.xlu0 %v3103_v58, %s3557_s22  ;;  %v5186_v58 = vld [vmem:[%s3604_s19 + $0x182] sm:$0xff] }
 0x257   : > { %v1805_v13 = vpop.permute.xlu1 %1804  ;;  %v1679_v50 = vpop.permute.xlu0 %1678 }
 0x258   : > { %v2014_v48 = vsel %vm1263_vm4, %v1982_v61, %v1805_v13  ;;  %v1983_v30 = vsel %vm1230_vm3, %v1951_v17, %v1679_v50 }
 0x259   : > { %1352 = vrot.lane.b32.xlu1 %v3510_v26, %s3555_s20  ;;  %1700 = vrot.lane.b32.xlu0 %v3135_v29, %s3558_s23  ;;  %v3515_v29 = vld [vmem:[%s3604_s19 + $0xe0] sm:$0xff] }
 0x25a   : > { %3395 = vmatprep.mubr.msk.f32.mxu1 %vm2042_vm5, %v2014_v48 }
 0x25b   : > { %v1425_v36 = vpop.permute.xlu1 %1424  ;;  %v5107_v5 = vpop.permute.xlu0 %1330 }
 0x25c   : > { %v1920_v21 = vsel %vm1164_vm1, %v1888_v23, %v1425_v36  ;;  %v1889_v61 = vsel %vm1131_vm0, %v3515_v29, %v5107_v5 }
 0x25d   : > { %1828 = vrot.lane.b32.xlu1 %v5104_v35, %s3559_s30  ;;  %1702 = vrot.lane.b32.xlu0 %v3136_v47, %s3558_s23 }
 0x25e   : > { %v3322_v56 = vpop.f32.mrb[0].mxu0 }
 0x25f   : > { %v2211_v32 = vadd.f32 %v3322_v56, %v5113_v6  ;;  %v2205_v16 = vpop.f32.mrb[1].mxu0  ;;  %v5128_v57 = vpop.permute.xlu1 %1426  ;;  %v3516_v56 = vld [vmem:[%s3604_s19 + $0x189] sm:$0xff] }
 0x260   : > { %v2206_v52 = vadd.f32 %v5113_v6, %v2205_v16  ;;  %v1807_v49 = vpop.permute.xlu0 %1806  ;;  %v1921_v13 = vsel %vm1164_vm1, %v1889_v61, %v5128_v57 }
 0x261   : > { %2690 = vst.msk [vmem:[%s5124_s12 + $0x8] sm:$0xff] %vm1164_vm1, %v2211_v32  ;;  %v2015_v31 = vsel %vm1263_vm4, %v1983_v30, %v1807_v49  ;;  %1448 = vrot.lane.b32.xlu1 %v5104_v35, %s3556_s21  ;;  %1354 = vrot.lane.b32.xlu0 %v3512_v44, %s3555_s20  ;;  %v5222_v32 = vld [vmem:[%s3604_s19 + $0x18a] sm:$0xff] }
 0x262   : > { %2689 = vst.msk [vmem:[%s5124_s12] sm:$0xff] %vm1164_vm1, %v2206_v52  ;;  %v3325_v34 = vpop.f32.mrb[2].mxu0  ;;  %3396 = vmatmul.mubr.msk.f32.gmra.mrb[14].mxu1 %vm2042_vm5, %v2015_v31  ;;  %v3108_v44 = vld [vmem:[%s3604_s19 + $0x1a0] sm:$0xff] }
 0x263   : > { %v2221_v41 = vadd.f32 %v3325_v34, %v5113_v6  ;;  %v2215_v46 = vpop.f32.mrb[3].mxu0  ;;  %v1555_v33 = vpop.permute.xlu1 %1554  ;;  %v3107_v34 = vld [vmem:[%s3604_s19 + $0x198] sm:$0xff] }
 0x264   : > { %v2216_v3 = vadd.f32 %v5113_v6, %v2215_v46  ;;  %v1553_v10 = vpop.permute.xlu0 %1552  ;;  %v1953_v48 = vsel %vm1197_vm2, %v1921_v13, %v1555_v33 }
 0x265   : > { %2692 = vst.msk [vmem:[%s5124_s12 + $0x18] sm:$0xff] %vm1164_vm1, %v2221_v41  ;;  %1450 = vrot.lane.b32.xlu1 %v5143_v2, %s3556_s21  ;;  %1830 = vrot.lane.b32.xlu0 %v5143_v2, %s3559_s30  ;;  %v1952_v0 = vsel %vm1197_vm2, %v1920_v21, %v1553_v10 }
 0x266   : > { %2691 = vst.msk [vmem:[%s5124_s12 + $0x10] sm:$0xff] %vm1164_vm1, %v2216_v3  ;;  %v3328_v39 = vpop.f32.mrb[4].mxu0  ;;  %v3517_v3 = vld [vmem:[%s3604_s19 + $0xf0] sm:$0xff] }
 0x267   : > { %v2231_v38 = vadd.f32 %v3328_v39, %v5113_v6  ;;  %v2225_v1 = vpop.f32.mrb[5].mxu0  ;;  %v5158_v18 = vpop.permute.xlu1 %1332 }
 0x268   : > { %v2226_v20 = vadd.f32 %v5113_v6, %v2225_v1  ;;  %v1681_v15 = vpop.permute.xlu0 %1680  ;;  %v1890_v10 = vsel %vm1131_vm0, %v3517_v3, %v5158_v18  ;;  %v3140_v18 = vld [vmem:[%s3604_s19 + $0x1a1] sm:$0xff] }
 0x269   : > { %2694 = vst.msk [vmem:[%s5124_s12 + $0x28] sm:$0xff] %vm1164_vm1, %v2231_v38  ;;  %1578 = vrot.lane.b32.xlu1 %v3106_v7, %s3557_s22  ;;  %1576 = vrot.lane.b32.xlu0 %v3105_v8, %s3557_s22  ;;  %v1984_v45 = vsel %vm1230_vm3, %v1952_v0, %v1681_v15 }
 0x26a   : > { %2693 = vst.msk [vmem:[%s5124_s12 + $0x20] sm:$0xff] %vm1164_vm1, %v2226_v20  ;;  %v3331_v54 = vpop.f32.mrb[6].mxu0 }
 0x26b   : > { %v2241_v25 = vadd.f32 %v3331_v54, %v5113_v6  ;;  %v2235_v53 = vpop.f32.mrb[7].mxu0  ;;  %v1809_v37 = vpop.permute.xlu1 %1808 }
 0x26c   : > { %v2236_v4 = vadd.f32 %v5113_v6, %v2235_v53  ;;  %v2016_v51 = vsel %vm1263_vm4, %v1984_v45, %v1809_v37  ;;  %v1683_v59 = vpop.permute.xlu0 %1682  ;;  %v3171_v53 = vld [vmem:[%s3604_s19 + $0x19a] sm:$0xff] }
 0x26d   : > { %2696 = vst.msk [vmem:[%s5124_s12 + $0x38] sm:$0xff] %vm1164_vm1, %v2241_v25  ;;  %1356 = vrot.lane.b32.xlu1 %v3514_v9, %s3555_s20  ;;  %1704 = vrot.lane.b32.xlu0 %v3137_v24, %s3558_s23  ;;  %v1985_v5 = vsel %vm1230_vm3, %v1953_v48, %v1683_v59  ;;  %v3172_v25 = vld [vmem:[%s3604_s19 + $0x1a2] sm:$0xff] }
 0x26e   : > { %2695 = vst.msk [vmem:[%s5124_s12 + $0x30] sm:$0xff] %vm1164_vm1, %v2236_v4  ;;  %v3334_v11 = vpop.f32.mrb[8].mxu0  ;;  %3398 = vmatprep.mubr.msk.f32.mxu1 %vm2042_vm5, %v2016_v51 }
 0x26f   : > { %v2251_v60 = vadd.f32 %v3334_v11, %v5113_v6  ;;  %v2245_v28 = vpop.f32.mrb[9].mxu0  ;;  %v1429_v22 = vpop.permute.xlu1 %1428  ;;  %v3518_v11 = vld [vmem:[%s3604_s19 + $0xf8] sm:$0xff] }
 0x270   : > { %v2246_v40 = vadd.f32 %v5113_v6, %v2245_v28  ;;  %v5191_v19 = vpop.permute.xlu0 %1334  ;;  %v1922_v8 = vsel %vm1164_vm1, %v1890_v10, %v1429_v22 }
 0x271   : > { %2698 = vst.msk [vmem:[%s5124_s12 + $0x48] sm:$0xff] %vm1164_vm1, %v2251_v60  ;;  %1832 = vrot.lane.b32.xlu1 %v5186_v58, %s3559_s30  ;;  %1706 = vrot.lane.b32.xlu0 %v3138_v42, %s3558_s23  ;;  %v1891_v42 = vsel %vm1131_vm0, %v3518_v11, %v5191_v19 }
 0x272   : > { %2697 = vst.msk [vmem:[%s5124_s12 + $0x40] sm:$0xff] %vm1164_vm1, %v2246_v40  ;;  %v3337_v50 = vpop.f32.mrb[10].mxu0 }
 0x273   : > { %v2261_v26 = vadd.f32 %v3337_v50, %v5113_v6  ;;  %v2255_v47 = vpop.f32.mrb[11].mxu0  ;;  %v5207_v36 = vpop.permute.xlu1 %1430 }
 0x274   : > { %v2256_v63 = vadd.f32 %v5113_v6, %v2255_v47  ;;  %v1811_v27 = vpop.permute.xlu0 %1810  ;;  %v1923_v60 = vsel %vm1164_vm1, %v1891_v42, %v5207_v36 }
 0x275   : > { %2700 = vst.msk [vmem:[%s5124_s12 + $0x58] sm:$0xff] %vm1164_vm1, %v2261_v26  ;;  %v2017_v12 = vsel %vm1263_vm4, %v1985_v5, %v1811_v27  ;;  %1452 = vrot.lane.b32.xlu1 %v5186_v58, %s3556_s21  ;;  %1358 = vrot.lane.b32.xlu0 %v3516_v56, %s3555_s20 }
 0x276   : > { %2699 = vst.msk [vmem:[%s5124_s12 + $0x50] sm:$0xff] %vm1164_vm1, %v2256_v63  ;;  %v3340_v17 = vpop.f32.mrb[12].mxu0  ;;  %3399 = vmatmul.mubr.msk.f32.gmra.mrb[16].mxu1 %vm2042_vm5, %v2017_v12 }
 0x277   : > { %v2271_v16 = vadd.f32 %v3340_v17, %v5113_v6  ;;  %v2265_v57 = vpop.f32.mrb[13].mxu0  ;;  %v1559_v30 = vpop.permute.xlu1 %1558  ;;  %v3519_v17 = vld [vmem:[%s3604_s19 + $0x108] sm:$0xff] }
 0x278   : > { %v2266_v52 = vadd.f32 %v5113_v6, %v2265_v57  ;;  %v1557_v49 = vpop.permute.xlu0 %1556  ;;  %v1955_v22 = vsel %vm1197_vm2, %v1923_v60, %v1559_v30 }
 0x279   : > { %2702 = vst.msk [vmem:[%s5124_s12 + $0x68] sm:$0xff] %vm1164_vm1, %v2271_v16  ;;  %1454 = vrot.lane.b32.xlu1 %v5222_v32, %s3556_s21  ;;  %1834 = vrot.lane.b32.xlu0 %v5222_v32, %s3559_s30  ;;  %v1954_v38 = vsel %vm1197_vm2, %v1922_v8, %v1557_v49 }
 0x27a   : > { %2701 = vst.msk [vmem:[%s5124_s12 + $0x60] sm:$0xff] %vm1164_vm1, %v2266_v52  ;;  %v3343_v31 = vpop.f32.mrb[14].mxu0 }
 0x27b   : > { %v2281_v41 = vadd.f32 %v3343_v31, %v5113_v6  ;;  %v2275_v46 = vpop.f32.mrb[15].mxu0  ;;  %v5237_v33 = vpop.permute.xlu1 %1336 }
 0x27c   : > { %v2276_v39 = vadd.f32 %v5113_v6, %v2275_v46  ;;  %v1685_v7 = vpop.permute.xlu0 %1684  ;;  %v1892_v16 = vsel %vm1131_vm0, %v3519_v17, %v5237_v33  ;;  %v3520_v46 = vld [vmem:[%s3604_s19 + $0x110] sm:$0xff] }
 0x27d   : > { %2704 = vst.msk [vmem:[%s5124_s12 + $0x78] sm:$0xff] %vm1164_vm1, %v2281_v41  ;;  %1582 = vrot.lane.b32.xlu1 %v3108_v44, %s3557_s22  ;;  %1580 = vrot.lane.b32.xlu0 %v3107_v34, %s3557_s22  ;;  %v1986_v23 = vsel %vm1230_vm3, %v1954_v38, %v1685_v7 }
 0x27e   : > { %2703 = vst.msk [vmem:[%s5124_s12 + $0x70] sm:$0xff] %vm1164_vm1, %v2276_v39  ;;  %v3346_v1 = vpop.f32.mrb[16].mxu0 }
 0x27f   : > { %v2291_v20 = vadd.f32 %v3346_v1, %v5113_v6  ;;  %v2285_v15 = vpop.f32.mrb[17].mxu0  ;;  %v1813_v21 = vpop.permute.xlu1 %1812 }
 0x280   : > { %v2286_v0 = vadd.f32 %v5113_v6, %v2285_v15  ;;  %v2018_v54 = vsel %vm1263_vm4, %v1986_v23, %v1813_v21  ;;  %v1687_v24 = vpop.permute.xlu0 %1686 }
 0x281   : > { %2706 = vst.msk [vmem:[%s5124_s12 + $0x88] sm:$0xff] %vm1164_vm1, %v2291_v20  ;;  %1710 = vrot.lane.b32.xlu1 %v3140_v18, %s3558_s23  ;;  %1708 = vrot.lane.b32.xlu0 %v3139_v43, %s3558_s23  ;;  %v1987_v19 = vsel %vm1230_vm3, %v1955_v22, %v1687_v24  ;;  %v3521_v18 = vld [vmem:[%s3604_s19 + $0x120] sm:$0xff] }
 0x282   : > { %2705 = vst.msk [vmem:[%s5124_s12 + $0x80] sm:$0xff] %vm1164_vm1, %v2286_v0  ;;  %v3349_v45 = vpop.f32.mrb[18].mxu0  ;;  %3401 = vmatprep.mubr.msk.f32.mxu1 %vm2042_vm5, %v2018_v54 }
 0x283   : > { %v2301_v37 = vadd.f32 %v3349_v45, %v5113_v6  ;;  %v2295_v4 = vpop.f32.mrb[19].mxu0  ;;  %v1433_v51 = vpop.permute.xlu1 %1432 }
 0x284   : > { %v2296_v59 = vadd.f32 %v5113_v6, %v2295_v4  ;;  %v1339_v9 = vpop.permute.xlu0 %1338 }
 0x285   : > { %2708 = vst.msk [vmem:[%s5124_s12 + $0x98] sm:$0xff] %vm1164_vm1, %v2301_v37  ;;  %1838 = vrot.lane.b32.xlu1 %v3172_v25, %s3559_s30  ;;  %1836 = vrot.lane.b32.xlu0 %v3171_v53, %s3559_s30 }
 0x286   : > { %2707 = vst.msk [vmem:[%s5124_s12 + $0x90] sm:$0xff] %vm1164_vm1, %v2296_v59  ;;  %v3352_v28 = vpop.f32.mrb[20].mxu0  ;;  %v3522_v59 = vld [vmem:[%s3604_s19 + $0x128] sm:$0xff] }
 0x287   : > { %v2311_v40 = vadd.f32 %v3352_v28, %v5113_v6  ;;  %v2305_v29 = vpop.f32.mrb[21].mxu0  ;;  %v1435_v61 = vpop.permute.xlu1 %1434 }
 0x288   : > { %v2306_v13 = vadd.f32 %v5113_v6, %v2305_v29  ;;  %v1815_v50 = vpop.permute.xlu0 %1814 }
 0x289   : > { %2710 = vst.msk [vmem:[%s5124_s12 + $0xa8] sm:$0xff] %vm1164_vm1, %v2311_v40  ;;  %v2019_v48 = vsel %vm1263_vm4, %v1987_v19, %v1815_v50  ;;  %1089 = vrot.lane.b32.xlu1 %v5080_v55, %s3559_s30  ;;  %1087 = vrot.lane.b32.xlu0 %v5062_v14, %s3559_s30 }
 0x28a   : > { %2709 = vst.msk [vmem:[%s5124_s12 + $0xa0] sm:$0xff] %vm1164_vm1, %v2306_v13  ;;  %v3355_v26 = vpop.f32.mrb[22].mxu0  ;;  %3402 = vmatmul.mubr.msk.f32.gmra.mrb[18].mxu1 %vm2042_vm5, %v2019_v48  ;;  %v5347_v13 = vld [vmem:[%s3604_s19 + $0x138] sm:$0xff] }
 0x28b   : > { %v2321_v47 = vadd.f32 %v3355_v26, %v5113_v6  ;;  %v2315_v36 = vpop.f32.mrb[23].mxu0  ;;  %v1563_v5 = vpop.permute.xlu1 %1562 }
 0x28c   : > { %v2316_v63 = vadd.f32 %v5113_v6, %v2315_v36  ;;  %v1561_v27 = vpop.permute.xlu0 %1560 }
 0x28d   : > { %2712 = vst.msk [vmem:[%s5124_s12 + $0xb8] sm:$0xff] %vm1164_vm1, %v2321_v47  ;;  %1093 = vrot.lane.b32.xlu1 %v5143_v2, %s3559_s30  ;;  %1091 = vrot.lane.b32.xlu0 %v5104_v35, %s3559_s30  ;;  %v1924_v2 = vsel %vm1164_vm1, %v1892_v16, %v1433_v51 }
 0x28e   : > { %2711 = vst.msk [vmem:[%s5124_s12 + $0xb0] sm:$0xff] %vm1164_vm1, %v2316_v63  ;;  %v3358_v14 = vpop.f32.mrb[24].mxu0  ;;  %v1956_v35 = vsel %vm1197_vm2, %v1924_v2, %v1561_v27 }
 0x28f   : > { %v2331_v55 = vadd.f32 %v3358_v14, %v5113_v6  ;;  %v2325_v12 = vpop.f32.mrb[25].mxu0  ;;  %v1341_v56 = vpop.permute.xlu1 %1340 }
 0x290   : > { %v2326_v57 = vadd.f32 %v5113_v6, %v2325_v12  ;;  %v1689_v30 = vpop.permute.xlu0 %1688  ;;  %v1894_v43 = vsel %vm1131_vm0, %v3521_v18, %v1341_v56 }
 0x291   : > { %2714 = vst.msk [vmem:[%s5124_s12 + $0xc8] sm:$0xff] %vm1164_vm1, %v2331_v55  ;;  %1097 = vrot.lane.b32.xlu1 %v5222_v32, %s3559_s30  ;;  %1095 = vrot.lane.b32.xlu0 %v5186_v58, %s3559_s30  ;;  %v1988_v52 = vsel %vm1230_vm3, %v1956_v35, %v1689_v30  ;;  %v1893_v32 = vsel %vm1131_vm0, %v3520_v46, %v1339_v9 }
 0x292   : > { %2713 = vst.msk [vmem:[%s5124_s12 + $0xc0] sm:$0xff] %vm1164_vm1, %v2326_v57  ;;  %v1925_v58 = vsel %vm1164_vm1, %v1893_v32, %v1435_v61  ;;  %v5360_v57 = vld [vmem:[%s3604_s19 + $0x140] sm:$0xff]  ;;  %v5371_v32 = vld [vmem:[%s3604_s19 + $0x150] sm:$0xff] }
 0x293   : > { %v1817_v49 = vpop.permute.xlu1 %1816  ;;  %v1957_v33 = vsel %vm1197_vm2, %v1925_v58, %v1563_v5 }
 0x294   : > { %v2020_v31 = vsel %vm1263_vm4, %v1988_v52, %v1817_v49  ;;  %v1691_v44 = vpop.permute.xlu0 %1690 }
 0x295   : > { %3404 = vmatprep.mubr.msk.f32.mxu1 %vm2042_vm5, %v2020_v31  ;;  %v1989_v10 = vsel %vm1230_vm3, %v1957_v33, %v1691_v44 }
 0x297   : > { %v1437_v34 = vpop.permute.xlu1 %1436 }
 0x298   : > { %v1343_v41 = vpop.permute.xlu0 %1342  ;;  %v1926_v20 = vsel %vm1164_vm1, %v1894_v43, %v1437_v34 }
 0x299   : > { %v1895_v9 = vsel %vm1131_vm0, %v3522_v59, %v1343_v41 }
 0x29b   : > { %v1439_v3 = vpop.permute.xlu1 %1438 }
 0x29c   : > { %v1819_v39 = vpop.permute.xlu0 %1818  ;;  %v1927_v11 = vsel %vm1164_vm1, %v1895_v9, %v1439_v3  ;;  %v5395_v9 = vld [vmem:[%s3604_s19 + $0x168] sm:$0xff] }
 0x29d   : > { %v2021_v7 = vsel %vm1263_vm4, %v1989_v10, %v1819_v39 }
 0x29e   : > { %3405 = vmatmul.mubr.msk.f32.gmra.mrb[20].mxu1 %vm2042_vm5, %v2021_v7 }
 0x29f   : > { %v1567_v8 = vpop.permute.xlu1 %1566 }
 0x2a0   : > { %v1565_v38 = vpop.permute.xlu0 %1564  ;;  %v1959_v42 = vsel %vm1197_vm2, %v1927_v11, %v1567_v8 }
 0x2a1   : > { %v1958_v15 = vsel %vm1197_vm2, %v1926_v20, %v1565_v38 }
 0x2a3   : > { %v1345_v1 = vpop.permute.xlu1 %1344 }
 0x2a4   : > { %v1693_v23 = vpop.permute.xlu0 %1692  ;;  %v1896_v50 = vsel %vm1131_vm0, %v5347_v13, %v1345_v1 }
 0x2a5   : > { %v1990_v21 = vsel %vm1230_vm3, %v1958_v15, %v1693_v23 }
 0x2a7   : > { %v1821_v0 = vpop.permute.xlu1 %1820 }
 0x2a8   : > { %v2022_v54 = vsel %vm1263_vm4, %v1990_v21, %v1821_v0  ;;  %v1695_v24 = vpop.permute.xlu0 %1694  ;;  %v5384_v21 = vld [vmem:[%s3604_s19 + $0x158] sm:$0xff] }
 0x2a9   : > { %v3376_v45 = vpop.f32.mrb[0].mxu1  ;;  %3407 = vmatprep.mubr.msk.f32.mxu1 %vm2042_vm5, %v2022_v54  ;;  %v1991_v28 = vsel %vm1230_vm3, %v1959_v42, %v1695_v24 }
 0x2aa   : > { %v2536_v25 = vadd.f32 %v3376_v45, %v5113_v6  ;;  %v2530_v53 = vpop.f32.mrb[1].mxu1 }
 0x2ab   : > { %v2531_v37 = vadd.f32 %v5113_v6, %v2530_v53  ;;  %v1441_v4 = vpop.permute.xlu1 %1440 }
 0x2ac   : > { %2755 = vrot.lane.b32.xlu1 %v2536_v25, %s3556_s21  ;;  %v1347_v51 = vpop.permute.xlu0 %1346  ;;  %v1928_v26 = vsel %vm1164_vm1, %v1896_v50, %v1441_v4 }
 0x2ad   : > { %2753 = vrot.lane.b32.xlu0 %v2531_v37, %s3556_s21  ;;  %v1897_v30 = vsel %vm1131_vm0, %v5360_v57, %v1347_v51 }
 0x2af   : > { %v1443_v60 = vpop.permute.xlu1 %1442 }
 0x2b0   : > { %v1823_v22 = vpop.permute.xlu0 %1822  ;;  %v1929_v2 = vsel %vm1164_vm1, %v1897_v30, %v1443_v60 }
 0x2b1   : > { %v2023_v40 = vsel %vm1263_vm4, %v1991_v28, %v1823_v22 }
 0x2b2   : > { %3408 = vmatmul.mubr.msk.f32.gmra.mrb[22].mxu1 %vm2042_vm5, %v2023_v40 }
 0x2b3   : > { %v1571_v29 = vpop.permute.xlu1 %1570 }
 0x2b4   : > { %v1569_v61 = vpop.permute.xlu0 %1568  ;;  %v1961_v35 = vsel %vm1197_vm2, %v1929_v2, %v1571_v29 }
 0x2b5   : > { %v1960_v47 = vsel %vm1197_vm2, %v1928_v26, %v1569_v61 }
 0x2b7   : > { %v1349_v19 = vpop.permute.xlu1 %1348 }
 0x2b8   : > { %v1697_v48 = vpop.permute.xlu0 %1696  ;;  %v1898_v58 = vsel %vm1131_vm0, %v5371_v32, %v1349_v19 }
 0x2b9   : > { %v1992_v36 = vsel %vm1230_vm3, %v1960_v47, %v1697_v48 }
 0x2bb   : > { %v1825_v5 = vpop.permute.xlu1 %1824 }
 0x2bc   : > { %v2024_v63 = vsel %vm1263_vm4, %v1992_v36, %v1825_v5  ;;  %v1699_v27 = vpop.permute.xlu0 %1698  ;;  %v3528_v5 = vld [vmem:[%s3604_s19 + $0x170] sm:$0xff] }
 0x2bd   : > { %v3379_v14 = vpop.f32.mrb[2].mxu1  ;;  %3410 = vmatprep.mubr.msk.f32.mxu1 %vm2042_vm5, %v2024_v63  ;;  %v1993_v49 = vsel %vm1230_vm3, %v1961_v35, %v1699_v27  ;;  %v3529_v35 = vld [vmem:[%s3604_s19 + $0x188] sm:$0xff] }
 0x2be   : > { %v2546_v55 = vadd.f32 %v3379_v14, %v5113_v6  ;;  %v2540_v12 = vpop.f32.mrb[3].mxu1 }
 0x2bf   : > { %v2541_v56 = vadd.f32 %v5113_v6, %v2540_v12  ;;  %v1445_v17 = vpop.permute.xlu1 %1444 }
 0x2c0   : > { %2759 = vrot.lane.b32.xlu1 %v2546_v55, %s3556_s21  ;;  %v1351_v16 = vpop.permute.xlu0 %1350  ;;  %v1930_v3 = vsel %vm1164_vm1, %v1898_v58, %v1445_v17 }
 0x2c1   : > { %2757 = vrot.lane.b32.xlu0 %v2541_v56, %s3556_s21  ;;  %v1899_v0 = vsel %vm1131_vm0, %v5384_v21, %v1351_v16 }
 0x2c3   : > { %v1447_v52 = vpop.permute.xlu1 %1446 }
 0x2c4   : > { %v1827_v31 = vpop.permute.xlu0 %1826  ;;  %v1931_v54 = vsel %vm1164_vm1, %v1899_v0, %v1447_v52  ;;  %v5879_v0 = vld [vmem:[#allocation80_spill] sm:$0xff] }
 0x2c5   : > { %v2025_v44 = vsel %vm1263_vm4, %v1993_v49, %v1827_v31  ;;  %v3530_v31 = vld [vmem:[%s3604_s19 + $0x180] sm:$0xff] }
 0x2c6   : > { %3411 = vmatmul.mubr.msk.f32.gmra.mrb[24].mxu1 %vm2042_vm5, %v2025_v44 }
 0x2c7   : > { %v1575_v34 = vpop.permute.xlu1 %1574 }
 0x2c8   : > { %v1573_v41 = vpop.permute.xlu0 %1572  ;;  %v1963_v24 = vsel %vm1197_vm2, %v1931_v54, %v1575_v34 }
 0x2c9   : > { %v1962_v10 = vsel %vm1197_vm2, %v1930_v3, %v1573_v41 }
 0x2cb   : > { %v1353_v46 = vpop.permute.xlu1 %1352 }
 0x2cc   : > { %v1701_v33 = vpop.permute.xlu0 %1700  ;;  %v1900_v11 = vsel %vm1131_vm0, %v5395_v9, %v1353_v46 }
 0x2cd   : > { %v1994_v39 = vsel %vm1230_vm3, %v1962_v10, %v1701_v33  ;;  %v5876_v10 = vld [vmem:[#allocation50_spill] sm:$0xff] }
 0x2cf   : > { %v1829_v7 = vpop.permute.xlu1 %1828 }
 0x2d0   : > { %v2026_v8 = vsel %vm1263_vm4, %v1994_v39, %v1829_v7  ;;  %v1703_v38 = vpop.permute.xlu0 %1702  ;;  %v1159_v39 = vsel %vm1131_vm0, %v5360_v57, %v5876_v10  ;;  %v5898_v10 = vld [vmem:[#allocation107_spill] sm:$0xff] }
 0x2d1   : > { %v3382_v1 = vpop.f32.mrb[4].mxu1  ;;  %3413 = vmatprep.mubr.msk.f32.mxu1 %vm2042_vm5, %v2026_v8  ;;  %v1995_v25 = vsel %vm1230_vm3, %v1963_v24, %v1703_v38  ;;  %v5880_v24 = vld [vmem:[#allocation95_spill] sm:$0xff] }
 0x2d2   : > { %v2556_v18 = vadd.f32 %v3382_v1, %v5113_v6  ;;  %v2550_v43 = vpop.f32.mrb[5].mxu1  ;;  %v5877_v1 = vld [vmem:[#allocation51_spill] sm:$0xff] }
 0x2d3   : > { %v2551_v23 = vadd.f32 %v5113_v6, %v2550_v43  ;;  %v1449_v20 = vpop.permute.xlu1 %1448  ;;  %v5878_v43 = vld [vmem:[#allocation79_spill] sm:$0xff] }
 0x2d4   : > { %2763 = vrot.lane.b32.xlu1 %v2556_v18, %s3556_s21  ;;  %v1355_v15 = vpop.permute.xlu0 %1354  ;;  %v1932_v60 = vsel %vm1164_vm1, %v1900_v11, %v1449_v20  ;;  %v1158_v18 = vsel %vm1131_vm0, %v5347_v13, %v5877_v1  ;;  %v5883_v11 = vld [vmem:[#allocation54_spill] sm:$0xff] }
 0x2d5   : > { %2761 = vrot.lane.b32.xlu0 %v2551_v23, %s3556_s21  ;;  %v1901_v63 = vsel %vm1131_vm0, %v3528_v5, %v1355_v15  ;;  %v1192_v23 = vsel %vm1164_vm1, %v1159_v39, %v5878_v43  ;;  %v1191_v54 = vsel %vm1164_vm1, %v1158_v18, %v5879_v0 }
 0x2d6   : > { %v1225_v57 = vsel %vm1197_vm2, %v1192_v23, %v5880_v24 }
 0x2d7   : > { %v1451_v45 = vpop.permute.xlu1 %1450 }
 0x2d8   : > { %v1831_v53 = vpop.permute.xlu0 %1830  ;;  %v1933_v27 = vsel %vm1164_vm1, %v1901_v63, %v1451_v45  ;;  %v5889_v63 = vld [vmem:[#allocation98_spill] sm:$0xff] }
 0x2d9   : > { %v2027_v37 = vsel %vm1263_vm4, %v1995_v25, %v1831_v53  ;;  %v5881_v53 = vld [vmem:[#allocation96_spill] sm:$0xff] }
 0x2da   : > { %3414 = vmatmul.mubr.msk.f32.gmra.mrb[26].mxu1 %vm2042_vm5, %v2027_v37  ;;  %v1224_v13 = vsel %vm1197_vm2, %v1191_v54, %v5881_v53  ;;  %v5882_v37 = vld [vmem:[#allocation24_spill] sm:$0xff] }
 0x2db   : > { %v1579_v4 = vpop.permute.xlu1 %1578 }
 0x2dc   : > { %v1577_v51 = vpop.permute.xlu0 %1576  ;;  %v1965_v14 = vsel %vm1197_vm2, %v1933_v27, %v1579_v4  ;;  %v1258_v4 = vsel %vm1230_vm3, %v1225_v57, %v5882_v37 }
 0x2dd   : > { %v1964_v28 = vsel %vm1197_vm2, %v1932_v60, %v1577_v51  ;;  %v5884_v60 = vld [vmem:[#allocation25_spill] sm:$0xff] }
 0x2df   : > { %v1357_v59 = vpop.permute.xlu1 %1356 }
 0x2e0   : > { %v1705_v42 = vpop.permute.xlu0 %1704  ;;  %v1902_v44 = vsel %vm1131_vm0, %v3530_v31, %v1357_v59 }
 0x2e1   : > { %v1996_v22 = vsel %vm1230_vm3, %v1964_v28, %v1705_v42  ;;  %v1161_v42 = vsel %vm1131_vm0, %v5384_v21, %v5883_v11  ;;  %v1257_v28 = vsel %vm1230_vm3, %v1224_v13, %v5884_v60  ;;  %v5887_v21 = vld [vmem:[#allocation82_spill] sm:$0xff] }
 0x2e3   : > { %v1833_v40 = vpop.permute.xlu1 %1832 }
 0x2e4   : > { %v2028_v29 = vsel %vm1263_vm4, %v1996_v22, %v1833_v40  ;;  %v1707_v61 = vpop.permute.xlu0 %1706 }
 0x2e5   : > { %v3385_v19 = vpop.f32.mrb[6].mxu1  ;;  %3416 = vmatprep.mubr.msk.f32.mxu1 %vm2042_vm5, %v2028_v29  ;;  %v1997_v12 = vsel %vm1230_vm3, %v1965_v14, %v1707_v61  ;;  %v5885_v29 = vld [vmem:[#allocation55_spill] sm:$0xff]  ;;  %v5890_v14 = vld [vmem:[#allocation105_spill] sm:$0xff] }
 0x2e6   : > { %v2566_v50 = vadd.f32 %v3385_v19, %v5113_v6  ;;  %v2560_v48 = vpop.f32.mrb[7].mxu1  ;;  %v1160_v61 = vsel %vm1131_vm0, %v5371_v32, %v5885_v29  ;;  %v5886_v19 = vld [vmem:[#allocation81_spill] sm:$0xff] }
 0x2e7   : > { %v2561_v26 = vadd.f32 %v5113_v6, %v2560_v48  ;;  %v1453_v47 = vpop.permute.xlu1 %1452 }
 0x2e8   : > { %2767 = vrot.lane.b32.xlu1 %v2566_v50, %s3556_s21  ;;  %v1359_v36 = vpop.permute.xlu0 %1358  ;;  %v1934_v41 = vsel %vm1164_vm1, %v1902_v44, %v1453_v47  ;;  %v1194_v50 = vsel %vm1164_vm1, %v1161_v42, %v5886_v19  ;;  %v5888_v47 = vld [vmem:[#allocation97_spill] sm:$0xff] }
 0x2e9   : > { %2765 = vrot.lane.b32.xlu0 %v2561_v26, %s3556_s21  ;;  %v1903_v52 = vsel %vm1131_vm0, %v3529_v35, %v1359_v36  ;;  %v1193_v26 = vsel %vm1164_vm1, %v1160_v61, %v5887_v21  ;;  %v1227_v36 = vsel %vm1197_vm2, %v1194_v50, %v5888_v47  ;;  %v5893_v35 = vld [vmem:[#allocation59_spill] sm:$0xff] }
 0x2ea   : > { %v1226_v27 = vsel %vm1197_vm2, %v1193_v26, %v5889_v63  ;;  %v1260_v32 = vsel %vm1230_vm3, %v1227_v36, %v5890_v14 }
 0x2eb   : > { %v1455_v55 = vpop.permute.xlu1 %1454 }
 0x2ec   : > { %v1835_v56 = vpop.permute.xlu0 %1834  ;;  %v1935_v34 = vsel %vm1164_vm1, %v1903_v52, %v1455_v55  ;;  %v1162_v52 = vsel %vm1131_vm0, %v5395_v9, %v5893_v35 }
 0x2ed   : > { %v2029_v17 = vsel %vm1263_vm4, %v1997_v12, %v1835_v56  ;;  %v5891_v12 = vld [vmem:[#allocation58_spill] sm:$0xff] }
 0x2ee   : > { %3417 = vmatmul.mubr.msk.f32.gmra.mrb[28].mxu1 %vm2042_vm5, %v2029_v17  ;;  %v1163_v56 = vsel %vm1131_vm0, %v3528_v5, %v5891_v12  ;;  %v5892_v17 = vld [vmem:[#allocation106_spill] sm:$0xff] }
 0x2ef   : > { %v1583_v16 = vpop.permute.xlu1 %1582 }
 0x2f0   : > { %v1581_v30 = vpop.permute.xlu0 %1580  ;;  %v1967_v46 = vsel %vm1197_vm2, %v1935_v34, %v1583_v16  ;;  %v1259_v16 = vsel %vm1230_vm3, %v1226_v27, %v5892_v17  ;;  %v5895_v34 = vld [vmem:[#allocation84_spill] sm:$0xff] }
 0x2f1   : > { %v1966_v58 = vsel %vm1197_vm2, %v1934_v41, %v1581_v30  ;;  %v1195_v41 = vsel %vm1164_vm1, %v1162_v52, %v5895_v34 }
 0x2f3   : > { %v1711_v2 = vpop.permute.xlu1 %1710 }
 0x2f4   : > { %v1709_v49 = vpop.permute.xlu0 %1708  ;;  %v1999_v33 = vsel %vm1230_vm3, %v1967_v46, %v1711_v2  ;;  %v5896_v46 = vld [vmem:[#allocation99_spill] sm:$0xff] }
 0x2f5   : > { %v1998_v7 = vsel %vm1230_vm3, %v1966_v58, %v1709_v49  ;;  %v5894_v49 = vld [vmem:[#allocation83_spill] sm:$0xff]  ;;  %v5897_v58 = vld [vmem:[#allocation100_spill] sm:$0xff] }
 0x2f6   : > { %v1196_v31 = vsel %vm1164_vm1, %v1163_v56, %v5894_v49 }
 0x2f7   : > { %v1839_v3 = vpop.permute.xlu1 %1838  ;;  %v1229_v5 = vsel %vm1197_vm2, %v1196_v31, %v5896_v46 }
 0x2f8   : > { %v2031_v8 = vsel %vm1263_vm4, %v1999_v33, %v1839_v3  ;;  %v1837_v38 = vpop.permute.xlu0 %1836  ;;  %v1228_v33 = vsel %vm1197_vm2, %v1195_v41, %v5897_v58  ;;  %v1262_v3 = vsel %vm1230_vm3, %v1229_v5, %v4486_v62 }
 0x2f9   : > { %v2030_v20 = vsel %vm1263_vm4, %v1998_v7, %v1837_v38  ;;  %v3388_v15 = vpop.f32.mrb[8].mxu1  ;;  %v1261_v39 = vsel %vm1230_vm3, %v1228_v33, %v5898_v10 }
 0x2fa   : > { %v2576_v45 = vadd.f32 %v3388_v15, %v5113_v6  ;;  %v2570_v25 = vpop.f32.mrb[9].mxu1  ;;  %3419 = vmatprep.mubr.msk.f32.mxu1 %vm2042_vm5, %v2030_v20 }
 0x2fb   : > { %v2571_v51 = vadd.f32 %v5113_v6, %v2570_v25  ;;  %3420 = vmatmul.mubr.msk.f32.gmra.mrb[30].mxu1 %vm2042_vm5, %v2031_v8  ;;  %v1090_v59 = vpop.permute.xlu1 %1089 }
 0x2fc   : > { %v1291_v22 = vsel %vm1263_vm4, %v1258_v4, %v1090_v59  ;;  %2771 = vrot.lane.b32.xlu1 %v2576_v45, %s3556_s21  ;;  %v1088_v40 = vpop.permute.xlu0 %1087 }
 0x2fd   : > { %v1290_v48 = vsel %vm1263_vm4, %v1257_v28, %v1088_v40  ;;  %2769 = vrot.lane.b32.xlu0 %v2571_v51, %s3556_s21 }
 0x2fe   : > { %3359 = vmatprep.mubr.msk.f32.mxu0 %vm2042_vm5, %v1290_v48 }
 0x2ff   : > { %3360 = vmatmul.mubr.msk.f32.gmra.mrb[26].mxu0 %vm2042_vm5, %v1291_v22  ;;  %v1094_v55 = vpop.permute.xlu1 %1093 }
 0x300   : > { %v1293_v30 = vsel %vm1263_vm4, %v1260_v32, %v1094_v55  ;;  %v1092_v2 = vpop.permute.xlu0 %1091 }
 0x301   : > { %v1292_v44 = vsel %vm1263_vm4, %v1259_v16, %v1092_v2 }
 0x302   : > { %3362 = vmatprep.mubr.msk.f32.mxu0 %vm2042_vm5, %v1292_v44 }
 0x303   : > { %3363 = vmatmul.mubr.msk.f32.gmra.mrb[28].mxu0 %vm2042_vm5, %v1293_v30  ;;  %v1098_v9 = vpop.permute.xlu1 %1097 }
 0x304   : > { %v1295_v7 = vsel %vm1263_vm4, %v1262_v3, %v1098_v9  ;;  %v1096_v8 = vpop.permute.xlu0 %1095 }
 0x305   : > { %v1294_v38 = vsel %vm1263_vm4, %v1261_v39, %v1096_v8 }
 0x306   : > { %3365 = vmatprep.mubr.msk.f32.mxu0 %vm2042_vm5, %v1294_v38 }
 0x307   : > { %3366 = vmatmul.mubr.msk.f32.gmra.mrb[30].mxu0 %vm2042_vm5, %v1295_v7 }
 0x30d   : > { %v3391_v1 = vpop.f32.mrb[10].mxu1 }
 0x30e   : > { %v2586_v62 = vadd.f32 %v3391_v1, %v5113_v6  ;;  %v2580_v18 = vpop.f32.mrb[11].mxu1 }
 0x30f   : > { %v2581_v43 = vadd.f32 %v5113_v6, %v2580_v18 }
 0x310   : > { %2775 = vrot.lane.b32.xlu1 %v2586_v62, %s3556_s21 }
 0x311   : > { %2773 = vrot.lane.b32.xlu0 %v2581_v43, %s3556_s21 }
 0x31e   : > { %v2756_v23 = vpop.permute.xlu1 %2755 }
 0x31f   : > { %2851 = vst.msk [vmem:[%s5124_s12 + $0x8] sm:$0xff] %vm2849_vm6, %v2756_v23  ;;  %v2754_v20 = vpop.permute.xlu0 %2753 }
 0x320   : > { %2850 = vst.msk [vmem:[%s5124_s12] sm:$0xff] %vm2849_vm6, %v2754_v20 }
 0x321   : > { %v3394_v15 = vpop.f32.mrb[12].mxu1 }
 0x322   : > { %v2596_v0 = vadd.f32 %v3394_v15, %v5113_v6  ;;  %v2590_v54 = vpop.f32.mrb[13].mxu1 }
 0x323   : > { %v2591_v24 = vadd.f32 %v5113_v6, %v2590_v54 }
 0x324   : > { %2779 = vrot.lane.b32.xlu1 %v2596_v0, %s3556_s21 }
 0x325   : > { %2777 = vrot.lane.b32.xlu0 %v2591_v24, %s3556_s21 }
 0x332   : > { %v2760_v57 = vpop.permute.xlu1 %2759 }
 0x333   : > { %2853 = vst.msk [vmem:[%s5124_s12 + $0x18] sm:$0xff] %vm2849_vm6, %v2760_v57  ;;  %v2758_v45 = vpop.permute.xlu0 %2757 }
 0x334   : > { %2852 = vst.msk [vmem:[%s5124_s12 + $0x10] sm:$0xff] %vm2849_vm6, %v2758_v45 }
 0x335   : > { %v3397_v25 = vpop.f32.mrb[14].mxu1 }
 0x336   : > { %v2606_v53 = vadd.f32 %v3397_v25, %v5113_v6  ;;  %v2600_v13 = vpop.f32.mrb[15].mxu1 }
 0x337   : > { %v2601_v37 = vadd.f32 %v5113_v6, %v2600_v13 }
 0x338   : > { %2783 = vrot.lane.b32.xlu1 %v2606_v53, %s3556_s21 }
 0x339   : > { %2781 = vrot.lane.b32.xlu0 %v2601_v37, %s3556_s21 }
 0x346   : > { %v2764_v4 = vpop.permute.xlu1 %2763 }
 0x347   : > { %2855 = vst.msk [vmem:[%s5124_s12 + $0x28] sm:$0xff] %vm2849_vm6, %v2764_v4  ;;  %v2762_v51 = vpop.permute.xlu0 %2761 }
 0x348   : > { %2854 = vst.msk [vmem:[%s5124_s12 + $0x20] sm:$0xff] %vm2849_vm6, %v2762_v51 }
 0x349   : > { %v3400_v59 = vpop.f32.mrb[16].mxu1 }
 0x34a   : > { %v2616_v11 = vadd.f32 %v3400_v59, %v5113_v6  ;;  %v2610_v42 = vpop.f32.mrb[17].mxu1 }
 0x34b   : > { %v2611_v60 = vadd.f32 %v5113_v6, %v2610_v42 }
 0x34c   : > { %2787 = vrot.lane.b32.xlu1 %v2616_v11, %s3556_s21 }
 0x34d   : > { %2785 = vrot.lane.b32.xlu0 %v2611_v60, %s3556_s21 }
 0x35a   : > { %v2768_v28 = vpop.permute.xlu1 %2767 }
 0x35b   : > { %2857 = vst.msk [vmem:[%s5124_s12 + $0x38] sm:$0xff] %vm2849_vm6, %v2768_v28  ;;  %v2766_v22 = vpop.permute.xlu0 %2765 }
 0x35c   : > { %2856 = vst.msk [vmem:[%s5124_s12 + $0x30] sm:$0xff] %vm2849_vm6, %v2766_v22 }
 0x35d   : > { %v3403_v40 = vpop.f32.mrb[18].mxu1 }
 0x35e   : > { %v2626_v29 = vadd.f32 %v3403_v40, %v5113_v6  ;;  %v2620_v61 = vpop.f32.mrb[19].mxu1 }
 0x35f   : > { %v2621_v19 = vadd.f32 %v5113_v6, %v2620_v61 }
 0x360   : > { %2791 = vrot.lane.b32.xlu1 %v2626_v29, %s3556_s21 }
 0x361   : > { %2789 = vrot.lane.b32.xlu0 %v2621_v19, %s3556_s21 }
 0x36e   : > { %v2772_v50 = vpop.permute.xlu1 %2771 }
 0x36f   : > { %2859 = vst.msk [vmem:[%s5124_s12 + $0x48] sm:$0xff] %vm2849_vm6, %v2772_v50  ;;  %v2770_v48 = vpop.permute.xlu0 %2769 }
 0x370   : > { %2858 = vst.msk [vmem:[%s5124_s12 + $0x40] sm:$0xff] %vm2849_vm6, %v2770_v48 }
 0x371   : > { %v3406_v21 = vpop.f32.mrb[20].mxu1 }
 0x372   : > { %v2636_v26 = vadd.f32 %v3406_v21, %v5113_v6  ;;  %v2630_v47 = vpop.f32.mrb[21].mxu1 }
 0x373   : > { %v2631_v36 = vadd.f32 %v5113_v6, %v2630_v47 }
 0x374   : > { %2795 = vrot.lane.b32.xlu1 %v2636_v26, %s3556_s21 }
 0x375   : > { %2793 = vrot.lane.b32.xlu0 %v2631_v36, %s3556_s21 }
 0x382   : > { %v2776_v63 = vpop.permute.xlu1 %2775 }
 0x383   : > { %2861 = vst.msk [vmem:[%s5124_s12 + $0x58] sm:$0xff] %vm2849_vm6, %v2776_v63  ;;  %v2774_v27 = vpop.permute.xlu0 %2773 }
 0x384   : > { %2860 = vst.msk [vmem:[%s5124_s12 + $0x50] sm:$0xff] %vm2849_vm6, %v2774_v27 }
 0x385   : > { %v3409_v14 = vpop.f32.mrb[22].mxu1 }
 0x386   : > { %v2646_v32 = vadd.f32 %v3409_v14, %v5113_v6  ;;  %v2640_v55 = vpop.f32.mrb[23].mxu1 }
 0x387   : > { %v2641_v12 = vadd.f32 %v5113_v6, %v2640_v55 }
 0x388   : > { %2799 = vrot.lane.b32.xlu1 %v2646_v32, %s3556_s21 }
 0x389   : > { %2797 = vrot.lane.b32.xlu0 %v2641_v12, %s3556_s21 }
 0x396   : > { %v2780_v56 = vpop.permute.xlu1 %2779 }
 0x397   : > { %2863 = vst.msk [vmem:[%s5124_s12 + $0x68] sm:$0xff] %vm2849_vm6, %v2780_v56  ;;  %v2778_v17 = vpop.permute.xlu0 %2777 }
 0x398   : > { %2862 = vst.msk [vmem:[%s5124_s12 + $0x60] sm:$0xff] %vm2849_vm6, %v2778_v17 }
 0x399   : > { %v3412_v16 = vpop.f32.mrb[24].mxu1 }
 0x39a   : > { %v2656_v30 = vadd.f32 %v3412_v16, %v5113_v6  ;;  %v2650_v2 = vpop.f32.mrb[25].mxu1 }
 0x39b   : > { %v2651_v35 = vadd.f32 %v5113_v6, %v2650_v2 }
 0x39c   : > { %2803 = vrot.lane.b32.xlu1 %v2656_v30, %s3556_s21 }
 0x39d   : > { %2801 = vrot.lane.b32.xlu0 %v2651_v35, %s3556_s21 }
 0x3aa   : > { %v2784_v52 = vpop.permute.xlu1 %2783 }
 0x3ab   : > { %2865 = vst.msk [vmem:[%s5124_s12 + $0x78] sm:$0xff] %vm2849_vm6, %v2784_v52  ;;  %v2782_v49 = vpop.permute.xlu0 %2781 }
 0x3ac   : > { %2864 = vst.msk [vmem:[%s5124_s12 + $0x70] sm:$0xff] %vm2849_vm6, %v2782_v49 }
 0x3ad   : > { %v3415_v31 = vpop.f32.mrb[26].mxu1 }
 0x3ae   : > { %v2666_v44 = vadd.f32 %v3415_v31, %v5113_v6  ;;  %v2660_v34 = vpop.f32.mrb[27].mxu1 }
 0x3af   : > { %v2661_v41 = vadd.f32 %v5113_v6, %v2660_v34 }
 0x3b0   : > { %2807 = vrot.lane.b32.xlu1 %v2666_v44, %s3556_s21 }
 0x3b1   : > { %2805 = vrot.lane.b32.xlu0 %v2661_v41, %s3556_s21 }
 0x3be   : > { %v2788_v46 = vpop.permute.xlu1 %2787 }
 0x3bf   : > { %2867 = vst.msk [vmem:[%s5124_s12 + $0x88] sm:$0xff] %vm2849_vm6, %v2788_v46  ;;  %v2786_v5 = vpop.permute.xlu0 %2785 }
 0x3c0   : > { %2866 = vst.msk [vmem:[%s5124_s12 + $0x80] sm:$0xff] %vm2849_vm6, %v2786_v5 }
 0x3c1   : > { %v3418_v58 = vpop.f32.mrb[28].mxu1 }
 0x3c2   : > { %v2676_v33 = vadd.f32 %v3418_v58, %v5113_v6  ;;  %v2670_v3 = vpop.f32.mrb[29].mxu1 }
 0x3c3   : > { %v2671_v9 = vadd.f32 %v5113_v6, %v2670_v3 }
 0x3c4   : > { %2811 = vrot.lane.b32.xlu1 %v2676_v33, %s3556_s21 }
 0x3c5   : > { %2809 = vrot.lane.b32.xlu0 %v2671_v9, %s3556_s21 }
 0x3ce   : > { %v3421_v10 = vpop.f32.mrb[30].mxu1 }
 0x3cf   : > { %v2686_v39 = vadd.f32 %v3421_v10, %v5113_v6  ;;  %v2680_v7 = vpop.f32.mrb[31].mxu1 }
 0x3d0   : > { %v2681_v8 = vadd.f32 %v5113_v6, %v2680_v7 }
 0x3d1   : > { %2815 = vrot.lane.b32.xlu1 %v2686_v39, %s3556_s21 }
 0x3d2   : > { %v2792_v38 = vpop.permute.xlu1 %2791  ;;  %2813 = vrot.lane.b32.xlu0 %v2681_v8, %s3556_s21  ;;  %v3361_v1 = vpop.f32.mrb[26].mxu0 }
 0x3d3   : > { %2869 = vst.msk [vmem:[%s5124_s12 + $0x98] sm:$0xff] %vm2849_vm6, %v2792_v38  ;;  %v2341_v62 = vadd.f32 %v3361_v1, %v5113_v6  ;;  %v2790_v18 = vpop.permute.xlu0 %2789  ;;  %v2335_v43 = vpop.f32.mrb[27].mxu0 }
 0x3d4   : > { %2868 = vst.msk [vmem:[%s5124_s12 + $0x90] sm:$0xff] %vm2849_vm6, %v2790_v18  ;;  %v2336_v23 = vadd.f32 %v5113_v6, %v2335_v43 }
 0x3d5   : > { %2716 = vst.msk [vmem:[%s5124_s12 + $0xd8] sm:$0xff] %vm1164_vm1, %v2341_v62 }
 0x3d6   : > { %2715 = vst.msk [vmem:[%s5124_s12 + $0xd0] sm:$0xff] %vm1164_vm1, %v2336_v23  ;;  %v3364_v20 = vpop.f32.mrb[28].mxu0 }
 0x3d7   : > { %v2351_v15 = vadd.f32 %v3364_v20, %v5113_v6  ;;  %v2345_v0 = vpop.f32.mrb[29].mxu0 }
 0x3d8   : > { %v2346_v54 = vadd.f32 %v5113_v6, %v2345_v0 }
 0x3d9   : > { %2718 = vst.msk [vmem:[%s5124_s12 + $0xe8] sm:$0xff] %vm1164_vm1, %v2351_v15 }
 0x3da   : > { %2717 = vst.msk [vmem:[%s5124_s12 + $0xe0] sm:$0xff] %vm1164_vm1, %v2346_v54  ;;  %v3367_v24 = vpop.f32.mrb[30].mxu0 }
 0x3db   : > { %v2361_v57 = vadd.f32 %v3367_v24, %v5113_v6  ;;  %v2355_v45 = vpop.f32.mrb[31].mxu0 }
 0x3dc   : > { %v2356_v25 = vadd.f32 %v5113_v6, %v2355_v45 }
 0x3dd   : > { %2720 = vst.msk [vmem:[%s5124_s12 + $0xf8] sm:$0xff] %vm1164_vm1, %v2361_v57 }
 0x3de   : > { %2719 = vst.msk [vmem:[%s5124_s12 + $0xf0] sm:$0xff] %vm1164_vm1, %v2356_v25 }
 0x3e6   : > { %v2796_v53 = vpop.permute.xlu1 %2795 }
 0x3e7   : > { %2871 = vst.msk [vmem:[%s5124_s12 + $0xa8] sm:$0xff] %vm2849_vm6, %v2796_v53  ;;  %v2794_v13 = vpop.permute.xlu0 %2793 }
 0x3e8   : > { %2870 = vst.msk [vmem:[%s5124_s12 + $0xa0] sm:$0xff] %vm2849_vm6, %v2794_v13 }
 0x3fa   : > { %v2800_v37 = vpop.permute.xlu1 %2799 }
 0x3fb   : > { %2873 = vst.msk [vmem:[%s5124_s12 + $0xb8] sm:$0xff] %vm2849_vm6, %v2800_v37  ;;  %v2798_v4 = vpop.permute.xlu0 %2797 }
 0x3fc   : > { %2872 = vst.msk [vmem:[%s5124_s12 + $0xb0] sm:$0xff] %vm2849_vm6, %v2798_v4 }
 0x40e   : > { %v2804_v6 = vpop.permute.xlu1 %2803 }
 0x40f   : > { %2875 = vst.msk [vmem:[%s5124_s12 + $0xc8] sm:$0xff] %vm2849_vm6, %v2804_v6  ;;  %v2802_v51 = vpop.permute.xlu0 %2801 }
 0x410   : > { %2874 = vst.msk [vmem:[%s5124_s12 + $0xc0] sm:$0xff] %vm2849_vm6, %v2802_v51 }
 0x422   : > { %v2808_v59 = vpop.permute.xlu1 %2807 }
 0x423   : > { %2877 = vst.msk [vmem:[%s5124_s12 + $0xd8] sm:$0xff] %vm2849_vm6, %v2808_v59  ;;  %v2806_v11 = vpop.permute.xlu0 %2805 }
 0x424   : > { %2876 = vst.msk [vmem:[%s5124_s12 + $0xd0] sm:$0xff] %vm2849_vm6, %v2806_v11 }
 0x436   : > { %v2812_v42 = vpop.permute.xlu1 %2811 }
 0x437   : > { %2879 = vst.msk [vmem:[%s5124_s12 + $0xe8] sm:$0xff] %vm2849_vm6, %v2812_v42  ;;  %v2810_v60 = vpop.permute.xlu0 %2809 }
 0x438   : > { %2878 = vst.msk [vmem:[%s5124_s12 + $0xe0] sm:$0xff] %vm2849_vm6, %v2810_v60 }
 0x443   : > { %v2816_v28 = vpop.permute.xlu1 %2815 }
 0x444   : > { %2881 = vst.msk [vmem:[%s5124_s12 + $0xf8] sm:$0xff] %vm2849_vm6, %v2816_v28  ;;  %v2814_v22 = vpop.permute.xlu0 %2813 }
 0x445   : > { %2880 = vst.msk [vmem:[%s5124_s12 + $0xf0] sm:$0xff] %vm2849_vm6, %v2814_v22 }
 0x446 PF: > { %s13_s14 = sadd.s32 1, %s3553_s14   ;;  %s5899_s12 = smov %s3549_s13 }
 0x447   : > { %p10_p5 = scmp.ge.s32.totalorder %s13_s14, 4   ;;  %s5900_s13 = smov %s5902_s15 }
 0x449   :  { %12 = sbr.rel (!%p10_p5) target bundleno = 2 (0x2), region = 66 }

</bundles_post_ra>
